<compile_context>
chip_gen: v7x
topology: tpu7x:2x2x1
jax: 0.10.0
libtpu: 0.0.40
codegen_flags: <defaults>
</compile_context>

<pallas_src>
import functools
import math

import jax
import jax.numpy as jnp
from jax import lax
from jax.experimental import pallas as pl
from jax.experimental.pallas import tpu as pltpu

IGST = 10
COMP = 1
HIDE = 4
# (inchannel, outchannel, kernel_size) for the ResBlock tower of cal_lam / cal_L
BLOCKS = [(COMP * 2, 16, 3), (16, 16, 3), (16, 32, 3),
          (32, 64, 3), (64, 64, 3), (64, 64, 1)]
PACK_W = 128   # packed-parameter lane width (max per-row-block width = 64)


def _tower_plan():
    """Static row layout of one tower inside its packed (rows, PACK_W) buffer.

    kernel_size=3 convs use three consecutive row blocks (tap L / M / R), so every
    weight read is a lane-offset-0 slice of width cin (<= 64)."""
    plan, row = [], 0
    for (cin, cout, k) in BLOCKS:
        e = {"cin": cin, "cout": cout, "k": k, "r1": row}
        row += 3 * cout if k == 3 else cout    # conv1 (per-tap row blocks for k=3)
        e["r2"] = row
        row += cout                            # conv2 (1x1)
        if cin != cout:
            e["rs"] = row
            row += cout                        # shortcut 1x1
        else:
            e["rs"] = None
        plan.append(e)
    rf = row
    row += HIDE                                # final 1x1: 64 -> HIDE
    rows = ((row + 7) // 8) * 8
    return plan, rf, rows


TOWER_PLAN, TOWER_RF, TOWER_ROWS = _tower_plan()


# ----------------------- deterministic parameter init -----------------------
def _init_conv(key, cin, cout, k):
    # PyTorch default Conv1d init: U(-1/sqrt(fan_in), 1/sqrt(fan_in))
    bound = 1.0 / math.sqrt(cin * k)
    kw, kb = jax.random.split(key)
    w = jax.random.uniform(kw, (cout, cin, k), jnp.float32, -bound, bound)
    b = jax.random.uniform(kb, (cout,), jnp.float32, -bound, bound)
    return w, b


def init_packed_tower(key):
    """One tower's params -> (weights (TOWER_ROWS, PACK_W), biases (TOWER_ROWS, 1)).
    A layer occupying rows [r, r+cout) has its weight in cols [0, cin) and its
    bias in column 0 of the bias buffer at the same rows."""
    wbuf = jnp.zeros((TOWER_ROWS, PACK_W), jnp.float32)
    bbuf = jnp.zeros((TOWER_ROWS, 1), jnp.float32)

    def put(wb, bb, r, w2d, b):
        cout, cin = w2d.shape
        wb = wb.at[r:r + cout, 0:cin].set(w2d)
        bb = bb.at[r:r + cout, 0].set(b)
        return wb, bb

    for e in TOWER_PLAN:
        cin, cout, k = e["cin"], e["cout"], e["k"]
        key, k1, k2, k3 = jax.random.split(key, 4)
        w1, b1 = _init_conv(k1, cin, cout, k)
        if k == 3:
            # tap t multiplies x[i-1+t] (replicate-padded conv); one row block per tap
            for t in range(3):
                r = e["r1"] + t * cout
                wbuf = wbuf.at[r:r + cout, 0:cin].set(w1[:, :, t])
            bbuf = bbuf.at[e["r1"]:e["r1"] + cout, 0].set(b1)
        else:
            wbuf, bbuf = put(wbuf, bbuf, e["r1"], w1[:, :, 0], b1)
        w2, b2 = _init_conv(k2, cout, cout, 1)
        wbuf, bbuf = put(wbuf, bbuf, e["r2"], w2[:, :, 0], b2)
        if e["rs"] is not None:
            ws, bs = _init_conv(k3, cin, cout, 1)
            wbuf, bbuf = put(wbuf, bbuf, e["rs"], ws[:, :, 0], bs)
    key, kf = jax.random.split(key)
    wf, bf = _init_conv(kf, 64, HIDE, 1)
    return put(wbuf, bbuf, TOWER_RF, wf[:, :, 0], bf)


# ----------------------------- in-kernel compute -----------------------------
def _roll(x, shift):
    # jnp.roll-style lane rotation; Mosaic requires non-negative shift and a
    # non-negative axis index (axis=-1 is rejected), so normalize both.
    axis = x.ndim - 1
    return pltpu.roll(x, shift % x.shape[axis], axis=axis)


def _stack2(a, b):
    """Build a (2, L) array from two (1, L) rows without a sublane concatenate
    (sublane broadcast + select is always supported)."""
    L = a.shape[-1]
    row = lax.broadcasted_iota(jnp.int32, (2, L), 0)
    return jnp.where(row == 0, jnp.broadcast_to(a, (2, L)), jnp.broadcast_to(b, (2, L)))


def _layer(w_ref, b_ref, r, cout, cin, x):
    w = w_ref[r:r + cout, 0:cin]             # (cout, cin)  -- lane-offset-0 slice
    b = b_ref[r:r + cout, 0:1]               # (cout, 1)
    return jnp.dot(w, x, preferred_element_type=jnp.float32) + b


def _conv3(w_ref, b_ref, r, cout, cin, xl, xm, xr):
    """kernel_size=3 conv as three MXU matmuls against per-tap row blocks."""
    yl = jnp.dot(w_ref[r:r + cout, 0:cin], xl, preferred_element_type=jnp.float32)
    ym = jnp.dot(w_ref[r + cout:r + 2 * cout, 0:cin], xm, preferred_element_type=jnp.float32)
    yr = jnp.dot(w_ref[r + 2 * cout:r + 3 * cout, 0:cin], xr, preferred_element_type=jnp.float32)
    return yl + ym + yr + b_ref[r:r + cout, 0:1]


def _apply_tower(w_ref, b_ref, x, seg_first, seg_last):
    """x: (2, L) lane-packed activations; seg_* mark the first/last cell of each
    length-N spatial segment (= replicate-pad boundaries of the 3-tap convs)."""
    for e in TOWER_PLAN:
        cin, cout = e["cin"], e["cout"]
        if e["k"] == 3:
            # replicate-padded left/right neighbour taps, fixed up at segment edges
            xl = jnp.where(seg_first, x, _roll(x, 1))
            xr = jnp.where(seg_last, x, _roll(x, -1))
            y = _conv3(w_ref, b_ref, e["r1"], cout, cin, xl, x, xr)
        else:
            y = _layer(w_ref, b_ref, e["r1"], cout, cin, x)
        y = jnp.maximum(y, 0.0)                                   # conv + ReLU
        y = _layer(w_ref, b_ref, e["r2"], cout, cout, y)          # 1x1 conv
        sc = _layer(w_ref, b_ref, e["rs"], cout, cin, x) if e["rs"] is not None else x
        x = jnp.maximum(y + sc, 0.0)                              # residual + ReLU
    return _layer(w_ref, b_ref, TOWER_RF, HIDE, 64, x)            # final 1x1


def _roenet_kernel(z_ref, wlam_ref, blam_ref, wL_ref, bL_ref, out_ref, *,
                   N, B, steps, c_flux, g):
    L1 = B * N          # packed width of one "side"                (128)
    L2 = 2 * L1         # width of [data_left | data_right]         (256)

    # hoisted per-segment lane-position masks
    pos1 = lax.broadcasted_iota(jnp.int32, (1, L1), 1) % N
    first1, last1 = pos1 == 0, pos1 == N - 1
    pos2 = lax.broadcasted_iota(jnp.int32, (1, L2), 1) % N
    first2, last2 = pos2 == 0, pos2 == N - 1

    def step(z):
        um = z                                                   # (1, L1)
        # circular shift of each batch's N-cell segment (torch.cat on dim=2)
        ul = jnp.where(first1, _roll(z, -(N - 1)), _roll(z, 1))
        ur = jnp.where(last1, _roll(z, N - 1), _roll(z, -1))

        # shared cal_lam tower: ONE pass over [data_left | data_right]
        #   channel 0 = [ul | um], channel 1 = [um | ur]   (lane concat is 128-aligned)
        x_lam = _stack2(jnp.concatenate([ul, um], axis=1),
                        jnp.concatenate([um, ur], axis=1))       # (2, L2)
        lam = _apply_tower(wlam_ref, blam_ref, x_lam, first2, last2)   # (HIDE, L2)
        lam_l, lam_r = lam[:, :L1], lam[:, L1:]

        # cal_L only on data_left (reference overwrites L_r with L_l;
        # cal_L(data_right) is dead code -> not computed)
        Lm = _apply_tower(wL_ref, bL_ref, _stack2(ul, um), first1, last1)  # (HIDE, L1)

        # comp == 1: R = L^T/(L^T L); R diag(lam') L collapses to a per-point scalar.
        inv_s = pl.reciprocal(jnp.sum(Lm * Lm, axis=0, keepdims=True), approx=True)
        coef_r = jnp.sum(Lm * (lam_r - jnp.abs(lam_r)) * Lm, axis=0, keepdims=True) * inv_s
        coef_l = jnp.sum(Lm * (lam_l + jnp.abs(lam_l)) * Lm, axis=0, keepdims=True) * inv_s
        # z + h*du with du = -(coef_r*(ur-um)+coef_l*(um-ul))/(2*dx); c_flux = h/(2*dx)
        z_new = um - c_flux * (coef_r * (ur - um) + coef_l * (um - ul))

        # boundary_condition: periodic ghost-cell refill within each N-segment
        z_lo = _roll(z_new, -(N - 2 * g))     # pos <  g      <- pos + (N - 2g)
        z_hi = _roll(z_new, N - 2 * g)        # pos >= N - g  <- pos - (N - 2g)
        return jnp.where(pos1 < g, z_lo, jnp.where(pos1 >= N - g, z_hi, z_new))

    z = z_ref[...]
    if steps <= 8:                            # short static time loop: fully unroll
        for _ in range(steps):
            z = step(z)
    else:
        z = lax.fori_loop(0, steps, lambda i, zz: step(zz), z)
    out_ref[...] = z


def make_roenet_call(B, N, steps, h, dx, igst):
    kernel = functools.partial(_roenet_kernel, N=N, B=B, steps=steps,
                               c_flux=h / (2.0 * dx), g=igst)
    vmem = pltpu.MemorySpace.VMEM
    # Single invocation (no grid): batch is lane-packed, the time loop is inside,
    # and all five operands (z + 2 packed towers + 2 bias slabs, ~2 MiB) live in VMEM.
    return pl.pallas_call(
        kernel,
        out_shape=jax.ShapeDtypeStruct((1, B * N), jnp.float32),
        in_specs=[pl.BlockSpec(memory_space=vmem)] * 5,
        out_specs=pl.BlockSpec(memory_space=vmem),
    )


def roenet_forward(z0, params_lam, params_L, Delta_t, eps, dx, igst):
    B, comp, N = z0.shape
    assert comp == COMP
    steps = int(round(Delta_t / eps))
    h = Delta_t / steps
    call = make_roenet_call(B, N, steps, h, dx, igst)
    w_lam, b_lam = params_lam
    w_L, b_L = params_L

    @jax.jit
    def run(z, wl, bl, wL, bL):
        out = call(z.reshape(1, B * N), wl, bl, wL, bL)   # lane-packed (1, B*N)
        return out.reshape(B, COMP, N)

    return run(z0, w_lam, b_lam, w_L, b_L)


if __name__ == "__main__":
    key = jax.random.PRNGKey(0)
    k_lam, k_L, k_z = jax.random.split(key, 3)
    params_lam = init_packed_tower(k_lam)   # cal_lam tower: (1016, 128) + (1016, 1)
    params_L = init_packed_tower(k_L)       # cal_L  tower: (1016, 128) + (1016, 1)

    B = 2
    grid_interior = 44
    N = grid_interior + 2 * IGST            # 64 cells including ghost cells
    dx = 1.0 / grid_interior
    eps = 0.05
    Delta_t = 0.1                           # -> steps = 2, h = 0.05

    z0 = 0.1 * jax.random.normal(k_z, (B, COMP, N), jnp.float32)

    z = roenet_forward(z0, params_lam, params_L, Delta_t, eps, dx, IGST)
    jax.block_until_ready(z)
    assert z.shape == (B, COMP, N) and z.dtype == jnp.float32
    print("KERNEL_OK")
</pallas_src>

<mosaic_0001>
module attributes {stable_mosaic.version = 11 : i64} {
  func.func @_roenet_kernel(%arg0: memref<1x128xf32, #tpu.memory_space<vmem>>, %arg1: memref<1016x128xf32, #tpu.memory_space<vmem>>, %arg2: memref<1016x1xf32, #tpu.memory_space<vmem>>, %arg3: memref<1016x128xf32, #tpu.memory_space<vmem>>, %arg4: memref<1016x1xf32, #tpu.memory_space<vmem>>, %arg5: memref<1x128xf32, #tpu.memory_space<vmem>>) attributes {dimension_semantics = [], scalar_prefetch = 0 : i64, scratch_operands = 0 : i64, tpu.core_type = #tpu.core_type<tc>} {
    %0 = tpu.iota {dimensions = array<i32: 1>} : vector<1x128xi32>
    %c64_i32 = arith.constant 64 : i32
    %c0_i32 = arith.constant 0 : i32
    %1 = arith.cmpi eq, %c64_i32, %c0_i32 : i32
    %c1_i32 = arith.constant 1 : i32
    %2 = arith.select %1, %c1_i32, %c64_i32 : i32
    %3 = vector.broadcast %2 : i32 to vector<1x128xi32>
    %4 = arith.remsi %0, %3 : vector<1x128xi32>
    %c0_i32_0 = arith.constant 0 : i32
    %5 = vector.broadcast %c0_i32_0 : i32 to vector<1x128xi32>
    %6 = arith.cmpi ne, %4, %5 : vector<1x128xi32>
    %c0_i32_1 = arith.constant 0 : i32
    %7 = vector.broadcast %c0_i32_1 : i32 to vector<1x128xi32>
    %8 = arith.cmpi slt, %4, %7 : vector<1x128xi32>
    %c0_i32_2 = arith.constant 0 : i32
    %9 = arith.cmpi slt, %2, %c0_i32_2 : i32
    %10 = vector.broadcast %9 : i1 to vector<1x128xi1>
    %11 = vector.broadcast %10 : vector<1x128xi1> to vector<1x128xi1>
    %12 = arith.xori %8, %11 : vector<1x128xi1>
    %13 = arith.andi %12, %6 : vector<1x128xi1>
    %14 = vector.broadcast %2 : i32 to vector<1x128xi32>
    %15 = arith.addi %4, %14 : vector<1x128xi32>
    %16 = arith.select %13, %15, %4 : vector<1x128xi1>, vector<1x128xi32>
    %c0_i32_3 = arith.constant 0 : i32
    %17 = vector.broadcast %c0_i32_3 : i32 to vector<1x128xi32>
    %18 = arith.cmpi eq, %16, %17 : vector<1x128xi32>
    %c63_i32 = arith.constant 63 : i32
    %19 = vector.broadcast %c63_i32 : i32 to vector<1x128xi32>
    %20 = arith.cmpi eq, %16, %19 : vector<1x128xi32>
    %21 = tpu.iota {dimensions = array<i32: 1>} : vector<1x256xi32>
    %c64_i32_4 = arith.constant 64 : i32
    %c0_i32_5 = arith.constant 0 : i32
    %22 = arith.cmpi eq, %c64_i32_4, %c0_i32_5 : i32
    %c1_i32_6 = arith.constant 1 : i32
    %23 = arith.select %22, %c1_i32_6, %c64_i32_4 : i32
    %24 = vector.broadcast %23 : i32 to vector<1x256xi32>
    %25 = arith.remsi %21, %24 : vector<1x256xi32>
    %c0_i32_7 = arith.constant 0 : i32
    %26 = vector.broadcast %c0_i32_7 : i32 to vector<1x256xi32>
    %27 = arith.cmpi ne, %25, %26 : vector<1x256xi32>
    %c0_i32_8 = arith.constant 0 : i32
    %28 = vector.broadcast %c0_i32_8 : i32 to vector<1x256xi32>
    %29 = arith.cmpi slt, %25, %28 : vector<1x256xi32>
    %c0_i32_9 = arith.constant 0 : i32
    %30 = arith.cmpi slt, %23, %c0_i32_9 : i32
    %31 = vector.broadcast %30 : i1 to vector<1x256xi1>
    %32 = vector.broadcast %31 : vector<1x256xi1> to vector<1x256xi1>
    %33 = arith.xori %29, %32 : vector<1x256xi1>
    %34 = arith.andi %33, %27 : vector<1x256xi1>
    %35 = vector.broadcast %23 : i32 to vector<1x256xi32>
    %36 = arith.addi %25, %35 : vector<1x256xi32>
    %37 = arith.select %34, %36, %25 : vector<1x256xi1>, vector<1x256xi32>
    %c0_i32_10 = arith.constant 0 : i32
    %38 = vector.broadcast %c0_i32_10 : i32 to vector<1x256xi32>
    %39 = arith.cmpi eq, %37, %38 : vector<1x256xi32>
    %c63_i32_11 = arith.constant 63 : i32
    %40 = vector.broadcast %c63_i32_11 : i32 to vector<1x256xi32>
    %41 = arith.cmpi eq, %37, %40 : vector<1x256xi32>
    %c0 = arith.constant 0 : index
    %c0_12 = arith.constant 0 : index
    %42 = vector.load %arg0[%c0, %c0_12] : memref<1x128xf32, #tpu.memory_space<vmem>>, vector<1x128xf32>
    %c65_i32 = arith.constant 65 : i32
    %43 = tpu.dynamic_rotate %42 by %c65_i32 dim 1 : vector<1x128xf32>, i32 -> vector<1x128xf32>
    %c1_i32_13 = arith.constant 1 : i32
    %44 = tpu.dynamic_rotate %42 by %c1_i32_13 dim 1 : vector<1x128xf32>, i32 -> vector<1x128xf32>
    %45 = arith.select %18, %43, %44 : vector<1x128xi1>, vector<1x128xf32>
    %c63_i32_14 = arith.constant 63 : i32
    %46 = tpu.dynamic_rotate %42 by %c63_i32_14 dim 1 : vector<1x128xf32>, i32 -> vector<1x128xf32>
    %c127_i32 = arith.constant 127 : i32
    %47 = tpu.dynamic_rotate %42 by %c127_i32 dim 1 : vector<1x128xf32>, i32 -> vector<1x128xf32>
    %48 = arith.select %20, %46, %47 : vector<1x128xi1>, vector<1x128xf32>
    %49 = tpu.concatenate %45, %42 in 1 : vector<1x128xf32>, vector<1x128xf32> -> vector<1x256xf32>
    %50 = tpu.concatenate %42, %48 in 1 : vector<1x128xf32>, vector<1x128xf32> -> vector<1x256xf32>
    %51 = tpu.iota {dimensions = array<i32: 0>} : vector<2x256xi32>
    %c0_i32_15 = arith.constant 0 : i32
    %52 = vector.broadcast %c0_i32_15 : i32 to vector<2x256xi32>
    %53 = arith.cmpi eq, %51, %52 : vector<2x256xi32>
    %54 = vector.shape_cast %49 : vector<1x256xf32> to vector<1x256xf32>
    %55 = vector.broadcast %54 : vector<1x256xf32> to vector<2x256xf32>
    %56 = vector.shape_cast %50 : vector<1x256xf32> to vector<1x256xf32>
    %57 = vector.broadcast %56 : vector<1x256xf32> to vector<2x256xf32>
    %58 = arith.select %53, %55, %57 : vector<2x256xi1>, vector<2x256xf32>
    %c1_i32_16 = arith.constant 1 : i32
    %59 = tpu.dynamic_rotate %58 by %c1_i32_16 dim 1 : vector<2x256xf32>, i32 -> vector<2x256xf32>
    %60 = vector.shape_cast %39 : vector<1x256xi1> to vector<1x256xi1>
    %61 = vector.broadcast %60 : vector<1x256xi1> to vector<2x256xi1>
    %62 = arith.select %61, %58, %59 : vector<2x256xi1>, vector<2x256xf32>
    %c255_i32 = arith.constant 255 : i32
    %63 = tpu.dynamic_rotate %58 by %c255_i32 dim 1 : vector<2x256xf32>, i32 -> vector<2x256xf32>
    %64 = vector.shape_cast %41 : vector<1x256xi1> to vector<1x256xi1>
    %65 = vector.broadcast %64 : vector<1x256xi1> to vector<2x256xi1>
    %66 = arith.select %65, %58, %63 : vector<2x256xi1>, vector<2x256xf32>
    %c0_17 = arith.constant 0 : index
    %c0_18 = arith.constant 0 : index
    %67 = vector.load %arg1[%c0_17, %c0_18] : memref<1016x128xf32, #tpu.memory_space<vmem>>, vector<16x2xf32>
    %cst = arith.constant dense<0.000000e+00> : vector<16x256xf32>
    %68 = tpu.matmul %67, %62, %cst {dimension_numbers = #tpu.dot_dimension_numbers<[1], [0], [0], [1], [0, 0, 1, 1], [], []>} : vector<16x2xf32>, vector<2x256xf32>, vector<16x256xf32> -> vector<16x256xf32>
    %c16 = arith.constant 16 : index
    %c0_19 = arith.constant 0 : index
    %69 = vector.load %arg1[%c16, %c0_19] : memref<1016x128xf32, #tpu.memory_space<vmem>>, vector<16x2xf32>
    %cst_20 = arith.constant dense<0.000000e+00> : vector<16x256xf32>
    %70 = tpu.matmul %69, %58, %cst_20 {dimension_numbers = #tpu.dot_dimension_numbers<[1], [0], [0], [1], [0, 0, 1, 1], [], []>} : vector<16x2xf32>, vector<2x256xf32>, vector<16x256xf32> -> vector<16x256xf32>
    %c32 = arith.constant 32 : index
    %c0_21 = arith.constant 0 : index
    %71 = vector.load %arg1[%c32, %c0_21] : memref<1016x128xf32, #tpu.memory_space<vmem>>, vector<16x2xf32>
    %cst_22 = arith.constant dense<0.000000e+00> : vector<16x256xf32>
    %72 = tpu.matmul %71, %66, %cst_22 {dimension_numbers = #tpu.dot_dimension_numbers<[1], [0], [0], [1], [0, 0, 1, 1], [], []>} : vector<16x2xf32>, vector<2x256xf32>, vector<16x256xf32> -> vector<16x256xf32>
    %73 = arith.addf %68, %70 : vector<16x256xf32>
    %74 = arith.addf %73, %72 : vector<16x256xf32>
    %c0_23 = arith.constant 0 : index
    %c0_24 = arith.constant 0 : index
    %75 = vector.load %arg2[%c0_23, %c0_24] : memref<1016x1xf32, #tpu.memory_space<vmem>>, vector<16x1xf32>
    %76 = vector.broadcast %75 : vector<16x1xf32> to vector<16x256xf32>
    %77 = arith.addf %74, %76 : vector<16x256xf32>
    %cst_25 = arith.constant 0.000000e+00 : f32
    %78 = vector.broadcast %cst_25 : f32 to vector<16x256xf32>
    %79 = arith.maximumf %77, %78 : vector<16x256xf32>
    %c48 = arith.constant 48 : index
    %c0_26 = arith.constant 0 : index
    %80 = vector.load %arg1[%c48, %c0_26] : memref<1016x128xf32, #tpu.memory_space<vmem>>, vector<16x16xf32>
    %c48_27 = arith.constant 48 : index
    %c0_28 = arith.constant 0 : index
    %81 = vector.load %arg2[%c48_27, %c0_28] : memref<1016x1xf32, #tpu.memory_space<vmem>>, vector<16x1xf32>
    %cst_29 = arith.constant dense<0.000000e+00> : vector<16x256xf32>
    %82 = tpu.matmul %80, %79, %cst_29 {dimension_numbers = #tpu.dot_dimension_numbers<[1], [0], [0], [1], [0, 0, 1, 1], [], []>} : vector<16x16xf32>, vector<16x256xf32>, vector<16x256xf32> -> vector<16x256xf32>
    %83 = vector.broadcast %81 : vector<16x1xf32> to vector<16x256xf32>
    %84 = arith.addf %82, %83 : vector<16x256xf32>
    %c64 = arith.constant 64 : index
    %c0_30 = arith.constant 0 : index
    %85 = vector.load %arg1[%c64, %c0_30] : memref<1016x128xf32, #tpu.memory_space<vmem>>, vector<16x2xf32>
    %c64_31 = arith.constant 64 : index
    %c0_32 = arith.constant 0 : index
    %86 = vector.load %arg2[%c64_31, %c0_32] : memref<1016x1xf32, #tpu.memory_space<vmem>>, vector<16x1xf32>
    %cst_33 = arith.constant dense<0.000000e+00> : vector<16x256xf32>
    %87 = tpu.matmul %85, %58, %cst_33 {dimension_numbers = #tpu.dot_dimension_numbers<[1], [0], [0], [1], [0, 0, 1, 1], [], []>} : vector<16x2xf32>, vector<2x256xf32>, vector<16x256xf32> -> vector<16x256xf32>
    %88 = vector.broadcast %86 : vector<16x1xf32> to vector<16x256xf32>
    %89 = arith.addf %87, %88 : vector<16x256xf32>
    %90 = arith.addf %84, %89 : vector<16x256xf32>
    %cst_34 = arith.constant 0.000000e+00 : f32
    %91 = vector.broadcast %cst_34 : f32 to vector<16x256xf32>
    %92 = arith.maximumf %90, %91 : vector<16x256xf32>
    %c1_i32_35 = arith.constant 1 : i32
    %93 = tpu.dynamic_rotate %92 by %c1_i32_35 dim 1 : vector<16x256xf32>, i32 -> vector<16x256xf32>
    %94 = vector.shape_cast %39 : vector<1x256xi1> to vector<1x256xi1>
    %95 = vector.broadcast %94 : vector<1x256xi1> to vector<16x256xi1>
    %96 = arith.select %95, %92, %93 : vector<16x256xi1>, vector<16x256xf32>
    %c255_i32_36 = arith.constant 255 : i32
    %97 = tpu.dynamic_rotate %92 by %c255_i32_36 dim 1 : vector<16x256xf32>, i32 -> vector<16x256xf32>
    %98 = vector.shape_cast %41 : vector<1x256xi1> to vector<1x256xi1>
    %99 = vector.broadcast %98 : vector<1x256xi1> to vector<16x256xi1>
    %100 = arith.select %99, %92, %97 : vector<16x256xi1>, vector<16x256xf32>
    %c80 = arith.constant 80 : index
    %c0_37 = arith.constant 0 : index
    %101 = vector.load %arg1[%c80, %c0_37] : memref<1016x128xf32, #tpu.memory_space<vmem>>, vector<16x16xf32>
    %cst_38 = arith.constant dense<0.000000e+00> : vector<16x256xf32>
    %102 = tpu.matmul %101, %96, %cst_38 {dimension_numbers = #tpu.dot_dimension_numbers<[1], [0], [0], [1], [0, 0, 1, 1], [], []>} : vector<16x16xf32>, vector<16x256xf32>, vector<16x256xf32> -> vector<16x256xf32>
    %c96 = arith.constant 96 : index
    %c0_39 = arith.constant 0 : index
    %103 = vector.load %arg1[%c96, %c0_39] : memref<1016x128xf32, #tpu.memory_space<vmem>>, vector<16x16xf32>
    %cst_40 = arith.constant dense<0.000000e+00> : vector<16x256xf32>
    %104 = tpu.matmul %103, %92, %cst_40 {dimension_numbers = #tpu.dot_dimension_numbers<[1], [0], [0], [1], [0, 0, 1, 1], [], []>} : vector<16x16xf32>, vector<16x256xf32>, vector<16x256xf32> -> vector<16x256xf32>
    %c112 = arith.constant 112 : index
    %c0_41 = arith.constant 0 : index
    %105 = vector.load %arg1[%c112, %c0_41] : memref<1016x128xf32, #tpu.memory_space<vmem>>, vector<16x16xf32>
    %cst_42 = arith.constant dense<0.000000e+00> : vector<16x256xf32>
    %106 = tpu.matmul %105, %100, %cst_42 {dimension_numbers = #tpu.dot_dimension_numbers<[1], [0], [0], [1], [0, 0, 1, 1], [], []>} : vector<16x16xf32>, vector<16x256xf32>, vector<16x256xf32> -> vector<16x256xf32>
    %107 = arith.addf %102, %104 : vector<16x256xf32>
    %108 = arith.addf %107, %106 : vector<16x256xf32>
    %c80_43 = arith.constant 80 : index
    %c0_44 = arith.constant 0 : index
    %109 = vector.load %arg2[%c80_43, %c0_44] : memref<1016x1xf32, #tpu.memory_space<vmem>>, vector<16x1xf32>
    %110 = vector.broadcast %109 : vector<16x1xf32> to vector<16x256xf32>
    %111 = arith.addf %108, %110 : vector<16x256xf32>
    %cst_45 = arith.constant 0.000000e+00 : f32
    %112 = vector.broadcast %cst_45 : f32 to vector<16x256xf32>
    %113 = arith.maximumf %111, %112 : vector<16x256xf32>
    %c128 = arith.constant 128 : index
    %c0_46 = arith.constant 0 : index
    %114 = vector.load %arg1[%c128, %c0_46] : memref<1016x128xf32, #tpu.memory_space<vmem>>, vector<16x16xf32>
    %c128_47 = arith.constant 128 : index
    %c0_48 = arith.constant 0 : index
    %115 = vector.load %arg2[%c128_47, %c0_48] : memref<1016x1xf32, #tpu.memory_space<vmem>>, vector<16x1xf32>
    %cst_49 = arith.constant dense<0.000000e+00> : vector<16x256xf32>
    %116 = tpu.matmul %114, %113, %cst_49 {dimension_numbers = #tpu.dot_dimension_numbers<[1], [0], [0], [1], [0, 0, 1, 1], [], []>} : vector<16x16xf32>, vector<16x256xf32>, vector<16x256xf32> -> vector<16x256xf32>
    %117 = vector.broadcast %115 : vector<16x1xf32> to vector<16x256xf32>
    %118 = arith.addf %116, %117 : vector<16x256xf32>
    %119 = arith.addf %118, %92 : vector<16x256xf32>
    %cst_50 = arith.constant 0.000000e+00 : f32
    %120 = vector.broadcast %cst_50 : f32 to vector<16x256xf32>
    %121 = arith.maximumf %119, %120 : vector<16x256xf32>
    %c1_i32_51 = arith.constant 1 : i32
    %122 = tpu.dynamic_rotate %121 by %c1_i32_51 dim 1 : vector<16x256xf32>, i32 -> vector<16x256xf32>
    %123 = vector.shape_cast %39 : vector<1x256xi1> to vector<1x256xi1>
    %124 = vector.broadcast %123 : vector<1x256xi1> to vector<16x256xi1>
    %125 = arith.select %124, %121, %122 : vector<16x256xi1>, vector<16x256xf32>
    %c255_i32_52 = arith.constant 255 : i32
    %126 = tpu.dynamic_rotate %121 by %c255_i32_52 dim 1 : vector<16x256xf32>, i32 -> vector<16x256xf32>
    %127 = vector.shape_cast %41 : vector<1x256xi1> to vector<1x256xi1>
    %128 = vector.broadcast %127 : vector<1x256xi1> to vector<16x256xi1>
    %129 = arith.select %128, %121, %126 : vector<16x256xi1>, vector<16x256xf32>
    %c144 = arith.constant 144 : index
    %c0_53 = arith.constant 0 : index
    %130 = vector.load %arg1[%c144, %c0_53] : memref<1016x128xf32, #tpu.memory_space<vmem>>, vector<32x16xf32>
    %cst_54 = arith.constant dense<0.000000e+00> : vector<32x256xf32>
    %131 = tpu.matmul %130, %125, %cst_54 {dimension_numbers = #tpu.dot_dimension_numbers<[1], [0], [0], [1], [0, 0, 1, 1], [], []>} : vector<32x16xf32>, vector<16x256xf32>, vector<32x256xf32> -> vector<32x256xf32>
    %c176 = arith.constant 176 : index
    %c0_55 = arith.constant 0 : index
    %132 = vector.load %arg1[%c176, %c0_55] : memref<1016x128xf32, #tpu.memory_space<vmem>>, vector<32x16xf32>
    %cst_56 = arith.constant dense<0.000000e+00> : vector<32x256xf32>
    %133 = tpu.matmul %132, %121, %cst_56 {dimension_numbers = #tpu.dot_dimension_numbers<[1], [0], [0], [1], [0, 0, 1, 1], [], []>} : vector<32x16xf32>, vector<16x256xf32>, vector<32x256xf32> -> vector<32x256xf32>
    %c208 = arith.constant 208 : index
    %c0_57 = arith.constant 0 : index
    %134 = vector.load %arg1[%c208, %c0_57] : memref<1016x128xf32, #tpu.memory_space<vmem>>, vector<32x16xf32>
    %cst_58 = arith.constant dense<0.000000e+00> : vector<32x256xf32>
    %135 = tpu.matmul %134, %129, %cst_58 {dimension_numbers = #tpu.dot_dimension_numbers<[1], [0], [0], [1], [0, 0, 1, 1], [], []>} : vector<32x16xf32>, vector<16x256xf32>, vector<32x256xf32> -> vector<32x256xf32>
    %136 = arith.addf %131, %133 : vector<32x256xf32>
    %137 = arith.addf %136, %135 : vector<32x256xf32>
    %c144_59 = arith.constant 144 : index
    %c0_60 = arith.constant 0 : index
    %138 = vector.load %arg2[%c144_59, %c0_60] : memref<1016x1xf32, #tpu.memory_space<vmem>>, vector<32x1xf32>
    %139 = vector.broadcast %138 : vector<32x1xf32> to vector<32x256xf32>
    %140 = arith.addf %137, %139 : vector<32x256xf32>
    %cst_61 = arith.constant 0.000000e+00 : f32
    %141 = vector.broadcast %cst_61 : f32 to vector<32x256xf32>
    %142 = arith.maximumf %140, %141 : vector<32x256xf32>
    %c240 = arith.constant 240 : index
    %c0_62 = arith.constant 0 : index
    %143 = vector.load %arg1[%c240, %c0_62] : memref<1016x128xf32, #tpu.memory_space<vmem>>, vector<32x32xf32>
    %c240_63 = arith.constant 240 : index
    %c0_64 = arith.constant 0 : index
    %144 = vector.load %arg2[%c240_63, %c0_64] : memref<1016x1xf32, #tpu.memory_space<vmem>>, vector<32x1xf32>
    %cst_65 = arith.constant dense<0.000000e+00> : vector<32x256xf32>
    %145 = tpu.matmul %143, %142, %cst_65 {dimension_numbers = #tpu.dot_dimension_numbers<[1], [0], [0], [1], [0, 0, 1, 1], [], []>} : vector<32x32xf32>, vector<32x256xf32>, vector<32x256xf32> -> vector<32x256xf32>
    %146 = vector.broadcast %144 : vector<32x1xf32> to vector<32x256xf32>
    %147 = arith.addf %145, %146 : vector<32x256xf32>
    %c272 = arith.constant 272 : index
    %c0_66 = arith.constant 0 : index
    %148 = vector.load %arg1[%c272, %c0_66] : memref<1016x128xf32, #tpu.memory_space<vmem>>, vector<32x16xf32>
    %c272_67 = arith.constant 272 : index
    %c0_68 = arith.constant 0 : index
    %149 = vector.load %arg2[%c272_67, %c0_68] : memref<1016x1xf32, #tpu.memory_space<vmem>>, vector<32x1xf32>
    %cst_69 = arith.constant dense<0.000000e+00> : vector<32x256xf32>
    %150 = tpu.matmul %148, %121, %cst_69 {dimension_numbers = #tpu.dot_dimension_numbers<[1], [0], [0], [1], [0, 0, 1, 1], [], []>} : vector<32x16xf32>, vector<16x256xf32>, vector<32x256xf32> -> vector<32x256xf32>
    %151 = vector.broadcast %149 : vector<32x1xf32> to vector<32x256xf32>
    %152 = arith.addf %150, %151 : vector<32x256xf32>
    %153 = arith.addf %147, %152 : vector<32x256xf32>
    %cst_70 = arith.constant 0.000000e+00 : f32
    %154 = vector.broadcast %cst_70 : f32 to vector<32x256xf32>
    %155 = arith.maximumf %153, %154 : vector<32x256xf32>
    %c1_i32_71 = arith.constant 1 : i32
    %156 = tpu.dynamic_rotate %155 by %c1_i32_71 dim 1 : vector<32x256xf32>, i32 -> vector<32x256xf32>
    %157 = vector.shape_cast %39 : vector<1x256xi1> to vector<1x256xi1>
    %158 = vector.broadcast %157 : vector<1x256xi1> to vector<32x256xi1>
    %159 = arith.select %158, %155, %156 : vector<32x256xi1>, vector<32x256xf32>
    %c255_i32_72 = arith.constant 255 : i32
    %160 = tpu.dynamic_rotate %155 by %c255_i32_72 dim 1 : vector<32x256xf32>, i32 -> vector<32x256xf32>
    %161 = vector.shape_cast %41 : vector<1x256xi1> to vector<1x256xi1>
    %162 = vector.broadcast %161 : vector<1x256xi1> to vector<32x256xi1>
    %163 = arith.select %162, %155, %160 : vector<32x256xi1>, vector<32x256xf32>
    %c304 = arith.constant 304 : index
    %c0_73 = arith.constant 0 : index
    %164 = vector.load %arg1[%c304, %c0_73] : memref<1016x128xf32, #tpu.memory_space<vmem>>, vector<64x32xf32>
    %cst_74 = arith.constant dense<0.000000e+00> : vector<64x256xf32>
    %165 = tpu.matmul %164, %159, %cst_74 {dimension_numbers = #tpu.dot_dimension_numbers<[1], [0], [0], [1], [0, 0, 1, 1], [], []>} : vector<64x32xf32>, vector<32x256xf32>, vector<64x256xf32> -> vector<64x256xf32>
    %c368 = arith.constant 368 : index
    %c0_75 = arith.constant 0 : index
    %166 = vector.load %arg1[%c368, %c0_75] : memref<1016x128xf32, #tpu.memory_space<vmem>>, vector<64x32xf32>
    %cst_76 = arith.constant dense<0.000000e+00> : vector<64x256xf32>
    %167 = tpu.matmul %166, %155, %cst_76 {dimension_numbers = #tpu.dot_dimension_numbers<[1], [0], [0], [1], [0, 0, 1, 1], [], []>} : vector<64x32xf32>, vector<32x256xf32>, vector<64x256xf32> -> vector<64x256xf32>
    %c432 = arith.constant 432 : index
    %c0_77 = arith.constant 0 : index
    %168 = vector.load %arg1[%c432, %c0_77] : memref<1016x128xf32, #tpu.memory_space<vmem>>, vector<64x32xf32>
    %cst_78 = arith.constant dense<0.000000e+00> : vector<64x256xf32>
    %169 = tpu.matmul %168, %163, %cst_78 {dimension_numbers = #tpu.dot_dimension_numbers<[1], [0], [0], [1], [0, 0, 1, 1], [], []>} : vector<64x32xf32>, vector<32x256xf32>, vector<64x256xf32> -> vector<64x256xf32>
    %170 = arith.addf %165, %167 : vector<64x256xf32>
    %171 = arith.addf %170, %169 : vector<64x256xf32>
    %c304_79 = arith.constant 304 : index
    %c0_80 = arith.constant 0 : index
    %172 = vector.load %arg2[%c304_79, %c0_80] : memref<1016x1xf32, #tpu.memory_space<vmem>>, vector<64x1xf32>
    %173 = vector.broadcast %172 : vector<64x1xf32> to vector<64x256xf32>
    %174 = arith.addf %171, %173 : vector<64x256xf32>
    %cst_81 = arith.constant 0.000000e+00 : f32
    %175 = vector.broadcast %cst_81 : f32 to vector<64x256xf32>
    %176 = arith.maximumf %174, %175 : vector<64x256xf32>
    %c496 = arith.constant 496 : index
    %c0_82 = arith.constant 0 : index
    %177 = vector.load %arg1[%c496, %c0_82] : memref<1016x128xf32, #tpu.memory_space<vmem>>, vector<64x64xf32>
    %c496_83 = arith.constant 496 : index
    %c0_84 = arith.constant 0 : index
    %178 = vector.load %arg2[%c496_83, %c0_84] : memref<1016x1xf32, #tpu.memory_space<vmem>>, vector<64x1xf32>
    %cst_85 = arith.constant dense<0.000000e+00> : vector<64x256xf32>
    %179 = tpu.matmul %177, %176, %cst_85 {dimension_numbers = #tpu.dot_dimension_numbers<[1], [0], [0], [1], [0, 0, 1, 1], [], []>} : vector<64x64xf32>, vector<64x256xf32>, vector<64x256xf32> -> vector<64x256xf32>
    %180 = vector.broadcast %178 : vector<64x1xf32> to vector<64x256xf32>
    %181 = arith.addf %179, %180 : vector<64x256xf32>
    %c560 = arith.constant 560 : index
    %c0_86 = arith.constant 0 : index
    %182 = vector.load %arg1[%c560, %c0_86] : memref<1016x128xf32, #tpu.memory_space<vmem>>, vector<64x32xf32>
    %c560_87 = arith.constant 560 : index
    %c0_88 = arith.constant 0 : index
    %183 = vector.load %arg2[%c560_87, %c0_88] : memref<1016x1xf32, #tpu.memory_space<vmem>>, vector<64x1xf32>
    %cst_89 = arith.constant dense<0.000000e+00> : vector<64x256xf32>
    %184 = tpu.matmul %182, %155, %cst_89 {dimension_numbers = #tpu.dot_dimension_numbers<[1], [0], [0], [1], [0, 0, 1, 1], [], []>} : vector<64x32xf32>, vector<32x256xf32>, vector<64x256xf32> -> vector<64x256xf32>
    %185 = vector.broadcast %183 : vector<64x1xf32> to vector<64x256xf32>
    %186 = arith.addf %184, %185 : vector<64x256xf32>
    %187 = arith.addf %181, %186 : vector<64x256xf32>
    %cst_90 = arith.constant 0.000000e+00 : f32
    %188 = vector.broadcast %cst_90 : f32 to vector<64x256xf32>
    %189 = arith.maximumf %187, %188 : vector<64x256xf32>
    %c1_i32_91 = arith.constant 1 : i32
    %190 = tpu.dynamic_rotate %189 by %c1_i32_91 dim 1 : vector<64x256xf32>, i32 -> vector<64x256xf32>
    %191 = vector.shape_cast %39 : vector<1x256xi1> to vector<1x256xi1>
    %192 = vector.broadcast %191 : vector<1x256xi1> to vector<64x256xi1>
    %193 = arith.select %192, %189, %190 : vector<64x256xi1>, vector<64x256xf32>
    %c255_i32_92 = arith.constant 255 : i32
    %194 = tpu.dynamic_rotate %189 by %c255_i32_92 dim 1 : vector<64x256xf32>, i32 -> vector<64x256xf32>
    %195 = vector.shape_cast %41 : vector<1x256xi1> to vector<1x256xi1>
    %196 = vector.broadcast %195 : vector<1x256xi1> to vector<64x256xi1>
    %197 = arith.select %196, %189, %194 : vector<64x256xi1>, vector<64x256xf32>
    %c624 = arith.constant 624 : index
    %c0_93 = arith.constant 0 : index
    %198 = vector.load %arg1[%c624, %c0_93] : memref<1016x128xf32, #tpu.memory_space<vmem>>, vector<64x64xf32>
    %cst_94 = arith.constant dense<0.000000e+00> : vector<64x256xf32>
    %199 = tpu.matmul %198, %193, %cst_94 {dimension_numbers = #tpu.dot_dimension_numbers<[1], [0], [0], [1], [0, 0, 1, 1], [], []>} : vector<64x64xf32>, vector<64x256xf32>, vector<64x256xf32> -> vector<64x256xf32>
    %c688 = arith.constant 688 : index
    %c0_95 = arith.constant 0 : index
    %200 = vector.load %arg1[%c688, %c0_95] : memref<1016x128xf32, #tpu.memory_space<vmem>>, vector<64x64xf32>
    %cst_96 = arith.constant dense<0.000000e+00> : vector<64x256xf32>
    %201 = tpu.matmul %200, %189, %cst_96 {dimension_numbers = #tpu.dot_dimension_numbers<[1], [0], [0], [1], [0, 0, 1, 1], [], []>} : vector<64x64xf32>, vector<64x256xf32>, vector<64x256xf32> -> vector<64x256xf32>
    %c752 = arith.constant 752 : index
    %c0_97 = arith.constant 0 : index
    %202 = vector.load %arg1[%c752, %c0_97] : memref<1016x128xf32, #tpu.memory_space<vmem>>, vector<64x64xf32>
    %cst_98 = arith.constant dense<0.000000e+00> : vector<64x256xf32>
    %203 = tpu.matmul %202, %197, %cst_98 {dimension_numbers = #tpu.dot_dimension_numbers<[1], [0], [0], [1], [0, 0, 1, 1], [], []>} : vector<64x64xf32>, vector<64x256xf32>, vector<64x256xf32> -> vector<64x256xf32>
    %204 = arith.addf %199, %201 : vector<64x256xf32>
    %205 = arith.addf %204, %203 : vector<64x256xf32>
    %c624_99 = arith.constant 624 : index
    %c0_100 = arith.constant 0 : index
    %206 = vector.load %arg2[%c624_99, %c0_100] : memref<1016x1xf32, #tpu.memory_space<vmem>>, vector<64x1xf32>
    %207 = vector.broadcast %206 : vector<64x1xf32> to vector<64x256xf32>
    %208 = arith.addf %205, %207 : vector<64x256xf32>
    %cst_101 = arith.constant 0.000000e+00 : f32
    %209 = vector.broadcast %cst_101 : f32 to vector<64x256xf32>
    %210 = arith.maximumf %208, %209 : vector<64x256xf32>
    %c816 = arith.constant 816 : index
    %c0_102 = arith.constant 0 : index
    %211 = vector.load %arg1[%c816, %c0_102] : memref<1016x128xf32, #tpu.memory_space<vmem>>, vector<64x64xf32>
    %c816_103 = arith.constant 816 : index
    %c0_104 = arith.constant 0 : index
    %212 = vector.load %arg2[%c816_103, %c0_104] : memref<1016x1xf32, #tpu.memory_space<vmem>>, vector<64x1xf32>
    %cst_105 = arith.constant dense<0.000000e+00> : vector<64x256xf32>
    %213 = tpu.matmul %211, %210, %cst_105 {dimension_numbers = #tpu.dot_dimension_numbers<[1], [0], [0], [1], [0, 0, 1, 1], [], []>} : vector<64x64xf32>, vector<64x256xf32>, vector<64x256xf32> -> vector<64x256xf32>
    %214 = vector.broadcast %212 : vector<64x1xf32> to vector<64x256xf32>
    %215 = arith.addf %213, %214 : vector<64x256xf32>
    %216 = arith.addf %215, %189 : vector<64x256xf32>
    %cst_106 = arith.constant 0.000000e+00 : f32
    %217 = vector.broadcast %cst_106 : f32 to vector<64x256xf32>
    %218 = arith.maximumf %216, %217 : vector<64x256xf32>
    %c880 = arith.constant 880 : index
    %c0_107 = arith.constant 0 : index
    %219 = vector.load %arg1[%c880, %c0_107] : memref<1016x128xf32, #tpu.memory_space<vmem>>, vector<64x64xf32>
    %c880_108 = arith.constant 880 : index
    %c0_109 = arith.constant 0 : index
    %220 = vector.load %arg2[%c880_108, %c0_109] : memref<1016x1xf32, #tpu.memory_space<vmem>>, vector<64x1xf32>
    %cst_110 = arith.constant dense<0.000000e+00> : vector<64x256xf32>
    %221 = tpu.matmul %219, %218, %cst_110 {dimension_numbers = #tpu.dot_dimension_numbers<[1], [0], [0], [1], [0, 0, 1, 1], [], []>} : vector<64x64xf32>, vector<64x256xf32>, vector<64x256xf32> -> vector<64x256xf32>
    %222 = vector.broadcast %220 : vector<64x1xf32> to vector<64x256xf32>
    %223 = arith.addf %221, %222 : vector<64x256xf32>
    %cst_111 = arith.constant 0.000000e+00 : f32
    %224 = vector.broadcast %cst_111 : f32 to vector<64x256xf32>
    %225 = arith.maximumf %223, %224 : vector<64x256xf32>
    %c944 = arith.constant 944 : index
    %c0_112 = arith.constant 0 : index
    %226 = vector.load %arg1[%c944, %c0_112] : memref<1016x128xf32, #tpu.memory_space<vmem>>, vector<64x64xf32>
    %c944_113 = arith.constant 944 : index
    %c0_114 = arith.constant 0 : index
    %227 = vector.load %arg2[%c944_113, %c0_114] : memref<1016x1xf32, #tpu.memory_space<vmem>>, vector<64x1xf32>
    %cst_115 = arith.constant dense<0.000000e+00> : vector<64x256xf32>
    %228 = tpu.matmul %226, %225, %cst_115 {dimension_numbers = #tpu.dot_dimension_numbers<[1], [0], [0], [1], [0, 0, 1, 1], [], []>} : vector<64x64xf32>, vector<64x256xf32>, vector<64x256xf32> -> vector<64x256xf32>
    %229 = vector.broadcast %227 : vector<64x1xf32> to vector<64x256xf32>
    %230 = arith.addf %228, %229 : vector<64x256xf32>
    %231 = arith.addf %230, %218 : vector<64x256xf32>
    %cst_116 = arith.constant 0.000000e+00 : f32
    %232 = vector.broadcast %cst_116 : f32 to vector<64x256xf32>
    %233 = arith.maximumf %231, %232 : vector<64x256xf32>
    %c1008 = arith.constant 1008 : index
    %c0_117 = arith.constant 0 : index
    %234 = vector.load %arg1[%c1008, %c0_117] : memref<1016x128xf32, #tpu.memory_space<vmem>>, vector<4x64xf32>
    %c1008_118 = arith.constant 1008 : index
    %c0_119 = arith.constant 0 : index
    %235 = vector.load %arg2[%c1008_118, %c0_119] : memref<1016x1xf32, #tpu.memory_space<vmem>>, vector<4x1xf32>
    %cst_120 = arith.constant dense<0.000000e+00> : vector<4x256xf32>
    %236 = tpu.matmul %234, %233, %cst_120 {dimension_numbers = #tpu.dot_dimension_numbers<[1], [0], [0], [1], [0, 0, 1, 1], [], []>} : vector<4x64xf32>, vector<64x256xf32>, vector<4x256xf32> -> vector<4x256xf32>
    %237 = vector.broadcast %235 : vector<4x1xf32> to vector<4x256xf32>
    %238 = arith.addf %236, %237 : vector<4x256xf32>
    %239 = vector.extract_strided_slice %238 {offsets = [0, 0], sizes = [4, 128], strides = [1, 1]} : vector<4x256xf32> to vector<4x128xf32>
    %240 = vector.extract_strided_slice %238 {offsets = [0, 128], sizes = [4, 128], strides = [1, 1]} : vector<4x256xf32> to vector<4x128xf32>
    %241 = tpu.iota {dimensions = array<i32: 0>} : vector<2x128xi32>
    %c0_i32_121 = arith.constant 0 : i32
    %242 = vector.broadcast %c0_i32_121 : i32 to vector<2x128xi32>
    %243 = arith.cmpi eq, %241, %242 : vector<2x128xi32>
    %244 = vector.shape_cast %45 : vector<1x128xf32> to vector<1x128xf32>
    %245 = vector.broadcast %244 : vector<1x128xf32> to vector<2x128xf32>
    %246 = vector.shape_cast %42 : vector<1x128xf32> to vector<1x128xf32>
    %247 = vector.broadcast %246 : vector<1x128xf32> to vector<2x128xf32>
    %248 = arith.select %243, %245, %247 : vector<2x128xi1>, vector<2x128xf32>
    %c1_i32_122 = arith.constant 1 : i32
    %249 = tpu.dynamic_rotate %248 by %c1_i32_122 dim 1 : vector<2x128xf32>, i32 -> vector<2x128xf32>
    %250 = vector.shape_cast %18 : vector<1x128xi1> to vector<1x128xi1>
    %251 = vector.broadcast %250 : vector<1x128xi1> to vector<2x128xi1>
    %252 = arith.select %251, %248, %249 : vector<2x128xi1>, vector<2x128xf32>
    %c127_i32_123 = arith.constant 127 : i32
    %253 = tpu.dynamic_rotate %248 by %c127_i32_123 dim 1 : vector<2x128xf32>, i32 -> vector<2x128xf32>
    %254 = vector.shape_cast %20 : vector<1x128xi1> to vector<1x128xi1>
    %255 = vector.broadcast %254 : vector<1x128xi1> to vector<2x128xi1>
    %256 = arith.select %255, %248, %253 : vector<2x128xi1>, vector<2x128xf32>
    %c0_124 = arith.constant 0 : index
    %c0_125 = arith.constant 0 : index
    %257 = vector.load %arg3[%c0_124, %c0_125] : memref<1016x128xf32, #tpu.memory_space<vmem>>, vector<16x2xf32>
    %cst_126 = arith.constant dense<0.000000e+00> : vector<16x128xf32>
    %258 = tpu.matmul %257, %252, %cst_126 {dimension_numbers = #tpu.dot_dimension_numbers<[1], [0], [0], [1], [0, 0, 1, 1], [], []>} : vector<16x2xf32>, vector<2x128xf32>, vector<16x128xf32> -> vector<16x128xf32>
    %c16_127 = arith.constant 16 : index
    %c0_128 = arith.constant 0 : index
    %259 = vector.load %arg3[%c16_127, %c0_128] : memref<1016x128xf32, #tpu.memory_space<vmem>>, vector<16x2xf32>
    %cst_129 = arith.constant dense<0.000000e+00> : vector<16x128xf32>
    %260 = tpu.matmul %259, %248, %cst_129 {dimension_numbers = #tpu.dot_dimension_numbers<[1], [0], [0], [1], [0, 0, 1, 1], [], []>} : vector<16x2xf32>, vector<2x128xf32>, vector<16x128xf32> -> vector<16x128xf32>
    %c32_130 = arith.constant 32 : index
    %c0_131 = arith.constant 0 : index
    %261 = vector.load %arg3[%c32_130, %c0_131] : memref<1016x128xf32, #tpu.memory_space<vmem>>, vector<16x2xf32>
    %cst_132 = arith.constant dense<0.000000e+00> : vector<16x128xf32>
    %262 = tpu.matmul %261, %256, %cst_132 {dimension_numbers = #tpu.dot_dimension_numbers<[1], [0], [0], [1], [0, 0, 1, 1], [], []>} : vector<16x2xf32>, vector<2x128xf32>, vector<16x128xf32> -> vector<16x128xf32>
    %263 = arith.addf %258, %260 : vector<16x128xf32>
    %264 = arith.addf %263, %262 : vector<16x128xf32>
    %c0_133 = arith.constant 0 : index
    %c0_134 = arith.constant 0 : index
    %265 = vector.load %arg4[%c0_133, %c0_134] : memref<1016x1xf32, #tpu.memory_space<vmem>>, vector<16x1xf32>
    %266 = vector.broadcast %265 : vector<16x1xf32> to vector<16x128xf32>
    %267 = arith.addf %264, %266 : vector<16x128xf32>
    %cst_135 = arith.constant 0.000000e+00 : f32
    %268 = vector.broadcast %cst_135 : f32 to vector<16x128xf32>
    %269 = arith.maximumf %267, %268 : vector<16x128xf32>
    %c48_136 = arith.constant 48 : index
    %c0_137 = arith.constant 0 : index
    %270 = vector.load %arg3[%c48_136, %c0_137] : memref<1016x128xf32, #tpu.memory_space<vmem>>, vector<16x16xf32>
    %c48_138 = arith.constant 48 : index
    %c0_139 = arith.constant 0 : index
    %271 = vector.load %arg4[%c48_138, %c0_139] : memref<1016x1xf32, #tpu.memory_space<vmem>>, vector<16x1xf32>
    %cst_140 = arith.constant dense<0.000000e+00> : vector<16x128xf32>
    %272 = tpu.matmul %270, %269, %cst_140 {dimension_numbers = #tpu.dot_dimension_numbers<[1], [0], [0], [1], [0, 0, 1, 1], [], []>} : vector<16x16xf32>, vector<16x128xf32>, vector<16x128xf32> -> vector<16x128xf32>
    %273 = vector.broadcast %271 : vector<16x1xf32> to vector<16x128xf32>
    %274 = arith.addf %272, %273 : vector<16x128xf32>
    %c64_141 = arith.constant 64 : index
    %c0_142 = arith.constant 0 : index
    %275 = vector.load %arg3[%c64_141, %c0_142] : memref<1016x128xf32, #tpu.memory_space<vmem>>, vector<16x2xf32>
    %c64_143 = arith.constant 64 : index
    %c0_144 = arith.constant 0 : index
    %276 = vector.load %arg4[%c64_143, %c0_144] : memref<1016x1xf32, #tpu.memory_space<vmem>>, vector<16x1xf32>
    %cst_145 = arith.constant dense<0.000000e+00> : vector<16x128xf32>
    %277 = tpu.matmul %275, %248, %cst_145 {dimension_numbers = #tpu.dot_dimension_numbers<[1], [0], [0], [1], [0, 0, 1, 1], [], []>} : vector<16x2xf32>, vector<2x128xf32>, vector<16x128xf32> -> vector<16x128xf32>
    %278 = vector.broadcast %276 : vector<16x1xf32> to vector<16x128xf32>
    %279 = arith.addf %277, %278 : vector<16x128xf32>
    %280 = arith.addf %274, %279 : vector<16x128xf32>
    %cst_146 = arith.constant 0.000000e+00 : f32
    %281 = vector.broadcast %cst_146 : f32 to vector<16x128xf32>
    %282 = arith.maximumf %280, %281 : vector<16x128xf32>
    %c1_i32_147 = arith.constant 1 : i32
    %283 = tpu.dynamic_rotate %282 by %c1_i32_147 dim 1 : vector<16x128xf32>, i32 -> vector<16x128xf32>
    %284 = vector.shape_cast %18 : vector<1x128xi1> to vector<1x128xi1>
    %285 = vector.broadcast %284 : vector<1x128xi1> to vector<16x128xi1>
    %286 = arith.select %285, %282, %283 : vector<16x128xi1>, vector<16x128xf32>
    %c127_i32_148 = arith.constant 127 : i32
    %287 = tpu.dynamic_rotate %282 by %c127_i32_148 dim 1 : vector<16x128xf32>, i32 -> vector<16x128xf32>
    %288 = vector.shape_cast %20 : vector<1x128xi1> to vector<1x128xi1>
    %289 = vector.broadcast %288 : vector<1x128xi1> to vector<16x128xi1>
    %290 = arith.select %289, %282, %287 : vector<16x128xi1>, vector<16x128xf32>
    %c80_149 = arith.constant 80 : index
    %c0_150 = arith.constant 0 : index
    %291 = vector.load %arg3[%c80_149, %c0_150] : memref<1016x128xf32, #tpu.memory_space<vmem>>, vector<16x16xf32>
    %cst_151 = arith.constant dense<0.000000e+00> : vector<16x128xf32>
    %292 = tpu.matmul %291, %286, %cst_151 {dimension_numbers = #tpu.dot_dimension_numbers<[1], [0], [0], [1], [0, 0, 1, 1], [], []>} : vector<16x16xf32>, vector<16x128xf32>, vector<16x128xf32> -> vector<16x128xf32>
    %c96_152 = arith.constant 96 : index
    %c0_153 = arith.constant 0 : index
    %293 = vector.load %arg3[%c96_152, %c0_153] : memref<1016x128xf32, #tpu.memory_space<vmem>>, vector<16x16xf32>
    %cst_154 = arith.constant dense<0.000000e+00> : vector<16x128xf32>
    %294 = tpu.matmul %293, %282, %cst_154 {dimension_numbers = #tpu.dot_dimension_numbers<[1], [0], [0], [1], [0, 0, 1, 1], [], []>} : vector<16x16xf32>, vector<16x128xf32>, vector<16x128xf32> -> vector<16x128xf32>
    %c112_155 = arith.constant 112 : index
    %c0_156 = arith.constant 0 : index
    %295 = vector.load %arg3[%c112_155, %c0_156] : memref<1016x128xf32, #tpu.memory_space<vmem>>, vector<16x16xf32>
    %cst_157 = arith.constant dense<0.000000e+00> : vector<16x128xf32>
    %296 = tpu.matmul %295, %290, %cst_157 {dimension_numbers = #tpu.dot_dimension_numbers<[1], [0], [0], [1], [0, 0, 1, 1], [], []>} : vector<16x16xf32>, vector<16x128xf32>, vector<16x128xf32> -> vector<16x128xf32>
    %297 = arith.addf %292, %294 : vector<16x128xf32>
    %298 = arith.addf %297, %296 : vector<16x128xf32>
    %c80_158 = arith.constant 80 : index
    %c0_159 = arith.constant 0 : index
    %299 = vector.load %arg4[%c80_158, %c0_159] : memref<1016x1xf32, #tpu.memory_space<vmem>>, vector<16x1xf32>
    %300 = vector.broadcast %299 : vector<16x1xf32> to vector<16x128xf32>
    %301 = arith.addf %298, %300 : vector<16x128xf32>
    %cst_160 = arith.constant 0.000000e+00 : f32
    %302 = vector.broadcast %cst_160 : f32 to vector<16x128xf32>
    %303 = arith.maximumf %301, %302 : vector<16x128xf32>
    %c128_161 = arith.constant 128 : index
    %c0_162 = arith.constant 0 : index
    %304 = vector.load %arg3[%c128_161, %c0_162] : memref<1016x128xf32, #tpu.memory_space<vmem>>, vector<16x16xf32>
    %c128_163 = arith.constant 128 : index
    %c0_164 = arith.constant 0 : index
    %305 = vector.load %arg4[%c128_163, %c0_164] : memref<1016x1xf32, #tpu.memory_space<vmem>>, vector<16x1xf32>
    %cst_165 = arith.constant dense<0.000000e+00> : vector<16x128xf32>
    %306 = tpu.matmul %304, %303, %cst_165 {dimension_numbers = #tpu.dot_dimension_numbers<[1], [0], [0], [1], [0, 0, 1, 1], [], []>} : vector<16x16xf32>, vector<16x128xf32>, vector<16x128xf32> -> vector<16x128xf32>
    %307 = vector.broadcast %305 : vector<16x1xf32> to vector<16x128xf32>
    %308 = arith.addf %306, %307 : vector<16x128xf32>
    %309 = arith.addf %308, %282 : vector<16x128xf32>
    %cst_166 = arith.constant 0.000000e+00 : f32
    %310 = vector.broadcast %cst_166 : f32 to vector<16x128xf32>
    %311 = arith.maximumf %309, %310 : vector<16x128xf32>
    %c1_i32_167 = arith.constant 1 : i32
    %312 = tpu.dynamic_rotate %311 by %c1_i32_167 dim 1 : vector<16x128xf32>, i32 -> vector<16x128xf32>
    %313 = vector.shape_cast %18 : vector<1x128xi1> to vector<1x128xi1>
    %314 = vector.broadcast %313 : vector<1x128xi1> to vector<16x128xi1>
    %315 = arith.select %314, %311, %312 : vector<16x128xi1>, vector<16x128xf32>
    %c127_i32_168 = arith.constant 127 : i32
    %316 = tpu.dynamic_rotate %311 by %c127_i32_168 dim 1 : vector<16x128xf32>, i32 -> vector<16x128xf32>
    %317 = vector.shape_cast %20 : vector<1x128xi1> to vector<1x128xi1>
    %318 = vector.broadcast %317 : vector<1x128xi1> to vector<16x128xi1>
    %319 = arith.select %318, %311, %316 : vector<16x128xi1>, vector<16x128xf32>
    %c144_169 = arith.constant 144 : index
    %c0_170 = arith.constant 0 : index
    %320 = vector.load %arg3[%c144_169, %c0_170] : memref<1016x128xf32, #tpu.memory_space<vmem>>, vector<32x16xf32>
    %cst_171 = arith.constant dense<0.000000e+00> : vector<32x128xf32>
    %321 = tpu.matmul %320, %315, %cst_171 {dimension_numbers = #tpu.dot_dimension_numbers<[1], [0], [0], [1], [0, 0, 1, 1], [], []>} : vector<32x16xf32>, vector<16x128xf32>, vector<32x128xf32> -> vector<32x128xf32>
    %c176_172 = arith.constant 176 : index
    %c0_173 = arith.constant 0 : index
    %322 = vector.load %arg3[%c176_172, %c0_173] : memref<1016x128xf32, #tpu.memory_space<vmem>>, vector<32x16xf32>
    %cst_174 = arith.constant dense<0.000000e+00> : vector<32x128xf32>
    %323 = tpu.matmul %322, %311, %cst_174 {dimension_numbers = #tpu.dot_dimension_numbers<[1], [0], [0], [1], [0, 0, 1, 1], [], []>} : vector<32x16xf32>, vector<16x128xf32>, vector<32x128xf32> -> vector<32x128xf32>
    %c208_175 = arith.constant 208 : index
    %c0_176 = arith.constant 0 : index
    %324 = vector.load %arg3[%c208_175, %c0_176] : memref<1016x128xf32, #tpu.memory_space<vmem>>, vector<32x16xf32>
    %cst_177 = arith.constant dense<0.000000e+00> : vector<32x128xf32>
    %325 = tpu.matmul %324, %319, %cst_177 {dimension_numbers = #tpu.dot_dimension_numbers<[1], [0], [0], [1], [0, 0, 1, 1], [], []>} : vector<32x16xf32>, vector<16x128xf32>, vector<32x128xf32> -> vector<32x128xf32>
    %326 = arith.addf %321, %323 : vector<32x128xf32>
    %327 = arith.addf %326, %325 : vector<32x128xf32>
    %c144_178 = arith.constant 144 : index
    %c0_179 = arith.constant 0 : index
    %328 = vector.load %arg4[%c144_178, %c0_179] : memref<1016x1xf32, #tpu.memory_space<vmem>>, vector<32x1xf32>
    %329 = vector.broadcast %328 : vector<32x1xf32> to vector<32x128xf32>
    %330 = arith.addf %327, %329 : vector<32x128xf32>
    %cst_180 = arith.constant 0.000000e+00 : f32
    %331 = vector.broadcast %cst_180 : f32 to vector<32x128xf32>
    %332 = arith.maximumf %330, %331 : vector<32x128xf32>
    %c240_181 = arith.constant 240 : index
    %c0_182 = arith.constant 0 : index
    %333 = vector.load %arg3[%c240_181, %c0_182] : memref<1016x128xf32, #tpu.memory_space<vmem>>, vector<32x32xf32>
    %c240_183 = arith.constant 240 : index
    %c0_184 = arith.constant 0 : index
    %334 = vector.load %arg4[%c240_183, %c0_184] : memref<1016x1xf32, #tpu.memory_space<vmem>>, vector<32x1xf32>
    %cst_185 = arith.constant dense<0.000000e+00> : vector<32x128xf32>
    %335 = tpu.matmul %333, %332, %cst_185 {dimension_numbers = #tpu.dot_dimension_numbers<[1], [0], [0], [1], [0, 0, 1, 1], [], []>} : vector<32x32xf32>, vector<32x128xf32>, vector<32x128xf32> -> vector<32x128xf32>
    %336 = vector.broadcast %334 : vector<32x1xf32> to vector<32x128xf32>
    %337 = arith.addf %335, %336 : vector<32x128xf32>
    %c272_186 = arith.constant 272 : index
    %c0_187 = arith.constant 0 : index
    %338 = vector.load %arg3[%c272_186, %c0_187] : memref<1016x128xf32, #tpu.memory_space<vmem>>, vector<32x16xf32>
    %c272_188 = arith.constant 272 : index
    %c0_189 = arith.constant 0 : index
    %339 = vector.load %arg4[%c272_188, %c0_189] : memref<1016x1xf32, #tpu.memory_space<vmem>>, vector<32x1xf32>
    %cst_190 = arith.constant dense<0.000000e+00> : vector<32x128xf32>
    %340 = tpu.matmul %338, %311, %cst_190 {dimension_numbers = #tpu.dot_dimension_numbers<[1], [0], [0], [1], [0, 0, 1, 1], [], []>} : vector<32x16xf32>, vector<16x128xf32>, vector<32x128xf32> -> vector<32x128xf32>
    %341 = vector.broadcast %339 : vector<32x1xf32> to vector<32x128xf32>
    %342 = arith.addf %340, %341 : vector<32x128xf32>
    %343 = arith.addf %337, %342 : vector<32x128xf32>
    %cst_191 = arith.constant 0.000000e+00 : f32
    %344 = vector.broadcast %cst_191 : f32 to vector<32x128xf32>
    %345 = arith.maximumf %343, %344 : vector<32x128xf32>
    %c1_i32_192 = arith.constant 1 : i32
    %346 = tpu.dynamic_rotate %345 by %c1_i32_192 dim 1 : vector<32x128xf32>, i32 -> vector<32x128xf32>
    %347 = vector.shape_cast %18 : vector<1x128xi1> to vector<1x128xi1>
    %348 = vector.broadcast %347 : vector<1x128xi1> to vector<32x128xi1>
    %349 = arith.select %348, %345, %346 : vector<32x128xi1>, vector<32x128xf32>
    %c127_i32_193 = arith.constant 127 : i32
    %350 = tpu.dynamic_rotate %345 by %c127_i32_193 dim 1 : vector<32x128xf32>, i32 -> vector<32x128xf32>
    %351 = vector.shape_cast %20 : vector<1x128xi1> to vector<1x128xi1>
    %352 = vector.broadcast %351 : vector<1x128xi1> to vector<32x128xi1>
    %353 = arith.select %352, %345, %350 : vector<32x128xi1>, vector<32x128xf32>
    %c304_194 = arith.constant 304 : index
    %c0_195 = arith.constant 0 : index
    %354 = vector.load %arg3[%c304_194, %c0_195] : memref<1016x128xf32, #tpu.memory_space<vmem>>, vector<64x32xf32>
    %cst_196 = arith.constant dense<0.000000e+00> : vector<64x128xf32>
    %355 = tpu.matmul %354, %349, %cst_196 {dimension_numbers = #tpu.dot_dimension_numbers<[1], [0], [0], [1], [0, 0, 1, 1], [], []>} : vector<64x32xf32>, vector<32x128xf32>, vector<64x128xf32> -> vector<64x128xf32>
    %c368_197 = arith.constant 368 : index
    %c0_198 = arith.constant 0 : index
    %356 = vector.load %arg3[%c368_197, %c0_198] : memref<1016x128xf32, #tpu.memory_space<vmem>>, vector<64x32xf32>
    %cst_199 = arith.constant dense<0.000000e+00> : vector<64x128xf32>
    %357 = tpu.matmul %356, %345, %cst_199 {dimension_numbers = #tpu.dot_dimension_numbers<[1], [0], [0], [1], [0, 0, 1, 1], [], []>} : vector<64x32xf32>, vector<32x128xf32>, vector<64x128xf32> -> vector<64x128xf32>
    %c432_200 = arith.constant 432 : index
    %c0_201 = arith.constant 0 : index
    %358 = vector.load %arg3[%c432_200, %c0_201] : memref<1016x128xf32, #tpu.memory_space<vmem>>, vector<64x32xf32>
    %cst_202 = arith.constant dense<0.000000e+00> : vector<64x128xf32>
    %359 = tpu.matmul %358, %353, %cst_202 {dimension_numbers = #tpu.dot_dimension_numbers<[1], [0], [0], [1], [0, 0, 1, 1], [], []>} : vector<64x32xf32>, vector<32x128xf32>, vector<64x128xf32> -> vector<64x128xf32>
    %360 = arith.addf %355, %357 : vector<64x128xf32>
    %361 = arith.addf %360, %359 : vector<64x128xf32>
    %c304_203 = arith.constant 304 : index
    %c0_204 = arith.constant 0 : index
    %362 = vector.load %arg4[%c304_203, %c0_204] : memref<1016x1xf32, #tpu.memory_space<vmem>>, vector<64x1xf32>
    %363 = vector.broadcast %362 : vector<64x1xf32> to vector<64x128xf32>
    %364 = arith.addf %361, %363 : vector<64x128xf32>
    %cst_205 = arith.constant 0.000000e+00 : f32
    %365 = vector.broadcast %cst_205 : f32 to vector<64x128xf32>
    %366 = arith.maximumf %364, %365 : vector<64x128xf32>
    %c496_206 = arith.constant 496 : index
    %c0_207 = arith.constant 0 : index
    %367 = vector.load %arg3[%c496_206, %c0_207] : memref<1016x128xf32, #tpu.memory_space<vmem>>, vector<64x64xf32>
    %c496_208 = arith.constant 496 : index
    %c0_209 = arith.constant 0 : index
    %368 = vector.load %arg4[%c496_208, %c0_209] : memref<1016x1xf32, #tpu.memory_space<vmem>>, vector<64x1xf32>
    %cst_210 = arith.constant dense<0.000000e+00> : vector<64x128xf32>
    %369 = tpu.matmul %367, %366, %cst_210 {dimension_numbers = #tpu.dot_dimension_numbers<[1], [0], [0], [1], [0, 0, 1, 1], [], []>} : vector<64x64xf32>, vector<64x128xf32>, vector<64x128xf32> -> vector<64x128xf32>
    %370 = vector.broadcast %368 : vector<64x1xf32> to vector<64x128xf32>
    %371 = arith.addf %369, %370 : vector<64x128xf32>
    %c560_211 = arith.constant 560 : index
    %c0_212 = arith.constant 0 : index
    %372 = vector.load %arg3[%c560_211, %c0_212] : memref<1016x128xf32, #tpu.memory_space<vmem>>, vector<64x32xf32>
    %c560_213 = arith.constant 560 : index
    %c0_214 = arith.constant 0 : index
    %373 = vector.load %arg4[%c560_213, %c0_214] : memref<1016x1xf32, #tpu.memory_space<vmem>>, vector<64x1xf32>
    %cst_215 = arith.constant dense<0.000000e+00> : vector<64x128xf32>
    %374 = tpu.matmul %372, %345, %cst_215 {dimension_numbers = #tpu.dot_dimension_numbers<[1], [0], [0], [1], [0, 0, 1, 1], [], []>} : vector<64x32xf32>, vector<32x128xf32>, vector<64x128xf32> -> vector<64x128xf32>
    %375 = vector.broadcast %373 : vector<64x1xf32> to vector<64x128xf32>
    %376 = arith.addf %374, %375 : vector<64x128xf32>
    %377 = arith.addf %371, %376 : vector<64x128xf32>
    %cst_216 = arith.constant 0.000000e+00 : f32
    %378 = vector.broadcast %cst_216 : f32 to vector<64x128xf32>
    %379 = arith.maximumf %377, %378 : vector<64x128xf32>
    %c1_i32_217 = arith.constant 1 : i32
    %380 = tpu.dynamic_rotate %379 by %c1_i32_217 dim 1 : vector<64x128xf32>, i32 -> vector<64x128xf32>
    %381 = vector.shape_cast %18 : vector<1x128xi1> to vector<1x128xi1>
    %382 = vector.broadcast %381 : vector<1x128xi1> to vector<64x128xi1>
    %383 = arith.select %382, %379, %380 : vector<64x128xi1>, vector<64x128xf32>
    %c127_i32_218 = arith.constant 127 : i32
    %384 = tpu.dynamic_rotate %379 by %c127_i32_218 dim 1 : vector<64x128xf32>, i32 -> vector<64x128xf32>
    %385 = vector.shape_cast %20 : vector<1x128xi1> to vector<1x128xi1>
    %386 = vector.broadcast %385 : vector<1x128xi1> to vector<64x128xi1>
    %387 = arith.select %386, %379, %384 : vector<64x128xi1>, vector<64x128xf32>
    %c624_219 = arith.constant 624 : index
    %c0_220 = arith.constant 0 : index
    %388 = vector.load %arg3[%c624_219, %c0_220] : memref<1016x128xf32, #tpu.memory_space<vmem>>, vector<64x64xf32>
    %cst_221 = arith.constant dense<0.000000e+00> : vector<64x128xf32>
    %389 = tpu.matmul %388, %383, %cst_221 {dimension_numbers = #tpu.dot_dimension_numbers<[1], [0], [0], [1], [0, 0, 1, 1], [], []>} : vector<64x64xf32>, vector<64x128xf32>, vector<64x128xf32> -> vector<64x128xf32>
    %c688_222 = arith.constant 688 : index
    %c0_223 = arith.constant 0 : index
    %390 = vector.load %arg3[%c688_222, %c0_223] : memref<1016x128xf32, #tpu.memory_space<vmem>>, vector<64x64xf32>
    %cst_224 = arith.constant dense<0.000000e+00> : vector<64x128xf32>
    %391 = tpu.matmul %390, %379, %cst_224 {dimension_numbers = #tpu.dot_dimension_numbers<[1], [0], [0], [1], [0, 0, 1, 1], [], []>} : vector<64x64xf32>, vector<64x128xf32>, vector<64x128xf32> -> vector<64x128xf32>
    %c752_225 = arith.constant 752 : index
    %c0_226 = arith.constant 0 : index
    %392 = vector.load %arg3[%c752_225, %c0_226] : memref<1016x128xf32, #tpu.memory_space<vmem>>, vector<64x64xf32>
    %cst_227 = arith.constant dense<0.000000e+00> : vector<64x128xf32>
    %393 = tpu.matmul %392, %387, %cst_227 {dimension_numbers = #tpu.dot_dimension_numbers<[1], [0], [0], [1], [0, 0, 1, 1], [], []>} : vector<64x64xf32>, vector<64x128xf32>, vector<64x128xf32> -> vector<64x128xf32>
    %394 = arith.addf %389, %391 : vector<64x128xf32>
    %395 = arith.addf %394, %393 : vector<64x128xf32>
    %c624_228 = arith.constant 624 : index
    %c0_229 = arith.constant 0 : index
    %396 = vector.load %arg4[%c624_228, %c0_229] : memref<1016x1xf32, #tpu.memory_space<vmem>>, vector<64x1xf32>
    %397 = vector.broadcast %396 : vector<64x1xf32> to vector<64x128xf32>
    %398 = arith.addf %395, %397 : vector<64x128xf32>
    %cst_230 = arith.constant 0.000000e+00 : f32
    %399 = vector.broadcast %cst_230 : f32 to vector<64x128xf32>
    %400 = arith.maximumf %398, %399 : vector<64x128xf32>
    %c816_231 = arith.constant 816 : index
    %c0_232 = arith.constant 0 : index
    %401 = vector.load %arg3[%c816_231, %c0_232] : memref<1016x128xf32, #tpu.memory_space<vmem>>, vector<64x64xf32>
    %c816_233 = arith.constant 816 : index
    %c0_234 = arith.constant 0 : index
    %402 = vector.load %arg4[%c816_233, %c0_234] : memref<1016x1xf32, #tpu.memory_space<vmem>>, vector<64x1xf32>
    %cst_235 = arith.constant dense<0.000000e+00> : vector<64x128xf32>
    %403 = tpu.matmul %401, %400, %cst_235 {dimension_numbers = #tpu.dot_dimension_numbers<[1], [0], [0], [1], [0, 0, 1, 1], [], []>} : vector<64x64xf32>, vector<64x128xf32>, vector<64x128xf32> -> vector<64x128xf32>
    %404 = vector.broadcast %402 : vector<64x1xf32> to vector<64x128xf32>
    %405 = arith.addf %403, %404 : vector<64x128xf32>
    %406 = arith.addf %405, %379 : vector<64x128xf32>
    %cst_236 = arith.constant 0.000000e+00 : f32
    %407 = vector.broadcast %cst_236 : f32 to vector<64x128xf32>
    %408 = arith.maximumf %406, %407 : vector<64x128xf32>
    %c880_237 = arith.constant 880 : index
    %c0_238 = arith.constant 0 : index
    %409 = vector.load %arg3[%c880_237, %c0_238] : memref<1016x128xf32, #tpu.memory_space<vmem>>, vector<64x64xf32>
    %c880_239 = arith.constant 880 : index
    %c0_240 = arith.constant 0 : index
    %410 = vector.load %arg4[%c880_239, %c0_240] : memref<1016x1xf32, #tpu.memory_space<vmem>>, vector<64x1xf32>
    %cst_241 = arith.constant dense<0.000000e+00> : vector<64x128xf32>
    %411 = tpu.matmul %409, %408, %cst_241 {dimension_numbers = #tpu.dot_dimension_numbers<[1], [0], [0], [1], [0, 0, 1, 1], [], []>} : vector<64x64xf32>, vector<64x128xf32>, vector<64x128xf32> -> vector<64x128xf32>
    %412 = vector.broadcast %410 : vector<64x1xf32> to vector<64x128xf32>
    %413 = arith.addf %411, %412 : vector<64x128xf32>
    %cst_242 = arith.constant 0.000000e+00 : f32
    %414 = vector.broadcast %cst_242 : f32 to vector<64x128xf32>
    %415 = arith.maximumf %413, %414 : vector<64x128xf32>
    %c944_243 = arith.constant 944 : index
    %c0_244 = arith.constant 0 : index
    %416 = vector.load %arg3[%c944_243, %c0_244] : memref<1016x128xf32, #tpu.memory_space<vmem>>, vector<64x64xf32>
    %c944_245 = arith.constant 944 : index
    %c0_246 = arith.constant 0 : index
    %417 = vector.load %arg4[%c944_245, %c0_246] : memref<1016x1xf32, #tpu.memory_space<vmem>>, vector<64x1xf32>
    %cst_247 = arith.constant dense<0.000000e+00> : vector<64x128xf32>
    %418 = tpu.matmul %416, %415, %cst_247 {dimension_numbers = #tpu.dot_dimension_numbers<[1], [0], [0], [1], [0, 0, 1, 1], [], []>} : vector<64x64xf32>, vector<64x128xf32>, vector<64x128xf32> -> vector<64x128xf32>
    %419 = vector.broadcast %417 : vector<64x1xf32> to vector<64x128xf32>
    %420 = arith.addf %418, %419 : vector<64x128xf32>
    %421 = arith.addf %420, %408 : vector<64x128xf32>
    %cst_248 = arith.constant 0.000000e+00 : f32
    %422 = vector.broadcast %cst_248 : f32 to vector<64x128xf32>
    %423 = arith.maximumf %421, %422 : vector<64x128xf32>
    %c1008_249 = arith.constant 1008 : index
    %c0_250 = arith.constant 0 : index
    %424 = vector.load %arg3[%c1008_249, %c0_250] : memref<1016x128xf32, #tpu.memory_space<vmem>>, vector<4x64xf32>
    %c1008_251 = arith.constant 1008 : index
    %c0_252 = arith.constant 0 : index
    %425 = vector.load %arg4[%c1008_251, %c0_252] : memref<1016x1xf32, #tpu.memory_space<vmem>>, vector<4x1xf32>
    %cst_253 = arith.constant dense<0.000000e+00> : vector<4x128xf32>
    %426 = tpu.matmul %424, %423, %cst_253 {dimension_numbers = #tpu.dot_dimension_numbers<[1], [0], [0], [1], [0, 0, 1, 1], [], []>} : vector<4x64xf32>, vector<64x128xf32>, vector<4x128xf32> -> vector<4x128xf32>
    %427 = vector.broadcast %425 : vector<4x1xf32> to vector<4x128xf32>
    %428 = arith.addf %426, %427 : vector<4x128xf32>
    %429 = arith.mulf %428, %428 : vector<4x128xf32>
    %cst_254 = arith.constant dense<0.000000e+00> : vector<128xf32>
    %430 = vector.multi_reduction <add>, %429, %cst_254 [0] : vector<4x128xf32> to vector<128xf32>
    %431 = vector.shape_cast %430 : vector<128xf32> to vector<1x128xf32>
    %432 = tpu.reciprocal %431 {approx = true} : vector<1x128xf32> -> vector<1x128xf32>
    %433 = math.absf %240 : vector<4x128xf32>
    %434 = arith.subf %240, %433 : vector<4x128xf32>
    %435 = arith.mulf %428, %434 : vector<4x128xf32>
    %436 = arith.mulf %435, %428 : vector<4x128xf32>
    %cst_255 = arith.constant dense<0.000000e+00> : vector<128xf32>
    %437 = vector.multi_reduction <add>, %436, %cst_255 [0] : vector<4x128xf32> to vector<128xf32>
    %438 = vector.shape_cast %437 : vector<128xf32> to vector<1x128xf32>
    %439 = arith.mulf %438, %432 : vector<1x128xf32>
    %440 = math.absf %239 : vector<4x128xf32>
    %441 = arith.addf %239, %440 : vector<4x128xf32>
    %442 = arith.mulf %428, %441 : vector<4x128xf32>
    %443 = arith.mulf %442, %428 : vector<4x128xf32>
    %cst_256 = arith.constant dense<0.000000e+00> : vector<128xf32>
    %444 = vector.multi_reduction <add>, %443, %cst_256 [0] : vector<4x128xf32> to vector<128xf32>
    %445 = vector.shape_cast %444 : vector<128xf32> to vector<1x128xf32>
    %446 = arith.mulf %445, %432 : vector<1x128xf32>
    %447 = arith.subf %48, %42 : vector<1x128xf32>
    %448 = arith.mulf %439, %447 : vector<1x128xf32>
    %449 = arith.subf %42, %45 : vector<1x128xf32>
    %450 = arith.mulf %446, %449 : vector<1x128xf32>
    %451 = arith.addf %448, %450 : vector<1x128xf32>
    %cst_257 = arith.constant 1.100000e+00 : f32
    %452 = vector.broadcast %cst_257 : f32 to vector<1x128xf32>
    %453 = arith.mulf %452, %451 : vector<1x128xf32>
    %454 = arith.subf %42, %453 : vector<1x128xf32>
    %c84_i32 = arith.constant 84 : i32
    %455 = tpu.dynamic_rotate %454 by %c84_i32 dim 1 : vector<1x128xf32>, i32 -> vector<1x128xf32>
    %c44_i32 = arith.constant 44 : i32
    %456 = tpu.dynamic_rotate %454 by %c44_i32 dim 1 : vector<1x128xf32>, i32 -> vector<1x128xf32>
    %c10_i32 = arith.constant 10 : i32
    %457 = vector.broadcast %c10_i32 : i32 to vector<1x128xi32>
    %458 = arith.cmpi slt, %16, %457 : vector<1x128xi32>
    %c54_i32 = arith.constant 54 : i32
    %459 = vector.broadcast %c54_i32 : i32 to vector<1x128xi32>
    %460 = arith.cmpi sge, %16, %459 : vector<1x128xi32>
    %461 = arith.select %460, %456, %454 : vector<1x128xi1>, vector<1x128xf32>
    %462 = arith.select %458, %455, %461 : vector<1x128xi1>, vector<1x128xf32>
    %c65_i32_258 = arith.constant 65 : i32
    %463 = tpu.dynamic_rotate %462 by %c65_i32_258 dim 1 : vector<1x128xf32>, i32 -> vector<1x128xf32>
    %c1_i32_259 = arith.constant 1 : i32
    %464 = tpu.dynamic_rotate %462 by %c1_i32_259 dim 1 : vector<1x128xf32>, i32 -> vector<1x128xf32>
    %465 = arith.select %18, %463, %464 : vector<1x128xi1>, vector<1x128xf32>
    %c63_i32_260 = arith.constant 63 : i32
    %466 = tpu.dynamic_rotate %462 by %c63_i32_260 dim 1 : vector<1x128xf32>, i32 -> vector<1x128xf32>
    %c127_i32_261 = arith.constant 127 : i32
    %467 = tpu.dynamic_rotate %462 by %c127_i32_261 dim 1 : vector<1x128xf32>, i32 -> vector<1x128xf32>
    %468 = arith.select %20, %466, %467 : vector<1x128xi1>, vector<1x128xf32>
    %469 = tpu.concatenate %465, %462 in 1 : vector<1x128xf32>, vector<1x128xf32> -> vector<1x256xf32>
    %470 = tpu.concatenate %462, %468 in 1 : vector<1x128xf32>, vector<1x128xf32> -> vector<1x256xf32>
    %471 = tpu.iota {dimensions = array<i32: 0>} : vector<2x256xi32>
    %c0_i32_262 = arith.constant 0 : i32
    %472 = vector.broadcast %c0_i32_262 : i32 to vector<2x256xi32>
    %473 = arith.cmpi eq, %471, %472 : vector<2x256xi32>
    %474 = vector.shape_cast %469 : vector<1x256xf32> to vector<1x256xf32>
    %475 = vector.broadcast %474 : vector<1x256xf32> to vector<2x256xf32>
    %476 = vector.shape_cast %470 : vector<1x256xf32> to vector<1x256xf32>
    %477 = vector.broadcast %476 : vector<1x256xf32> to vector<2x256xf32>
    %478 = arith.select %473, %475, %477 : vector<2x256xi1>, vector<2x256xf32>
    %c1_i32_263 = arith.constant 1 : i32
    %479 = tpu.dynamic_rotate %478 by %c1_i32_263 dim 1 : vector<2x256xf32>, i32 -> vector<2x256xf32>
    %480 = vector.shape_cast %39 : vector<1x256xi1> to vector<1x256xi1>
    %481 = vector.broadcast %480 : vector<1x256xi1> to vector<2x256xi1>
    %482 = arith.select %481, %478, %479 : vector<2x256xi1>, vector<2x256xf32>
    %c255_i32_264 = arith.constant 255 : i32
    %483 = tpu.dynamic_rotate %478 by %c255_i32_264 dim 1 : vector<2x256xf32>, i32 -> vector<2x256xf32>
    %484 = vector.shape_cast %41 : vector<1x256xi1> to vector<1x256xi1>
    %485 = vector.broadcast %484 : vector<1x256xi1> to vector<2x256xi1>
    %486 = arith.select %485, %478, %483 : vector<2x256xi1>, vector<2x256xf32>
    %c0_265 = arith.constant 0 : index
    %c0_266 = arith.constant 0 : index
    %487 = vector.load %arg1[%c0_265, %c0_266] : memref<1016x128xf32, #tpu.memory_space<vmem>>, vector<16x2xf32>
    %cst_267 = arith.constant dense<0.000000e+00> : vector<16x256xf32>
    %488 = tpu.matmul %487, %482, %cst_267 {dimension_numbers = #tpu.dot_dimension_numbers<[1], [0], [0], [1], [0, 0, 1, 1], [], []>} : vector<16x2xf32>, vector<2x256xf32>, vector<16x256xf32> -> vector<16x256xf32>
    %c16_268 = arith.constant 16 : index
    %c0_269 = arith.constant 0 : index
    %489 = vector.load %arg1[%c16_268, %c0_269] : memref<1016x128xf32, #tpu.memory_space<vmem>>, vector<16x2xf32>
    %cst_270 = arith.constant dense<0.000000e+00> : vector<16x256xf32>
    %490 = tpu.matmul %489, %478, %cst_270 {dimension_numbers = #tpu.dot_dimension_numbers<[1], [0], [0], [1], [0, 0, 1, 1], [], []>} : vector<16x2xf32>, vector<2x256xf32>, vector<16x256xf32> -> vector<16x256xf32>
    %c32_271 = arith.constant 32 : index
    %c0_272 = arith.constant 0 : index
    %491 = vector.load %arg1[%c32_271, %c0_272] : memref<1016x128xf32, #tpu.memory_space<vmem>>, vector<16x2xf32>
    %cst_273 = arith.constant dense<0.000000e+00> : vector<16x256xf32>
    %492 = tpu.matmul %491, %486, %cst_273 {dimension_numbers = #tpu.dot_dimension_numbers<[1], [0], [0], [1], [0, 0, 1, 1], [], []>} : vector<16x2xf32>, vector<2x256xf32>, vector<16x256xf32> -> vector<16x256xf32>
    %493 = arith.addf %488, %490 : vector<16x256xf32>
    %494 = arith.addf %493, %492 : vector<16x256xf32>
    %c0_274 = arith.constant 0 : index
    %c0_275 = arith.constant 0 : index
    %495 = vector.load %arg2[%c0_274, %c0_275] : memref<1016x1xf32, #tpu.memory_space<vmem>>, vector<16x1xf32>
    %496 = vector.broadcast %495 : vector<16x1xf32> to vector<16x256xf32>
    %497 = arith.addf %494, %496 : vector<16x256xf32>
    %cst_276 = arith.constant 0.000000e+00 : f32
    %498 = vector.broadcast %cst_276 : f32 to vector<16x256xf32>
    %499 = arith.maximumf %497, %498 : vector<16x256xf32>
    %c48_277 = arith.constant 48 : index
    %c0_278 = arith.constant 0 : index
    %500 = vector.load %arg1[%c48_277, %c0_278] : memref<1016x128xf32, #tpu.memory_space<vmem>>, vector<16x16xf32>
    %c48_279 = arith.constant 48 : index
    %c0_280 = arith.constant 0 : index
    %501 = vector.load %arg2[%c48_279, %c0_280] : memref<1016x1xf32, #tpu.memory_space<vmem>>, vector<16x1xf32>
    %cst_281 = arith.constant dense<0.000000e+00> : vector<16x256xf32>
    %502 = tpu.matmul %500, %499, %cst_281 {dimension_numbers = #tpu.dot_dimension_numbers<[1], [0], [0], [1], [0, 0, 1, 1], [], []>} : vector<16x16xf32>, vector<16x256xf32>, vector<16x256xf32> -> vector<16x256xf32>
    %503 = vector.broadcast %501 : vector<16x1xf32> to vector<16x256xf32>
    %504 = arith.addf %502, %503 : vector<16x256xf32>
    %c64_282 = arith.constant 64 : index
    %c0_283 = arith.constant 0 : index
    %505 = vector.load %arg1[%c64_282, %c0_283] : memref<1016x128xf32, #tpu.memory_space<vmem>>, vector<16x2xf32>
    %c64_284 = arith.constant 64 : index
    %c0_285 = arith.constant 0 : index
    %506 = vector.load %arg2[%c64_284, %c0_285] : memref<1016x1xf32, #tpu.memory_space<vmem>>, vector<16x1xf32>
    %cst_286 = arith.constant dense<0.000000e+00> : vector<16x256xf32>
    %507 = tpu.matmul %505, %478, %cst_286 {dimension_numbers = #tpu.dot_dimension_numbers<[1], [0], [0], [1], [0, 0, 1, 1], [], []>} : vector<16x2xf32>, vector<2x256xf32>, vector<16x256xf32> -> vector<16x256xf32>
    %508 = vector.broadcast %506 : vector<16x1xf32> to vector<16x256xf32>
    %509 = arith.addf %507, %508 : vector<16x256xf32>
    %510 = arith.addf %504, %509 : vector<16x256xf32>
    %cst_287 = arith.constant 0.000000e+00 : f32
    %511 = vector.broadcast %cst_287 : f32 to vector<16x256xf32>
    %512 = arith.maximumf %510, %511 : vector<16x256xf32>
    %c1_i32_288 = arith.constant 1 : i32
    %513 = tpu.dynamic_rotate %512 by %c1_i32_288 dim 1 : vector<16x256xf32>, i32 -> vector<16x256xf32>
    %514 = vector.shape_cast %39 : vector<1x256xi1> to vector<1x256xi1>
    %515 = vector.broadcast %514 : vector<1x256xi1> to vector<16x256xi1>
    %516 = arith.select %515, %512, %513 : vector<16x256xi1>, vector<16x256xf32>
    %c255_i32_289 = arith.constant 255 : i32
    %517 = tpu.dynamic_rotate %512 by %c255_i32_289 dim 1 : vector<16x256xf32>, i32 -> vector<16x256xf32>
    %518 = vector.shape_cast %41 : vector<1x256xi1> to vector<1x256xi1>
    %519 = vector.broadcast %518 : vector<1x256xi1> to vector<16x256xi1>
    %520 = arith.select %519, %512, %517 : vector<16x256xi1>, vector<16x256xf32>
    %c80_290 = arith.constant 80 : index
    %c0_291 = arith.constant 0 : index
    %521 = vector.load %arg1[%c80_290, %c0_291] : memref<1016x128xf32, #tpu.memory_space<vmem>>, vector<16x16xf32>
    %cst_292 = arith.constant dense<0.000000e+00> : vector<16x256xf32>
    %522 = tpu.matmul %521, %516, %cst_292 {dimension_numbers = #tpu.dot_dimension_numbers<[1], [0], [0], [1], [0, 0, 1, 1], [], []>} : vector<16x16xf32>, vector<16x256xf32>, vector<16x256xf32> -> vector<16x256xf32>
    %c96_293 = arith.constant 96 : index
    %c0_294 = arith.constant 0 : index
    %523 = vector.load %arg1[%c96_293, %c0_294] : memref<1016x128xf32, #tpu.memory_space<vmem>>, vector<16x16xf32>
    %cst_295 = arith.constant dense<0.000000e+00> : vector<16x256xf32>
    %524 = tpu.matmul %523, %512, %cst_295 {dimension_numbers = #tpu.dot_dimension_numbers<[1], [0], [0], [1], [0, 0, 1, 1], [], []>} : vector<16x16xf32>, vector<16x256xf32>, vector<16x256xf32> -> vector<16x256xf32>
    %c112_296 = arith.constant 112 : index
    %c0_297 = arith.constant 0 : index
    %525 = vector.load %arg1[%c112_296, %c0_297] : memref<1016x128xf32, #tpu.memory_space<vmem>>, vector<16x16xf32>
    %cst_298 = arith.constant dense<0.000000e+00> : vector<16x256xf32>
    %526 = tpu.matmul %525, %520, %cst_298 {dimension_numbers = #tpu.dot_dimension_numbers<[1], [0], [0], [1], [0, 0, 1, 1], [], []>} : vector<16x16xf32>, vector<16x256xf32>, vector<16x256xf32> -> vector<16x256xf32>
    %527 = arith.addf %522, %524 : vector<16x256xf32>
    %528 = arith.addf %527, %526 : vector<16x256xf32>
    %c80_299 = arith.constant 80 : index
    %c0_300 = arith.constant 0 : index
    %529 = vector.load %arg2[%c80_299, %c0_300] : memref<1016x1xf32, #tpu.memory_space<vmem>>, vector<16x1xf32>
    %530 = vector.broadcast %529 : vector<16x1xf32> to vector<16x256xf32>
    %531 = arith.addf %528, %530 : vector<16x256xf32>
    %cst_301 = arith.constant 0.000000e+00 : f32
    %532 = vector.broadcast %cst_301 : f32 to vector<16x256xf32>
    %533 = arith.maximumf %531, %532 : vector<16x256xf32>
    %c128_302 = arith.constant 128 : index
    %c0_303 = arith.constant 0 : index
    %534 = vector.load %arg1[%c128_302, %c0_303] : memref<1016x128xf32, #tpu.memory_space<vmem>>, vector<16x16xf32>
    %c128_304 = arith.constant 128 : index
    %c0_305 = arith.constant 0 : index
    %535 = vector.load %arg2[%c128_304, %c0_305] : memref<1016x1xf32, #tpu.memory_space<vmem>>, vector<16x1xf32>
    %cst_306 = arith.constant dense<0.000000e+00> : vector<16x256xf32>
    %536 = tpu.matmul %534, %533, %cst_306 {dimension_numbers = #tpu.dot_dimension_numbers<[1], [0], [0], [1], [0, 0, 1, 1], [], []>} : vector<16x16xf32>, vector<16x256xf32>, vector<16x256xf32> -> vector<16x256xf32>
    %537 = vector.broadcast %535 : vector<16x1xf32> to vector<16x256xf32>
    %538 = arith.addf %536, %537 : vector<16x256xf32>
    %539 = arith.addf %538, %512 : vector<16x256xf32>
    %cst_307 = arith.constant 0.000000e+00 : f32
    %540 = vector.broadcast %cst_307 : f32 to vector<16x256xf32>
    %541 = arith.maximumf %539, %540 : vector<16x256xf32>
    %c1_i32_308 = arith.constant 1 : i32
    %542 = tpu.dynamic_rotate %541 by %c1_i32_308 dim 1 : vector<16x256xf32>, i32 -> vector<16x256xf32>
    %543 = vector.shape_cast %39 : vector<1x256xi1> to vector<1x256xi1>
    %544 = vector.broadcast %543 : vector<1x256xi1> to vector<16x256xi1>
    %545 = arith.select %544, %541, %542 : vector<16x256xi1>, vector<16x256xf32>
    %c255_i32_309 = arith.constant 255 : i32
    %546 = tpu.dynamic_rotate %541 by %c255_i32_309 dim 1 : vector<16x256xf32>, i32 -> vector<16x256xf32>
    %547 = vector.shape_cast %41 : vector<1x256xi1> to vector<1x256xi1>
    %548 = vector.broadcast %547 : vector<1x256xi1> to vector<16x256xi1>
    %549 = arith.select %548, %541, %546 : vector<16x256xi1>, vector<16x256xf32>
    %c144_310 = arith.constant 144 : index
    %c0_311 = arith.constant 0 : index
    %550 = vector.load %arg1[%c144_310, %c0_311] : memref<1016x128xf32, #tpu.memory_space<vmem>>, vector<32x16xf32>
    %cst_312 = arith.constant dense<0.000000e+00> : vector<32x256xf32>
    %551 = tpu.matmul %550, %545, %cst_312 {dimension_numbers = #tpu.dot_dimension_numbers<[1], [0], [0], [1], [0, 0, 1, 1], [], []>} : vector<32x16xf32>, vector<16x256xf32>, vector<32x256xf32> -> vector<32x256xf32>
    %c176_313 = arith.constant 176 : index
    %c0_314 = arith.constant 0 : index
    %552 = vector.load %arg1[%c176_313, %c0_314] : memref<1016x128xf32, #tpu.memory_space<vmem>>, vector<32x16xf32>
    %cst_315 = arith.constant dense<0.000000e+00> : vector<32x256xf32>
    %553 = tpu.matmul %552, %541, %cst_315 {dimension_numbers = #tpu.dot_dimension_numbers<[1], [0], [0], [1], [0, 0, 1, 1], [], []>} : vector<32x16xf32>, vector<16x256xf32>, vector<32x256xf32> -> vector<32x256xf32>
    %c208_316 = arith.constant 208 : index
    %c0_317 = arith.constant 0 : index
    %554 = vector.load %arg1[%c208_316, %c0_317] : memref<1016x128xf32, #tpu.memory_space<vmem>>, vector<32x16xf32>
    %cst_318 = arith.constant dense<0.000000e+00> : vector<32x256xf32>
    %555 = tpu.matmul %554, %549, %cst_318 {dimension_numbers = #tpu.dot_dimension_numbers<[1], [0], [0], [1], [0, 0, 1, 1], [], []>} : vector<32x16xf32>, vector<16x256xf32>, vector<32x256xf32> -> vector<32x256xf32>
    %556 = arith.addf %551, %553 : vector<32x256xf32>
    %557 = arith.addf %556, %555 : vector<32x256xf32>
    %c144_319 = arith.constant 144 : index
    %c0_320 = arith.constant 0 : index
    %558 = vector.load %arg2[%c144_319, %c0_320] : memref<1016x1xf32, #tpu.memory_space<vmem>>, vector<32x1xf32>
    %559 = vector.broadcast %558 : vector<32x1xf32> to vector<32x256xf32>
    %560 = arith.addf %557, %559 : vector<32x256xf32>
    %cst_321 = arith.constant 0.000000e+00 : f32
    %561 = vector.broadcast %cst_321 : f32 to vector<32x256xf32>
    %562 = arith.maximumf %560, %561 : vector<32x256xf32>
    %c240_322 = arith.constant 240 : index
    %c0_323 = arith.constant 0 : index
    %563 = vector.load %arg1[%c240_322, %c0_323] : memref<1016x128xf32, #tpu.memory_space<vmem>>, vector<32x32xf32>
    %c240_324 = arith.constant 240 : index
    %c0_325 = arith.constant 0 : index
    %564 = vector.load %arg2[%c240_324, %c0_325] : memref<1016x1xf32, #tpu.memory_space<vmem>>, vector<32x1xf32>
    %cst_326 = arith.constant dense<0.000000e+00> : vector<32x256xf32>
    %565 = tpu.matmul %563, %562, %cst_326 {dimension_numbers = #tpu.dot_dimension_numbers<[1], [0], [0], [1], [0, 0, 1, 1], [], []>} : vector<32x32xf32>, vector<32x256xf32>, vector<32x256xf32> -> vector<32x256xf32>
    %566 = vector.broadcast %564 : vector<32x1xf32> to vector<32x256xf32>
    %567 = arith.addf %565, %566 : vector<32x256xf32>
    %c272_327 = arith.constant 272 : index
    %c0_328 = arith.constant 0 : index
    %568 = vector.load %arg1[%c272_327, %c0_328] : memref<1016x128xf32, #tpu.memory_space<vmem>>, vector<32x16xf32>
    %c272_329 = arith.constant 272 : index
    %c0_330 = arith.constant 0 : index
    %569 = vector.load %arg2[%c272_329, %c0_330] : memref<1016x1xf32, #tpu.memory_space<vmem>>, vector<32x1xf32>
    %cst_331 = arith.constant dense<0.000000e+00> : vector<32x256xf32>
    %570 = tpu.matmul %568, %541, %cst_331 {dimension_numbers = #tpu.dot_dimension_numbers<[1], [0], [0], [1], [0, 0, 1, 1], [], []>} : vector<32x16xf32>, vector<16x256xf32>, vector<32x256xf32> -> vector<32x256xf32>
    %571 = vector.broadcast %569 : vector<32x1xf32> to vector<32x256xf32>
    %572 = arith.addf %570, %571 : vector<32x256xf32>
    %573 = arith.addf %567, %572 : vector<32x256xf32>
    %cst_332 = arith.constant 0.000000e+00 : f32
    %574 = vector.broadcast %cst_332 : f32 to vector<32x256xf32>
    %575 = arith.maximumf %573, %574 : vector<32x256xf32>
    %c1_i32_333 = arith.constant 1 : i32
    %576 = tpu.dynamic_rotate %575 by %c1_i32_333 dim 1 : vector<32x256xf32>, i32 -> vector<32x256xf32>
    %577 = vector.shape_cast %39 : vector<1x256xi1> to vector<1x256xi1>
    %578 = vector.broadcast %577 : vector<1x256xi1> to vector<32x256xi1>
    %579 = arith.select %578, %575, %576 : vector<32x256xi1>, vector<32x256xf32>
    %c255_i32_334 = arith.constant 255 : i32
    %580 = tpu.dynamic_rotate %575 by %c255_i32_334 dim 1 : vector<32x256xf32>, i32 -> vector<32x256xf32>
    %581 = vector.shape_cast %41 : vector<1x256xi1> to vector<1x256xi1>
    %582 = vector.broadcast %581 : vector<1x256xi1> to vector<32x256xi1>
    %583 = arith.select %582, %575, %580 : vector<32x256xi1>, vector<32x256xf32>
    %c304_335 = arith.constant 304 : index
    %c0_336 = arith.constant 0 : index
    %584 = vector.load %arg1[%c304_335, %c0_336] : memref<1016x128xf32, #tpu.memory_space<vmem>>, vector<64x32xf32>
    %cst_337 = arith.constant dense<0.000000e+00> : vector<64x256xf32>
    %585 = tpu.matmul %584, %579, %cst_337 {dimension_numbers = #tpu.dot_dimension_numbers<[1], [0], [0], [1], [0, 0, 1, 1], [], []>} : vector<64x32xf32>, vector<32x256xf32>, vector<64x256xf32> -> vector<64x256xf32>
    %c368_338 = arith.constant 368 : index
    %c0_339 = arith.constant 0 : index
    %586 = vector.load %arg1[%c368_338, %c0_339] : memref<1016x128xf32, #tpu.memory_space<vmem>>, vector<64x32xf32>
    %cst_340 = arith.constant dense<0.000000e+00> : vector<64x256xf32>
    %587 = tpu.matmul %586, %575, %cst_340 {dimension_numbers = #tpu.dot_dimension_numbers<[1], [0], [0], [1], [0, 0, 1, 1], [], []>} : vector<64x32xf32>, vector<32x256xf32>, vector<64x256xf32> -> vector<64x256xf32>
    %c432_341 = arith.constant 432 : index
    %c0_342 = arith.constant 0 : index
    %588 = vector.load %arg1[%c432_341, %c0_342] : memref<1016x128xf32, #tpu.memory_space<vmem>>, vector<64x32xf32>
    %cst_343 = arith.constant dense<0.000000e+00> : vector<64x256xf32>
    %589 = tpu.matmul %588, %583, %cst_343 {dimension_numbers = #tpu.dot_dimension_numbers<[1], [0], [0], [1], [0, 0, 1, 1], [], []>} : vector<64x32xf32>, vector<32x256xf32>, vector<64x256xf32> -> vector<64x256xf32>
    %590 = arith.addf %585, %587 : vector<64x256xf32>
    %591 = arith.addf %590, %589 : vector<64x256xf32>
    %c304_344 = arith.constant 304 : index
    %c0_345 = arith.constant 0 : index
    %592 = vector.load %arg2[%c304_344, %c0_345] : memref<1016x1xf32, #tpu.memory_space<vmem>>, vector<64x1xf32>
    %593 = vector.broadcast %592 : vector<64x1xf32> to vector<64x256xf32>
    %594 = arith.addf %591, %593 : vector<64x256xf32>
    %cst_346 = arith.constant 0.000000e+00 : f32
    %595 = vector.broadcast %cst_346 : f32 to vector<64x256xf32>
    %596 = arith.maximumf %594, %595 : vector<64x256xf32>
    %c496_347 = arith.constant 496 : index
    %c0_348 = arith.constant 0 : index
    %597 = vector.load %arg1[%c496_347, %c0_348] : memref<1016x128xf32, #tpu.memory_space<vmem>>, vector<64x64xf32>
    %c496_349 = arith.constant 496 : index
    %c0_350 = arith.constant 0 : index
    %598 = vector.load %arg2[%c496_349, %c0_350] : memref<1016x1xf32, #tpu.memory_space<vmem>>, vector<64x1xf32>
    %cst_351 = arith.constant dense<0.000000e+00> : vector<64x256xf32>
    %599 = tpu.matmul %597, %596, %cst_351 {dimension_numbers = #tpu.dot_dimension_numbers<[1], [0], [0], [1], [0, 0, 1, 1], [], []>} : vector<64x64xf32>, vector<64x256xf32>, vector<64x256xf32> -> vector<64x256xf32>
    %600 = vector.broadcast %598 : vector<64x1xf32> to vector<64x256xf32>
    %601 = arith.addf %599, %600 : vector<64x256xf32>
    %c560_352 = arith.constant 560 : index
    %c0_353 = arith.constant 0 : index
    %602 = vector.load %arg1[%c560_352, %c0_353] : memref<1016x128xf32, #tpu.memory_space<vmem>>, vector<64x32xf32>
    %c560_354 = arith.constant 560 : index
    %c0_355 = arith.constant 0 : index
    %603 = vector.load %arg2[%c560_354, %c0_355] : memref<1016x1xf32, #tpu.memory_space<vmem>>, vector<64x1xf32>
    %cst_356 = arith.constant dense<0.000000e+00> : vector<64x256xf32>
    %604 = tpu.matmul %602, %575, %cst_356 {dimension_numbers = #tpu.dot_dimension_numbers<[1], [0], [0], [1], [0, 0, 1, 1], [], []>} : vector<64x32xf32>, vector<32x256xf32>, vector<64x256xf32> -> vector<64x256xf32>
    %605 = vector.broadcast %603 : vector<64x1xf32> to vector<64x256xf32>
    %606 = arith.addf %604, %605 : vector<64x256xf32>
    %607 = arith.addf %601, %606 : vector<64x256xf32>
    %cst_357 = arith.constant 0.000000e+00 : f32
    %608 = vector.broadcast %cst_357 : f32 to vector<64x256xf32>
    %609 = arith.maximumf %607, %608 : vector<64x256xf32>
    %c1_i32_358 = arith.constant 1 : i32
    %610 = tpu.dynamic_rotate %609 by %c1_i32_358 dim 1 : vector<64x256xf32>, i32 -> vector<64x256xf32>
    %611 = vector.shape_cast %39 : vector<1x256xi1> to vector<1x256xi1>
    %612 = vector.broadcast %611 : vector<1x256xi1> to vector<64x256xi1>
    %613 = arith.select %612, %609, %610 : vector<64x256xi1>, vector<64x256xf32>
    %c255_i32_359 = arith.constant 255 : i32
    %614 = tpu.dynamic_rotate %609 by %c255_i32_359 dim 1 : vector<64x256xf32>, i32 -> vector<64x256xf32>
    %615 = vector.shape_cast %41 : vector<1x256xi1> to vector<1x256xi1>
    %616 = vector.broadcast %615 : vector<1x256xi1> to vector<64x256xi1>
    %617 = arith.select %616, %609, %614 : vector<64x256xi1>, vector<64x256xf32>
    %c624_360 = arith.constant 624 : index
    %c0_361 = arith.constant 0 : index
    %618 = vector.load %arg1[%c624_360, %c0_361] : memref<1016x128xf32, #tpu.memory_space<vmem>>, vector<64x64xf32>
    %cst_362 = arith.constant dense<0.000000e+00> : vector<64x256xf32>
    %619 = tpu.matmul %618, %613, %cst_362 {dimension_numbers = #tpu.dot_dimension_numbers<[1], [0], [0], [1], [0, 0, 1, 1], [], []>} : vector<64x64xf32>, vector<64x256xf32>, vector<64x256xf32> -> vector<64x256xf32>
    %c688_363 = arith.constant 688 : index
    %c0_364 = arith.constant 0 : index
    %620 = vector.load %arg1[%c688_363, %c0_364] : memref<1016x128xf32, #tpu.memory_space<vmem>>, vector<64x64xf32>
    %cst_365 = arith.constant dense<0.000000e+00> : vector<64x256xf32>
    %621 = tpu.matmul %620, %609, %cst_365 {dimension_numbers = #tpu.dot_dimension_numbers<[1], [0], [0], [1], [0, 0, 1, 1], [], []>} : vector<64x64xf32>, vector<64x256xf32>, vector<64x256xf32> -> vector<64x256xf32>
    %c752_366 = arith.constant 752 : index
    %c0_367 = arith.constant 0 : index
    %622 = vector.load %arg1[%c752_366, %c0_367] : memref<1016x128xf32, #tpu.memory_space<vmem>>, vector<64x64xf32>
    %cst_368 = arith.constant dense<0.000000e+00> : vector<64x256xf32>
    %623 = tpu.matmul %622, %617, %cst_368 {dimension_numbers = #tpu.dot_dimension_numbers<[1], [0], [0], [1], [0, 0, 1, 1], [], []>} : vector<64x64xf32>, vector<64x256xf32>, vector<64x256xf32> -> vector<64x256xf32>
    %624 = arith.addf %619, %621 : vector<64x256xf32>
    %625 = arith.addf %624, %623 : vector<64x256xf32>
    %c624_369 = arith.constant 624 : index
    %c0_370 = arith.constant 0 : index
    %626 = vector.load %arg2[%c624_369, %c0_370] : memref<1016x1xf32, #tpu.memory_space<vmem>>, vector<64x1xf32>
    %627 = vector.broadcast %626 : vector<64x1xf32> to vector<64x256xf32>
    %628 = arith.addf %625, %627 : vector<64x256xf32>
    %cst_371 = arith.constant 0.000000e+00 : f32
    %629 = vector.broadcast %cst_371 : f32 to vector<64x256xf32>
    %630 = arith.maximumf %628, %629 : vector<64x256xf32>
    %c816_372 = arith.constant 816 : index
    %c0_373 = arith.constant 0 : index
    %631 = vector.load %arg1[%c816_372, %c0_373] : memref<1016x128xf32, #tpu.memory_space<vmem>>, vector<64x64xf32>
    %c816_374 = arith.constant 816 : index
    %c0_375 = arith.constant 0 : index
    %632 = vector.load %arg2[%c816_374, %c0_375] : memref<1016x1xf32, #tpu.memory_space<vmem>>, vector<64x1xf32>
    %cst_376 = arith.constant dense<0.000000e+00> : vector<64x256xf32>
    %633 = tpu.matmul %631, %630, %cst_376 {dimension_numbers = #tpu.dot_dimension_numbers<[1], [0], [0], [1], [0, 0, 1, 1], [], []>} : vector<64x64xf32>, vector<64x256xf32>, vector<64x256xf32> -> vector<64x256xf32>
    %634 = vector.broadcast %632 : vector<64x1xf32> to vector<64x256xf32>
    %635 = arith.addf %633, %634 : vector<64x256xf32>
    %636 = arith.addf %635, %609 : vector<64x256xf32>
    %cst_377 = arith.constant 0.000000e+00 : f32
    %637 = vector.broadcast %cst_377 : f32 to vector<64x256xf32>
    %638 = arith.maximumf %636, %637 : vector<64x256xf32>
    %c880_378 = arith.constant 880 : index
    %c0_379 = arith.constant 0 : index
    %639 = vector.load %arg1[%c880_378, %c0_379] : memref<1016x128xf32, #tpu.memory_space<vmem>>, vector<64x64xf32>
    %c880_380 = arith.constant 880 : index
    %c0_381 = arith.constant 0 : index
    %640 = vector.load %arg2[%c880_380, %c0_381] : memref<1016x1xf32, #tpu.memory_space<vmem>>, vector<64x1xf32>
    %cst_382 = arith.constant dense<0.000000e+00> : vector<64x256xf32>
    %641 = tpu.matmul %639, %638, %cst_382 {dimension_numbers = #tpu.dot_dimension_numbers<[1], [0], [0], [1], [0, 0, 1, 1], [], []>} : vector<64x64xf32>, vector<64x256xf32>, vector<64x256xf32> -> vector<64x256xf32>
    %642 = vector.broadcast %640 : vector<64x1xf32> to vector<64x256xf32>
    %643 = arith.addf %641, %642 : vector<64x256xf32>
    %cst_383 = arith.constant 0.000000e+00 : f32
    %644 = vector.broadcast %cst_383 : f32 to vector<64x256xf32>
    %645 = arith.maximumf %643, %644 : vector<64x256xf32>
    %c944_384 = arith.constant 944 : index
    %c0_385 = arith.constant 0 : index
    %646 = vector.load %arg1[%c944_384, %c0_385] : memref<1016x128xf32, #tpu.memory_space<vmem>>, vector<64x64xf32>
    %c944_386 = arith.constant 944 : index
    %c0_387 = arith.constant 0 : index
    %647 = vector.load %arg2[%c944_386, %c0_387] : memref<1016x1xf32, #tpu.memory_space<vmem>>, vector<64x1xf32>
    %cst_388 = arith.constant dense<0.000000e+00> : vector<64x256xf32>
    %648 = tpu.matmul %646, %645, %cst_388 {dimension_numbers = #tpu.dot_dimension_numbers<[1], [0], [0], [1], [0, 0, 1, 1], [], []>} : vector<64x64xf32>, vector<64x256xf32>, vector<64x256xf32> -> vector<64x256xf32>
    %649 = vector.broadcast %647 : vector<64x1xf32> to vector<64x256xf32>
    %650 = arith.addf %648, %649 : vector<64x256xf32>
    %651 = arith.addf %650, %638 : vector<64x256xf32>
    %cst_389 = arith.constant 0.000000e+00 : f32
    %652 = vector.broadcast %cst_389 : f32 to vector<64x256xf32>
    %653 = arith.maximumf %651, %652 : vector<64x256xf32>
    %c1008_390 = arith.constant 1008 : index
    %c0_391 = arith.constant 0 : index
    %654 = vector.load %arg1[%c1008_390, %c0_391] : memref<1016x128xf32, #tpu.memory_space<vmem>>, vector<4x64xf32>
    %c1008_392 = arith.constant 1008 : index
    %c0_393 = arith.constant 0 : index
    %655 = vector.load %arg2[%c1008_392, %c0_393] : memref<1016x1xf32, #tpu.memory_space<vmem>>, vector<4x1xf32>
    %cst_394 = arith.constant dense<0.000000e+00> : vector<4x256xf32>
    %656 = tpu.matmul %654, %653, %cst_394 {dimension_numbers = #tpu.dot_dimension_numbers<[1], [0], [0], [1], [0, 0, 1, 1], [], []>} : vector<4x64xf32>, vector<64x256xf32>, vector<4x256xf32> -> vector<4x256xf32>
    %657 = vector.broadcast %655 : vector<4x1xf32> to vector<4x256xf32>
    %658 = arith.addf %656, %657 : vector<4x256xf32>
    %659 = vector.extract_strided_slice %658 {offsets = [0, 0], sizes = [4, 128], strides = [1, 1]} : vector<4x256xf32> to vector<4x128xf32>
    %660 = vector.extract_strided_slice %658 {offsets = [0, 128], sizes = [4, 128], strides = [1, 1]} : vector<4x256xf32> to vector<4x128xf32>
    %661 = tpu.iota {dimensions = array<i32: 0>} : vector<2x128xi32>
    %c0_i32_395 = arith.constant 0 : i32
    %662 = vector.broadcast %c0_i32_395 : i32 to vector<2x128xi32>
    %663 = arith.cmpi eq, %661, %662 : vector<2x128xi32>
    %664 = vector.shape_cast %465 : vector<1x128xf32> to vector<1x128xf32>
    %665 = vector.broadcast %664 : vector<1x128xf32> to vector<2x128xf32>
    %666 = vector.shape_cast %462 : vector<1x128xf32> to vector<1x128xf32>
    %667 = vector.broadcast %666 : vector<1x128xf32> to vector<2x128xf32>
    %668 = arith.select %663, %665, %667 : vector<2x128xi1>, vector<2x128xf32>
    %c1_i32_396 = arith.constant 1 : i32
    %669 = tpu.dynamic_rotate %668 by %c1_i32_396 dim 1 : vector<2x128xf32>, i32 -> vector<2x128xf32>
    %670 = vector.shape_cast %18 : vector<1x128xi1> to vector<1x128xi1>
    %671 = vector.broadcast %670 : vector<1x128xi1> to vector<2x128xi1>
    %672 = arith.select %671, %668, %669 : vector<2x128xi1>, vector<2x128xf32>
    %c127_i32_397 = arith.constant 127 : i32
    %673 = tpu.dynamic_rotate %668 by %c127_i32_397 dim 1 : vector<2x128xf32>, i32 -> vector<2x128xf32>
    %674 = vector.shape_cast %20 : vector<1x128xi1> to vector<1x128xi1>
    %675 = vector.broadcast %674 : vector<1x128xi1> to vector<2x128xi1>
    %676 = arith.select %675, %668, %673 : vector<2x128xi1>, vector<2x128xf32>
    %c0_398 = arith.constant 0 : index
    %c0_399 = arith.constant 0 : index
    %677 = vector.load %arg3[%c0_398, %c0_399] : memref<1016x128xf32, #tpu.memory_space<vmem>>, vector<16x2xf32>
    %cst_400 = arith.constant dense<0.000000e+00> : vector<16x128xf32>
    %678 = tpu.matmul %677, %672, %cst_400 {dimension_numbers = #tpu.dot_dimension_numbers<[1], [0], [0], [1], [0, 0, 1, 1], [], []>} : vector<16x2xf32>, vector<2x128xf32>, vector<16x128xf32> -> vector<16x128xf32>
    %c16_401 = arith.constant 16 : index
    %c0_402 = arith.constant 0 : index
    %679 = vector.load %arg3[%c16_401, %c0_402] : memref<1016x128xf32, #tpu.memory_space<vmem>>, vector<16x2xf32>
    %cst_403 = arith.constant dense<0.000000e+00> : vector<16x128xf32>
    %680 = tpu.matmul %679, %668, %cst_403 {dimension_numbers = #tpu.dot_dimension_numbers<[1], [0], [0], [1], [0, 0, 1, 1], [], []>} : vector<16x2xf32>, vector<2x128xf32>, vector<16x128xf32> -> vector<16x128xf32>
    %c32_404 = arith.constant 32 : index
    %c0_405 = arith.constant 0 : index
    %681 = vector.load %arg3[%c32_404, %c0_405] : memref<1016x128xf32, #tpu.memory_space<vmem>>, vector<16x2xf32>
    %cst_406 = arith.constant dense<0.000000e+00> : vector<16x128xf32>
    %682 = tpu.matmul %681, %676, %cst_406 {dimension_numbers = #tpu.dot_dimension_numbers<[1], [0], [0], [1], [0, 0, 1, 1], [], []>} : vector<16x2xf32>, vector<2x128xf32>, vector<16x128xf32> -> vector<16x128xf32>
    %683 = arith.addf %678, %680 : vector<16x128xf32>
    %684 = arith.addf %683, %682 : vector<16x128xf32>
    %c0_407 = arith.constant 0 : index
    %c0_408 = arith.constant 0 : index
    %685 = vector.load %arg4[%c0_407, %c0_408] : memref<1016x1xf32, #tpu.memory_space<vmem>>, vector<16x1xf32>
    %686 = vector.broadcast %685 : vector<16x1xf32> to vector<16x128xf32>
    %687 = arith.addf %684, %686 : vector<16x128xf32>
    %cst_409 = arith.constant 0.000000e+00 : f32
    %688 = vector.broadcast %cst_409 : f32 to vector<16x128xf32>
    %689 = arith.maximumf %687, %688 : vector<16x128xf32>
    %c48_410 = arith.constant 48 : index
    %c0_411 = arith.constant 0 : index
    %690 = vector.load %arg3[%c48_410, %c0_411] : memref<1016x128xf32, #tpu.memory_space<vmem>>, vector<16x16xf32>
    %c48_412 = arith.constant 48 : index
    %c0_413 = arith.constant 0 : index
    %691 = vector.load %arg4[%c48_412, %c0_413] : memref<1016x1xf32, #tpu.memory_space<vmem>>, vector<16x1xf32>
    %cst_414 = arith.constant dense<0.000000e+00> : vector<16x128xf32>
    %692 = tpu.matmul %690, %689, %cst_414 {dimension_numbers = #tpu.dot_dimension_numbers<[1], [0], [0], [1], [0, 0, 1, 1], [], []>} : vector<16x16xf32>, vector<16x128xf32>, vector<16x128xf32> -> vector<16x128xf32>
    %693 = vector.broadcast %691 : vector<16x1xf32> to vector<16x128xf32>
    %694 = arith.addf %692, %693 : vector<16x128xf32>
    %c64_415 = arith.constant 64 : index
    %c0_416 = arith.constant 0 : index
    %695 = vector.load %arg3[%c64_415, %c0_416] : memref<1016x128xf32, #tpu.memory_space<vmem>>, vector<16x2xf32>
    %c64_417 = arith.constant 64 : index
    %c0_418 = arith.constant 0 : index
    %696 = vector.load %arg4[%c64_417, %c0_418] : memref<1016x1xf32, #tpu.memory_space<vmem>>, vector<16x1xf32>
    %cst_419 = arith.constant dense<0.000000e+00> : vector<16x128xf32>
    %697 = tpu.matmul %695, %668, %cst_419 {dimension_numbers = #tpu.dot_dimension_numbers<[1], [0], [0], [1], [0, 0, 1, 1], [], []>} : vector<16x2xf32>, vector<2x128xf32>, vector<16x128xf32> -> vector<16x128xf32>
    %698 = vector.broadcast %696 : vector<16x1xf32> to vector<16x128xf32>
    %699 = arith.addf %697, %698 : vector<16x128xf32>
    %700 = arith.addf %694, %699 : vector<16x128xf32>
    %cst_420 = arith.constant 0.000000e+00 : f32
    %701 = vector.broadcast %cst_420 : f32 to vector<16x128xf32>
    %702 = arith.maximumf %700, %701 : vector<16x128xf32>
    %c1_i32_421 = arith.constant 1 : i32
    %703 = tpu.dynamic_rotate %702 by %c1_i32_421 dim 1 : vector<16x128xf32>, i32 -> vector<16x128xf32>
    %704 = vector.shape_cast %18 : vector<1x128xi1> to vector<1x128xi1>
    %705 = vector.broadcast %704 : vector<1x128xi1> to vector<16x128xi1>
    %706 = arith.select %705, %702, %703 : vector<16x128xi1>, vector<16x128xf32>
    %c127_i32_422 = arith.constant 127 : i32
    %707 = tpu.dynamic_rotate %702 by %c127_i32_422 dim 1 : vector<16x128xf32>, i32 -> vector<16x128xf32>
    %708 = vector.shape_cast %20 : vector<1x128xi1> to vector<1x128xi1>
    %709 = vector.broadcast %708 : vector<1x128xi1> to vector<16x128xi1>
    %710 = arith.select %709, %702, %707 : vector<16x128xi1>, vector<16x128xf32>
    %c80_423 = arith.constant 80 : index
    %c0_424 = arith.constant 0 : index
    %711 = vector.load %arg3[%c80_423, %c0_424] : memref<1016x128xf32, #tpu.memory_space<vmem>>, vector<16x16xf32>
    %cst_425 = arith.constant dense<0.000000e+00> : vector<16x128xf32>
    %712 = tpu.matmul %711, %706, %cst_425 {dimension_numbers = #tpu.dot_dimension_numbers<[1], [0], [0], [1], [0, 0, 1, 1], [], []>} : vector<16x16xf32>, vector<16x128xf32>, vector<16x128xf32> -> vector<16x128xf32>
    %c96_426 = arith.constant 96 : index
    %c0_427 = arith.constant 0 : index
    %713 = vector.load %arg3[%c96_426, %c0_427] : memref<1016x128xf32, #tpu.memory_space<vmem>>, vector<16x16xf32>
    %cst_428 = arith.constant dense<0.000000e+00> : vector<16x128xf32>
    %714 = tpu.matmul %713, %702, %cst_428 {dimension_numbers = #tpu.dot_dimension_numbers<[1], [0], [0], [1], [0, 0, 1, 1], [], []>} : vector<16x16xf32>, vector<16x128xf32>, vector<16x128xf32> -> vector<16x128xf32>
    %c112_429 = arith.constant 112 : index
    %c0_430 = arith.constant 0 : index
    %715 = vector.load %arg3[%c112_429, %c0_430] : memref<1016x128xf32, #tpu.memory_space<vmem>>, vector<16x16xf32>
    %cst_431 = arith.constant dense<0.000000e+00> : vector<16x128xf32>
    %716 = tpu.matmul %715, %710, %cst_431 {dimension_numbers = #tpu.dot_dimension_numbers<[1], [0], [0], [1], [0, 0, 1, 1], [], []>} : vector<16x16xf32>, vector<16x128xf32>, vector<16x128xf32> -> vector<16x128xf32>
    %717 = arith.addf %712, %714 : vector<16x128xf32>
    %718 = arith.addf %717, %716 : vector<16x128xf32>
    %c80_432 = arith.constant 80 : index
    %c0_433 = arith.constant 0 : index
    %719 = vector.load %arg4[%c80_432, %c0_433] : memref<1016x1xf32, #tpu.memory_space<vmem>>, vector<16x1xf32>
    %720 = vector.broadcast %719 : vector<16x1xf32> to vector<16x128xf32>
    %721 = arith.addf %718, %720 : vector<16x128xf32>
    %cst_434 = arith.constant 0.000000e+00 : f32
    %722 = vector.broadcast %cst_434 : f32 to vector<16x128xf32>
    %723 = arith.maximumf %721, %722 : vector<16x128xf32>
    %c128_435 = arith.constant 128 : index
    %c0_436 = arith.constant 0 : index
    %724 = vector.load %arg3[%c128_435, %c0_436] : memref<1016x128xf32, #tpu.memory_space<vmem>>, vector<16x16xf32>
    %c128_437 = arith.constant 128 : index
    %c0_438 = arith.constant 0 : index
    %725 = vector.load %arg4[%c128_437, %c0_438] : memref<1016x1xf32, #tpu.memory_space<vmem>>, vector<16x1xf32>
    %cst_439 = arith.constant dense<0.000000e+00> : vector<16x128xf32>
    %726 = tpu.matmul %724, %723, %cst_439 {dimension_numbers = #tpu.dot_dimension_numbers<[1], [0], [0], [1], [0, 0, 1, 1], [], []>} : vector<16x16xf32>, vector<16x128xf32>, vector<16x128xf32> -> vector<16x128xf32>
    %727 = vector.broadcast %725 : vector<16x1xf32> to vector<16x128xf32>
    %728 = arith.addf %726, %727 : vector<16x128xf32>
    %729 = arith.addf %728, %702 : vector<16x128xf32>
    %cst_440 = arith.constant 0.000000e+00 : f32
    %730 = vector.broadcast %cst_440 : f32 to vector<16x128xf32>
    %731 = arith.maximumf %729, %730 : vector<16x128xf32>
    %c1_i32_441 = arith.constant 1 : i32
    %732 = tpu.dynamic_rotate %731 by %c1_i32_441 dim 1 : vector<16x128xf32>, i32 -> vector<16x128xf32>
    %733 = vector.shape_cast %18 : vector<1x128xi1> to vector<1x128xi1>
    %734 = vector.broadcast %733 : vector<1x128xi1> to vector<16x128xi1>
    %735 = arith.select %734, %731, %732 : vector<16x128xi1>, vector<16x128xf32>
    %c127_i32_442 = arith.constant 127 : i32
    %736 = tpu.dynamic_rotate %731 by %c127_i32_442 dim 1 : vector<16x128xf32>, i32 -> vector<16x128xf32>
    %737 = vector.shape_cast %20 : vector<1x128xi1> to vector<1x128xi1>
    %738 = vector.broadcast %737 : vector<1x128xi1> to vector<16x128xi1>
    %739 = arith.select %738, %731, %736 : vector<16x128xi1>, vector<16x128xf32>
    %c144_443 = arith.constant 144 : index
    %c0_444 = arith.constant 0 : index
    %740 = vector.load %arg3[%c144_443, %c0_444] : memref<1016x128xf32, #tpu.memory_space<vmem>>, vector<32x16xf32>
    %cst_445 = arith.constant dense<0.000000e+00> : vector<32x128xf32>
    %741 = tpu.matmul %740, %735, %cst_445 {dimension_numbers = #tpu.dot_dimension_numbers<[1], [0], [0], [1], [0, 0, 1, 1], [], []>} : vector<32x16xf32>, vector<16x128xf32>, vector<32x128xf32> -> vector<32x128xf32>
    %c176_446 = arith.constant 176 : index
    %c0_447 = arith.constant 0 : index
    %742 = vector.load %arg3[%c176_446, %c0_447] : memref<1016x128xf32, #tpu.memory_space<vmem>>, vector<32x16xf32>
    %cst_448 = arith.constant dense<0.000000e+00> : vector<32x128xf32>
    %743 = tpu.matmul %742, %731, %cst_448 {dimension_numbers = #tpu.dot_dimension_numbers<[1], [0], [0], [1], [0, 0, 1, 1], [], []>} : vector<32x16xf32>, vector<16x128xf32>, vector<32x128xf32> -> vector<32x128xf32>
    %c208_449 = arith.constant 208 : index
    %c0_450 = arith.constant 0 : index
    %744 = vector.load %arg3[%c208_449, %c0_450] : memref<1016x128xf32, #tpu.memory_space<vmem>>, vector<32x16xf32>
    %cst_451 = arith.constant dense<0.000000e+00> : vector<32x128xf32>
    %745 = tpu.matmul %744, %739, %cst_451 {dimension_numbers = #tpu.dot_dimension_numbers<[1], [0], [0], [1], [0, 0, 1, 1], [], []>} : vector<32x16xf32>, vector<16x128xf32>, vector<32x128xf32> -> vector<32x128xf32>
    %746 = arith.addf %741, %743 : vector<32x128xf32>
    %747 = arith.addf %746, %745 : vector<32x128xf32>
    %c144_452 = arith.constant 144 : index
    %c0_453 = arith.constant 0 : index
    %748 = vector.load %arg4[%c144_452, %c0_453] : memref<1016x1xf32, #tpu.memory_space<vmem>>, vector<32x1xf32>
    %749 = vector.broadcast %748 : vector<32x1xf32> to vector<32x128xf32>
    %750 = arith.addf %747, %749 : vector<32x128xf32>
    %cst_454 = arith.constant 0.000000e+00 : f32
    %751 = vector.broadcast %cst_454 : f32 to vector<32x128xf32>
    %752 = arith.maximumf %750, %751 : vector<32x128xf32>
    %c240_455 = arith.constant 240 : index
    %c0_456 = arith.constant 0 : index
    %753 = vector.load %arg3[%c240_455, %c0_456] : memref<1016x128xf32, #tpu.memory_space<vmem>>, vector<32x32xf32>
    %c240_457 = arith.constant 240 : index
    %c0_458 = arith.constant 0 : index
    %754 = vector.load %arg4[%c240_457, %c0_458] : memref<1016x1xf32, #tpu.memory_space<vmem>>, vector<32x1xf32>
    %cst_459 = arith.constant dense<0.000000e+00> : vector<32x128xf32>
    %755 = tpu.matmul %753, %752, %cst_459 {dimension_numbers = #tpu.dot_dimension_numbers<[1], [0], [0], [1], [0, 0, 1, 1], [], []>} : vector<32x32xf32>, vector<32x128xf32>, vector<32x128xf32> -> vector<32x128xf32>
    %756 = vector.broadcast %754 : vector<32x1xf32> to vector<32x128xf32>
    %757 = arith.addf %755, %756 : vector<32x128xf32>
    %c272_460 = arith.constant 272 : index
    %c0_461 = arith.constant 0 : index
    %758 = vector.load %arg3[%c272_460, %c0_461] : memref<1016x128xf32, #tpu.memory_space<vmem>>, vector<32x16xf32>
    %c272_462 = arith.constant 272 : index
    %c0_463 = arith.constant 0 : index
    %759 = vector.load %arg4[%c272_462, %c0_463] : memref<1016x1xf32, #tpu.memory_space<vmem>>, vector<32x1xf32>
    %cst_464 = arith.constant dense<0.000000e+00> : vector<32x128xf32>
    %760 = tpu.matmul %758, %731, %cst_464 {dimension_numbers = #tpu.dot_dimension_numbers<[1], [0], [0], [1], [0, 0, 1, 1], [], []>} : vector<32x16xf32>, vector<16x128xf32>, vector<32x128xf32> -> vector<32x128xf32>
    %761 = vector.broadcast %759 : vector<32x1xf32> to vector<32x128xf32>
    %762 = arith.addf %760, %761 : vector<32x128xf32>
    %763 = arith.addf %757, %762 : vector<32x128xf32>
    %cst_465 = arith.constant 0.000000e+00 : f32
    %764 = vector.broadcast %cst_465 : f32 to vector<32x128xf32>
    %765 = arith.maximumf %763, %764 : vector<32x128xf32>
    %c1_i32_466 = arith.constant 1 : i32
    %766 = tpu.dynamic_rotate %765 by %c1_i32_466 dim 1 : vector<32x128xf32>, i32 -> vector<32x128xf32>
    %767 = vector.shape_cast %18 : vector<1x128xi1> to vector<1x128xi1>
    %768 = vector.broadcast %767 : vector<1x128xi1> to vector<32x128xi1>
    %769 = arith.select %768, %765, %766 : vector<32x128xi1>, vector<32x128xf32>
    %c127_i32_467 = arith.constant 127 : i32
    %770 = tpu.dynamic_rotate %765 by %c127_i32_467 dim 1 : vector<32x128xf32>, i32 -> vector<32x128xf32>
    %771 = vector.shape_cast %20 : vector<1x128xi1> to vector<1x128xi1>
    %772 = vector.broadcast %771 : vector<1x128xi1> to vector<32x128xi1>
    %773 = arith.select %772, %765, %770 : vector<32x128xi1>, vector<32x128xf32>
    %c304_468 = arith.constant 304 : index
    %c0_469 = arith.constant 0 : index
    %774 = vector.load %arg3[%c304_468, %c0_469] : memref<1016x128xf32, #tpu.memory_space<vmem>>, vector<64x32xf32>
    %cst_470 = arith.constant dense<0.000000e+00> : vector<64x128xf32>
    %775 = tpu.matmul %774, %769, %cst_470 {dimension_numbers = #tpu.dot_dimension_numbers<[1], [0], [0], [1], [0, 0, 1, 1], [], []>} : vector<64x32xf32>, vector<32x128xf32>, vector<64x128xf32> -> vector<64x128xf32>
    %c368_471 = arith.constant 368 : index
    %c0_472 = arith.constant 0 : index
    %776 = vector.load %arg3[%c368_471, %c0_472] : memref<1016x128xf32, #tpu.memory_space<vmem>>, vector<64x32xf32>
    %cst_473 = arith.constant dense<0.000000e+00> : vector<64x128xf32>
    %777 = tpu.matmul %776, %765, %cst_473 {dimension_numbers = #tpu.dot_dimension_numbers<[1], [0], [0], [1], [0, 0, 1, 1], [], []>} : vector<64x32xf32>, vector<32x128xf32>, vector<64x128xf32> -> vector<64x128xf32>
    %c432_474 = arith.constant 432 : index
    %c0_475 = arith.constant 0 : index
    %778 = vector.load %arg3[%c432_474, %c0_475] : memref<1016x128xf32, #tpu.memory_space<vmem>>, vector<64x32xf32>
    %cst_476 = arith.constant dense<0.000000e+00> : vector<64x128xf32>
    %779 = tpu.matmul %778, %773, %cst_476 {dimension_numbers = #tpu.dot_dimension_numbers<[1], [0], [0], [1], [0, 0, 1, 1], [], []>} : vector<64x32xf32>, vector<32x128xf32>, vector<64x128xf32> -> vector<64x128xf32>
    %780 = arith.addf %775, %777 : vector<64x128xf32>
    %781 = arith.addf %780, %779 : vector<64x128xf32>
    %c304_477 = arith.constant 304 : index
    %c0_478 = arith.constant 0 : index
    %782 = vector.load %arg4[%c304_477, %c0_478] : memref<1016x1xf32, #tpu.memory_space<vmem>>, vector<64x1xf32>
    %783 = vector.broadcast %782 : vector<64x1xf32> to vector<64x128xf32>
    %784 = arith.addf %781, %783 : vector<64x128xf32>
    %cst_479 = arith.constant 0.000000e+00 : f32
    %785 = vector.broadcast %cst_479 : f32 to vector<64x128xf32>
    %786 = arith.maximumf %784, %785 : vector<64x128xf32>
    %c496_480 = arith.constant 496 : index
    %c0_481 = arith.constant 0 : index
    %787 = vector.load %arg3[%c496_480, %c0_481] : memref<1016x128xf32, #tpu.memory_space<vmem>>, vector<64x64xf32>
    %c496_482 = arith.constant 496 : index
    %c0_483 = arith.constant 0 : index
    %788 = vector.load %arg4[%c496_482, %c0_483] : memref<1016x1xf32, #tpu.memory_space<vmem>>, vector<64x1xf32>
    %cst_484 = arith.constant dense<0.000000e+00> : vector<64x128xf32>
    %789 = tpu.matmul %787, %786, %cst_484 {dimension_numbers = #tpu.dot_dimension_numbers<[1], [0], [0], [1], [0, 0, 1, 1], [], []>} : vector<64x64xf32>, vector<64x128xf32>, vector<64x128xf32> -> vector<64x128xf32>
    %790 = vector.broadcast %788 : vector<64x1xf32> to vector<64x128xf32>
    %791 = arith.addf %789, %790 : vector<64x128xf32>
    %c560_485 = arith.constant 560 : index
    %c0_486 = arith.constant 0 : index
    %792 = vector.load %arg3[%c560_485, %c0_486] : memref<1016x128xf32, #tpu.memory_space<vmem>>, vector<64x32xf32>
    %c560_487 = arith.constant 560 : index
    %c0_488 = arith.constant 0 : index
    %793 = vector.load %arg4[%c560_487, %c0_488] : memref<1016x1xf32, #tpu.memory_space<vmem>>, vector<64x1xf32>
    %cst_489 = arith.constant dense<0.000000e+00> : vector<64x128xf32>
    %794 = tpu.matmul %792, %765, %cst_489 {dimension_numbers = #tpu.dot_dimension_numbers<[1], [0], [0], [1], [0, 0, 1, 1], [], []>} : vector<64x32xf32>, vector<32x128xf32>, vector<64x128xf32> -> vector<64x128xf32>
    %795 = vector.broadcast %793 : vector<64x1xf32> to vector<64x128xf32>
    %796 = arith.addf %794, %795 : vector<64x128xf32>
    %797 = arith.addf %791, %796 : vector<64x128xf32>
    %cst_490 = arith.constant 0.000000e+00 : f32
    %798 = vector.broadcast %cst_490 : f32 to vector<64x128xf32>
    %799 = arith.maximumf %797, %798 : vector<64x128xf32>
    %c1_i32_491 = arith.constant 1 : i32
    %800 = tpu.dynamic_rotate %799 by %c1_i32_491 dim 1 : vector<64x128xf32>, i32 -> vector<64x128xf32>
    %801 = vector.shape_cast %18 : vector<1x128xi1> to vector<1x128xi1>
    %802 = vector.broadcast %801 : vector<1x128xi1> to vector<64x128xi1>
    %803 = arith.select %802, %799, %800 : vector<64x128xi1>, vector<64x128xf32>
    %c127_i32_492 = arith.constant 127 : i32
    %804 = tpu.dynamic_rotate %799 by %c127_i32_492 dim 1 : vector<64x128xf32>, i32 -> vector<64x128xf32>
    %805 = vector.shape_cast %20 : vector<1x128xi1> to vector<1x128xi1>
    %806 = vector.broadcast %805 : vector<1x128xi1> to vector<64x128xi1>
    %807 = arith.select %806, %799, %804 : vector<64x128xi1>, vector<64x128xf32>
    %c624_493 = arith.constant 624 : index
    %c0_494 = arith.constant 0 : index
    %808 = vector.load %arg3[%c624_493, %c0_494] : memref<1016x128xf32, #tpu.memory_space<vmem>>, vector<64x64xf32>
    %cst_495 = arith.constant dense<0.000000e+00> : vector<64x128xf32>
    %809 = tpu.matmul %808, %803, %cst_495 {dimension_numbers = #tpu.dot_dimension_numbers<[1], [0], [0], [1], [0, 0, 1, 1], [], []>} : vector<64x64xf32>, vector<64x128xf32>, vector<64x128xf32> -> vector<64x128xf32>
    %c688_496 = arith.constant 688 : index
    %c0_497 = arith.constant 0 : index
    %810 = vector.load %arg3[%c688_496, %c0_497] : memref<1016x128xf32, #tpu.memory_space<vmem>>, vector<64x64xf32>
    %cst_498 = arith.constant dense<0.000000e+00> : vector<64x128xf32>
    %811 = tpu.matmul %810, %799, %cst_498 {dimension_numbers = #tpu.dot_dimension_numbers<[1], [0], [0], [1], [0, 0, 1, 1], [], []>} : vector<64x64xf32>, vector<64x128xf32>, vector<64x128xf32> -> vector<64x128xf32>
    %c752_499 = arith.constant 752 : index
    %c0_500 = arith.constant 0 : index
    %812 = vector.load %arg3[%c752_499, %c0_500] : memref<1016x128xf32, #tpu.memory_space<vmem>>, vector<64x64xf32>
    %cst_501 = arith.constant dense<0.000000e+00> : vector<64x128xf32>
    %813 = tpu.matmul %812, %807, %cst_501 {dimension_numbers = #tpu.dot_dimension_numbers<[1], [0], [0], [1], [0, 0, 1, 1], [], []>} : vector<64x64xf32>, vector<64x128xf32>, vector<64x128xf32> -> vector<64x128xf32>
    %814 = arith.addf %809, %811 : vector<64x128xf32>
    %815 = arith.addf %814, %813 : vector<64x128xf32>
    %c624_502 = arith.constant 624 : index
    %c0_503 = arith.constant 0 : index
    %816 = vector.load %arg4[%c624_502, %c0_503] : memref<1016x1xf32, #tpu.memory_space<vmem>>, vector<64x1xf32>
    %817 = vector.broadcast %816 : vector<64x1xf32> to vector<64x128xf32>
    %818 = arith.addf %815, %817 : vector<64x128xf32>
    %cst_504 = arith.constant 0.000000e+00 : f32
    %819 = vector.broadcast %cst_504 : f32 to vector<64x128xf32>
    %820 = arith.maximumf %818, %819 : vector<64x128xf32>
    %c816_505 = arith.constant 816 : index
    %c0_506 = arith.constant 0 : index
    %821 = vector.load %arg3[%c816_505, %c0_506] : memref<1016x128xf32, #tpu.memory_space<vmem>>, vector<64x64xf32>
    %c816_507 = arith.constant 816 : index
    %c0_508 = arith.constant 0 : index
    %822 = vector.load %arg4[%c816_507, %c0_508] : memref<1016x1xf32, #tpu.memory_space<vmem>>, vector<64x1xf32>
    %cst_509 = arith.constant dense<0.000000e+00> : vector<64x128xf32>
    %823 = tpu.matmul %821, %820, %cst_509 {dimension_numbers = #tpu.dot_dimension_numbers<[1], [0], [0], [1], [0, 0, 1, 1], [], []>} : vector<64x64xf32>, vector<64x128xf32>, vector<64x128xf32> -> vector<64x128xf32>
    %824 = vector.broadcast %822 : vector<64x1xf32> to vector<64x128xf32>
    %825 = arith.addf %823, %824 : vector<64x128xf32>
    %826 = arith.addf %825, %799 : vector<64x128xf32>
    %cst_510 = arith.constant 0.000000e+00 : f32
    %827 = vector.broadcast %cst_510 : f32 to vector<64x128xf32>
    %828 = arith.maximumf %826, %827 : vector<64x128xf32>
    %c880_511 = arith.constant 880 : index
    %c0_512 = arith.constant 0 : index
    %829 = vector.load %arg3[%c880_511, %c0_512] : memref<1016x128xf32, #tpu.memory_space<vmem>>, vector<64x64xf32>
    %c880_513 = arith.constant 880 : index
    %c0_514 = arith.constant 0 : index
    %830 = vector.load %arg4[%c880_513, %c0_514] : memref<1016x1xf32, #tpu.memory_space<vmem>>, vector<64x1xf32>
    %cst_515 = arith.constant dense<0.000000e+00> : vector<64x128xf32>
    %831 = tpu.matmul %829, %828, %cst_515 {dimension_numbers = #tpu.dot_dimension_numbers<[1], [0], [0], [1], [0, 0, 1, 1], [], []>} : vector<64x64xf32>, vector<64x128xf32>, vector<64x128xf32> -> vector<64x128xf32>
    %832 = vector.broadcast %830 : vector<64x1xf32> to vector<64x128xf32>
    %833 = arith.addf %831, %832 : vector<64x128xf32>
    %cst_516 = arith.constant 0.000000e+00 : f32
    %834 = vector.broadcast %cst_516 : f32 to vector<64x128xf32>
    %835 = arith.maximumf %833, %834 : vector<64x128xf32>
    %c944_517 = arith.constant 944 : index
    %c0_518 = arith.constant 0 : index
    %836 = vector.load %arg3[%c944_517, %c0_518] : memref<1016x128xf32, #tpu.memory_space<vmem>>, vector<64x64xf32>
    %c944_519 = arith.constant 944 : index
    %c0_520 = arith.constant 0 : index
    %837 = vector.load %arg4[%c944_519, %c0_520] : memref<1016x1xf32, #tpu.memory_space<vmem>>, vector<64x1xf32>
    %cst_521 = arith.constant dense<0.000000e+00> : vector<64x128xf32>
    %838 = tpu.matmul %836, %835, %cst_521 {dimension_numbers = #tpu.dot_dimension_numbers<[1], [0], [0], [1], [0, 0, 1, 1], [], []>} : vector<64x64xf32>, vector<64x128xf32>, vector<64x128xf32> -> vector<64x128xf32>
    %839 = vector.broadcast %837 : vector<64x1xf32> to vector<64x128xf32>
    %840 = arith.addf %838, %839 : vector<64x128xf32>
    %841 = arith.addf %840, %828 : vector<64x128xf32>
    %cst_522 = arith.constant 0.000000e+00 : f32
    %842 = vector.broadcast %cst_522 : f32 to vector<64x128xf32>
    %843 = arith.maximumf %841, %842 : vector<64x128xf32>
    %c1008_523 = arith.constant 1008 : index
    %c0_524 = arith.constant 0 : index
    %844 = vector.load %arg3[%c1008_523, %c0_524] : memref<1016x128xf32, #tpu.memory_space<vmem>>, vector<4x64xf32>
    %c1008_525 = arith.constant 1008 : index
    %c0_526 = arith.constant 0 : index
    %845 = vector.load %arg4[%c1008_525, %c0_526] : memref<1016x1xf32, #tpu.memory_space<vmem>>, vector<4x1xf32>
    %cst_527 = arith.constant dense<0.000000e+00> : vector<4x128xf32>
    %846 = tpu.matmul %844, %843, %cst_527 {dimension_numbers = #tpu.dot_dimension_numbers<[1], [0], [0], [1], [0, 0, 1, 1], [], []>} : vector<4x64xf32>, vector<64x128xf32>, vector<4x128xf32> -> vector<4x128xf32>
    %847 = vector.broadcast %845 : vector<4x1xf32> to vector<4x128xf32>
    %848 = arith.addf %846, %847 : vector<4x128xf32>
    %849 = arith.mulf %848, %848 : vector<4x128xf32>
    %cst_528 = arith.constant dense<0.000000e+00> : vector<128xf32>
    %850 = vector.multi_reduction <add>, %849, %cst_528 [0] : vector<4x128xf32> to vector<128xf32>
    %851 = vector.shape_cast %850 : vector<128xf32> to vector<1x128xf32>
    %852 = tpu.reciprocal %851 {approx = true} : vector<1x128xf32> -> vector<1x128xf32>
    %853 = math.absf %660 : vector<4x128xf32>
    %854 = arith.subf %660, %853 : vector<4x128xf32>
    %855 = arith.mulf %848, %854 : vector<4x128xf32>
    %856 = arith.mulf %855, %848 : vector<4x128xf32>
    %cst_529 = arith.constant dense<0.000000e+00> : vector<128xf32>
    %857 = vector.multi_reduction <add>, %856, %cst_529 [0] : vector<4x128xf32> to vector<128xf32>
    %858 = vector.shape_cast %857 : vector<128xf32> to vector<1x128xf32>
    %859 = arith.mulf %858, %852 : vector<1x128xf32>
    %860 = math.absf %659 : vector<4x128xf32>
    %861 = arith.addf %659, %860 : vector<4x128xf32>
    %862 = arith.mulf %848, %861 : vector<4x128xf32>
    %863 = arith.mulf %862, %848 : vector<4x128xf32>
    %cst_530 = arith.constant dense<0.000000e+00> : vector<128xf32>
    %864 = vector.multi_reduction <add>, %863, %cst_530 [0] : vector<4x128xf32> to vector<128xf32>
    %865 = vector.shape_cast %864 : vector<128xf32> to vector<1x128xf32>
    %866 = arith.mulf %865, %852 : vector<1x128xf32>
    %867 = arith.subf %468, %462 : vector<1x128xf32>
    %868 = arith.mulf %859, %867 : vector<1x128xf32>
    %869 = arith.subf %462, %465 : vector<1x128xf32>
    %870 = arith.mulf %866, %869 : vector<1x128xf32>
    %871 = arith.addf %868, %870 : vector<1x128xf32>
    %cst_531 = arith.constant 1.100000e+00 : f32
    %872 = vector.broadcast %cst_531 : f32 to vector<1x128xf32>
    %873 = arith.mulf %872, %871 : vector<1x128xf32>
    %874 = arith.subf %462, %873 : vector<1x128xf32>
    %c84_i32_532 = arith.constant 84 : i32
    %875 = tpu.dynamic_rotate %874 by %c84_i32_532 dim 1 : vector<1x128xf32>, i32 -> vector<1x128xf32>
    %c44_i32_533 = arith.constant 44 : i32
    %876 = tpu.dynamic_rotate %874 by %c44_i32_533 dim 1 : vector<1x128xf32>, i32 -> vector<1x128xf32>
    %c10_i32_534 = arith.constant 10 : i32
    %877 = vector.broadcast %c10_i32_534 : i32 to vector<1x128xi32>
    %878 = arith.cmpi slt, %16, %877 : vector<1x128xi32>
    %c54_i32_535 = arith.constant 54 : i32
    %879 = vector.broadcast %c54_i32_535 : i32 to vector<1x128xi32>
    %880 = arith.cmpi sge, %16, %879 : vector<1x128xi32>
    %881 = arith.select %880, %876, %874 : vector<1x128xi1>, vector<1x128xf32>
    %882 = arith.select %878, %875, %881 : vector<1x128xi1>, vector<1x128xf32>
    %c0_536 = arith.constant 0 : index
    %c0_537 = arith.constant 0 : index
    %883 = vector.load %arg5[%c0_536, %c0_537] : memref<1x128xf32, #tpu.memory_space<vmem>>, vector<1x128xf32>
    tpu.vector_store %arg5[%c0_536, %c0_537], %882 {strides = array<i32>} : memref<1x128xf32, #tpu.memory_space<vmem>>, vector<1x128xf32>,
    return
  }
}

</mosaic_0001>

<bundles_post_ra>
// kernel: run.1
= control target key start
LH: loop header
LB: loop body
LE: loop exit
PB: predicated region body
PF: predicated region fallthrough
CT: control target
= control target key end

     0   :  { %s17307_s20 = smov 63   ;;  %s17308_s21 = smov 65   ;;  %v22748_v1 = vmov 0.0   ;;  %v20_v2 = vlaneseq  ;;  %vm116_vm3 = vcmask 1041408   ;;  %vm109_vm4 = vcmask 15360   ;;  %s22742_s0 = inlined_call_operand.vmem [shape: f32[1,128], index: 0, kind: input, shape index: {}]   ;;  %s22743_s1 = inlined_call_operand.vmem [shape: f32[1016,128], index: 1, kind: input, shape index: {}]   ;;  %s22744_s2 = inlined_call_operand.vmem [shape: f32[1016,1], index: 2, kind: input, shape index: {}]   ;;  %s22745_s4 = inlined_call_operand.vmem [shape: f32[1016,1], index: 4, kind: input, shape index: {}]   ;;  %s22746_s3 = inlined_call_operand.vmem [shape: f32[1016,128], index: 3, kind: input, shape index: {}]   ;;  %s22747_s5 = inlined_call_operand.vmem [shape: f32[1,128], index: 5, kind: output, shape index: {}]  }
   0x1   :  { %v51_v0 = vld [vmem:[%s22742_s0] sm:$0x1]  ;;  %187 = vmatprep.mubr.f32.mxu0 %v22748_v1  ;;  %489 = vmatprep.mubr.f32.mxu1 %v22748_v1  ;;  %s17310_s22 = smov 127   ;;  %s17311_s23 = smov 1   ;;  %v107_v18 = vld [vmem:[%s22743_s1 + $0x10] sm:$0xff]  ;;  %v108_v19 = vld [vmem:[%s22743_s1 + $0x18] sm:$0xff] }
   0x2   :  { %57 = vrot.lane.b32.xlu1 %v51_v0, %s17307_s20  ;;  %52 = vrot.lane.b32.xlu0 %v51_v0, %s17308_s21  ;;  %v17356_v3 = vand.u32 127, %v20_v2  ;;  %v17358_v4 = vshrl.u32 %v20_v2, 7  ;;  %v17312_v20 = vmov 0   ;;  %v385_v21 = vld [vmem:[%s22744_s2 + $0x8] sm:$0xff]  ;;  %v384_v22 = vld [vmem:[%s22744_s2] sm:$0xff]  ;;  %vm418_vm9 = vcmask 130048  }
   0x3   :  { %16567 = vset.pattern.permute.xlu1 %v17312_v20  ;;  %16566 = vset.pattern.permute.xlu0 %v17312_v20  ;;  %v406_v23 = vld [vmem:[%s22744_s2 + $0x30] sm:$0xff]  ;;  %v407_v24 = vld [vmem:[%s22744_s2 + $0x38] sm:$0xff]  ;;  %v504_v25 = vld [vmem:[%s22744_s2 + $0x40] sm:$0xff]  ;;  %vm1446_vm10 = vcmask 261120   ;;  %vm2344_vm11 = vcmask 523264   ;;  %vm17314_vm12 = vmmov 0  }
   0x4   :  { %v17361_v5 = vand.u32 63, %v17356_v3  ;;  %v17364_v8 = vsub.s32 0, %v17358_v4  ;;  %vm64_vm2 = vcmp.eq.s32.totalorder %v17358_v4, 0  ;;  %v505_v26 = vld [vmem:[%s22744_s2 + $0x48] sm:$0xff]  ;;  %v36_v27 = vadd.s32 128, %v17356_v3  ;;  %v200_v36 = vld [vmem:[%s22743_s1 + $0x20] sm:$0xff] }
   0x5   :  { %vm96_vm5 = vcmp.lt.s32.totalorder %v17356_v3, 127  ;;  %vm83_vm7 = vcmp.lt.s32.totalorder %v17356_v3, 1  ;;  %v201_v44 = vld [vmem:[%s22743_s1 + $0x28] sm:$0xff]  ;;  %v105_v45 = vld [vmem:[%s22743_s1] sm:$0xff]  ;;  %v404_v63 = vld [vmem:[%s22743_s1 + $0x30] sm:$0xff]  ;;  %vm7676_vm13 = vcmask 1043456  }
   0x6   :  { %59 = vrot.lane.b32.xlu1 %v51_v0, %s17310_s22  ;;  %54 = vrot.lane.b32.xlu0 %v51_v0, %s17311_s23  ;;  %vm34_vm0 = vcmp.eq.s32.totalorder %v17361_v5, 0  ;;  %vm35_vm1 = vcmp.eq.s32.totalorder %v17361_v5, 63  ;;  %v72_v10 = vrot.slane %v51_v0, %v17364_v8  ;;  %v41_v28 = vand.u32 63, %v36_v27  ;;  %v106_v46 = vld [vmem:[%s22743_s1 + $0x8] sm:$0xff]  ;;  %v405_v0 = vld [vmem:[%s22743_s1 + $0x38] sm:$0xff]  ;;  %s17315_s19 = smov 84  }
   0x7   :  { %v502_v2 = vld [vmem:[%s22743_s1 + $0x40] sm:$0xff]  ;;  %s17316_s24 = smov 44   ;;  %vm7721_vm14 = vcmp.ge.s32.totalorder %v17361_v5, 54  ;;  %vm7720_vm15 = vcmp.lt.s32.totalorder %v17361_v5, 10  ;;  %v17054_v4 = vld [vmem:[%s22743_s1 + $0x18] sm:$0xff] }
   0x8   :  { %vm17432_vm6 = vcmp.eq.s32.totalorder %v41_v28, 63  ;;  %vm17450_vm8 = vcmp.eq.s32.totalorder %v41_v28, 0 }
  0x74   :  { %v58_v6 = vpop.permute.xlu1 %57  ;;  %v53_v7 = vpop.permute.xlu0 %52 }
  0x78   :  { %v60_v9 = vpop.permute.xlu1 %59  ;;  %v55_v11 = vpop.permute.xlu0 %54 }
  0x79   :  { %v17372_v12 = vsel %vm35_vm1, %v58_v6, %v60_v9  ;;  %v17376_v13 = vsel %vm34_vm0, %v53_v7, %v55_v11  ;;  %v503_v6 = vld [vmem:[%s22743_s1 + $0x48] sm:$0xff] }
  0x7a   :  { %v76_v14 = vrot.slane %v17372_v12, %v17364_v8  ;;  %v68_v15 = vrot.slane %v17376_v13, %v17364_v8 }
  0x7c   :  { %v17384_v16 = vsel %vm64_vm2, %v72_v10, %v76_v14  ;;  %v17388_v17 = vsel %vm64_vm2, %v68_v15, %v72_v10 }
  0x7d   :  { %94 = vrot.lane.b32.xlu1 %v17384_v16, %s17310_s22  ;;  %13402 = vmatprep.subr.msk.mxu0 %vm116_vm3, %v17384_v16 }
  0x7e   :  { %92 = vrot.lane.b32.xlu0 %v17388_v17, %s17310_s22  ;;  %13403 = vmatpush1.msk.msra.mxu0 %vm116_vm3, %v17388_v17 }
  0x7f   :  { %13404 = vmatmul.mubr.msk.f32.vlgmr.msra.gmra.mrb[0].mxu0 %vm109_vm4, %v107_v18 }
  0x80   :  { %193 = vmatprep.mubr.f32.mxu0 %v22748_v1 }
  0x81   :  { %81 = vrot.lane.b32.xlu1 %v17384_v16, %s17311_s23 }
  0x82   :  { %79 = vrot.lane.b32.xlu0 %v17388_v17, %s17311_s23 }
  0x83   :  { %13405 = vmatmul.mubr.msk.f32.gmra.mrb[2].mxu0 %vm109_vm4, %v108_v19 }
  0x84   :  { %278 = vmatprep.mubr.f32.mxu0 %v22748_v1 }
  0x85   :  { %393 = vperm.xlu1 %16567, %v385_v21  }
  0x86   :  { %388 = vperm.xlu0 %16566, %v384_v22  }
  0x89   :  { %410 = vperm.xlu1 %16567, %v406_v23  }
  0x8a   :  { %415 = vperm.xlu0 %16566, %v407_v24  }
  0x8d   :  { %508 = vperm.xlu1 %16567, %v504_v25  }
  0x8e   :  { %513 = vperm.xlu0 %16566, %v505_v26  }
  0xef   :  { %v95_v30 = vpop.permute.xlu1 %94 }
  0xf0   :  { %v93_v31 = vpop.permute.xlu0 %92 }
  0xf1   :  { %v97_v32 = vsel %vm96_vm5, %v93_v31, %v95_v30  ;;  %v98_v33 = vsel %vm96_vm5, %v95_v30, %v93_v31 }
  0xf2   :  { %v104_v34 = vsel %vm17432_vm6, %v17384_v16, %v98_v33  ;;  %v103_v35 = vsel %vm35_vm1, %v17388_v17, %v97_v32 }
  0xf3   :  { %13406 = vmatprep.subr.msk.mxu0 %vm116_vm3, %v104_v34  ;;  %v82_v38 = vpop.permute.xlu1 %81  ;;  %v641_v34 = vld [vmem:[%s22743_s1 + $0x60] sm:$0xff] }
  0xf4   :  { %v80_v39 = vpop.permute.xlu0 %79  ;;  %13407 = vmatpush1.msk.msra.mxu0 %vm116_vm3, %v103_v35  ;;  %v898_v35 = vld [vmem:[%s22744_s2 + $0x50] sm:$0xff] }
  0xf5   :  { %v84_v40 = vsel %vm83_vm7, %v80_v39, %v82_v38  ;;  %v85_v41 = vsel %vm83_vm7, %v82_v38, %v80_v39  ;;  %13408 = vmatmul.mubr.msk.f32.vlgmr.msra.gmra.mrb[0].mxu0 %vm109_vm4, %v200_v36  ;;  %v899_v36 = vld [vmem:[%s22744_s2 + $0x58] sm:$0xff]  ;;  %v642_v38 = vld [vmem:[%s22743_s1 + $0x68] sm:$0xff]  ;;  %v920_v39 = vld [vmem:[%s22744_s2 + $0x80] sm:$0xff] }
  0xf6   :  { %v91_v42 = vsel %vm17450_vm8, %v17384_v16, %v84_v40  ;;  %284 = vmatprep.mubr.f32.mxu0 %v22748_v1  ;;  %v90_v43 = vsel %vm34_vm0, %v17388_v17, %v85_v41  ;;  %v921_v40 = vld [vmem:[%s22744_s2 + $0x88] sm:$0xff] }
  0xf7   :  { %13410 = vmatprep.subr.msk.mxu0 %vm116_vm3, %v91_v42 }
  0xf8   :  { %13411 = vmatpush1.msk.msra.mxu0 %vm116_vm3, %v90_v43 }
  0xf9   :  { %13409 = vmatmul.mubr.msk.f32.gmra.mrb[2].mxu0 %vm109_vm4, %v201_v44 }
  0xfa   :  { %367 = vmatprep.mubr.f32.mxu0 %v22748_v1 }
  0xfd   :  { %13412 = vmatmul.mubr.msk.f32.vlgmr.msra.gmra.mrb[0].mxu0 %vm109_vm4, %v105_v45 }
  0xfe   :  { %373 = vmatprep.mubr.f32.mxu0 %v22748_v1 }
 0x101   :  { %13413 = vmatmul.mubr.msk.f32.gmra.mrb[2].mxu0 %vm109_vm4, %v106_v46 }
 0x102   :  { %1002 = vmatprep.mubr.f32.mxu0 %v22748_v1 }
 0x104   :  { %v17488_v51 = vpop.permute.xlu1 %393 }
 0x105   :  { %v17485_v49 = vpop.permute.xlu0 %388 }
 0x108   :  { %v411_v7 = vpop.permute.xlu1 %410 }
 0x109   :  { %v416_v9 = vpop.permute.xlu0 %415 }
 0x10c   :  { %v509_v10 = vpop.permute.xlu1 %508 }
 0x10d   :  { %v514_v11 = vpop.permute.xlu0 %513  ;;  %v17517_v15 = vadd.f32 %v509_v10, %v411_v7 }
 0x10e   :  { %v17519_v18 = vadd.f32 %v514_v11, %v416_v9 }
 0x1d0   :  { %v369_v47 = vpop.f32.mrb[0].mxu0 }
 0x1d1   :  { %v371_v48 = vpop.f32.mrb[1].mxu0  ;;  %v396_v50 = vadd.f32 %v17485_v49, %v369_v47 }
 0x1d2   :  { %v397_v52 = vadd.f32 %v17485_v49, %v371_v48 }
 0x1d3   :  { %v400_v57 = vmax.f32 %v396_v50, 0.0 }
 0x1d4   :  { %v375_v53 = vpop.f32.mrb[2].mxu0  ;;  %v401_v59 = vmax.f32 %v397_v52, 0.0 }
 0x1d5   :  { %v398_v54 = vadd.f32 %v17488_v51, %v375_v53  ;;  %v377_v55 = vpop.f32.mrb[3].mxu0 }
 0x1d6   :  { %v399_v56 = vadd.f32 %v17488_v51, %v377_v55 }
 0x1d7   :  { %v402_v58 = vmax.f32 %v398_v54, 0.0 }
 0x1d8   :  { %v403_v60 = vmax.f32 %v399_v56, 0.0 }
 0x1d9   :  { %v15210_v61 = vpack.c.bf16 %v402_v58, %v400_v57 }
 0x1da   :  { %v15208_v62 = vpack.c.bf16 %v403_v60, %v401_v59 }
 0x1dc   :  { %15209 = vmatprep.subr.bf16.mxu1 %v15208_v62 }
 0x1dd   :  { %15211 = vmatpush1.bf16.msra.mxu1 %v15210_v61 }
 0x1de   :  { %13416 = vmatprep.subr.msk.mxu1 %vm116_vm3, %v17384_v16 }
 0x1e0   :  { %13414 = vmatmul.mubr.msk.f32.vlgmr.msra.gmra.mrb[0].mxu1 %vm418_vm9, %v404_v63 }
 0x1e1   :  { %13417 = vmatpush1.msk.msra.mxu1 %vm116_vm3, %v17388_v17  ;;  %495 = vmatprep.mubr.f32.mxu1 %v22748_v1 }
 0x1e4   :  { %13415 = vmatmul.mubr.msk.f32.gmra.mrb[2].mxu1 %vm418_vm9, %v405_v0 }
 0x1e5   :  { %586 = vmatprep.mubr.f32.mxu1 %v22748_v1 }
 0x1e8   :  { %13418 = vmatmul.mubr.msk.f32.vlgmr.msra.gmra.mrb[0].mxu1 %vm109_vm4, %v502_v2 }
 0x1e9   :  { %592 = vmatprep.mubr.f32.mxu1 %v22748_v1 }
 0x1ec   :  { %13419 = vmatmul.mubr.msk.f32.gmra.mrb[2].mxu1 %vm109_vm4, %v503_v6 }
 0x1ed   :  { %713 = vmatprep.mubr.f32.mxu1 %v22748_v1 }
 0x2bb   :  { %v588_v14 = vpop.f32.mrb[0].mxu1 }
 0x2bc   :  { %v590_v16 = vpop.f32.mrb[1].mxu1  ;;  %v16017_v19 = vadd.f32 %v17517_v15, %v588_v14 }
 0x2bd   :  { %v16019_v20 = vadd.f32 %v17517_v15, %v590_v16  ;;  %v726_v16 = vld [vmem:[%s22743_s1 + $0x70] sm:$0xff] }
 0x2be   :  { %v17525_v25 = vmax.f32 %v16017_v19, 0.0 }
 0x2bf   :  { %v594_v21 = vpop.f32.mrb[2].mxu1  ;;  %v17529_v27 = vmax.f32 %v16019_v20, 0.0 }
 0x2c0   :  { %v16021_v22 = vadd.f32 %v17519_v18, %v594_v21  ;;  %v596_v23 = vpop.f32.mrb[3].mxu1 }
 0x2c1   :  { %v16023_v24 = vadd.f32 %v17519_v18, %v596_v23  ;;  %v639_v23 = vld [vmem:[%s22743_s1 + $0x50] sm:$0xff] }
 0x2c2   :  { %v17527_v26 = vmax.f32 %v16021_v22, 0.0  ;;  %v727_v22 = vld [vmem:[%s22743_s1 + $0x78] sm:$0xff] }
 0x2c3   :  { %v17531_v28 = vmax.f32 %v16023_v24, 0.0  ;;  %v640_v24 = vld [vmem:[%s22743_s1 + $0x58] sm:$0xff] }
 0x2c4   :  { %v16568_v30 = vpack.i.bf16 %v17527_v26, %v17525_v25  ;;  %v15214_v33 = vpack.c.bf16 %v17527_v26, %v17525_v25 }
 0x2c5   :  { %v16573_v31 = vpack.i.bf16 %v17531_v28, %v17529_v27  ;;  %v15212_v32 = vpack.c.bf16 %v17531_v28, %v17529_v27 }
 0x2c6   :  { %16569 = vrot.lane.b32.xlu1 %v16568_v30, %s17310_s22 }
 0x2c7   :  { %16574 = vrot.lane.b32.xlu0 %v16573_v31, %s17310_s22  ;;  %15213 = vmatprep.subr.bf16.mxu1 %v15212_v32 }
 0x2c8   :  { %15215 = vmatpush1.bf16.msra.mxu1 %v15214_v33 }
 0x2ca   :  { %16579 = vrot.lane.b32.xlu1 %v16568_v30, %s17311_s23 }
 0x2cb   :  { %16584 = vrot.lane.b32.xlu0 %v16573_v31, %s17311_s23  ;;  %13420 = vmatmul.mubr.msk.f32.vlgmr.msra.gmra.mrb[4].mxu1 %vm418_vm9, %v641_v34 }
 0x2cc   :  { %719 = vmatprep.mubr.f32.mxu1 %v22748_v1 }
 0x2ce   :  { %902 = vperm.xlu1 %16567, %v898_v35  }
 0x2cf   :  { %907 = vperm.xlu0 %16566, %v899_v36   ;;  %13421 = vmatmul.mubr.msk.f32.gmra.mrb[6].mxu1 %vm418_vm9, %v642_v38 }
 0x2d0   :  { %798 = vmatprep.mubr.f32.mxu1 %v22748_v1 }
 0x2d2   :  { %924 = vperm.xlu1 %16567, %v920_v39  }
 0x2d3   :  { %929 = vperm.xlu0 %16566, %v921_v40  }
 0x338   :  { %v16570_v41 = vpop.permute.xlu1 %16569 }
 0x339   :  { %v16572_v42 = vunpack.i.h.bf16 %v16570_v41  ;;  %v16571_v43 = vunpack.i.l.bf16 %v16570_v41  ;;  %v16575_v44 = vpop.permute.xlu0 %16574 }
 0x33a   :  { %v16577_v45 = vunpack.i.h.bf16 %v16575_v44  ;;  %v16576_v46 = vunpack.i.l.bf16 %v16575_v44 }
 0x33c   :  { %v632_v47 = vsel %vm96_vm5, %v16572_v42, %v16577_v45  ;;  %v631_v48 = vsel %vm96_vm5, %v16571_v43, %v16576_v46  ;;  %v16580_v50 = vpop.permute.xlu1 %16579  ;;  %v633_v52 = vsel %vm96_vm5, %v16576_v46, %v16571_v43  ;;  %v634_v53 = vsel %vm96_vm5, %v16577_v45, %v16572_v42 }
 0x33d   :  { %v16582_v54 = vunpack.i.h.bf16 %v16580_v50  ;;  %v16581_v55 = vunpack.i.l.bf16 %v16580_v50  ;;  %v16585_v56 = vpop.permute.xlu0 %16584  ;;  %v636_v57 = vsel %vm17432_vm6, %v17529_v27, %v633_v52  ;;  %v638_v58 = vsel %vm17432_vm6, %v17531_v28, %v634_v53 }
 0x33e   :  { %v16587_v59 = vunpack.i.h.bf16 %v16585_v56  ;;  %v16586_v60 = vunpack.i.l.bf16 %v16585_v56  ;;  %v15216_v61 = vpack.c.bf16 %v638_v58, %v636_v57  ;;  %v635_v62 = vsel %vm35_vm1, %v17525_v25, %v631_v48  ;;  %v919_v48 = vld [vmem:[%s22743_s1 + $0x88] sm:$0xff] }
 0x33f   :  { %v637_v63 = vsel %vm35_vm1, %v17527_v26, %v632_v47  ;;  %v918_v47 = vld [vmem:[%s22743_s1 + $0x80] sm:$0xff] }
 0x340   :  { %v618_v0 = vsel %vm83_vm7, %v16587_v59, %v16582_v54  ;;  %v617_v2 = vsel %vm83_vm7, %v16586_v60, %v16581_v55  ;;  %15217 = vmatprep.subr.bf16.mxu1 %v15216_v61  ;;  %v15218_v6 = vpack.c.bf16 %v637_v63, %v635_v62  ;;  %v615_v7 = vsel %vm83_vm7, %v16581_v55, %v16586_v60 }
 0x341   :  { %v616_v9 = vsel %vm83_vm7, %v16582_v54, %v16587_v59  ;;  %v620_v10 = vsel %vm17450_vm8, %v17529_v27, %v615_v7  ;;  %v619_v11 = vsel %vm34_vm0, %v17525_v25, %v617_v2  ;;  %v621_v14 = vsel %vm34_vm0, %v17527_v26, %v618_v0 }
 0x342   :  { %15219 = vmatpush1.bf16.msra.mxu1 %v15218_v6  ;;  %v622_v19 = vsel %vm17450_vm8, %v17531_v28, %v616_v9  ;;  %v15222_v20 = vpack.c.bf16 %v621_v14, %v619_v11  ;;  %v1378_v11 = vld [vmem:[%s22744_s2 + $0x90] sm:$0xff]  ;;  %v1379_v14 = vld [vmem:[%s22744_s2 + $0x98] sm:$0xff] }
 0x343   :  { %v15220_v21 = vpack.c.bf16 %v622_v19, %v620_v10  ;;  %v1380_v19 = vld [vmem:[%s22744_s2 + $0xa0] sm:$0xff] }
 0x345   :  { %13422 = vmatmul.mubr.msk.f32.vlgmr.msra.gmra.mrb[4].mxu1 %vm418_vm9, %v726_v16  ;;  %15221 = vmatprep.subr.bf16.mxu1 %v15220_v21  ;;  %v1060_v16 = vld [vmem:[%s22743_s1 + $0xb8] sm:$0xff]  ;;  %v1061_v21 = vld [vmem:[%s22743_s1 + $0xc0] sm:$0xff] }
 0x346   :  { %15223 = vmatpush1.bf16.msra.mxu1 %v15222_v20  ;;  %804 = vmatprep.mubr.f32.mxu1 %v22748_v1  ;;  %v1381_v20 = vld [vmem:[%s22744_s2 + $0xa8] sm:$0xff] }
 0x349   :  { %13423 = vmatmul.mubr.msk.f32.gmra.mrb[6].mxu1 %vm418_vm9, %v727_v22  ;;  %v1422_v22 = vld [vmem:[%s22744_s2 + $0xf0] sm:$0xff] }
 0x34a   :  { %881 = vmatprep.mubr.f32.mxu1 %v22748_v1 }
 0x34d   :  { %13424 = vmatmul.mubr.msk.f32.vlgmr.msra.gmra.mrb[4].mxu1 %vm418_vm9, %v639_v23  ;;  %v17627_v32 = vpop.permute.xlu1 %902  ;;  %v1423_v23 = vld [vmem:[%s22744_s2 + $0xf8] sm:$0xff] }
 0x34e   :  { %887 = vmatprep.mubr.f32.mxu1 %v22748_v1  ;;  %v17630_v34 = vpop.permute.xlu0 %907 }
 0x351   :  { %13425 = vmatmul.mubr.msk.f32.gmra.mrb[6].mxu1 %vm418_vm9, %v640_v24  ;;  %v17645_v50 = vpop.permute.xlu1 %924  ;;  %v1062_v24 = vld [vmem:[%s22743_s1 + $0xc8] sm:$0xff] }
 0x352   :  { %1523 = vmatprep.mubr.f32.mxu1 %v22748_v1  ;;  %v17649_v56 = vpop.permute.xlu0 %929 }
 0x420   :  { %v883_v30 = vpop.f32.mrb[4].mxu1 }
 0x421   :  { %v885_v31 = vpop.f32.mrb[5].mxu1  ;;  %v910_v33 = vadd.f32 %v17627_v32, %v883_v30  ;;  %v1552_v30 = vld [vmem:[%s22744_s2 + $0x110] sm:$0xff] }
 0x422   :  { %v911_v35 = vadd.f32 %v17627_v32, %v885_v31  ;;  %v1553_v31 = vld [vmem:[%s22744_s2 + $0x118] sm:$0xff] }
 0x423   :  { %v914_v41 = vmax.f32 %v910_v33, 0.0  ;;  %v1424_v33 = vld [vmem:[%s22744_s2 + $0x100] sm:$0xff] }
 0x424   :  { %v889_v36 = vpop.f32.mrb[6].mxu1  ;;  %v915_v43 = vmax.f32 %v911_v35, 0.0  ;;  %v1425_v35 = vld [vmem:[%s22744_s2 + $0x108] sm:$0xff] }
 0x425   :  { %v912_v38 = vadd.f32 %v17630_v34, %v889_v36  ;;  %v891_v39 = vpop.f32.mrb[7].mxu1  ;;  %v1554_v36 = vld [vmem:[%s22744_s2 + $0x120] sm:$0xff] }
 0x426   :  { %v913_v40 = vadd.f32 %v17630_v34, %v891_v39 }
 0x427   :  { %v916_v42 = vmax.f32 %v912_v38, 0.0  ;;  %v1555_v38 = vld [vmem:[%s22744_s2 + $0x128] sm:$0xff] }
 0x428   :  { %v917_v44 = vmax.f32 %v913_v40, 0.0 }
 0x429   :  { %v15226_v45 = vpack.c.bf16 %v916_v42, %v914_v41 }
 0x42a   :  { %v15224_v46 = vpack.c.bf16 %v917_v44, %v915_v43 }
 0x42c   :  { %15225 = vmatprep.subr.bf16.mxu0 %v15224_v46 }
 0x42d   :  { %15227 = vmatpush1.bf16.msra.mxu0 %v15226_v45 }
 0x430   :  { %13426 = vmatmul.mubr.msk.f32.vlgmr.msra.gmra.mrb[4].mxu0 %vm418_vm9, %v918_v47 }
 0x431   :  { %1008 = vmatprep.mubr.f32.mxu0 %v22748_v1 }
 0x434   :  { %13427 = vmatmul.mubr.msk.f32.gmra.mrb[6].mxu0 %vm418_vm9, %v919_v48 }
 0x435   :  { %1139 = vmatprep.mubr.f32.mxu0 %v22748_v1 }
 0x503   :  { %v1004_v52 = vpop.f32.mrb[4].mxu0 }
 0x504   :  { %v1005_v53 = vadd.f32 %v1004_v52, %v17645_v50  ;;  %v1006_v54 = vpop.f32.mrb[5].mxu0 }
 0x505   :  { %v1007_v55 = vadd.f32 %v1006_v54, %v17645_v50 }
 0x506   :  { %v1015_v58 = vadd.f32 %v1005_v53, %v17525_v25 }
 0x507   :  { %v1010_v57 = vpop.f32.mrb[6].mxu0  ;;  %v1016_v61 = vadd.f32 %v1007_v55, %v17529_v27 }
 0x508   :  { %v1011_v59 = vadd.f32 %v1010_v57, %v17649_v56  ;;  %v1012_v60 = vpop.f32.mrb[7].mxu0  ;;  %v17657_v2 = vmax.f32 %v1015_v58, 0.0 }
 0x509   :  { %v1013_v62 = vadd.f32 %v1012_v60, %v17649_v56  ;;  %v17661_v7 = vmax.f32 %v1016_v61, 0.0 }
 0x50a   :  { %v1017_v63 = vadd.f32 %v1011_v59, %v17527_v26 }
 0x50b   :  { %v1018_v0 = vadd.f32 %v1013_v62, %v17531_v28  ;;  %v1059_v28 = vld [vmem:[%s22743_s1 + $0xb0] sm:$0xff] }
 0x50c   :  { %v17659_v6 = vmax.f32 %v1017_v63, 0.0 }
 0x50d   :  { %v17663_v9 = vmax.f32 %v1018_v0, 0.0 }
 0x50e   :  { %v16588_v25 = vpack.i.bf16 %v17659_v6, %v17657_v2  ;;  %v17676_v26 = vpack.c.bf16 %v17659_v6, %v17657_v2 }
 0x50f   :  { %v16593_v27 = vpack.i.bf16 %v17663_v9, %v17661_v7  ;;  %v17671_v10 = vpack.c.bf16 %v17663_v9, %v17661_v7 }
 0x510   :  { %16589 = vrot.lane.b32.xlu1 %v16588_v25, %s17310_s22 }
 0x511   :  { %16594 = vrot.lane.b32.xlu0 %v16593_v27, %s17310_s22  ;;  %15229 = vmatprep.subr.bf16.mxu0 %v17671_v10 }
 0x512   :  { %15231 = vmatpush1.bf16.msra.mxu0 %v17676_v26 }
 0x514   :  { %16599 = vrot.lane.b32.xlu1 %v16588_v25, %s17311_s23 }
 0x515   :  { %16604 = vrot.lane.b32.xlu0 %v16593_v27, %s17311_s23  ;;  %13428 = vmatmul.mubr.msk.f32.vlgmr.msra.gmra.mrb[8].mxu0 %vm418_vm9, %v1059_v28 }
 0x516   :  { %1145 = vmatprep.mubr.f32.mxu0 %v22748_v1 }
 0x518   :  { %1384 = vperm.xlu1 %16567, %v1378_v11  }
 0x519   :  { %1389 = vperm.xlu0 %16566, %v1379_v14   ;;  %13429 = vmatmul.mubr.msk.f32.gmra.mrb[10].mxu0 %vm418_vm9, %v1060_v16 }
 0x51a   :  { %1151 = vmatprep.mubr.f32.mxu0 %v22748_v1 }
 0x51c   :  { %1394 = vperm.xlu1 %16567, %v1380_v19  }
 0x51d   :  { %1399 = vperm.xlu0 %16566, %v1381_v20   ;;  %13430 = vmatmul.mubr.msk.f32.gmra.mrb[12].mxu0 %vm418_vm9, %v1061_v21  ;;  %v1164_v20 = vld [vmem:[%s22743_s1 + $0xd0] sm:$0xff] }
 0x51e   :  { %1157 = vmatprep.mubr.f32.mxu0 %v22748_v1 }
 0x520   :  { %1428 = vperm.xlu1 %16567, %v1422_v22  }
 0x521   :  { %1433 = vperm.xlu0 %16566, %v1423_v23   ;;  %13431 = vmatmul.mubr.msk.f32.gmra.mrb[14].mxu0 %vm418_vm9, %v1062_v24  ;;  %v1056_v24 = vld [vmem:[%s22743_s1 + $0x98] sm:$0xff] }
 0x522   :  { %1244 = vmatprep.mubr.f32.mxu0 %v22748_v1 }
 0x524   :  { %1558 = vperm.xlu1 %16567, %v1552_v30   ;;  %v1057_v30 = vld [vmem:[%s22743_s1 + $0xa0] sm:$0xff] }
 0x525   :  { %1563 = vperm.xlu0 %16566, %v1553_v31   ;;  %v1058_v31 = vld [vmem:[%s22743_s1 + $0xa8] sm:$0xff] }
 0x528   :  { %1438 = vperm.xlu1 %16567, %v1424_v33  }
 0x529   :  { %1443 = vperm.xlu0 %16566, %v1425_v35  }
 0x52c   :  { %1568 = vperm.xlu1 %16567, %v1554_v36  }
 0x52d   :  { %1573 = vperm.xlu0 %16566, %v1555_v38  }
 0x582   :  { %v16590_v39 = vpop.permute.xlu1 %16589 }
 0x583   :  { %v16592_v40 = vunpack.i.h.bf16 %v16590_v39  ;;  %v16591_v41 = vunpack.i.l.bf16 %v16590_v39  ;;  %v16595_v42 = vpop.permute.xlu0 %16594 }
 0x584   :  { %v16597_v43 = vunpack.i.h.bf16 %v16595_v42  ;;  %v16596_v44 = vunpack.i.l.bf16 %v16595_v42 }
 0x586   :  { %v1047_v45 = vsel %vm96_vm5, %v16591_v41, %v16596_v44  ;;  %v1048_v46 = vsel %vm96_vm5, %v16592_v40, %v16597_v43  ;;  %v16600_v47 = vpop.permute.xlu1 %16599  ;;  %v1049_v48 = vsel %vm96_vm5, %v16596_v44, %v16591_v41  ;;  %v1050_v52 = vsel %vm96_vm5, %v16597_v43, %v16592_v40 }
 0x587   :  { %v16602_v53 = vunpack.i.h.bf16 %v16600_v47  ;;  %v16601_v54 = vunpack.i.l.bf16 %v16600_v47  ;;  %v16605_v55 = vpop.permute.xlu0 %16604  ;;  %v1052_v57 = vsel %vm17432_vm6, %v17661_v7, %v1049_v48  ;;  %v1054_v58 = vsel %vm17432_vm6, %v17663_v9, %v1050_v52 }
 0x588   :  { %v16607_v59 = vunpack.i.h.bf16 %v16605_v55  ;;  %v16606_v60 = vunpack.i.l.bf16 %v16605_v55  ;;  %v15232_v61 = vpack.c.bf16 %v1054_v58, %v1052_v57  ;;  %v1051_v62 = vsel %vm35_vm1, %v17657_v2, %v1047_v45 }
 0x589   :  { %v1053_v63 = vsel %vm35_vm1, %v17659_v6, %v1048_v46 }
 0x58a   :  { %v1033_v0 = vsel %vm83_vm7, %v16606_v60, %v16601_v54  ;;  %v1034_v25 = vsel %vm83_vm7, %v16607_v59, %v16602_v53  ;;  %15233 = vmatprep.subr.bf16.mxu0 %v15232_v61  ;;  %v15234_v27 = vpack.c.bf16 %v1053_v63, %v1051_v62  ;;  %v1031_v28 = vsel %vm83_vm7, %v16601_v54, %v16606_v60 }
 0x58b   :  { %v1032_v11 = vsel %vm83_vm7, %v16602_v53, %v16607_v59  ;;  %v1036_v14 = vsel %vm17450_vm8, %v17661_v7, %v1031_v28  ;;  %v1035_v16 = vsel %vm34_vm0, %v17657_v2, %v1033_v0  ;;  %v1037_v19 = vsel %vm34_vm0, %v17659_v6, %v1034_v25  ;;  %v1165_v2 = vld [vmem:[%s22743_s1 + $0xd8] sm:$0xff]  ;;  %v1166_v6 = vld [vmem:[%s22743_s1 + $0xe0] sm:$0xff]  ;;  %v1167_v7 = vld [vmem:[%s22743_s1 + $0xe8] sm:$0xff] }
 0x58c   :  { %15235 = vmatpush1.bf16.msra.mxu0 %v15234_v27  ;;  %v1038_v21 = vsel %vm17450_vm8, %v17663_v9, %v1032_v11  ;;  %v15238_v22 = vpack.c.bf16 %v1037_v19, %v1035_v16  ;;  %v1055_v9 = vld [vmem:[%s22743_s1 + $0x90] sm:$0xff] }
 0x58d   :  { %v15236_v23 = vpack.c.bf16 %v1038_v21, %v1036_v14  ;;  %v1418_v19 = vld [vmem:[%s22743_s1 + $0xf0] sm:$0xff]  ;;  %v1420_v21 = vld [vmem:[%s22743_s1 + $0x100] sm:$0xff] }
 0x58f   :  { %13432 = vmatmul.mubr.msk.f32.vlgmr.msra.gmra.mrb[8].mxu0 %vm418_vm9, %v1164_v20  ;;  %15237 = vmatprep.subr.bf16.mxu0 %v15236_v23  ;;  %v1419_v20 = vld [vmem:[%s22743_s1 + $0xf8] sm:$0xff]  ;;  %v1550_v23 = vld [vmem:[%s22743_s1 + $0x120] sm:$0xff] }
 0x590   :  { %15239 = vmatpush1.bf16.msra.mxu0 %v15238_v22  ;;  %1250 = vmatprep.mubr.f32.mxu0 %v22748_v1  ;;  %v1549_v22 = vld [vmem:[%s22743_s1 + $0x118] sm:$0xff] }
 0x593   :  { %13433 = vmatmul.mubr.msk.f32.gmra.mrb[10].mxu0 %vm418_vm9, %v1165_v2  ;;  %v1551_v2 = vld [vmem:[%s22743_s1 + $0x128] sm:$0xff] }
 0x594   :  { %1256 = vmatprep.mubr.f32.mxu0 %v22748_v1 }
 0x597   :  { %13434 = vmatmul.mubr.msk.f32.gmra.mrb[12].mxu0 %vm418_vm9, %v1166_v6  ;;  %v17819_v36 = vpop.permute.xlu1 %1384 }
 0x598   :  { %1262 = vmatprep.mubr.f32.mxu0 %v22748_v1  ;;  %v17822_v39 = vpop.permute.xlu0 %1389 }
 0x59b   :  { %13435 = vmatmul.mubr.msk.f32.gmra.mrb[14].mxu0 %vm418_vm9, %v1167_v7  ;;  %v17827_v55 = vpop.permute.xlu1 %1394 }
 0x59c   :  { %1345 = vmatprep.mubr.f32.mxu0 %v22748_v1  ;;  %v17830_v59 = vpop.permute.xlu0 %1399 }
 0x59f   :  { %13436 = vmatmul.mubr.msk.f32.vlgmr.msra.gmra.mrb[8].mxu0 %vm418_vm9, %v1055_v9  ;;  %v1429_v6 = vpop.permute.xlu1 %1428 }
 0x5a0   :  { %1351 = vmatprep.mubr.f32.mxu0 %v22748_v1  ;;  %v1434_v7 = vpop.permute.xlu0 %1433 }
 0x5a3   :  { %13437 = vmatmul.mubr.msk.f32.gmra.mrb[10].mxu0 %vm418_vm9, %v1056_v24  ;;  %v1559_v9 = vpop.permute.xlu1 %1558 }
 0x5a4   :  { %1357 = vmatprep.mubr.f32.mxu0 %v22748_v1  ;;  %v1564_v24 = vpop.permute.xlu0 %1563 }
 0x5a7   :  { %13438 = vmatmul.mubr.msk.f32.gmra.mrb[12].mxu0 %vm418_vm9, %v1057_v30  ;;  %v1439_v30 = vpop.permute.xlu1 %1438 }
 0x5a8   :  { %1363 = vmatprep.mubr.f32.mxu0 %v22748_v1 }
 0x5ab   :  { %13439 = vmatmul.mubr.msk.f32.gmra.mrb[14].mxu0 %vm418_vm9, %v1058_v31 }
 0x5ac   :  { %2433 = vmatprep.mubr.f32.mxu0 %v22748_v1 }
 0x672   :  { %v1347_v33 = vpop.f32.mrb[8].mxu0 }
 0x673   :  { %v1349_v35 = vpop.f32.mrb[9].mxu0  ;;  %v1402_v38 = vadd.f32 %v17819_v36, %v1347_v33  ;;  %v17877_v33 = vadd.f32 %v1559_v9, %v1429_v6  ;;  %v1765_v9 = vld [vmem:[%s22743_s1 + $0x170] sm:$0xff] }
 0x674   :  { %v1403_v40 = vadd.f32 %v17819_v36, %v1349_v35 }
 0x675   :  { %v1410_v45 = vmax.f32 %v1402_v38, 0.0  ;;  %v1444_v38 = vpop.permute.xlu0 %1443 }
 0x676   :  { %v1353_v41 = vpop.f32.mrb[10].mxu0  ;;  %v1411_v47 = vmax.f32 %v1403_v40, 0.0  ;;  %v17879_v40 = vadd.f32 %v1564_v24, %v1434_v7  ;;  %v1766_v24 = vld [vmem:[%s22743_s1 + $0x178] sm:$0xff] }
 0x677   :  { %v1404_v42 = vadd.f32 %v17822_v39, %v1353_v41  ;;  %v1355_v43 = vpop.f32.mrb[11].mxu0 }
 0x678   :  { %v1405_v44 = vadd.f32 %v17822_v39, %v1355_v43 }
 0x679   :  { %v1412_v46 = vmax.f32 %v1404_v42, 0.0 }
 0x67a   :  { %v1413_v48 = vmax.f32 %v1405_v44, 0.0  ;;  %v1359_v52 = vpop.f32.mrb[12].mxu0 }
 0x67b   :  { %v15242_v53 = vpack.c.bf16 %v1412_v46, %v1410_v45  ;;  %v1361_v54 = vpop.f32.mrb[13].mxu0  ;;  %v1406_v58 = vadd.f32 %v17827_v55, %v1359_v52  ;;  %v1569_v46 = vpop.permute.xlu1 %1568 }
 0x67c   :  { %v15240_v57 = vpack.c.bf16 %v1413_v48, %v1411_v47  ;;  %v1407_v60 = vadd.f32 %v17827_v55, %v1361_v54 }
 0x67d   :  { %v1414_v25 = vmax.f32 %v1406_v58, 0.0 }
 0x67e   :  { %v1365_v61 = vpop.f32.mrb[14].mxu0  ;;  %15241 = vmatprep.subr.bf16.mxu1 %v15240_v57  ;;  %v1415_v28 = vmax.f32 %v1407_v60, 0.0  ;;  %v17893_v60 = vadd.f32 %v1569_v46, %v1439_v30  ;;  %v2208_v30 = vld [vmem:[%s22744_s2 + $0x130] sm:$0xff]  ;;  %v2214_v46 = vld [vmem:[%s22744_s2 + $0x160] sm:$0xff] }
 0x67f   :  { %v1408_v62 = vadd.f32 %v17830_v59, %v1365_v61  ;;  %v1367_v63 = vpop.f32.mrb[15].mxu0  ;;  %15243 = vmatpush1.bf16.msra.mxu1 %v15242_v53  ;;  %v1574_v53 = vpop.permute.xlu0 %1573 }
 0x680   :  { %v1409_v0 = vadd.f32 %v17830_v59, %v1367_v63 }
 0x681   :  { %v1416_v27 = vmax.f32 %v1408_v62, 0.0 }
 0x682   :  { %v1417_v11 = vmax.f32 %v1409_v0, 0.0 }
 0x683   :  { %v15246_v14 = vpack.c.bf16 %v1416_v27, %v1414_v25  ;;  %v17903_v25 = vadd.f32 %v1574_v53, %v1444_v38  ;;  %v2210_v38 = vld [vmem:[%s22744_s2 + $0x140] sm:$0xff]  ;;  %v1770_v53 = vld [vmem:[%s22743_s1 + $0x198] sm:$0xff] }
 0x684   :  { %v15244_v16 = vpack.c.bf16 %v1417_v11, %v1415_v28 }
 0x686   :  { %15245 = vmatprep.subr.bf16.mxu1 %v15244_v16 }
 0x687   :  { %15247 = vmatpush1.bf16.msra.mxu1 %v15246_v14 }
 0x688   :  { %15249 = vmatprep.subr.bf16.mxu1 %v17671_v10  ;;  %v1421_v10 = vld [vmem:[%s22743_s1 + $0x108] sm:$0xff] }
 0x68a   :  { %13440 = vmatmul.mubr.msk.f32.vlgmr.msra.gmra.mrb[8].mxu1 %vm1446_vm10, %v1418_v19 }
 0x68b   :  { %15251 = vmatpush1.bf16.msra.mxu1 %v17676_v26  ;;  %1529 = vmatprep.mubr.f32.mxu1 %v22748_v1  ;;  %v1548_v26 = vld [vmem:[%s22743_s1 + $0x110] sm:$0xff] }
 0x68e   :  { %13441 = vmatmul.mubr.msk.f32.gmra.mrb[10].mxu1 %vm1446_vm10, %v1419_v20 }
 0x68f   :  { %1535 = vmatprep.mubr.f32.mxu1 %v22748_v1 }
 0x692   :  { %13442 = vmatmul.mubr.msk.f32.gmra.mrb[12].mxu1 %vm1446_vm10, %v1420_v21 }
 0x693   :  { %1541 = vmatprep.mubr.f32.mxu1 %v22748_v1 }
 0x696   :  { %13443 = vmatmul.mubr.msk.f32.gmra.mrb[14].mxu1 %vm1446_vm10, %v1421_v10 }
 0x697   :  { %1652 = vmatprep.mubr.f32.mxu1 %v22748_v1 }
 0x69a   :  { %13444 = vmatmul.mubr.msk.f32.vlgmr.msra.gmra.mrb[8].mxu1 %vm418_vm9, %v1548_v26 }
 0x69b   :  { %1658 = vmatprep.mubr.f32.mxu1 %v22748_v1 }
 0x69e   :  { %13445 = vmatmul.mubr.msk.f32.gmra.mrb[10].mxu1 %vm418_vm9, %v1549_v22 }
 0x69f   :  { %1664 = vmatprep.mubr.f32.mxu1 %v22748_v1 }
 0x6a2   :  { %13446 = vmatmul.mubr.msk.f32.gmra.mrb[12].mxu1 %vm418_vm9, %v1550_v23 }
 0x6a3   :  { %1670 = vmatprep.mubr.f32.mxu1 %v22748_v1 }
 0x6a6   :  { %13447 = vmatmul.mubr.msk.f32.gmra.mrb[14].mxu1 %vm418_vm9, %v1551_v2 }
 0x6a7   :  { %1861 = vmatprep.mubr.f32.mxu1 %v22748_v1 }
 0x76d   :  { %v1654_v31 = vpop.f32.mrb[8].mxu1 }
 0x76e   :  { %v1656_v35 = vpop.f32.mrb[9].mxu1  ;;  %v16025_v41 = vadd.f32 %v17877_v33, %v1654_v31  ;;  %v2209_v31 = vld [vmem:[%s22744_s2 + $0x138] sm:$0xff] }
 0x76f   :  { %v16027_v42 = vadd.f32 %v17877_v33, %v1656_v35  ;;  %v1767_v35 = vld [vmem:[%s22743_s1 + $0x180] sm:$0xff] }
 0x770   :  { %v17885_v48 = vmax.f32 %v16025_v41, 0.0  ;;  %v2211_v41 = vld [vmem:[%s22744_s2 + $0x148] sm:$0xff] }
 0x771   :  { %v1660_v43 = vpop.f32.mrb[10].mxu1  ;;  %v17889_v54 = vmax.f32 %v16027_v42, 0.0  ;;  %v1768_v42 = vld [vmem:[%s22743_s1 + $0x188] sm:$0xff] }
 0x772   :  { %v16029_v44 = vadd.f32 %v17879_v40, %v1660_v43  ;;  %v1662_v45 = vpop.f32.mrb[11].mxu1  ;;  %v2212_v43 = vld [vmem:[%s22744_s2 + $0x150] sm:$0xff] }
 0x773   :  { %v16031_v47 = vadd.f32 %v17879_v40, %v1662_v45  ;;  %v1769_v45 = vld [vmem:[%s22743_s1 + $0x190] sm:$0xff] }
 0x774   :  { %v17887_v52 = vmax.f32 %v16029_v44, 0.0  ;;  %v2213_v44 = vld [vmem:[%s22744_s2 + $0x158] sm:$0xff] }
 0x775   :  { %v17891_v57 = vmax.f32 %v16031_v47, 0.0  ;;  %v1666_v58 = vpop.f32.mrb[12].mxu1  ;;  %v2215_v47 = vld [vmem:[%s22744_s2 + $0x168] sm:$0xff] }
 0x776   :  { %v1668_v61 = vpop.f32.mrb[13].mxu1  ;;  %v16608_v62 = vpack.i.bf16 %v17887_v52, %v17885_v48  ;;  %v16033_v27 = vadd.f32 %v17893_v60, %v1666_v58  ;;  %v17909_v28 = vpack.c.bf16 %v17887_v52, %v17885_v48  ;;  %v2296_v58 = vld [vmem:[%s22744_s2 + $0x1f0] sm:$0xff] }
 0x777   :  { %v16613_v63 = vpack.i.bf16 %v17891_v57, %v17889_v54  ;;  %v17901_v0 = vpack.c.bf16 %v17891_v57, %v17889_v54  ;;  %v16035_v11 = vadd.f32 %v17893_v60, %v1668_v61  ;;  %v2297_v61 = vld [vmem:[%s22744_s2 + $0x1f8] sm:$0xff] }
 0x778   :  { %16609 = vrot.lane.b32.xlu1 %v16608_v62, %s17310_s22  ;;  %v17917_v21 = vmax.f32 %v16033_v27, 0.0  ;;  %v2491_v27 = vld [vmem:[%s22744_s2 + $0x238] sm:$0xff] }
 0x779   :  { %16614 = vrot.lane.b32.xlu0 %v16613_v63, %s17310_s22  ;;  %v1672_v14 = vpop.f32.mrb[14].mxu1  ;;  %15253 = vmatprep.subr.bf16.mxu1 %v17901_v0  ;;  %v17921_v26 = vmax.f32 %v16035_v11, 0.0  ;;  %v1772_v11 = vld [vmem:[%s22743_s1 + $0x1a8] sm:$0xff] }
 0x77a   :  { %v16037_v16 = vadd.f32 %v17903_v25, %v1672_v14  ;;  %v1674_v19 = vpop.f32.mrb[15].mxu1  ;;  %15255 = vmatpush1.bf16.msra.mxu1 %v17909_v28  ;;  %v2298_v14 = vld [vmem:[%s22744_s2 + $0x200] sm:$0xff] }
 0x77b   :  { %v16039_v20 = vadd.f32 %v17903_v25, %v1674_v19  ;;  %v2492_v19 = vld [vmem:[%s22744_s2 + $0x240] sm:$0xff] }
 0x77c   :  { %v17919_v10 = vmax.f32 %v16037_v16, 0.0  ;;  %v2299_v16 = vld [vmem:[%s22744_s2 + $0x208] sm:$0xff] }
 0x77d   :  { %v17923_v22 = vmax.f32 %v16039_v20, 0.0  ;;  %v2493_v20 = vld [vmem:[%s22744_s2 + $0x248] sm:$0xff] }
 0x77e   :  { %v16618_v23 = vpack.i.bf16 %v17919_v10, %v17917_v21  ;;  %v17936_v7 = vpack.c.bf16 %v17919_v10, %v17917_v21 }
 0x77f   :  { %v16623_v2 = vpack.i.bf16 %v17923_v22, %v17921_v26  ;;  %v17931_v6 = vpack.c.bf16 %v17923_v22, %v17921_v26 }
 0x780   :  { %16619 = vrot.lane.b32.xlu1 %v16618_v23, %s17310_s22 }
 0x781   :  { %16624 = vrot.lane.b32.xlu0 %v16623_v2, %s17310_s22  ;;  %15257 = vmatprep.subr.bf16.mxu1 %v17931_v6 }
 0x782   :  { %15259 = vmatpush1.bf16.msra.mxu1 %v17936_v7 }
 0x784   :  { %16629 = vrot.lane.b32.xlu1 %v16608_v62, %s17311_s23  ;;  %v1771_v62 = vld [vmem:[%s22743_s1 + $0x1a0] sm:$0xff] }
 0x785   :  { %16634 = vrot.lane.b32.xlu0 %v16613_v63, %s17311_s23  ;;  %13448 = vmatmul.mubr.msk.f32.vlgmr.msra.gmra.mrb[16].mxu1 %vm1446_vm10, %v1765_v9  ;;  %v2490_v63 = vld [vmem:[%s22744_s2 + $0x230] sm:$0xff] }
 0x786   :  { %1867 = vmatprep.mubr.f32.mxu1 %v22748_v1  ;;  %v2494_v9 = vld [vmem:[%s22744_s2 + $0x250] sm:$0xff] }
 0x788   :  { %16639 = vrot.lane.b32.xlu1 %v16618_v23, %s17311_s23  ;;  %v2300_v23 = vld [vmem:[%s22744_s2 + $0x210] sm:$0xff] }
 0x789   :  { %16644 = vrot.lane.b32.xlu0 %v16623_v2, %s17311_s23  ;;  %13449 = vmatmul.mubr.msk.f32.gmra.mrb[18].mxu1 %vm1446_vm10, %v1766_v24  ;;  %v2301_v2 = vld [vmem:[%s22744_s2 + $0x218] sm:$0xff] }
 0x78a   :  { %1873 = vmatprep.mubr.f32.mxu1 %v22748_v1  ;;  %v2495_v24 = vld [vmem:[%s22744_s2 + $0x258] sm:$0xff] }
 0x78c   :  { %2218 = vperm.xlu1 %16567, %v2208_v30   ;;  %v2302_v30 = vld [vmem:[%s22744_s2 + $0x220] sm:$0xff] }
 0x78d   :  { %2223 = vperm.xlu0 %16566, %v2209_v31   ;;  %13450 = vmatmul.mubr.msk.f32.gmra.mrb[20].mxu1 %vm1446_vm10, %v1767_v35  ;;  %v2303_v31 = vld [vmem:[%s22744_s2 + $0x228] sm:$0xff]  ;;  %v2496_v35 = vld [vmem:[%s22744_s2 + $0x260] sm:$0xff] }
 0x78e   :  { %1879 = vmatprep.mubr.f32.mxu1 %v22748_v1 }
 0x790   :  { %2228 = vperm.xlu1 %16567, %v2210_v38   ;;  %v2497_v38 = vld [vmem:[%s22744_s2 + $0x268] sm:$0xff] }
 0x791   :  { %2233 = vperm.xlu0 %16566, %v2211_v41   ;;  %13451 = vmatmul.mubr.msk.f32.gmra.mrb[22].mxu1 %vm1446_vm10, %v1768_v42 }
 0x792   :  { %1885 = vmatprep.mubr.f32.mxu1 %v22748_v1 }
 0x794   :  { %2238 = vperm.xlu1 %16567, %v2212_v43  }
 0x795   :  { %2243 = vperm.xlu0 %16566, %v2213_v44   ;;  %13452 = vmatmul.mubr.msk.f32.gmra.mrb[24].mxu1 %vm1446_vm10, %v1769_v45 }
 0x796   :  { %1891 = vmatprep.mubr.f32.mxu1 %v22748_v1 }
 0x798   :  { %2248 = vperm.xlu1 %16567, %v2214_v46  }
 0x799   :  { %2253 = vperm.xlu0 %16566, %v2215_v47   ;;  %13453 = vmatmul.mubr.msk.f32.gmra.mrb[26].mxu1 %vm1446_vm10, %v1770_v53 }
 0x79a   :  { %1897 = vmatprep.mubr.f32.mxu1 %v22748_v1 }
 0x79c   :  { %2306 = vperm.xlu1 %16567, %v2296_v58  }
 0x79d   :  { %2311 = vperm.xlu0 %16566, %v2297_v61   ;;  %13454 = vmatmul.mubr.msk.f32.gmra.mrb[28].mxu1 %vm1446_vm10, %v1771_v62 }
 0x79e   :  { %1903 = vmatprep.mubr.f32.mxu1 %v22748_v1 }
 0x7a0   :  { %2500 = vperm.xlu1 %16567, %v2490_v63  }
 0x7a1   :  { %2505 = vperm.xlu0 %16566, %v2491_v27   ;;  %13455 = vmatmul.mubr.msk.f32.gmra.mrb[30].mxu1 %vm1446_vm10, %v1772_v11 }
 0x7a2   :  { %2006 = vmatprep.mubr.f32.mxu1 %v22748_v1 }
 0x7a4   :  { %2316 = vperm.xlu1 %16567, %v2298_v14  }
 0x7a5   :  { %2321 = vperm.xlu0 %16566, %v2299_v16  }
 0x7a8   :  { %2510 = vperm.xlu1 %16567, %v2492_v19  }
 0x7a9   :  { %2515 = vperm.xlu0 %16566, %v2493_v20  }
 0x7ac   :  { %2326 = vperm.xlu1 %16567, %v2300_v23  }
 0x7ad   :  { %2331 = vperm.xlu0 %16566, %v2301_v2  }
 0x7b0   :  { %2520 = vperm.xlu1 %16567, %v2494_v9  }
 0x7b1   :  { %2525 = vperm.xlu0 %16566, %v2495_v24  }
 0x7b4   :  { %2336 = vperm.xlu1 %16567, %v2302_v30  }
 0x7b5   :  { %2341 = vperm.xlu0 %16566, %v2303_v31  }
 0x7b8   :  { %2530 = vperm.xlu1 %16567, %v2496_v35  }
 0x7b9   :  { %2535 = vperm.xlu0 %16566, %v2497_v38  }
 0x7ea   :  { %v16610_v41 = vpop.permute.xlu1 %16609 }
 0x7eb   :  { %v16612_v42 = vunpack.i.h.bf16 %v16610_v41  ;;  %v16611_v43 = vunpack.i.l.bf16 %v16610_v41  ;;  %v16615_v44 = vpop.permute.xlu0 %16614 }
 0x7ec   :  { %v16617_v45 = vunpack.i.h.bf16 %v16615_v44  ;;  %v16616_v46 = vunpack.i.l.bf16 %v16615_v44 }
 0x7ee   :  { %v1742_v47 = vsel %vm96_vm5, %v16612_v42, %v16617_v45  ;;  %v1741_v53 = vsel %vm96_vm5, %v16611_v43, %v16616_v46  ;;  %v1745_v58 = vsel %vm96_vm5, %v16616_v46, %v16611_v43  ;;  %v1746_v61 = vsel %vm96_vm5, %v16617_v45, %v16612_v42 }
 0x7ef   :  { %v1750_v62 = vsel %vm17432_vm6, %v17889_v54, %v1745_v58  ;;  %v1752_v63 = vsel %vm17432_vm6, %v17891_v57, %v1746_v61  ;;  %v1749_v27 = vsel %vm35_vm1, %v17885_v48, %v1741_v53  ;;  %v1751_v11 = vsel %vm35_vm1, %v17887_v52, %v1742_v47 }
 0x7f0   :  { %v15260_v14 = vpack.c.bf16 %v1752_v63, %v1750_v62  ;;  %v15262_v16 = vpack.c.bf16 %v1751_v11, %v1749_v27 }
 0x7f2   :  { %v16620_v19 = vpop.permute.xlu1 %16619  ;;  %15261 = vmatprep.subr.bf16.mxu1 %v15260_v14 }
 0x7f3   :  { %v16622_v20 = vunpack.i.h.bf16 %v16620_v19  ;;  %v16621_v23 = vunpack.i.l.bf16 %v16620_v19  ;;  %v16625_v2 = vpop.permute.xlu0 %16624  ;;  %15263 = vmatpush1.bf16.msra.mxu1 %v15262_v16 }
 0x7f4   :  { %v16627_v9 = vunpack.i.h.bf16 %v16625_v2  ;;  %v16626_v24 = vunpack.i.l.bf16 %v16625_v2 }
 0x7f6   :  { %v1744_v30 = vsel %vm96_vm5, %v16622_v20, %v16627_v9  ;;  %v1743_v31 = vsel %vm96_vm5, %v16621_v23, %v16626_v24  ;;  %v16630_v35 = vpop.permute.xlu1 %16629  ;;  %v1747_v38 = vsel %vm96_vm5, %v16626_v24, %v16621_v23  ;;  %v1748_v41 = vsel %vm96_vm5, %v16627_v9, %v16622_v20 }
 0x7f7   :  { %v16632_v42 = vunpack.i.h.bf16 %v16630_v35  ;;  %v16631_v43 = vunpack.i.l.bf16 %v16630_v35  ;;  %v16635_v44 = vpop.permute.xlu0 %16634  ;;  %v1754_v45 = vsel %vm17432_vm6, %v17921_v26, %v1747_v38  ;;  %v1756_v46 = vsel %vm17432_vm6, %v17923_v22, %v1748_v41 }
 0x7f8   :  { %v16637_v47 = vunpack.i.h.bf16 %v16635_v44  ;;  %v16636_v53 = vunpack.i.l.bf16 %v16635_v44  ;;  %v15264_v58 = vpack.c.bf16 %v1756_v46, %v1754_v45  ;;  %v1753_v61 = vsel %vm35_vm1, %v17917_v21, %v1743_v31  ;;  %v1910_v31 = vld [vmem:[%s22743_s1 + $0x1b0] sm:$0xff]  ;;  %v1911_v46 = vld [vmem:[%s22743_s1 + $0x1b8] sm:$0xff] }
 0x7f9   :  { %v1755_v62 = vsel %vm35_vm1, %v17919_v10, %v1744_v30 }
 0x7fa   :  { %v1714_v63 = vsel %vm83_vm7, %v16637_v47, %v16632_v42  ;;  %v1713_v27 = vsel %vm83_vm7, %v16636_v53, %v16631_v43  ;;  %v16640_v11 = vpop.permute.xlu1 %16639  ;;  %15265 = vmatprep.subr.bf16.mxu1 %v15264_v58  ;;  %v15266_v14 = vpack.c.bf16 %v1755_v62, %v1753_v61  ;;  %v1709_v16 = vsel %vm83_vm7, %v16631_v43, %v16636_v53  ;;  %v1915_v61 = vld [vmem:[%s22743_s1 + $0x1d8] sm:$0xff]  ;;  %v1916_v62 = vld [vmem:[%s22743_s1 + $0x1e0] sm:$0xff] }
 0x7fb   :  { %v16642_v19 = vunpack.i.h.bf16 %v16640_v11  ;;  %v16641_v20 = vunpack.i.l.bf16 %v16640_v11  ;;  %v16645_v23 = vpop.permute.xlu0 %16644  ;;  %v1710_v2 = vsel %vm83_vm7, %v16632_v42, %v16637_v47  ;;  %v1718_v9 = vsel %vm17450_vm8, %v17889_v54, %v1709_v16  ;;  %v1758_v11 = vld [vmem:[%s22743_s1 + $0x138] sm:$0xff]  ;;  %v1760_v16 = vld [vmem:[%s22743_s1 + $0x148] sm:$0xff] }
 0x7fc   :  { %v16647_v24 = vunpack.i.h.bf16 %v16645_v23  ;;  %v16646_v30 = vunpack.i.l.bf16 %v16645_v23  ;;  %15267 = vmatpush1.bf16.msra.mxu1 %v15266_v14  ;;  %v1720_v35 = vsel %vm17450_vm8, %v17891_v57, %v1710_v2  ;;  %v1717_v38 = vsel %vm34_vm0, %v17885_v48, %v1713_v27  ;;  %v1757_v27 = vld [vmem:[%s22743_s1 + $0x130] sm:$0xff]  ;;  %v1759_v14 = vld [vmem:[%s22743_s1 + $0x140] sm:$0xff]  ;;  %v1764_v2 = vld [vmem:[%s22743_s1 + $0x168] sm:$0xff] }
 0x7fd   :  { %v15268_v41 = vpack.c.bf16 %v1720_v35, %v1718_v9  ;;  %v1719_v54 = vsel %vm34_vm0, %v17887_v52, %v1714_v63  ;;  %v1917_v63 = vld [vmem:[%s22743_s1 + $0x1e8] sm:$0xff]  ;;  %v1763_v23 = vld [vmem:[%s22743_s1 + $0x160] sm:$0xff] }
 0x7fe   :  { %v1716_v42 = vsel %vm83_vm7, %v16647_v24, %v16642_v19  ;;  %v1715_v43 = vsel %vm83_vm7, %v16646_v30, %v16641_v20  ;;  %v15270_v44 = vpack.c.bf16 %v1719_v54, %v1717_v38  ;;  %v1711_v45 = vsel %vm83_vm7, %v16641_v20, %v16646_v30  ;;  %v1762_v20 = vld [vmem:[%s22743_s1 + $0x158] sm:$0xff] }
 0x7ff   :  { %13456 = vmatmul.mubr.msk.f32.vlgmr.msra.gmra.mrb[16].mxu1 %vm1446_vm10, %v1910_v31  ;;  %15269 = vmatprep.subr.bf16.mxu1 %v15268_v41  ;;  %v1712_v48 = vsel %vm83_vm7, %v16642_v19, %v16647_v24  ;;  %v1722_v52 = vsel %vm17450_vm8, %v17921_v26, %v1711_v45  ;;  %v1721_v57 = vsel %vm34_vm0, %v17917_v21, %v1715_v43  ;;  %v1912_v21 = vld [vmem:[%s22743_s1 + $0x1c0] sm:$0xff]  ;;  %v1761_v19 = vld [vmem:[%s22743_s1 + $0x150] sm:$0xff] }
 0x800   :  { %15271 = vmatpush1.bf16.msra.mxu1 %v15270_v44  ;;  %2012 = vmatprep.mubr.f32.mxu1 %v22748_v1  ;;  %v1724_v47 = vsel %vm17450_vm8, %v17923_v22, %v1712_v48  ;;  %v1723_v53 = vsel %vm34_vm0, %v17919_v10, %v1716_v42  ;;  %v1913_v10 = vld [vmem:[%s22743_s1 + $0x1c8] sm:$0xff]  ;;  %v1914_v22 = vld [vmem:[%s22743_s1 + $0x1d0] sm:$0xff] }
 0x801   :  { %v15272_v26 = vpack.c.bf16 %v1724_v47, %v1722_v52  ;;  %v15274_v58 = vpack.c.bf16 %v1723_v53, %v1721_v57 }
 0x803   :  { %13457 = vmatmul.mubr.msk.f32.gmra.mrb[18].mxu1 %vm1446_vm10, %v1911_v46  ;;  %15273 = vmatprep.subr.bf16.mxu1 %v15272_v26 }
 0x804   :  { %15275 = vmatpush1.bf16.msra.mxu1 %v15274_v58  ;;  %2018 = vmatprep.mubr.f32.mxu1 %v22748_v1 }
 0x807   :  { %13458 = vmatmul.mubr.msk.f32.gmra.mrb[20].mxu1 %vm1446_vm10, %v1912_v21 }
 0x808   :  { %2024 = vmatprep.mubr.f32.mxu1 %v22748_v1 }
 0x80b   :  { %13459 = vmatmul.mubr.msk.f32.gmra.mrb[22].mxu1 %vm1446_vm10, %v1913_v10  ;;  %v18217_v30 = vpop.permute.xlu1 %2218 }
 0x80c   :  { %2030 = vmatprep.mubr.f32.mxu1 %v22748_v1  ;;  %v18220_v35 = vpop.permute.xlu0 %2223 }
 0x80f   :  { %13460 = vmatmul.mubr.msk.f32.gmra.mrb[24].mxu1 %vm1446_vm10, %v1914_v22  ;;  %v18225_v53 = vpop.permute.xlu1 %2228 }
 0x810   :  { %2036 = vmatprep.mubr.f32.mxu1 %v22748_v1  ;;  %22930 = vst [vmem:[#allocation2_spill] sm:$0xff] %v18225_v53  ;;  %v18228_v21 = vpop.permute.xlu0 %2233 }
 0x811   :  { %22931 = vst [vmem:[#allocation3_spill] sm:$0xff] %v18228_v21 }
 0x813   :  { %13461 = vmatmul.mubr.msk.f32.gmra.mrb[26].mxu1 %vm1446_vm10, %v1915_v61 }
 0x814   :  { %2042 = vmatprep.mubr.f32.mxu1 %v22748_v1 }
 0x817   :  { %13462 = vmatmul.mubr.msk.f32.gmra.mrb[28].mxu1 %vm1446_vm10, %v1916_v62 }
 0x818   :  { %2048 = vmatprep.mubr.f32.mxu1 %v22748_v1 }
 0x81b   :  { %13463 = vmatmul.mubr.msk.f32.gmra.mrb[30].mxu1 %vm1446_vm10, %v1917_v63 }
 0x81c   :  { %2143 = vmatprep.mubr.f32.mxu1 %v22748_v1 }
 0x81f   :  { %13464 = vmatmul.mubr.msk.f32.vlgmr.msra.gmra.mrb[16].mxu1 %vm1446_vm10, %v1757_v27 }
 0x820   :  { %2149 = vmatprep.mubr.f32.mxu1 %v22748_v1 }
 0x823   :  { %13465 = vmatmul.mubr.msk.f32.gmra.mrb[18].mxu1 %vm1446_vm10, %v1758_v11 }
 0x824   :  { %2155 = vmatprep.mubr.f32.mxu1 %v22748_v1 }
 0x827   :  { %13466 = vmatmul.mubr.msk.f32.gmra.mrb[20].mxu1 %vm1446_vm10, %v1759_v14 }
 0x828   :  { %2161 = vmatprep.mubr.f32.mxu1 %v22748_v1 }
 0x82b   :  { %13467 = vmatmul.mubr.msk.f32.gmra.mrb[22].mxu1 %vm1446_vm10, %v1760_v16 }
 0x82c   :  { %2167 = vmatprep.mubr.f32.mxu1 %v22748_v1 }
 0x82f   :  { %13468 = vmatmul.mubr.msk.f32.gmra.mrb[24].mxu1 %vm1446_vm10, %v1761_v19 }
 0x830   :  { %2173 = vmatprep.mubr.f32.mxu1 %v22748_v1 }
 0x833   :  { %13469 = vmatmul.mubr.msk.f32.gmra.mrb[26].mxu1 %vm1446_vm10, %v1762_v20 }
 0x834   :  { %2179 = vmatprep.mubr.f32.mxu1 %v22748_v1 }
 0x837   :  { %13470 = vmatmul.mubr.msk.f32.gmra.mrb[28].mxu1 %vm1446_vm10, %v1763_v23 }
 0x838   :  { %2185 = vmatprep.mubr.f32.mxu1 %v22748_v1 }
 0x83b   :  { %13471 = vmatmul.mubr.msk.f32.gmra.mrb[30].mxu1 %vm1446_vm10, %v1764_v2  ;;  %v18233_v2 = vpop.permute.xlu1 %2238 }
 0x83c   :  { %3510 = vmatprep.mubr.f32.mxu1 %v22748_v1  ;;  %22932 = vst [vmem:[#allocation4_spill] sm:$0xff] %v18233_v2 }
 0x8f2   :  { %v2145_v9 = vpop.f32.mrb[16].mxu1 }
 0x8f3   :  { %v2147_v24 = vpop.f32.mrb[17].mxu1  ;;  %v2256_v31 = vadd.f32 %v18217_v30, %v2145_v9 }
 0x8f4   :  { %v2257_v38 = vadd.f32 %v18217_v30, %v2147_v24 }
 0x8f5   :  { %v2272_v44 = vmax.f32 %v2256_v31, 0.0  ;;  %v18236_v31 = vpop.permute.xlu0 %2243 }
 0x8f6   :  { %v2151_v41 = vpop.f32.mrb[18].mxu1  ;;  %v2273_v48 = vmax.f32 %v2257_v38, 0.0  ;;  %22933 = vst [vmem:[#allocation5_spill] sm:$0xff] %v18236_v31 }
 0x8f7   :  { %v2258_v54 = vadd.f32 %v18220_v35, %v2151_v41  ;;  %v2153_v42 = vpop.f32.mrb[19].mxu1 }
 0x8f8   :  { %v2259_v43 = vadd.f32 %v18220_v35, %v2153_v42 }
 0x8f9   :  { %v2274_v45 = vmax.f32 %v2258_v54, 0.0 }
 0x8fa   :  { %v2275_v52 = vmax.f32 %v2259_v43, 0.0  ;;  %v2157_v57 = vpop.f32.mrb[20].mxu1 }
 0x8fb   :  { %v15278_v46 = vpack.c.bf16 %v2274_v45, %v2272_v44  ;;  %v2159_v47 = vpop.f32.mrb[21].mxu1  ;;  %v2260_v58 = vadd.f32 %v18225_v53, %v2157_v57 }
 0x8fc   :  { %v15276_v26 = vpack.c.bf16 %v2275_v52, %v2273_v48  ;;  %v2261_v10 = vadd.f32 %v18225_v53, %v2159_v47 }
 0x8fd   :  { %v2276_v27 = vmax.f32 %v2260_v58, 0.0 }
 0x8fe   :  { %v2163_v22 = vpop.f32.mrb[22].mxu1  ;;  %15277 = vmatprep.subr.bf16.mxu0 %v15276_v26  ;;  %v2277_v14 = vmax.f32 %v2261_v10, 0.0  ;;  %v18241_v26 = vpop.permute.xlu1 %2248 }
 0x8ff   :  { %v2262_v61 = vadd.f32 %v18228_v21, %v2163_v22  ;;  %v2165_v62 = vpop.f32.mrb[23].mxu1  ;;  %15279 = vmatpush1.bf16.msra.mxu0 %v15278_v46  ;;  %22934 = vst [vmem:[#allocation6_spill] sm:$0xff] %v18241_v26  ;;  %v18244_v22 = vpop.permute.xlu0 %2253 }
 0x900   :  { %v2263_v63 = vadd.f32 %v18228_v21, %v2165_v62  ;;  %22935 = vst [vmem:[#allocation7_spill] sm:$0xff] %v18244_v22 }
 0x901   :  { %v2278_v11 = vmax.f32 %v2262_v61, 0.0 }
 0x902   :  { %v2279_v16 = vmax.f32 %v2263_v63, 0.0  ;;  %v2169_v19 = vpop.f32.mrb[24].mxu1 }
 0x903   :  { %v15282_v20 = vpack.c.bf16 %v2278_v11, %v2276_v27  ;;  %v2171_v23 = vpop.f32.mrb[25].mxu1  ;;  %v2264_v24 = vadd.f32 %v18233_v2, %v2169_v19 }
 0x904   :  { %v15280_v9 = vpack.c.bf16 %v2279_v16, %v2277_v14  ;;  %v2265_v38 = vadd.f32 %v18233_v2, %v2171_v23 }
 0x905   :  { %v2280_v44 = vmax.f32 %v2264_v24, 0.0  ;;  %v2288_v24 = vld [vmem:[%s22743_s1 + $0x1f0] sm:$0xff] }
 0x906   :  { %v2175_v41 = vpop.f32.mrb[26].mxu1  ;;  %15281 = vmatprep.subr.bf16.mxu0 %v15280_v9  ;;  %v2281_v48 = vmax.f32 %v2265_v38, 0.0  ;;  %v2289_v38 = vld [vmem:[%s22743_s1 + $0x1f8] sm:$0xff] }
 0x907   :  { %v2266_v54 = vadd.f32 %v18236_v31, %v2175_v41  ;;  %v2177_v42 = vpop.f32.mrb[27].mxu1  ;;  %15283 = vmatpush1.bf16.msra.mxu0 %v15282_v20  ;;  %v2294_v41 = vld [vmem:[%s22743_s1 + $0x220] sm:$0xff] }
 0x908   :  { %v2267_v43 = vadd.f32 %v18236_v31, %v2177_v42  ;;  %v2482_v42 = vld [vmem:[%s22743_s1 + $0x230] sm:$0xff] }
 0x909   :  { %v2282_v45 = vmax.f32 %v2266_v54, 0.0  ;;  %v2295_v54 = vld [vmem:[%s22743_s1 + $0x228] sm:$0xff] }
 0x90a   :  { %v2283_v52 = vmax.f32 %v2267_v43, 0.0  ;;  %v2181_v57 = vpop.f32.mrb[28].mxu1  ;;  %v2483_v43 = vld [vmem:[%s22743_s1 + $0x238] sm:$0xff] }
 0x90b   :  { %v15286_v46 = vpack.c.bf16 %v2282_v45, %v2280_v44  ;;  %v2183_v47 = vpop.f32.mrb[29].mxu1  ;;  %v2268_v10 = vadd.f32 %v18241_v26, %v2181_v57  ;;  %v2484_v44 = vld [vmem:[%s22743_s1 + $0x240] sm:$0xff]  ;;  %v2485_v45 = vld [vmem:[%s22743_s1 + $0x248] sm:$0xff] }
 0x90c   :  { %v15284_v58 = vpack.c.bf16 %v2283_v52, %v2281_v48  ;;  %v2269_v61 = vadd.f32 %v18241_v26, %v2183_v47  ;;  %v2486_v48 = vld [vmem:[%s22743_s1 + $0x250] sm:$0xff]  ;;  %v2487_v52 = vld [vmem:[%s22743_s1 + $0x258] sm:$0xff]  ;;  %v2488_v57 = vld [vmem:[%s22743_s1 + $0x260] sm:$0xff]  ;;  %v2307_v47 = vpop.permute.xlu1 %2306 }
 0x90d   :  { %v2284_v14 = vmax.f32 %v2268_v10, 0.0 }
 0x90e   :  { %v2187_v62 = vpop.f32.mrb[30].mxu1  ;;  %15285 = vmatprep.subr.bf16.mxu0 %v15284_v58  ;;  %v2285_v19 = vmax.f32 %v2269_v61, 0.0  ;;  %v2312_v58 = vpop.permute.xlu0 %2311 }
 0x90f   :  { %v2270_v63 = vadd.f32 %v18244_v22, %v2187_v62  ;;  %v2189_v27 = vpop.f32.mrb[31].mxu1  ;;  %15287 = vmatpush1.bf16.msra.mxu0 %v15286_v46  ;;  %v2489_v46 = vld [vmem:[%s22743_s1 + $0x268] sm:$0xff] }
 0x910   :  { %v2271_v11 = vadd.f32 %v18244_v22, %v2189_v27  ;;  %v2501_v10 = vpop.permute.xlu1 %2500 }
 0x911   :  { %v2286_v16 = vmax.f32 %v2270_v63, 0.0 }
 0x912   :  { %v2287_v20 = vmax.f32 %v2271_v11, 0.0  ;;  %v2506_v61 = vpop.permute.xlu0 %2505 }
 0x913   :  { %v15290_v23 = vpack.c.bf16 %v2286_v16, %v2284_v14  ;;  %v18333_v16 = vadd.f32 %v2501_v10, %v2307_v47 }
 0x914   :  { %v15288_v9 = vpack.c.bf16 %v2287_v20, %v2285_v19  ;;  %v2317_v62 = vpop.permute.xlu1 %2316  ;;  %v18335_v20 = vadd.f32 %v2506_v61, %v2312_v58 }
 0x915   :  { %22936 = vst [vmem:[#allocation8_spill] sm:$0xff] %v18333_v16 }
 0x916   :  { %15289 = vmatprep.subr.bf16.mxu0 %v15288_v9  ;;  %v2322_v63 = vpop.permute.xlu0 %2321  ;;  %22937 = vst [vmem:[#allocation9_spill] sm:$0xff] %v18335_v20 }
 0x917   :  { %15291 = vmatpush1.bf16.msra.mxu0 %v15290_v23 }
 0x918   :  { %15293 = vmatprep.subr.bf16.mxu0 %v17901_v0  ;;  %v2290_v0 = vld [vmem:[%s22743_s1 + $0x200] sm:$0xff]  ;;  %v2511_v27 = vpop.permute.xlu1 %2510 }
 0x91a   :  { %13472 = vmatmul.mubr.msk.f32.vlgmr.msra.gmra.mrb[16].mxu0 %vm2344_vm11, %v2288_v24  ;;  %v2516_v11 = vpop.permute.xlu0 %2515 }
 0x91b   :  { %15295 = vmatpush1.bf16.msra.mxu0 %v17909_v28  ;;  %2439 = vmatprep.mubr.f32.mxu0 %v22748_v1  ;;  %v2291_v28 = vld [vmem:[%s22743_s1 + $0x208] sm:$0xff]  ;;  %v18361_v58 = vadd.f32 %v2516_v11, %v2322_v63 }
 0x91c   :  { %15297 = vmatprep.subr.bf16.mxu0 %v17931_v6  ;;  %v2292_v6 = vld [vmem:[%s22743_s1 + $0x210] sm:$0xff]  ;;  %v2327_v9 = vpop.permute.xlu1 %2326 }
 0x91d   :  { %22939 = vst [vmem:[#allocation11_spill] sm:$0xff] %v18361_v58 }
 0x91e   :  { %13473 = vmatmul.mubr.msk.f32.gmra.mrb[18].mxu0 %vm2344_vm11, %v2289_v38 }
 0x91f   :  { %15299 = vmatpush1.bf16.msra.mxu0 %v17936_v7  ;;  %2445 = vmatprep.mubr.f32.mxu0 %v22748_v1  ;;  %v2293_v7 = vld [vmem:[%s22743_s1 + $0x218] sm:$0xff] }
 0x922   :  { %13474 = vmatmul.mubr.msk.f32.gmra.mrb[20].mxu0 %vm2344_vm11, %v2290_v0 }
 0x923   :  { %2451 = vmatprep.mubr.f32.mxu0 %v22748_v1 }
 0x926   :  { %13475 = vmatmul.mubr.msk.f32.gmra.mrb[22].mxu0 %vm2344_vm11, %v2291_v28 }
 0x927   :  { %2457 = vmatprep.mubr.f32.mxu0 %v22748_v1 }
 0x92a   :  { %13476 = vmatmul.mubr.msk.f32.gmra.mrb[24].mxu0 %vm2344_vm11, %v2292_v6  ;;  %v2332_v6 = vpop.permute.xlu0 %2331 }
 0x92b   :  { %2463 = vmatprep.mubr.f32.mxu0 %v22748_v1 }
 0x92e   :  { %13477 = vmatmul.mubr.msk.f32.gmra.mrb[26].mxu0 %vm2344_vm11, %v2293_v7 }
 0x92f   :  { %2469 = vmatprep.mubr.f32.mxu0 %v22748_v1 }
 0x932   :  { %13478 = vmatmul.mubr.msk.f32.gmra.mrb[28].mxu0 %vm2344_vm11, %v2294_v41 }
 0x933   :  { %2475 = vmatprep.mubr.f32.mxu0 %v22748_v1 }
 0x936   :  { %13479 = vmatmul.mubr.msk.f32.gmra.mrb[30].mxu0 %vm2344_vm11, %v2295_v54 }
 0x937   :  { %2626 = vmatprep.mubr.f32.mxu0 %v22748_v1 }
 0x93a   :  { %13480 = vmatmul.mubr.msk.f32.vlgmr.msra.gmra.mrb[16].mxu0 %vm1446_vm10, %v2482_v42 }
 0x93b   :  { %2632 = vmatprep.mubr.f32.mxu0 %v22748_v1 }
 0x93e   :  { %13481 = vmatmul.mubr.msk.f32.gmra.mrb[18].mxu0 %vm1446_vm10, %v2483_v43 }
 0x93f   :  { %2638 = vmatprep.mubr.f32.mxu0 %v22748_v1 }
 0x942   :  { %13482 = vmatmul.mubr.msk.f32.gmra.mrb[20].mxu0 %vm1446_vm10, %v2484_v44 }
 0x943   :  { %2644 = vmatprep.mubr.f32.mxu0 %v22748_v1 }
 0x946   :  { %13483 = vmatmul.mubr.msk.f32.gmra.mrb[22].mxu0 %vm1446_vm10, %v2485_v45  ;;  %v18349_v45 = vadd.f32 %v2511_v27, %v2317_v62  ;;  %v2526_v62 = vpop.permute.xlu0 %2525 }
 0x947   :  { %2650 = vmatprep.mubr.f32.mxu0 %v22748_v1 }
 0x948   :  { %22938 = vst [vmem:[#allocation10_spill] sm:$0xff] %v18349_v45 }
 0x94a   :  { %13484 = vmatmul.mubr.msk.f32.gmra.mrb[24].mxu0 %vm1446_vm10, %v2486_v48 }
 0x94b   :  { %2656 = vmatprep.mubr.f32.mxu0 %v22748_v1 }
 0x94e   :  { %13485 = vmatmul.mubr.msk.f32.gmra.mrb[26].mxu0 %vm1446_vm10, %v2487_v52 }
 0x94f   :  { %2662 = vmatprep.mubr.f32.mxu0 %v22748_v1 }
 0x952   :  { %13486 = vmatmul.mubr.msk.f32.gmra.mrb[28].mxu0 %vm1446_vm10, %v2488_v57  ;;  %v2521_v57 = vpop.permute.xlu1 %2520 }
 0x953   :  { %2668 = vmatprep.mubr.f32.mxu0 %v22748_v1 }
 0x956   :  { %13487 = vmatmul.mubr.msk.f32.gmra.mrb[30].mxu0 %vm1446_vm10, %v2489_v46 }
 0x957   :  { %2939 = vmatprep.mubr.f32.mxu0 %v22748_v1 }
 0xa0d   :  { %v2628_v14 = vpop.f32.mrb[16].mxu0 }
 0xa0e   :  { %v2630_v19 = vpop.f32.mrb[17].mxu0  ;;  %v16041_v23 = vadd.f32 %v18333_v16, %v2628_v14 }
 0xa0f   :  { %v16043_v24 = vadd.f32 %v18333_v16, %v2630_v19 }
 0xa10   :  { %v18341_v41 = vmax.f32 %v16041_v23, 0.0 }
 0xa11   :  { %v2634_v38 = vpop.f32.mrb[18].mxu0  ;;  %v18345_v42 = vmax.f32 %v16043_v24, 0.0 }
 0xa12   :  { %v16045_v0 = vadd.f32 %v18335_v20, %v2634_v38  ;;  %v2636_v28 = vpop.f32.mrb[19].mxu0  ;;  %v2337_v38 = vpop.permute.xlu1 %2336 }
 0xa13   :  { %v16047_v7 = vadd.f32 %v18335_v20, %v2636_v28 }
 0xa14   :  { %v18343_v54 = vmax.f32 %v16045_v0, 0.0 }
 0xa15   :  { %v18347_v43 = vmax.f32 %v16047_v7, 0.0  ;;  %v2640_v44 = vpop.f32.mrb[20].mxu0 }
 0xa16   :  { %v2642_v48 = vpop.f32.mrb[21].mxu0  ;;  %v18353_v52 = vpack.i.bf16 %v18343_v54, %v18341_v41  ;;  %v16049_v10 = vadd.f32 %v18349_v45, %v2640_v44  ;;  %v15302_v61 = vpack.c.bf16 %v18343_v54, %v18341_v41  ;;  %v18381_v44 = vadd.f32 %v2521_v57, %v2327_v9 }
 0xa17   :  { %v18357_v46 = vpack.i.bf16 %v18347_v43, %v18345_v42  ;;  %v15300_v47 = vpack.c.bf16 %v18347_v43, %v18345_v42  ;;  %v16051_v27 = vadd.f32 %v18349_v45, %v2642_v48 }
 0xa18   :  { %16649 = vrot.lane.b32.xlu1 %v18353_v52, %s17310_s22  ;;  %v18373_v23 = vmax.f32 %v16049_v10, 0.0  ;;  %22940 = vst [vmem:[#allocation12_spill] sm:$0xff] %v18381_v44 }
 0xa19   :  { %16654 = vrot.lane.b32.xlu0 %v18357_v46, %s17310_s22  ;;  %v2646_v14 = vpop.f32.mrb[22].mxu0  ;;  %15301 = vmatprep.subr.bf16.mxu0 %v15300_v47  ;;  %v18377_v0 = vmax.f32 %v16051_v27, 0.0 }
 0xa1a   :  { %v16053_v19 = vadd.f32 %v18361_v58, %v2646_v14  ;;  %v2648_v63 = vpop.f32.mrb[23].mxu0  ;;  %15303 = vmatpush1.bf16.msra.mxu0 %v15302_v61  ;;  %v2342_v14 = vpop.permute.xlu0 %2341 }
 0xa1b   :  { %v16055_v11 = vadd.f32 %v18361_v58, %v2648_v63  ;;  %v2531_v58 = vpop.permute.xlu1 %2530 }
 0xa1c   :  { %v18375_v24 = vmax.f32 %v16053_v19, 0.0  ;;  %v18389_v19 = vadd.f32 %v2526_v62, %v2332_v6 }
 0xa1d   :  { %v18379_v28 = vmax.f32 %v16055_v11, 0.0  ;;  %v2652_v7 = vpop.f32.mrb[24].mxu0 }
 0xa1e   :  { %v2654_v48 = vpop.f32.mrb[25].mxu0  ;;  %v16658_v47 = vpack.i.bf16 %v18375_v24, %v18373_v23  ;;  %22941 = vst [vmem:[#allocation13_spill] sm:$0xff] %v18389_v19  ;;  %v16057_v27 = vadd.f32 %v18381_v44, %v2652_v7  ;;  %v15306_v9 = vpack.c.bf16 %v18375_v24, %v18373_v23  ;;  %v2536_v45 = vpop.permute.xlu0 %2535 }
 0xa1f   :  { %v16663_v61 = vpack.i.bf16 %v18379_v28, %v18377_v0  ;;  %v15304_v10 = vpack.c.bf16 %v18379_v28, %v18377_v0  ;;  %v16059_v57 = vadd.f32 %v18381_v44, %v2654_v48  ;;  %v18407_v44 = vadd.f32 %v2531_v58, %v2337_v38 }
 0xa20   :  { %16659 = vrot.lane.b32.xlu1 %v16658_v47, %s17310_s22  ;;  %v18399_v62 = vmax.f32 %v16057_v27, 0.0  ;;  %v18415_v27 = vadd.f32 %v2536_v45, %v2342_v14 }
 0xa21   :  { %16664 = vrot.lane.b32.xlu0 %v16663_v61, %s17310_s22  ;;  %v2658_v63 = vpop.f32.mrb[26].mxu0  ;;  %15305 = vmatprep.subr.bf16.mxu0 %v15304_v10  ;;  %v18403_v20 = vmax.f32 %v16059_v57, 0.0  ;;  %22942 = vst [vmem:[#allocation14_spill] sm:$0xff] %v18407_v44 }
 0xa22   :  { %v16061_v11 = vadd.f32 %v18389_v19, %v2658_v63  ;;  %v2660_v1 = vpop.f32.mrb[27].mxu0  ;;  %15307 = vmatpush1.bf16.msra.mxu0 %v15306_v9  ;;  %22943 = vst [vmem:[#allocation15_spill] sm:$0xff] %v18415_v27 }
 0xa23   :  { %v16063_v6 = vadd.f32 %v18389_v19, %v2660_v1 }
 0xa24   :  { %v18401_v7 = vmax.f32 %v16061_v11, 0.0 }
 0xa25   :  { %v18405_v16 = vmax.f32 %v16063_v6, 0.0  ;;  %v2664_v48 = vpop.f32.mrb[28].mxu0 }
 0xa26   :  { %v2666_v10 = vpop.f32.mrb[29].mxu0  ;;  %v16668_v63 = vpack.i.bf16 %v18401_v7, %v18399_v62  ;;  %v16065_v57 = vadd.f32 %v18407_v44, %v2664_v48  ;;  %v15310_v58 = vpack.c.bf16 %v18401_v7, %v18399_v62 }
 0xa27   :  { %v16673_v9 = vpack.i.bf16 %v18405_v16, %v18403_v20  ;;  %v15308_v1 = vpack.c.bf16 %v18405_v16, %v18403_v20  ;;  %v16067_v38 = vadd.f32 %v18407_v44, %v2666_v10 }
 0xa28   :  { %16669 = vrot.lane.b32.xlu1 %v16668_v63, %s17310_s22  ;;  %v18425_v14 = vmax.f32 %v16065_v57, 0.0  ;;  %v2843_v57 = vld [vmem:[%s22743_s1 + $0x2b0] sm:$0xff] }
 0xa29   :  { %16674 = vrot.lane.b32.xlu0 %v16673_v9, %s17310_s22  ;;  %v2670_v11 = vpop.f32.mrb[30].mxu0  ;;  %15309 = vmatprep.subr.bf16.mxu0 %v15308_v1  ;;  %v18429_v22 = vmax.f32 %v16067_v38, 0.0  ;;  %v2844_v38 = vld [vmem:[%s22743_s1 + $0x2b8] sm:$0xff] }
 0xa2a   :  { %v16069_v6 = vadd.f32 %v18415_v27, %v2670_v11  ;;  %v2672_v19 = vpop.f32.mrb[31].mxu0  ;;  %15311 = vmatpush1.bf16.msra.mxu0 %v15310_v58  ;;  %v22944_v58 = vmov 0.0  }
 0xa2b   :  { %v16071_v45 = vadd.f32 %v18415_v27, %v2672_v19 }
 0xa2c   :  { %v18427_v48 = vmax.f32 %v16069_v6, 0.0  ;;  %v3289_v6 = vld [vmem:[%s22744_s2 + $0x288] sm:$0xff] }
 0xa2d   :  { %v18431_v26 = vmax.f32 %v16071_v45, 0.0  ;;  %v2848_v45 = vld [vmem:[%s22743_s1 + $0x2d8] sm:$0xff] }
 0xa2e   :  { %v16678_v10 = vpack.i.bf16 %v18427_v48, %v18425_v14  ;;  %v15314_v19 = vpack.c.bf16 %v18427_v48, %v18425_v14 }
 0xa2f   :  { %v16683_v1 = vpack.i.bf16 %v18431_v26, %v18429_v22  ;;  %v15312_v11 = vpack.c.bf16 %v18431_v26, %v18429_v22 }
 0xa30   :  { %16679 = vrot.lane.b32.xlu1 %v16678_v10, %s17310_s22 }
 0xa31   :  { %16684 = vrot.lane.b32.xlu0 %v16683_v1, %s17310_s22  ;;  %15313 = vmatprep.subr.bf16.mxu0 %v15312_v11  ;;  %v2849_v11 = vld [vmem:[%s22743_s1 + $0x2e0] sm:$0xff] }
 0xa32   :  { %15315 = vmatpush1.bf16.msra.mxu0 %v15314_v19  ;;  %v3292_v19 = vld [vmem:[%s22744_s2 + $0x2a0] sm:$0xff] }
 0xa34   :  { %16689 = vrot.lane.b32.xlu1 %v18353_v52, %s17311_s23  ;;  %v2845_v52 = vld [vmem:[%s22743_s1 + $0x2c0] sm:$0xff] }
 0xa35   :  { %16694 = vrot.lane.b32.xlu0 %v18357_v46, %s17311_s23  ;;  %13488 = vmatmul.mubr.msk.f32.vlgmr.msra.gmra.mrb[32].mxu0 %vm2344_vm11, %v2843_v57  ;;  %v2846_v46 = vld [vmem:[%s22743_s1 + $0x2c8] sm:$0xff] }
 0xa36   :  { %2945 = vmatprep.mubr.f32.mxu0 %v22944_v58  ;;  %v3293_v57 = vld [vmem:[%s22744_s2 + $0x2a8] sm:$0xff] }
 0xa38   :  { %16699 = vrot.lane.b32.xlu1 %v16658_v47, %s17311_s23  ;;  %v3286_v47 = vld [vmem:[%s22744_s2 + $0x270] sm:$0xff] }
 0xa39   :  { %16704 = vrot.lane.b32.xlu0 %v16663_v61, %s17311_s23  ;;  %13489 = vmatmul.mubr.msk.f32.gmra.mrb[34].mxu0 %vm2344_vm11, %v2844_v38  ;;  %v3287_v61 = vld [vmem:[%s22744_s2 + $0x278] sm:$0xff]  ;;  %v2850_v38 = vld [vmem:[%s22743_s1 + $0x2e8] sm:$0xff] }
 0xa3a   :  { %2951 = vmatprep.mubr.f32.mxu0 %v22944_v58 }
 0xa3c   :  { %16709 = vrot.lane.b32.xlu1 %v16668_v63, %s17311_s23  ;;  %v2847_v63 = vld [vmem:[%s22743_s1 + $0x2d0] sm:$0xff] }
 0xa3d   :  { %16714 = vrot.lane.b32.xlu0 %v16673_v9, %s17311_s23  ;;  %13490 = vmatmul.mubr.msk.f32.gmra.mrb[36].mxu0 %vm2344_vm11, %v2845_v52  ;;  %v3288_v9 = vld [vmem:[%s22744_s2 + $0x280] sm:$0xff]  ;;  %v3374_v52 = vld [vmem:[%s22744_s2 + $0x330] sm:$0xff] }
 0xa3e   :  { %2957 = vmatprep.mubr.f32.mxu0 %v22944_v58 }
 0xa40   :  { %16719 = vrot.lane.b32.xlu1 %v16678_v10, %s17311_s23  ;;  %v3290_v10 = vld [vmem:[%s22744_s2 + $0x290] sm:$0xff] }
 0xa41   :  { %16724 = vrot.lane.b32.xlu0 %v16683_v1, %s17311_s23  ;;  %13491 = vmatmul.mubr.msk.f32.gmra.mrb[38].mxu0 %vm2344_vm11, %v2846_v46  ;;  %v3291_v1 = vld [vmem:[%s22744_s2 + $0x298] sm:$0xff] }
 0xa42   :  { %2963 = vmatprep.mubr.f32.mxu0 %v22944_v58  ;;  %v3375_v46 = vld [vmem:[%s22744_s2 + $0x338] sm:$0xff] }
 0xa44   :  { %3296 = vperm.xlu1 %16567, %v3286_v47   ;;  %v3376_v47 = vld [vmem:[%s22744_s2 + $0x340] sm:$0xff] }
 0xa45   :  { %3301 = vperm.xlu0 %16566, %v3287_v61   ;;  %13492 = vmatmul.mubr.msk.f32.gmra.mrb[40].mxu0 %vm2344_vm11, %v2847_v63  ;;  %v3377_v61 = vld [vmem:[%s22744_s2 + $0x348] sm:$0xff]  ;;  %v3378_v63 = vld [vmem:[%s22744_s2 + $0x350] sm:$0xff] }
 0xa46   :  { %2969 = vmatprep.mubr.f32.mxu0 %v22944_v58 }
 0xa48   :  { %3306 = vperm.xlu1 %16567, %v3288_v9   ;;  %v3379_v9 = vld [vmem:[%s22744_s2 + $0x358] sm:$0xff] }
 0xa49   :  { %3311 = vperm.xlu0 %16566, %v3289_v6   ;;  %13493 = vmatmul.mubr.msk.f32.gmra.mrb[42].mxu0 %vm2344_vm11, %v2848_v45  ;;  %v3380_v6 = vld [vmem:[%s22744_s2 + $0x360] sm:$0xff]  ;;  %v3381_v45 = vld [vmem:[%s22744_s2 + $0x368] sm:$0xff] }
 0xa4a   :  { %2975 = vmatprep.mubr.f32.mxu0 %v22944_v58 }
 0xa4c   :  { %3316 = vperm.xlu1 %16567, %v3290_v10   ;;  %v3599_v10 = vld [vmem:[%s22744_s2 + $0x370] sm:$0xff] }
 0xa4d   :  { %3321 = vperm.xlu0 %16566, %v3291_v1   ;;  %13494 = vmatmul.mubr.msk.f32.gmra.mrb[44].mxu0 %vm2344_vm11, %v2849_v11  ;;  %v3600_v1 = vld [vmem:[%s22744_s2 + $0x378] sm:$0xff]  ;;  %v3601_v11 = vld [vmem:[%s22744_s2 + $0x380] sm:$0xff] }
 0xa4e   :  { %2981 = vmatprep.mubr.f32.mxu0 %v22944_v58 }
 0xa50   :  { %3326 = vperm.xlu1 %16567, %v3292_v19   ;;  %v3602_v19 = vld [vmem:[%s22744_s2 + $0x388] sm:$0xff] }
 0xa51   :  { %3331 = vperm.xlu0 %16566, %v3293_v57   ;;  %13495 = vmatmul.mubr.msk.f32.gmra.mrb[46].mxu0 %vm2344_vm11, %v2850_v38  ;;  %v3603_v57 = vld [vmem:[%s22744_s2 + $0x390] sm:$0xff]  ;;  %v3604_v38 = vld [vmem:[%s22744_s2 + $0x398] sm:$0xff] }
 0xa52   :  { %3084 = vmatprep.mubr.f32.mxu0 %v22944_v58 }
 0xa54   :  { %3384 = vperm.xlu1 %16567, %v3374_v52   ;;  %v3605_v52 = vld [vmem:[%s22744_s2 + $0x3a0] sm:$0xff] }
 0xa55   :  { %3389 = vperm.xlu0 %16566, %v3375_v46   ;;  %v3606_v46 = vld [vmem:[%s22744_s2 + $0x3a8] sm:$0xff] }
 0xa58   :  { %3394 = vperm.xlu1 %16567, %v3376_v47   ;;  %v3808_v47 = vld [vmem:[%s22744_s2 + $0x3b0] sm:$0xff] }
 0xa59   :  { %3399 = vperm.xlu0 %16566, %v3377_v61   ;;  %v3809_v61 = vld [vmem:[%s22744_s2 + $0x3b8] sm:$0xff] }
 0xa5c   :  { %3404 = vperm.xlu1 %16567, %v3378_v63   ;;  %v3810_v63 = vld [vmem:[%s22744_s2 + $0x3c0] sm:$0xff] }
 0xa5d   :  { %3409 = vperm.xlu0 %16566, %v3379_v9   ;;  %v3811_v9 = vld [vmem:[%s22744_s2 + $0x3c8] sm:$0xff] }
 0xa60   :  { %3414 = vperm.xlu1 %16567, %v3380_v6   ;;  %v3812_v6 = vld [vmem:[%s22744_s2 + $0x3d0] sm:$0xff] }
 0xa61   :  { %3419 = vperm.xlu0 %16566, %v3381_v45   ;;  %v3813_v45 = vld [vmem:[%s22744_s2 + $0x3d8] sm:$0xff] }
 0xa64   :  { %3609 = vperm.xlu1 %16567, %v3599_v10   ;;  %v3814_v10 = vld [vmem:[%s22744_s2 + $0x3e0] sm:$0xff] }
 0xa65   :  { %3614 = vperm.xlu0 %16566, %v3600_v1   ;;  %v3815_v1 = vld [vmem:[%s22744_s2 + $0x3e8] sm:$0xff] }
 0xa68   :  { %3619 = vperm.xlu1 %16567, %v3601_v11   ;;  %v4379_v11 = vld [vmem:[%s22745_s4] sm:$0xff] }
 0xa69   :  { %3624 = vperm.xlu0 %16566, %v3602_v19   ;;  %v4380_v19 = vld [vmem:[%s22745_s4 + $0x8] sm:$0xff] }
 0xa6c   :  { %3629 = vperm.xlu1 %16567, %v3603_v57   ;;  %v4397_v57 = vld [vmem:[%s22745_s4 + $0x30] sm:$0xff] }
 0xa6d   :  { %3634 = vperm.xlu0 %16566, %v3604_v38  }
 0xa70   :  { %3639 = vperm.xlu1 %16567, %v3605_v52   ;;  %v4398_v52 = vld [vmem:[%s22745_s4 + $0x38] sm:$0xff] }
 0xa71   :  { %3644 = vperm.xlu0 %16566, %v3606_v46  }
 0xa74   :  { %3818 = vperm.xlu1 %16567, %v3808_v47  }
 0xa75   :  { %3823 = vperm.xlu0 %16566, %v3809_v61  }
 0xa78   :  { %3828 = vperm.xlu1 %16567, %v3810_v63  }
 0xa79   :  { %3833 = vperm.xlu0 %16566, %v3811_v9  }
 0xa7c   :  { %3838 = vperm.xlu1 %16567, %v3812_v6   ;;  %v4492_v6 = vld [vmem:[%s22745_s4 + $0x40] sm:$0xff] }
 0xa7d   :  { %3843 = vperm.xlu0 %16566, %v3813_v45  }
 0xa80   :  { %3848 = vperm.xlu1 %16567, %v3814_v10  }
 0xa81   :  { %3853 = vperm.xlu0 %16566, %v3815_v1   ;;  %v4493_v1 = vld [vmem:[%s22745_s4 + $0x48] sm:$0xff] }
 0xa84   :  { %4116 = vrot.lane.b32.xlu1 %v17388_v17, %s17310_s22 }
 0xa85   :  { %4113 = vrot.lane.b32.xlu0 %v17388_v17, %s17311_s23 }
 0xa88   :  { %4383 = vperm.xlu1 %16567, %v4379_v11  }
 0xa89   :  { %4388 = vperm.xlu0 %16566, %v4380_v19  }
 0xa8a   :  { %v16650_v38 = vpop.permute.xlu1 %16649 }
 0xa8b   :  { %v16652_v46 = vunpack.i.h.bf16 %v16650_v38  ;;  %v16651_v47 = vunpack.i.l.bf16 %v16650_v38  ;;  %v16655_v61 = vpop.permute.xlu0 %16654 }
 0xa8c   :  { %v16657_v63 = vunpack.i.h.bf16 %v16655_v61  ;;  %v16656_v9 = vunpack.i.l.bf16 %v16655_v61  ;;  %4401 = vperm.xlu1 %16567, %v4397_v57  }
 0xa8d   :  { %4406 = vperm.xlu0 %16566, %v4398_v52  }
 0xa8e   :  { %v2804_v45 = vsel %vm96_vm5, %v16652_v46, %v16657_v63  ;;  %v2803_v10 = vsel %vm96_vm5, %v16651_v47, %v16656_v9  ;;  %v2811_v11 = vsel %vm96_vm5, %v16656_v9, %v16651_v47  ;;  %v2812_v19 = vsel %vm96_vm5, %v16657_v63, %v16652_v46 }
 0xa8f   :  { %v2820_v57 = vsel %vm17432_vm6, %v18345_v42, %v2811_v11  ;;  %v2822_v38 = vsel %vm17432_vm6, %v18347_v43, %v2812_v19  ;;  %v2819_v52 = vsel %vm35_vm1, %v18341_v41, %v2803_v10  ;;  %v2821_v61 = vsel %vm35_vm1, %v18343_v54, %v2804_v45 }
 0xa90   :  { %4496 = vperm.xlu1 %16567, %v4492_v6   ;;  %v15316_v47 = vpack.c.bf16 %v2822_v38, %v2820_v57  ;;  %v15318_v9 = vpack.c.bf16 %v2821_v61, %v2819_v52 }
 0xa91   :  { %4501 = vperm.xlu0 %16566, %v4493_v1  }
 0xa92   :  { %v16660_v46 = vpop.permute.xlu1 %16659  ;;  %15317 = vmatprep.subr.bf16.mxu0 %v15316_v47 }
 0xa93   :  { %v16662_v63 = vunpack.i.h.bf16 %v16660_v46  ;;  %v16661_v11 = vunpack.i.l.bf16 %v16660_v46  ;;  %v16665_v27 = vpop.permute.xlu0 %16664  ;;  %15319 = vmatpush1.bf16.msra.mxu0 %v15318_v9 }
 0xa94   :  { %v16667_v44 = vunpack.i.h.bf16 %v16665_v27  ;;  %v16666_v19 = vunpack.i.l.bf16 %v16665_v27 }
 0xa96   :  { %v2806_v31 = vsel %vm96_vm5, %v16662_v63, %v16667_v44  ;;  %v2805_v10 = vsel %vm96_vm5, %v16661_v11, %v16666_v19  ;;  %v2813_v6 = vsel %vm96_vm5, %v16666_v19, %v16661_v11  ;;  %v2814_v45 = vsel %vm96_vm5, %v16667_v44, %v16662_v63 }
 0xa97   :  { %v2824_v1 = vsel %vm17432_vm6, %v18377_v0, %v2813_v6  ;;  %v2826_v27 = vsel %vm17432_vm6, %v18379_v28, %v2814_v45  ;;  %v2823_v57 = vsel %vm35_vm1, %v18373_v23, %v2805_v10  ;;  %v2825_v38 = vsel %vm35_vm1, %v18375_v24, %v2806_v31 }
 0xa98   :  { %v15320_v52 = vpack.c.bf16 %v2826_v27, %v2824_v1  ;;  %v15322_v61 = vpack.c.bf16 %v2825_v38, %v2823_v57 }
 0xa9a   :  { %v16670_v47 = vpop.permute.xlu1 %16669  ;;  %15321 = vmatprep.subr.bf16.mxu0 %v15320_v52 }
 0xa9b   :  { %v16672_v44 = vunpack.i.h.bf16 %v16670_v47  ;;  %v16671_v9 = vunpack.i.l.bf16 %v16670_v47  ;;  %v16675_v46 = vpop.permute.xlu0 %16674  ;;  %15323 = vmatpush1.bf16.msra.mxu0 %v15322_v61 }
 0xa9c   :  { %v16677_v63 = vunpack.i.h.bf16 %v16675_v46  ;;  %v16676_v11 = vunpack.i.l.bf16 %v16675_v46 }
 0xa9e   :  { %v2808_v19 = vsel %vm96_vm5, %v16672_v44, %v16677_v63  ;;  %v2807_v10 = vsel %vm96_vm5, %v16671_v9, %v16676_v11  ;;  %v2815_v6 = vsel %vm96_vm5, %v16676_v11, %v16671_v9  ;;  %v2816_v31 = vsel %vm96_vm5, %v16677_v63, %v16672_v44 }
 0xa9f   :  { %v2828_v45 = vsel %vm17432_vm6, %v18403_v20, %v2815_v6  ;;  %v2830_v1 = vsel %vm17432_vm6, %v18405_v16, %v2816_v31  ;;  %v2827_v27 = vsel %vm35_vm1, %v18399_v62, %v2807_v10  ;;  %v2829_v57 = vsel %vm35_vm1, %v18401_v7, %v2808_v19 }
 0xaa0   :  { %v15324_v38 = vpack.c.bf16 %v2830_v1, %v2828_v45  ;;  %v15326_v52 = vpack.c.bf16 %v2829_v57, %v2827_v27 }
 0xaa2   :  { %v16680_v61 = vpop.permute.xlu1 %16679  ;;  %15325 = vmatprep.subr.bf16.mxu0 %v15324_v38 }
 0xaa3   :  { %v16682_v47 = vunpack.i.h.bf16 %v16680_v61  ;;  %v16681_v44 = vunpack.i.l.bf16 %v16680_v61  ;;  %v16685_v9 = vpop.permute.xlu0 %16684  ;;  %15327 = vmatpush1.bf16.msra.mxu0 %v15326_v52 }
 0xaa4   :  { %v16687_v46 = vunpack.i.h.bf16 %v16685_v9  ;;  %v16686_v63 = vunpack.i.l.bf16 %v16685_v9 }
 0xaa6   :  { %v2810_v11 = vsel %vm96_vm5, %v16682_v47, %v16687_v46  ;;  %v2809_v10 = vsel %vm96_vm5, %v16681_v44, %v16686_v63  ;;  %v16690_v6 = vpop.permute.xlu1 %16689  ;;  %v2817_v19 = vsel %vm96_vm5, %v16686_v63, %v16681_v44  ;;  %v2818_v31 = vsel %vm96_vm5, %v16687_v46, %v16682_v47 }
 0xaa7   :  { %v16692_v45 = vunpack.i.h.bf16 %v16690_v6  ;;  %v16691_v1 = vunpack.i.l.bf16 %v16690_v6  ;;  %v16695_v27 = vpop.permute.xlu0 %16694  ;;  %v2832_v57 = vsel %vm17432_vm6, %v18429_v22, %v2817_v19  ;;  %v2834_v38 = vsel %vm17432_vm6, %v18431_v26, %v2818_v31 }
 0xaa8   :  { %v16697_v52 = vunpack.i.h.bf16 %v16695_v27  ;;  %v16696_v61 = vunpack.i.l.bf16 %v16695_v27  ;;  %v15328_v9 = vpack.c.bf16 %v2834_v38, %v2832_v57  ;;  %v2831_v44 = vsel %vm35_vm1, %v18425_v14, %v2809_v10 }
 0xaa9   :  { %v2833_v47 = vsel %vm35_vm1, %v18427_v48, %v2810_v11 }
 0xaaa   :  { %v2748_v46 = vsel %vm83_vm7, %v16697_v52, %v16692_v45  ;;  %v2747_v63 = vsel %vm83_vm7, %v16696_v61, %v16691_v1  ;;  %v16700_v6 = vpop.permute.xlu1 %16699  ;;  %15329 = vmatprep.subr.bf16.mxu0 %v15328_v9  ;;  %v15330_v19 = vpack.c.bf16 %v2833_v47, %v2831_v44  ;;  %v2739_v31 = vsel %vm83_vm7, %v16691_v1, %v16696_v61  ;;  %v2988_v9 = vld [vmem:[%s22743_s1 + $0x2f0] sm:$0xff] }
 0xaab   :  { %v16702_v27 = vunpack.i.h.bf16 %v16700_v6  ;;  %v16701_v57 = vunpack.i.l.bf16 %v16700_v6  ;;  %v16705_v38 = vpop.permute.xlu0 %16704  ;;  %v2740_v10 = vsel %vm83_vm7, %v16692_v45, %v16697_v52  ;;  %v2756_v11 = vsel %vm17450_vm8, %v18345_v42, %v2739_v31 }
 0xaac   :  { %v16707_v2 = vunpack.i.h.bf16 %v16705_v38  ;;  %v16706_v21 = vunpack.i.l.bf16 %v16705_v38  ;;  %15331 = vmatpush1.bf16.msra.mxu0 %v15330_v19  ;;  %v2758_v1 = vsel %vm17450_vm8, %v18347_v43, %v2740_v10  ;;  %v2755_v61 = vsel %vm34_vm0, %v18341_v41, %v2747_v63 }
 0xaad   :  { %v15332_v45 = vpack.c.bf16 %v2758_v1, %v2756_v11  ;;  %v2757_v52 = vsel %vm34_vm0, %v18343_v54, %v2748_v46 }
 0xaae   :  { %v2750_v44 = vsel %vm83_vm7, %v16707_v2, %v16702_v27  ;;  %v2749_v47 = vsel %vm83_vm7, %v16706_v21, %v16701_v57  ;;  %v16710_v6 = vpop.permute.xlu1 %16709  ;;  %v15334_v19 = vpack.c.bf16 %v2757_v52, %v2755_v61  ;;  %v2741_v31 = vsel %vm83_vm7, %v16701_v57, %v16706_v21  ;;  %v2989_v21 = vld [vmem:[%s22743_s1 + $0x2f8] sm:$0xff] }
 0xaaf   :  { %v16712_v38 = vunpack.i.h.bf16 %v16710_v6  ;;  %v16711_v10 = vunpack.i.l.bf16 %v16710_v6  ;;  %13496 = vmatmul.mubr.msk.f32.vlgmr.msra.gmra.mrb[32].mxu0 %vm2344_vm11, %v2988_v9  ;;  %15333 = vmatprep.subr.bf16.mxu0 %v15332_v45  ;;  %v16715_v63 = vpop.permute.xlu0 %16714  ;;  %v2742_v46 = vsel %vm83_vm7, %v16702_v27, %v16707_v2  ;;  %v2760_v11 = vsel %vm17450_vm8, %v18377_v0, %v2741_v31 }
 0xab0   :  { %v16717_v1 = vunpack.i.h.bf16 %v16715_v63  ;;  %v16716_v53 = vunpack.i.l.bf16 %v16715_v63  ;;  %15335 = vmatpush1.bf16.msra.mxu0 %v15334_v19  ;;  %3090 = vmatprep.mubr.f32.mxu0 %v22944_v58  ;;  %v2762_v57 = vsel %vm17450_vm8, %v18379_v28, %v2742_v46  ;;  %v2759_v2 = vsel %vm34_vm0, %v18373_v23, %v2749_v47 }
 0xab1   :  { %v15336_v27 = vpack.c.bf16 %v2762_v57, %v2760_v11  ;;  %v2761_v9 = vsel %vm34_vm0, %v18375_v24, %v2750_v44 }
 0xab2   :  { %v2752_v61 = vsel %vm83_vm7, %v16717_v1, %v16712_v38  ;;  %v2751_v45 = vsel %vm83_vm7, %v16716_v53, %v16711_v10  ;;  %v16720_v52 = vpop.permute.xlu1 %16719  ;;  %v15338_v6 = vpack.c.bf16 %v2761_v9, %v2759_v2  ;;  %v2743_v19 = vsel %vm83_vm7, %v16711_v10, %v16716_v53  ;;  %v2990_v53 = vld [vmem:[%s22743_s1 + $0x300] sm:$0xff] }
 0xab3   :  { %v16722_v31 = vunpack.i.h.bf16 %v16720_v52  ;;  %v16721_v63 = vunpack.i.l.bf16 %v16720_v52  ;;  %13497 = vmatmul.mubr.msk.f32.gmra.mrb[34].mxu0 %vm2344_vm11, %v2989_v21  ;;  %15337 = vmatprep.subr.bf16.mxu0 %v15336_v27  ;;  %v16725_v47 = vpop.permute.xlu0 %16724  ;;  %v2744_v44 = vsel %vm83_vm7, %v16712_v38, %v16717_v1  ;;  %v2764_v46 = vsel %vm17450_vm8, %v18403_v20, %v2743_v19  ;;  %v2991_v19 = vld [vmem:[%s22743_s1 + $0x308] sm:$0xff] }
 0xab4   :  { %v16727_v11 = vunpack.i.h.bf16 %v16725_v47  ;;  %v16726_v57 = vunpack.i.l.bf16 %v16725_v47  ;;  %15339 = vmatpush1.bf16.msra.mxu0 %v15338_v6  ;;  %3096 = vmatprep.mubr.f32.mxu0 %v22944_v58  ;;  %v2766_v10 = vsel %vm17450_vm8, %v18405_v16, %v2744_v44  ;;  %v2763_v38 = vsel %vm34_vm0, %v18399_v62, %v2751_v45 }
 0xab5   :  { %v15340_v1 = vpack.c.bf16 %v2766_v10, %v2764_v46  ;;  %v2765_v21 = vsel %vm34_vm0, %v18401_v7, %v2752_v61  ;;  %v2992_v46 = vld [vmem:[%s22743_s1 + $0x310] sm:$0xff] }
 0xab6   :  { %v2754_v2 = vsel %vm83_vm7, %v16727_v11, %v16722_v31  ;;  %v2753_v27 = vsel %vm83_vm7, %v16726_v57, %v16721_v63  ;;  %v15342_v9 = vpack.c.bf16 %v2765_v21, %v2763_v38  ;;  %v2745_v52 = vsel %vm83_vm7, %v16721_v63, %v16726_v57  ;;  %v2994_v57 = vld [vmem:[%s22743_s1 + $0x320] sm:$0xff]  ;;  %v2835_v10 = vld [vmem:[%s22743_s1 + $0x270] sm:$0xff]  ;;  %v2836_v38 = vld [vmem:[%s22743_s1 + $0x278] sm:$0xff] }
 0xab7   :  { %13498 = vmatmul.mubr.msk.f32.gmra.mrb[36].mxu0 %vm2344_vm11, %v2990_v53  ;;  %15341 = vmatprep.subr.bf16.mxu0 %v15340_v1  ;;  %v2746_v45 = vsel %vm83_vm7, %v16722_v31, %v16727_v11  ;;  %v2768_v61 = vsel %vm17450_vm8, %v18429_v22, %v2745_v52  ;;  %v2767_v6 = vsel %vm34_vm0, %v18425_v14, %v2753_v27  ;;  %v2993_v11 = vld [vmem:[%s22743_s1 + $0x318] sm:$0xff]  ;;  %v2995_v53 = vld [vmem:[%s22743_s1 + $0x328] sm:$0xff]  ;;  %v2837_v1 = vld [vmem:[%s22743_s1 + $0x280] sm:$0xff] }
 0xab8   :  { %15343 = vmatpush1.bf16.msra.mxu0 %v15342_v9  ;;  %3102 = vmatprep.mubr.f32.mxu0 %v22944_v58  ;;  %v2770_v63 = vsel %vm17450_vm8, %v18431_v26, %v2746_v45  ;;  %v2769_v31 = vsel %vm34_vm0, %v18427_v48, %v2754_v2  ;;  %v2838_v21 = vld [vmem:[%s22743_s1 + $0x288] sm:$0xff]  ;;  %v2839_v2 = vld [vmem:[%s22743_s1 + $0x290] sm:$0xff]  ;;  %v2840_v27 = vld [vmem:[%s22743_s1 + $0x298] sm:$0xff] }
 0xab9   :  { %v15344_v47 = vpack.c.bf16 %v2770_v63, %v2768_v61  ;;  %v15346_v44 = vpack.c.bf16 %v2769_v31, %v2767_v6  ;;  %v2841_v9 = vld [vmem:[%s22743_s1 + $0x2a0] sm:$0xff]  ;;  %v2842_v52 = vld [vmem:[%s22743_s1 + $0x2a8] sm:$0xff] }
 0xabb   :  { %13499 = vmatmul.mubr.msk.f32.gmra.mrb[38].mxu0 %vm2344_vm11, %v2991_v19  ;;  %15345 = vmatprep.subr.bf16.mxu0 %v15344_v47 }
 0xabc   :  { %15347 = vmatpush1.bf16.msra.mxu0 %v15346_v44  ;;  %3108 = vmatprep.mubr.f32.mxu0 %v22944_v58 }
 0xabf   :  { %13500 = vmatmul.mubr.msk.f32.gmra.mrb[40].mxu0 %vm2344_vm11, %v2992_v46 }
 0xac0   :  { %3114 = vmatprep.mubr.f32.mxu0 %v22944_v58 }
 0xac3   :  { %13501 = vmatmul.mubr.msk.f32.gmra.mrb[42].mxu0 %vm2344_vm11, %v2993_v11  ;;  %v18851_v6 = vpop.permute.xlu1 %3296 }
 0xac4   :  { %3120 = vmatprep.mubr.f32.mxu0 %v22944_v58  ;;  %22945 = vst [vmem:[#allocation16_spill] sm:$0xff] %v18851_v6  ;;  %v18854_v63 = vpop.permute.xlu0 %3301 }
 0xac5   :  { %22946 = vst [vmem:[#allocation17_spill] sm:$0xff] %v18854_v63 }
 0xac7   :  { %13502 = vmatmul.mubr.msk.f32.gmra.mrb[44].mxu0 %vm2344_vm11, %v2994_v57 }
 0xac8   :  { %3126 = vmatprep.mubr.f32.mxu0 %v22944_v58 }
 0xacb   :  { %13503 = vmatmul.mubr.msk.f32.gmra.mrb[46].mxu0 %vm2344_vm11, %v2995_v53 }
 0xacc   :  { %3221 = vmatprep.mubr.f32.mxu0 %v22944_v58 }
 0xacf   :  { %13504 = vmatmul.mubr.msk.f32.vlgmr.msra.gmra.mrb[32].mxu0 %vm2344_vm11, %v2835_v10 }
 0xad0   :  { %3227 = vmatprep.mubr.f32.mxu0 %v22944_v58 }
 0xad3   :  { %13505 = vmatmul.mubr.msk.f32.gmra.mrb[34].mxu0 %vm2344_vm11, %v2836_v38 }
 0xad4   :  { %3233 = vmatprep.mubr.f32.mxu0 %v22944_v58 }
 0xad7   :  { %13506 = vmatmul.mubr.msk.f32.gmra.mrb[36].mxu0 %vm2344_vm11, %v2837_v1 }
 0xad8   :  { %3239 = vmatprep.mubr.f32.mxu0 %v22944_v58 }
 0xadb   :  { %13507 = vmatmul.mubr.msk.f32.gmra.mrb[38].mxu0 %vm2344_vm11, %v2838_v21 }
 0xadc   :  { %3245 = vmatprep.mubr.f32.mxu0 %v22944_v58 }
 0xadf   :  { %13508 = vmatmul.mubr.msk.f32.gmra.mrb[40].mxu0 %vm2344_vm11, %v2839_v2 }
 0xae0   :  { %3251 = vmatprep.mubr.f32.mxu0 %v22944_v58 }
 0xae3   :  { %13509 = vmatmul.mubr.msk.f32.gmra.mrb[42].mxu0 %vm2344_vm11, %v2840_v27  ;;  %v18859_v27 = vpop.permute.xlu1 %3306 }
 0xae4   :  { %3257 = vmatprep.mubr.f32.mxu0 %v22944_v58  ;;  %22947 = vst [vmem:[#allocation18_spill] sm:$0xff] %v18859_v27 }
 0xae7   :  { %13510 = vmatmul.mubr.msk.f32.gmra.mrb[44].mxu0 %vm2344_vm11, %v2841_v9 }
 0xae8   :  { %3263 = vmatprep.mubr.f32.mxu0 %v22944_v58 }
 0xaeb   :  { %13511 = vmatmul.mubr.msk.f32.gmra.mrb[46].mxu0 %vm2344_vm11, %v2842_v52 }
 0xaec   :  { %4099 = vmatprep.mubr.f32.mxu0 %v22944_v58 }
 0xba2   :  { %v3223_v45 = vpop.f32.mrb[32].mxu0 }
 0xba3   :  { %v3225_v61 = vpop.f32.mrb[33].mxu0  ;;  %v3334_v19 = vadd.f32 %v18851_v6, %v3223_v45  ;;  %v18862_v45 = vpop.permute.xlu0 %3311 }
 0xba4   :  { %v3335_v31 = vadd.f32 %v18851_v6, %v3225_v61  ;;  %22948 = vst [vmem:[#allocation19_spill] sm:$0xff] %v18862_v45 }
 0xba5   :  { %v3350_v57 = vmax.f32 %v3334_v19, 0.0 }
 0xba6   :  { %v3229_v47 = vpop.f32.mrb[34].mxu0  ;;  %v3351_v10 = vmax.f32 %v3335_v31, 0.0 }
 0xba7   :  { %v3336_v44 = vadd.f32 %v18854_v63, %v3229_v47  ;;  %v3231_v46 = vpop.f32.mrb[35].mxu0 }
 0xba8   :  { %v3337_v11 = vadd.f32 %v18854_v63, %v3231_v46 }
 0xba9   :  { %v3352_v53 = vmax.f32 %v3336_v44, 0.0 }
 0xbaa   :  { %v3353_v38 = vmax.f32 %v3337_v11, 0.0  ;;  %v3235_v1 = vpop.f32.mrb[36].mxu0 }
 0xbab   :  { %v15350_v21 = vpack.c.bf16 %v3352_v53, %v3350_v57  ;;  %v3237_v2 = vpop.f32.mrb[37].mxu0  ;;  %v3338_v52 = vadd.f32 %v18859_v27, %v3235_v1  ;;  %v18867_v1 = vpop.permute.xlu1 %3316 }
 0xbac   :  { %v15348_v9 = vpack.c.bf16 %v3353_v38, %v3351_v10  ;;  %v3339_v61 = vadd.f32 %v18859_v27, %v3237_v2  ;;  %22949 = vst [vmem:[#allocation20_spill] sm:$0xff] %v18867_v1  ;;  %v18870_v27 = vpop.permute.xlu0 %3321 }
 0xbad   :  { %v3354_v44 = vmax.f32 %v3338_v52, 0.0  ;;  %22950 = vst [vmem:[#allocation21_spill] sm:$0xff] %v18870_v27 }
 0xbae   :  { %v3241_v47 = vpop.f32.mrb[38].mxu0  ;;  %15349 = vmatprep.subr.bf16.mxu1 %v15348_v9  ;;  %v3355_v57 = vmax.f32 %v3339_v61, 0.0 }
 0xbaf   :  { %v3340_v46 = vadd.f32 %v18862_v45, %v3241_v47  ;;  %v3243_v19 = vpop.f32.mrb[39].mxu0  ;;  %15351 = vmatpush1.bf16.msra.mxu1 %v15350_v21 }
 0xbb0   :  { %v3341_v31 = vadd.f32 %v18862_v45, %v3243_v19 }
 0xbb1   :  { %v3356_v11 = vmax.f32 %v3340_v46, 0.0 }
 0xbb2   :  { %v3357_v53 = vmax.f32 %v3341_v31, 0.0  ;;  %v3247_v63 = vpop.f32.mrb[40].mxu0 }
 0xbb3   :  { %v15354_v10 = vpack.c.bf16 %v3356_v11, %v3354_v44  ;;  %v3249_v38 = vpop.f32.mrb[41].mxu0  ;;  %v3342_v2 = vadd.f32 %v18867_v1, %v3247_v63  ;;  %v18875_v63 = vpop.permute.xlu1 %3326 }
 0xbb4   :  { %v15352_v6 = vpack.c.bf16 %v3357_v53, %v3355_v57  ;;  %v3343_v9 = vadd.f32 %v18867_v1, %v3249_v38  ;;  %22951 = vst [vmem:[#allocation22_spill] sm:$0xff] %v18875_v63  ;;  %v18878_v1 = vpop.permute.xlu0 %3331 }
 0xbb5   :  { %v3358_v46 = vmax.f32 %v3342_v2, 0.0  ;;  %22952 = vst [vmem:[#allocation23_spill] sm:$0xff] %v18878_v1 }
 0xbb6   :  { %v3253_v47 = vpop.f32.mrb[42].mxu0  ;;  %15353 = vmatprep.subr.bf16.mxu1 %v15352_v6  ;;  %v3359_v31 = vmax.f32 %v3343_v9, 0.0 }
 0xbb7   :  { %v3344_v21 = vadd.f32 %v18870_v27, %v3253_v47  ;;  %v3255_v52 = vpop.f32.mrb[43].mxu0  ;;  %15355 = vmatpush1.bf16.msra.mxu1 %v15354_v10 }
 0xbb8   :  { %v3345_v61 = vadd.f32 %v18870_v27, %v3255_v52 }
 0xbb9   :  { %v3360_v19 = vmax.f32 %v3344_v21, 0.0 }
 0xbba   :  { %v3361_v44 = vmax.f32 %v3345_v61, 0.0  ;;  %v3259_v11 = vpop.f32.mrb[44].mxu0 }
 0xbbb   :  { %v15358_v57 = vpack.c.bf16 %v3360_v19, %v3358_v46  ;;  %v3261_v53 = vpop.f32.mrb[45].mxu0  ;;  %v3346_v38 = vadd.f32 %v18875_v63, %v3259_v11  ;;  %v3368_v11 = vld [vmem:[%s22743_s1 + $0x340] sm:$0xff] }
 0xbbc   :  { %v15356_v45 = vpack.c.bf16 %v3361_v44, %v3359_v31  ;;  %v3347_v6 = vadd.f32 %v18875_v63, %v3261_v53  ;;  %v3366_v44 = vld [vmem:[%s22743_s1 + $0x330] sm:$0xff] }
 0xbbd   :  { %v3362_v21 = vmax.f32 %v3346_v38, 0.0  ;;  %v3370_v53 = vld [vmem:[%s22743_s1 + $0x350] sm:$0xff]  ;;  %v3371_v38 = vld [vmem:[%s22743_s1 + $0x358] sm:$0xff] }
 0xbbe   :  { %v3265_v47 = vpop.f32.mrb[46].mxu0  ;;  %15357 = vmatprep.subr.bf16.mxu1 %v15356_v45  ;;  %v3363_v61 = vmax.f32 %v3347_v6, 0.0  ;;  %v3367_v45 = vld [vmem:[%s22743_s1 + $0x338] sm:$0xff]  ;;  %v3372_v6 = vld [vmem:[%s22743_s1 + $0x360] sm:$0xff] }
 0xbbf   :  { %v3348_v10 = vadd.f32 %v18878_v1, %v3265_v47  ;;  %v3267_v2 = vpop.f32.mrb[47].mxu0  ;;  %15359 = vmatpush1.bf16.msra.mxu1 %v15358_v57  ;;  %v3369_v57 = vld [vmem:[%s22743_s1 + $0x348] sm:$0xff] }
 0xbc0   :  { %v3349_v9 = vadd.f32 %v18878_v1, %v3267_v2  ;;  %v3373_v47 = vld [vmem:[%s22743_s1 + $0x368] sm:$0xff]  ;;  %v18923_v2 = vpop.permute.xlu1 %3384 }
 0xbc1   :  { %v3364_v52 = vmax.f32 %v3348_v10, 0.0  ;;  %22953 = vst [vmem:[#allocation24_spill] sm:$0xff] %v18923_v2 }
 0xbc2   :  { %v3365_v46 = vmax.f32 %v3349_v9, 0.0 }
 0xbc3   :  { %v15362_v19 = vpack.c.bf16 %v3364_v52, %v3362_v21 }
 0xbc4   :  { %v15360_v31 = vpack.c.bf16 %v3365_v46, %v3363_v61  ;;  %v18927_v61 = vpop.permute.xlu0 %3389 }
 0xbc5   :  { %22954 = vst [vmem:[#allocation25_spill] sm:$0xff] %v18927_v61 }
 0xbc6   :  { %15361 = vmatprep.subr.bf16.mxu1 %v15360_v31 }
 0xbc7   :  { %15363 = vmatpush1.bf16.msra.mxu1 %v15362_v19 }
 0xbca   :  { %13512 = vmatmul.mubr.msk.f32.vlgmr.msra.gmra.mrb[32].mxu1 %vm2344_vm11, %v3366_v44 }
 0xbcb   :  { %3516 = vmatprep.mubr.f32.mxu1 %v22944_v58 }
 0xbce   :  { %13513 = vmatmul.mubr.msk.f32.gmra.mrb[34].mxu1 %vm2344_vm11, %v3367_v45 }
 0xbcf   :  { %3522 = vmatprep.mubr.f32.mxu1 %v22944_v58 }
 0xbd2   :  { %13514 = vmatmul.mubr.msk.f32.gmra.mrb[36].mxu1 %vm2344_vm11, %v3368_v11 }
 0xbd3   :  { %3528 = vmatprep.mubr.f32.mxu1 %v22944_v58 }
 0xbd6   :  { %13515 = vmatmul.mubr.msk.f32.gmra.mrb[38].mxu1 %vm2344_vm11, %v3369_v57 }
 0xbd7   :  { %3534 = vmatprep.mubr.f32.mxu1 %v22944_v58 }
 0xbda   :  { %13516 = vmatmul.mubr.msk.f32.gmra.mrb[40].mxu1 %vm2344_vm11, %v3370_v53 }
 0xbdb   :  { %3540 = vmatprep.mubr.f32.mxu1 %v22944_v58 }
 0xbde   :  { %13517 = vmatmul.mubr.msk.f32.gmra.mrb[42].mxu1 %vm2344_vm11, %v3371_v38 }
 0xbdf   :  { %3546 = vmatprep.mubr.f32.mxu1 %v22944_v58 }
 0xbe2   :  { %13518 = vmatmul.mubr.msk.f32.gmra.mrb[44].mxu1 %vm2344_vm11, %v3372_v6  ;;  %v18943_v6 = vpop.permute.xlu1 %3394 }
 0xbe3   :  { %3552 = vmatprep.mubr.f32.mxu1 %v22944_v58  ;;  %22955 = vst [vmem:[#allocation26_spill] sm:$0xff] %v18943_v6 }
 0xbe6   :  { %13519 = vmatmul.mubr.msk.f32.gmra.mrb[46].mxu1 %vm2344_vm11, %v3373_v47 }
 0xbe7   :  { %3735 = vmatprep.mubr.f32.mxu1 %v22944_v58 }
 0xc9d   :  { %v3512_v10 = vpop.f32.mrb[32].mxu1 }
 0xc9e   :  { %v3514_v9 = vpop.f32.mrb[33].mxu1  ;;  %v3513_v52 = vadd.f32 %v3512_v10, %v18923_v2 }
 0xc9f   :  { %v3515_v21 = vadd.f32 %v3514_v9, %v18923_v2 }
 0xca0   :  { %v18935_v11 = vadd.f32 %v3513_v52, %v18341_v41  ;;  %v18951_v52 = vpop.permute.xlu0 %3399 }
 0xca1   :  { %v3518_v46 = vpop.f32.mrb[34].mxu1  ;;  %v18931_v44 = vadd.f32 %v3515_v21, %v18345_v42  ;;  %22956 = vst [vmem:[#allocation27_spill] sm:$0xff] %v18951_v52 }
 0xca2   :  { %v3519_v19 = vadd.f32 %v3518_v46, %v18927_v61  ;;  %v3520_v31 = vpop.f32.mrb[35].mxu1  ;;  %v22795_v41 = vmax.f32 %v18935_v11, 0.0 }
 0xca3   :  { %v3521_v45 = vadd.f32 %v3520_v31, %v18927_v61  ;;  %v22794_v42 = vmax.f32 %v18931_v44, 0.0 }
 0xca4   :  { %v18938_v57 = vadd.f32 %v3519_v19, %v18343_v54 }
 0xca5   :  { %v18941_v53 = vadd.f32 %v3521_v45, %v18347_v43  ;;  %v3524_v38 = vpop.f32.mrb[36].mxu1 }
 0xca6   :  { %v22793_v47 = vmax.f32 %v18938_v57, 0.0  ;;  %v3526_v10 = vpop.f32.mrb[37].mxu1  ;;  %v3525_v54 = vadd.f32 %v3524_v38, %v18943_v6 }
 0xca7   :  { %v22792_v9 = vmax.f32 %v18941_v53, 0.0  ;;  %v3527_v21 = vadd.f32 %v3526_v10, %v18943_v6 }
 0xca8   :  { %v15366_v19 = vpack.c.bf16 %v22793_v47, %v22795_v41  ;;  %v18967_v6 = vadd.f32 %v3525_v54, %v18373_v23 }
 0xca9   :  { %v3530_v43 = vpop.f32.mrb[38].mxu1  ;;  %v15364_v46 = vpack.c.bf16 %v22792_v9, %v22794_v42  ;;  %v18963_v10 = vadd.f32 %v3527_v21, %v18377_v0  ;;  %v18975_v42 = vpop.permute.xlu1 %3404 }
 0xcaa   :  { %v3531_v31 = vadd.f32 %v3530_v43, %v18951_v52  ;;  %v3532_v45 = vpop.f32.mrb[39].mxu1  ;;  %22957 = vst [vmem:[#allocation28_spill] sm:$0xff] %v18975_v42  ;;  %v22803_v54 = vmax.f32 %v18967_v6, 0.0 }
 0xcab   :  { %v3533_v38 = vadd.f32 %v3532_v45, %v18951_v52  ;;  %15365 = vmatprep.subr.bf16.mxu1 %v15364_v46  ;;  %v22802_v21 = vmax.f32 %v18963_v10, 0.0 }
 0xcac   :  { %v18970_v61 = vadd.f32 %v3531_v31, %v18375_v24  ;;  %15367 = vmatpush1.bf16.msra.mxu1 %v15366_v19  ;;  %v18983_v19 = vpop.permute.xlu0 %3409 }
 0xcad   :  { %v18973_v9 = vadd.f32 %v3533_v38, %v18379_v28  ;;  %v3536_v47 = vpop.f32.mrb[40].mxu1  ;;  %22958 = vst [vmem:[#allocation29_spill] sm:$0xff] %v18983_v19 }
 0xcae   :  { %v22801_v43 = vmax.f32 %v18970_v61, 0.0  ;;  %v3538_v0 = vpop.f32.mrb[41].mxu1  ;;  %v3537_v24 = vadd.f32 %v3536_v47, %v18975_v42 }
 0xcaf   :  { %v22800_v46 = vmax.f32 %v18973_v9, 0.0  ;;  %v3539_v23 = vadd.f32 %v3538_v0, %v18975_v42 }
 0xcb0   :  { %v15370_v45 = vpack.c.bf16 %v22801_v43, %v22803_v54  ;;  %v18999_v42 = vadd.f32 %v3537_v24, %v18399_v62 }
 0xcb1   :  { %v3542_v28 = vpop.f32.mrb[42].mxu1  ;;  %v15368_v31 = vpack.c.bf16 %v22800_v46, %v22802_v21  ;;  %v18995_v41 = vadd.f32 %v3539_v23, %v18403_v20  ;;  %v19007_v21 = vpop.permute.xlu1 %3414 }
 0xcb2   :  { %v3543_v38 = vadd.f32 %v3542_v28, %v18983_v19  ;;  %v3544_v0 = vpop.f32.mrb[43].mxu1  ;;  %22959 = vst [vmem:[#allocation30_spill] sm:$0xff] %v19007_v21  ;;  %v22815_v24 = vmax.f32 %v18999_v42, 0.0 }
 0xcb3   :  { %v3545_v47 = vadd.f32 %v3544_v0, %v18983_v19  ;;  %15369 = vmatprep.subr.bf16.mxu1 %v15368_v31  ;;  %v22814_v23 = vmax.f32 %v18995_v41, 0.0 }
 0xcb4   :  { %v19002_v52 = vadd.f32 %v3543_v38, %v18401_v7  ;;  %15371 = vmatpush1.bf16.msra.mxu1 %v15370_v45  ;;  %v19015_v45 = vpop.permute.xlu0 %3419 }
 0xcb5   :  { %v19005_v46 = vadd.f32 %v3545_v47, %v18405_v16  ;;  %v3548_v43 = vpop.f32.mrb[44].mxu1  ;;  %22960 = vst [vmem:[#allocation31_spill] sm:$0xff] %v19015_v45 }
 0xcb6   :  { %v22809_v28 = vmax.f32 %v19002_v52, 0.0  ;;  %v3550_v20 = vpop.f32.mrb[45].mxu1  ;;  %v3549_v7 = vadd.f32 %v3548_v43, %v19007_v21 }
 0xcb7   :  { %v22808_v31 = vmax.f32 %v19005_v46, 0.0  ;;  %v3551_v62 = vadd.f32 %v3550_v20, %v19007_v21 }
 0xcb8   :  { %v15374_v0 = vpack.c.bf16 %v22809_v28, %v22815_v24  ;;  %v19031_v21 = vadd.f32 %v3549_v7, %v18425_v14  ;;  %v3592_v7 = vld [vmem:[%s22743_s1 + $0x378] sm:$0xff] }
 0xcb9   :  { %v3554_v16 = vpop.f32.mrb[46].mxu1  ;;  %v15372_v38 = vpack.c.bf16 %v22808_v31, %v22814_v23  ;;  %v19027_v54 = vadd.f32 %v3551_v62, %v18429_v22 }
 0xcba   :  { %v3555_v47 = vadd.f32 %v3554_v16, %v19015_v45  ;;  %v3556_v20 = vpop.f32.mrb[47].mxu1  ;;  %v22813_v62 = vmax.f32 %v19031_v21, 0.0 }
 0xcbb   :  { %v3557_v43 = vadd.f32 %v3556_v20, %v19015_v45  ;;  %15373 = vmatprep.subr.bf16.mxu1 %v15372_v38  ;;  %v22812_v16 = vmax.f32 %v19027_v54, 0.0  ;;  %v3593_v38 = vld [vmem:[%s22743_s1 + $0x380] sm:$0xff]  ;;  %v3596_v20 = vld [vmem:[%s22743_s1 + $0x398] sm:$0xff] }
 0xcbc   :  { %v19034_v19 = vadd.f32 %v3555_v47, %v18427_v48  ;;  %15375 = vmatpush1.bf16.msra.mxu1 %v15374_v0  ;;  %v3594_v0 = vld [vmem:[%s22743_s1 + $0x388] sm:$0xff]  ;;  %v3595_v47 = vld [vmem:[%s22743_s1 + $0x390] sm:$0xff] }
 0xcbd   :  { %v19037_v31 = vadd.f32 %v3557_v43, %v18431_v26  ;;  %v3591_v26 = vld [vmem:[%s22743_s1 + $0x370] sm:$0xff]  ;;  %v3597_v43 = vld [vmem:[%s22743_s1 + $0x3a0] sm:$0xff] }
 0xcbe   :  { %v22811_v28 = vmax.f32 %v19034_v19, 0.0 }
 0xcbf   :  { %v22810_v22 = vmax.f32 %v19037_v31, 0.0 }
 0xcc0   :  { %v15378_v48 = vpack.c.bf16 %v22811_v28, %v22813_v62 }
 0xcc1   :  { %v15376_v14 = vpack.c.bf16 %v22810_v22, %v22812_v16 }
 0xcc3   :  { %15377 = vmatprep.subr.bf16.mxu1 %v15376_v14  ;;  %v3598_v14 = vld [vmem:[%s22743_s1 + $0x3a8] sm:$0xff] }
 0xcc4   :  { %15379 = vmatpush1.bf16.msra.mxu1 %v15378_v48 }
 0xcc7   :  { %13520 = vmatmul.mubr.msk.f32.vlgmr.msra.gmra.mrb[48].mxu1 %vm2344_vm11, %v3591_v26 }
 0xcc8   :  { %3741 = vmatprep.mubr.f32.mxu1 %v22944_v58 }
 0xccb   :  { %13521 = vmatmul.mubr.msk.f32.gmra.mrb[50].mxu1 %vm2344_vm11, %v3592_v7  ;;  %v19091_v7 = vpop.permute.xlu1 %3609 }
 0xccc   :  { %3747 = vmatprep.mubr.f32.mxu1 %v22944_v58  ;;  %22961 = vst [vmem:[#allocation32_spill] sm:$0xff] %v19091_v7 }
 0xccf   :  { %13522 = vmatmul.mubr.msk.f32.gmra.mrb[52].mxu1 %vm2344_vm11, %v3593_v38  ;;  %v19099_v1 = vpop.permute.xlu1 %3619 }
 0xcd0   :  { %3753 = vmatprep.mubr.f32.mxu1 %v22944_v58  ;;  %22963 = vst [vmem:[#allocation34_spill] sm:$0xff] %v19099_v1 }
 0xcd3   :  { %13523 = vmatmul.mubr.msk.f32.gmra.mrb[54].mxu1 %vm2344_vm11, %v3594_v0  ;;  %v19094_v0 = vpop.permute.xlu0 %3614 }
 0xcd4   :  { %3759 = vmatprep.mubr.f32.mxu1 %v22944_v58  ;;  %22962 = vst [vmem:[#allocation33_spill] sm:$0xff] %v19094_v0 }
 0xcd7   :  { %13524 = vmatmul.mubr.msk.f32.gmra.mrb[56].mxu1 %vm2344_vm11, %v3595_v47  ;;  %v19102_v27 = vpop.permute.xlu0 %3624 }
 0xcd8   :  { %3765 = vmatprep.mubr.f32.mxu1 %v22944_v58  ;;  %22964 = vst [vmem:[#allocation35_spill] sm:$0xff] %v19102_v27 }
 0xcdb   :  { %13525 = vmatmul.mubr.msk.f32.gmra.mrb[58].mxu1 %vm2344_vm11, %v3596_v20 }
 0xcdc   :  { %3771 = vmatprep.mubr.f32.mxu1 %v22944_v58 }
 0xcdf   :  { %13526 = vmatmul.mubr.msk.f32.gmra.mrb[60].mxu1 %vm2344_vm11, %v3597_v43 }
 0xce0   :  { %3777 = vmatprep.mubr.f32.mxu1 %v22944_v58 }
 0xce3   :  { %13527 = vmatmul.mubr.msk.f32.gmra.mrb[62].mxu1 %vm2344_vm11, %v3598_v14 }
 0xce4   :  { %3944 = vmatprep.mubr.f32.mxu1 %v22944_v58 }
 0xd9a   :  { %v3737_v48 = vpop.f32.mrb[48].mxu1 }
 0xd9b   :  { %v3739_v26 = vpop.f32.mrb[49].mxu1  ;;  %v3738_v38 = vadd.f32 %v3737_v48, %v19091_v7 }
 0xd9c   :  { %v3740_v47 = vadd.f32 %v3739_v26, %v19091_v7 }
 0xd9d   :  { %v3784_v16 = vmax.f32 %v3738_v38, 0.0 }
 0xd9e   :  { %v3743_v20 = vpop.f32.mrb[50].mxu1  ;;  %v3785_v62 = vmax.f32 %v3740_v47, 0.0 }
 0xd9f   :  { %v3744_v43 = vadd.f32 %v3743_v20, %v19094_v0  ;;  %v3745_v22 = vpop.f32.mrb[51].mxu1 }
 0xda0   :  { %v3746_v28 = vadd.f32 %v3745_v22, %v19094_v0 }
 0xda1   :  { %v3786_v14 = vmax.f32 %v3744_v43, 0.0 }
 0xda2   :  { %v3787_v23 = vmax.f32 %v3746_v28, 0.0  ;;  %v3749_v24 = vpop.f32.mrb[52].mxu1 }
 0xda3   :  { %v15382_v45 = vpack.c.bf16 %v3786_v14, %v3784_v16  ;;  %v3751_v2 = vpop.f32.mrb[53].mxu1  ;;  %v3750_v63 = vadd.f32 %v3749_v24, %v19099_v1  ;;  %v19107_v24 = vpop.permute.xlu1 %3629 }
 0xda4   :  { %v15380_v48 = vpack.c.bf16 %v3787_v23, %v3785_v62  ;;  %v3752_v26 = vadd.f32 %v3751_v2, %v19099_v1  ;;  %22965 = vst [vmem:[#allocation36_spill] sm:$0xff] %v19107_v24  ;;  %v19110_v1 = vpop.permute.xlu0 %3634 }
 0xda5   :  { %v3788_v47 = vmax.f32 %v3750_v63, 0.0 }
 0xda6   :  { %v3755_v20 = vpop.f32.mrb[54].mxu1  ;;  %15381 = vmatprep.subr.bf16.mxu1 %v15380_v48  ;;  %v3789_v43 = vmax.f32 %v3752_v26, 0.0 }
 0xda7   :  { %v3756_v22 = vadd.f32 %v3755_v20, %v19102_v27  ;;  %v3757_v38 = vpop.f32.mrb[55].mxu1  ;;  %15383 = vmatpush1.bf16.msra.mxu1 %v15382_v45 }
 0xda8   :  { %v3758_v28 = vadd.f32 %v3757_v38, %v19102_v27 }
 0xda9   :  { %v3790_v16 = vmax.f32 %v3756_v22, 0.0 }
 0xdaa   :  { %v3791_v14 = vmax.f32 %v3758_v28, 0.0  ;;  %v3761_v0 = vpop.f32.mrb[56].mxu1 }
 0xdab   :  { %v15386_v23 = vpack.c.bf16 %v3790_v16, %v3788_v47  ;;  %v3763_v62 = vpop.f32.mrb[57].mxu1  ;;  %v3762_v2 = vadd.f32 %v3761_v0, %v19107_v24  ;;  %v19115_v0 = vpop.permute.xlu1 %3639 }
 0xdac   :  { %v15384_v7 = vpack.c.bf16 %v3791_v14, %v3789_v43  ;;  %v3764_v48 = vadd.f32 %v3763_v62, %v19107_v24  ;;  %22966 = vst [vmem:[#allocation37_spill] sm:$0xff] %v19115_v0  ;;  %v19118_v24 = vpop.permute.xlu0 %3644 }
 0xdad   :  { %v3792_v22 = vmax.f32 %v3762_v2, 0.0  ;;  %22967 = vst [vmem:[#allocation38_spill] sm:$0xff] %v19118_v24 }
 0xdae   :  { %v3767_v20 = vpop.f32.mrb[58].mxu1  ;;  %15385 = vmatprep.subr.bf16.mxu1 %v15384_v7  ;;  %v3793_v28 = vmax.f32 %v3764_v48, 0.0 }
 0xdaf   :  { %v3768_v45 = vadd.f32 %v3767_v20, %v19110_v1  ;;  %v3769_v63 = vpop.f32.mrb[59].mxu1  ;;  %15387 = vmatpush1.bf16.msra.mxu1 %v15386_v23 }
 0xdb0   :  { %v3770_v26 = vadd.f32 %v3769_v63, %v19110_v1 }
 0xdb1   :  { %v3794_v38 = vmax.f32 %v3768_v45, 0.0 }
 0xdb2   :  { %v3795_v47 = vmax.f32 %v3770_v26, 0.0  ;;  %v3773_v16 = vpop.f32.mrb[60].mxu1 }
 0xdb3   :  { %v15390_v43 = vpack.c.bf16 %v3794_v38, %v3792_v22  ;;  %v3775_v14 = vpop.f32.mrb[61].mxu1  ;;  %v3774_v62 = vadd.f32 %v3773_v16, %v19115_v0  ;;  %v3802_v16 = vld [vmem:[%s22743_s1 + $0x3c0] sm:$0xff] }
 0xdb4   :  { %v15388_v27 = vpack.c.bf16 %v3795_v47, %v3793_v28  ;;  %v3776_v7 = vadd.f32 %v3775_v14, %v19115_v0  ;;  %v3800_v47 = vld [vmem:[%s22743_s1 + $0x3b0] sm:$0xff] }
 0xdb5   :  { %v3796_v45 = vmax.f32 %v3774_v62, 0.0  ;;  %v3804_v14 = vld [vmem:[%s22743_s1 + $0x3d0] sm:$0xff]  ;;  %v3805_v62 = vld [vmem:[%s22743_s1 + $0x3d8] sm:$0xff] }
 0xdb6   :  { %v3779_v20 = vpop.f32.mrb[62].mxu1  ;;  %15389 = vmatprep.subr.bf16.mxu1 %v15388_v27  ;;  %v3797_v26 = vmax.f32 %v3776_v7, 0.0  ;;  %v3801_v27 = vld [vmem:[%s22743_s1 + $0x3b8] sm:$0xff]  ;;  %v3806_v7 = vld [vmem:[%s22743_s1 + $0x3e0] sm:$0xff] }
 0xdb7   :  { %v3780_v23 = vadd.f32 %v3779_v20, %v19118_v24  ;;  %v3781_v2 = vpop.f32.mrb[63].mxu1  ;;  %15391 = vmatpush1.bf16.msra.mxu1 %v15390_v43  ;;  %v3803_v43 = vld [vmem:[%s22743_s1 + $0x3c8] sm:$0xff] }
 0xdb8   :  { %v3782_v48 = vadd.f32 %v3781_v2, %v19118_v24  ;;  %v3807_v20 = vld [vmem:[%s22743_s1 + $0x3e8] sm:$0xff] }
 0xdb9   :  { %v3798_v63 = vmax.f32 %v3780_v23, 0.0  ;;  %v19162_v23 = vpop.permute.xlu1 %3818 }
 0xdba   :  { %v3799_v22 = vmax.f32 %v3782_v48, 0.0  ;;  %22968 = vst [vmem:[#allocation39_spill] sm:$0xff] %v19162_v23 }
 0xdbb   :  { %v15394_v38 = vpack.c.bf16 %v3798_v63, %v3796_v45 }
 0xdbc   :  { %v15392_v28 = vpack.c.bf16 %v3799_v22, %v3797_v26  ;;  %v19166_v26 = vpop.permute.xlu0 %3823 }
 0xdbe   :  { %15393 = vmatprep.subr.bf16.mxu1 %v15392_v28 }
 0xdbf   :  { %15395 = vmatpush1.bf16.msra.mxu1 %v15394_v38  ;;  %v22969_v38 = vmax.f32 %v18935_v11, 0.0 }
 0xdc2   :  { %13528 = vmatmul.mubr.msk.f32.vlgmr.msra.gmra.mrb[64].mxu1 %vm2344_vm11, %v3800_v47 }
 0xdc3   :  { %3950 = vmatprep.mubr.f32.mxu1 %v22944_v58 }
 0xdc6   :  { %13529 = vmatmul.mubr.msk.f32.gmra.mrb[66].mxu1 %vm2344_vm11, %v3801_v27 }
 0xdc7   :  { %3956 = vmatprep.mubr.f32.mxu1 %v22944_v58 }
 0xdca   :  { %13530 = vmatmul.mubr.msk.f32.gmra.mrb[68].mxu1 %vm2344_vm11, %v3802_v16  ;;  %v22970_v16 = vmax.f32 %v18931_v44, 0.0 }
 0xdcb   :  { %3962 = vmatprep.mubr.f32.mxu1 %v22944_v58 }
 0xdce   :  { %13531 = vmatmul.mubr.msk.f32.gmra.mrb[70].mxu1 %vm2344_vm11, %v3803_v43 }
 0xdcf   :  { %3968 = vmatprep.mubr.f32.mxu1 %v22944_v58 }
 0xdd2   :  { %13532 = vmatmul.mubr.msk.f32.gmra.mrb[72].mxu1 %vm2344_vm11, %v3804_v14 }
 0xdd3   :  { %3974 = vmatprep.mubr.f32.mxu1 %v22944_v58 }
 0xdd6   :  { %13533 = vmatmul.mubr.msk.f32.gmra.mrb[74].mxu1 %vm2344_vm11, %v3805_v62  ;;  %v22971_v62 = vmax.f32 %v18938_v57, 0.0 }
 0xdd7   :  { %3980 = vmatprep.mubr.f32.mxu1 %v22944_v58 }
 0xdda   :  { %13534 = vmatmul.mubr.msk.f32.gmra.mrb[76].mxu1 %vm2344_vm11, %v3806_v7 }
 0xddb   :  { %3986 = vmatprep.mubr.f32.mxu1 %v22944_v58 }
 0xdde   :  { %13535 = vmatmul.mubr.msk.f32.gmra.mrb[78].mxu1 %vm2344_vm11, %v3807_v20  ;;  %v19176_v20 = vpop.permute.xlu1 %3828 }
 0xe95   :  { %v3946_v2 = vpop.f32.mrb[64].mxu1 }
 0xe96   :  { %v3947_v48 = vadd.f32 %v3946_v2, %v19162_v23  ;;  %v3948_v45 = vpop.f32.mrb[65].mxu1  ;;  %v22972_v2 = vmax.f32 %v18941_v53, 0.0 }
 0xe97   :  { %v3949_v63 = vadd.f32 %v3948_v45, %v19162_v23 }
 0xe98   :  { %v3993_v28 = vadd.f32 %v3947_v48, %v22969_v38 }
 0xe99   :  { %v3952_v22 = vpop.f32.mrb[66].mxu1  ;;  %v3994_v43 = vadd.f32 %v3949_v63, %v22970_v16  ;;  %v22973_v16 = vmax.f32 %v18967_v6, 0.0 }
 0xe9a   :  { %v3953_v47 = vadd.f32 %v3952_v22, %v19166_v26  ;;  %v3954_v27 = vpop.f32.mrb[67].mxu1  ;;  %v4009_v24 = vmax.f32 %v3993_v28, 0.0  ;;  %v22974_v28 = vmax.f32 %v18963_v10, 0.0 }
 0xe9b   :  { %v3955_v14 = vadd.f32 %v3954_v27, %v19166_v26  ;;  %v4010_v38 = vmax.f32 %v3994_v43, 0.0  ;;  %v19182_v27 = vpop.permute.xlu0 %3833  ;;  %v22975_v43 = vmax.f32 %v18970_v61, 0.0 }
 0xe9c   :  { %v3995_v7 = vadd.f32 %v3953_v47, %v22971_v62 }
 0xe9d   :  { %v3996_v45 = vadd.f32 %v3955_v14, %v22972_v2  ;;  %v3958_v23 = vpop.f32.mrb[68].mxu1 }
 0xe9e   :  { %v4011_v11 = vmax.f32 %v3995_v7, 0.0  ;;  %v3959_v48 = vadd.f32 %v3958_v23, %v19176_v20  ;;  %v3960_v22 = vpop.f32.mrb[69].mxu1 }
 0xe9f   :  { %v4012_v0 = vmax.f32 %v3996_v45, 0.0  ;;  %v3961_v44 = vadd.f32 %v3960_v22, %v19176_v20 }
 0xea0   :  { %v15398_v63 = vpack.c.bf16 %v4011_v11, %v4009_v24  ;;  %v3997_v62 = vadd.f32 %v3959_v48, %v22973_v16  ;;  %v19192_v24 = vpop.permute.xlu1 %3838  ;;  %v19198_v16 = vpop.permute.xlu0 %3843 }
 0xea1   :  { %v3964_v57 = vpop.f32.mrb[70].mxu1  ;;  %v15396_v47 = vpack.c.bf16 %v4012_v0, %v4010_v38  ;;  %v3998_v7 = vadd.f32 %v3961_v44, %v22974_v28  ;;  %v22976_v0 = vmax.f32 %v18973_v9, 0.0 }
 0xea2   :  { %v3965_v53 = vadd.f32 %v3964_v57, %v19182_v27  ;;  %v3966_v14 = vpop.f32.mrb[71].mxu1  ;;  %v4013_v11 = vmax.f32 %v3997_v62, 0.0  ;;  %v22978_v62 = vmax.f32 %v18995_v41, 0.0 }
 0xea3   :  { %v3967_v23 = vadd.f32 %v3966_v14, %v19182_v27  ;;  %15397 = vmatprep.subr.bf16.mxu0 %v15396_v47  ;;  %v4014_v10 = vmax.f32 %v3998_v7, 0.0  ;;  %v22979_v7 = vmax.f32 %v19002_v52, 0.0 }
 0xea4   :  { %v3999_v2 = vadd.f32 %v3965_v53, %v22975_v43  ;;  %15399 = vmatpush1.bf16.msra.mxu0 %v15398_v63  ;;  %v22977_v53 = vmax.f32 %v18999_v42, 0.0 }
 0xea5   :  { %v4000_v45 = vadd.f32 %v3967_v23, %v22976_v0  ;;  %v3970_v6 = vpop.f32.mrb[72].mxu1  ;;  %v19208_v0 = vpop.permute.xlu1 %3848 }
 0xea6   :  { %v4015_v48 = vmax.f32 %v3999_v2, 0.0  ;;  %v3971_v22 = vadd.f32 %v3970_v6, %v19192_v24  ;;  %v3972_v38 = vpop.f32.mrb[73].mxu1 }
 0xea7   :  { %v4016_v44 = vmax.f32 %v4000_v45, 0.0  ;;  %v3973_v57 = vadd.f32 %v3972_v38, %v19192_v24  ;;  %v22980_v45 = vmax.f32 %v19005_v46, 0.0 }
 0xea8   :  { %v15402_v47 = vpack.c.bf16 %v4015_v48, %v4013_v11  ;;  %v4001_v14 = vadd.f32 %v3971_v22, %v22977_v53 }
 0xea9   :  { %v3976_v61 = vpop.f32.mrb[74].mxu1  ;;  %v15400_v63 = vpack.c.bf16 %v4016_v44, %v4014_v10  ;;  %v4002_v23 = vadd.f32 %v3973_v57, %v22978_v62 }
 0xeaa   :  { %v3977_v9 = vadd.f32 %v3976_v61, %v19198_v16  ;;  %v3978_v28 = vpop.f32.mrb[75].mxu1  ;;  %v4017_v11 = vmax.f32 %v4001_v14, 0.0  ;;  %v19214_v61 = vpop.permute.xlu0 %3853  ;;  %v22983_v14 = vmax.f32 %v19027_v54, 0.0  ;;  %v4025_v54 = vld [vmem:[%s22743_s1 + $0x3f0] sm:$0xf] }
 0xeab   :  { %v3979_v43 = vadd.f32 %v3978_v28, %v19198_v16  ;;  %15401 = vmatprep.subr.bf16.mxu0 %v15400_v63  ;;  %v4018_v41 = vmax.f32 %v4002_v23, 0.0  ;;  %22981 = vst [vmem:[#allocation40_spill] sm:$0xff] %v19214_v61  ;;  %v22982_v63 = vmax.f32 %v19031_v21, 0.0  ;;  %v22984_v23 = vmax.f32 %v19034_v19, 0.0  ;;  %v4121_v19 = vld [vmem:[%s22746_s3 + $0x10] sm:$0xff] }
 0xeac   :  { %v4003_v2 = vadd.f32 %v3977_v9, %v22979_v7  ;;  %15403 = vmatpush1.bf16.msra.mxu0 %v15402_v47  ;;  %v22985_v7 = vmax.f32 %v19037_v31, 0.0 }
 0xead   :  { %v4004_v6 = vadd.f32 %v3979_v43, %v22980_v45  ;;  %v3982_v42 = vpop.f32.mrb[76].mxu1 }
 0xeae   :  { %v4019_v48 = vmax.f32 %v4003_v2, 0.0  ;;  %v3983_v22 = vadd.f32 %v3982_v42, %v19208_v0  ;;  %v3984_v38 = vpop.f32.mrb[77].mxu1 }
 0xeaf   :  { %v4020_v10 = vmax.f32 %v4004_v6, 0.0  ;;  %v3985_v44 = vadd.f32 %v3984_v38, %v19208_v0  ;;  %v4122_v38 = vld [vmem:[%s22746_s3 + $0x18] sm:$0xff] }
 0xeb0   :  { %v15406_v57 = vpack.c.bf16 %v4019_v48, %v4017_v11  ;;  %v4005_v53 = vadd.f32 %v3983_v22, %v22982_v63  ;;  %v4117_v22 = vpop.permute.xlu1 %4116  ;;  %v4395_v63 = vld [vmem:[%s22746_s3 + $0x30] sm:$0xff] }
 0xeb1   :  { %v3988_v52 = vpop.f32.mrb[78].mxu1  ;;  %v15404_v47 = vpack.c.bf16 %v4020_v10, %v4018_v41  ;;  %v4006_v28 = vadd.f32 %v3985_v44, %v22983_v14  ;;  %v4118_v31 = vsel %vm35_vm1, %v17388_v17, %v4117_v22  ;;  %v4114_v41 = vpop.permute.xlu0 %4113  ;;  %v4207_v10 = vld [vmem:[%s22746_s3 + $0x20] sm:$0xff] }
 0xeb2   :  { %v3989_v46 = vadd.f32 %v3988_v52, %v19214_v61  ;;  %v3990_v9 = vpop.f32.mrb[79].mxu1  ;;  %v4021_v45 = vmax.f32 %v4005_v53, 0.0  ;;  %v4115_v44 = vsel %vm34_vm0, %v17388_v17, %v4114_v41  ;;  %v4119_v52 = vld [vmem:[%s22746_s3] sm:$0xff] }
 0xeb3   :  { %v3991_v62 = vadd.f32 %v3990_v9, %v19214_v61  ;;  %15405 = vmatprep.subr.bf16.mxu0 %v15404_v47  ;;  %v4022_v21 = vmax.f32 %v4006_v28, 0.0  ;;  %v4120_v47 = vld [vmem:[%s22746_s3 + $0x8] sm:$0xff] }
 0xeb4   :  { %v4007_v43 = vadd.f32 %v3989_v46, %v22984_v23  ;;  %15407 = vmatpush1.bf16.msra.mxu0 %v15406_v57  ;;  %v4208_v57 = vld [vmem:[%s22746_s3 + $0x28] sm:$0xff]  ;;  %v19278_v28 = vpop.permute.xlu1 %4383 }
 0xeb5   :  { %v4008_v2 = vadd.f32 %v3991_v62, %v22985_v7  ;;  %v19276_v9 = vpop.permute.xlu0 %4388  ;;  %22987 = vst [vmem:[#allocation42_spill] sm:$0xff] %v19278_v28 }
 0xeb6   :  { %v4023_v6 = vmax.f32 %v4007_v43, 0.0  ;;  %22986 = vst [vmem:[#allocation41_spill] sm:$0xff] %v19276_v9 }
 0xeb7   :  { %v4024_v42 = vmax.f32 %v4008_v2, 0.0 }
 0xeb8   :  { %v15410_v11 = vpack.c.bf16 %v4023_v6, %v4021_v45  ;;  %v4396_v6 = vld [vmem:[%s22746_s3 + $0x38] sm:$0xff] }
 0xeb9   :  { %v15408_v48 = vpack.c.bf16 %v4024_v42, %v4022_v21  ;;  %v4490_v21 = vld [vmem:[%s22746_s3 + $0x40] sm:$0xff]  ;;  %v4491_v42 = vld [vmem:[%s22746_s3 + $0x48] sm:$0xff] }
 0xebb   :  { %15409 = vmatprep.subr.bf16.mxu0 %v15408_v48  ;;  %v4402_v48 = vpop.permute.xlu1 %4401 }
 0xebc   :  { %15411 = vmatpush1.bf16.msra.mxu0 %v15410_v11  ;;  %v4407_v11 = vpop.permute.xlu0 %4406 }
 0xebd   :  { %14400 = vmatprep.subr.msk.mxu0 %vm116_vm3, %v17388_v17 }
 0xebf   :  { %13536 = vmatmul.mubr.msk.f32.vlgmr.msra.gmra.mrb[48].mxu0 %vm2344_vm11, %v4025_v54  ;;  %v4603_v54 = vld [vmem:[%s22746_s3 + $0x60] sm:$0xff] }
 0xec0   :  { %14401 = vmatpush3.msk.msra.mxu0 %vm116_vm3, %v17388_v17  ;;  %14402 = vmatprep.mubr.msk.f32.mxu0 %vm109_vm4, %v4121_v19  ;;  %v4502_v22 = vpop.permute.xlu0 %4501  ;;  %v4497_v19 = vpop.permute.xlu1 %4496 }
 0xec1   :  { %14405 = vmatprep.subr.msk.mxu0 %vm116_vm3, %v4118_v31 }
 0xec3   :  { %14403 = vmatmul.mubr.msk.f32.vlgmr.msra.gmra.mrb[50].mxu0 %vm109_vm4, %v4122_v38 }
 0xec4   :  { %14406 = vmatpush3.msk.msra.mxu0 %vm116_vm3, %v4118_v31  ;;  %14407 = vmatprep.mubr.msk.f32.mxu0 %vm109_vm4, %v4207_v10  ;;  %v19302_v31 = vadd.f32 %v4502_v22, %v4407_v11 }
 0xec5   :  { %14410 = vmatprep.subr.msk.mxu0 %vm116_vm3, %v4115_v44 }
 0xec6   :  { %22988 = vst [vmem:[#allocation43_spill] sm:$0xff] %v19302_v31 }
 0xecb   :  { %14408 = vmatmul.mubr.msk.f32.vlgmr.msra.gmra.mrb[50].mxu0 %vm109_vm4, %v4208_v57 }
 0xecc   :  { %14411 = vmatpush3.msk.msra.mxu0 %vm116_vm3, %v4115_v44  ;;  %14412 = vmatprep.mubr.msk.f32.mxu0 %vm109_vm4, %v4119_v52 }
 0xed3   :  { %14413 = vmatmul.mubr.msk.f32.vlgmr.msra.gmra.mrb[50].mxu0 %vm109_vm4, %v4120_v47 }
 0xed4   :  { %14419 = vmatprep.mubr.msk.f32.mxu0 %vm418_vm9, %v4395_v63 }
 0xf92   :  { %v19272_v53 = vpop.f32.mrb[48].mxu0 }
 0xf93   :  { %v19274_v46 = vpop.f32.mrb[49].mxu0 }
 0xfa6   :  { %v14414_v14 = vpop.f32.mrb[50].mxu0 }
 0xfa7   :  { %v4392_v62 = vadd.f32 %v14414_v14, %v19276_v9  ;;  %v4368_v23 = vpop.f32.mrb[51].mxu0  ;;  %v4853_v14 = vld [vmem:[%s22745_s4 + $0x58] sm:$0xff] }
 0xfa8   :  { %v4391_v43 = vadd.f32 %v19278_v28, %v4368_v23  ;;  %v4604_v23 = vld [vmem:[%s22746_s3 + $0x68] sm:$0xff] }
 0xfa9   :  { %v4394_v7 = vmax.f32 %v4392_v62, 0.0  ;;  %v4852_v62 = vld [vmem:[%s22745_s4 + $0x50] sm:$0xff] }
 0xfaa   :  { %v4393_v2 = vmax.f32 %v4391_v43, 0.0  ;;  %v4686_v43 = vld [vmem:[%s22746_s3 + $0x70] sm:$0xff] }
 0xfac   :  { %v15412_v45 = vpack.c.bf16 %v4394_v7, %v4393_v2  ;;  %v4871_v7 = vld [vmem:[%s22745_s4 + $0x88] sm:$0xff]  ;;  %v4870_v2 = vld [vmem:[%s22745_s4 + $0x80] sm:$0xff] }
 0xfae   :  { %15413 = vmatprep.subr.bf16.mxu0 %v15412_v45 }
 0xfaf   :  { %15415 = vmatpush3.bf16.msra.mxu0 %v15412_v45 }
 0xfb0   :  { %14422 = vmatprep.subr.msk.mxu0 %vm116_vm3, %v17388_v17 }
 0xfb2   :  { %14420 = vmatmul.mubr.msk.f32.vlgmr.msra.gmra.mrb[52].mxu0 %vm418_vm9, %v4396_v6 }
 0xfb3   :  { %14423 = vmatpush3.msk.msra.mxu0 %vm116_vm3, %v17388_v17  ;;  %14424 = vmatprep.mubr.msk.f32.mxu0 %vm109_vm4, %v4490_v21  ;;  %v19304_v17 = vadd.f32 %v4497_v19, %v4402_v48 }
 0xfb5   :  { %22989 = vst [vmem:[#allocation44_spill] sm:$0xff] %v19304_v17 }
 0xfba   :  { %14425 = vmatmul.mubr.msk.f32.vlgmr.msra.gmra.mrb[52].mxu0 %vm109_vm4, %v4491_v42 }
 0xfbb   :  { %14431 = vmatprep.mubr.msk.f32.mxu0 %vm418_vm9, %v4603_v54 }
0x108d   :  { %v14426_v38 = vpop.f32.mrb[52].mxu0 }
0x108e   :  { %v16073_v41 = vadd.f32 %v19302_v31, %v14426_v38  ;;  %v4576_v10 = vpop.f32.mrb[53].mxu0 }
0x108f   :  { %v16075_v44 = vadd.f32 %v19304_v17, %v4576_v10 }
0x1090   :  { %v19308_v57 = vmax.f32 %v16073_v41, 0.0 }
0x1091   :  { %v19310_v52 = vmax.f32 %v16075_v44, 0.0  ;;  %v4687_v44 = vld [vmem:[%s22746_s3 + $0x78] sm:$0xff] }
0x1093   :  { %v16733_v47 = vpack.i.bf16 %v19308_v57, %v19310_v52  ;;  %v15416_v63 = vpack.c.bf16 %v19308_v57, %v19310_v52 }
0x1095   :  { %16734 = vrot.lane.b32.xlu0 %v16733_v47, %s17311_s23  ;;  %16729 = vrot.lane.b32.xlu1 %v16733_v47, %s17310_s22  ;;  %v4601_v47 = vld [vmem:[%s22746_s3 + $0x50] sm:$0xff] }
0x1096   :  { %15417 = vmatprep.subr.bf16.mxu0 %v15416_v63 }
0x1097   :  { %15419 = vmatpush3.bf16.msra.mxu0 %v15416_v63  ;;  %v4602_v63 = vld [vmem:[%s22746_s3 + $0x58] sm:$0xff] }
0x1099   :  { %4861 = vperm.xlu0 %16566, %v4853_v14   ;;  %4856 = vperm.xlu1 %16567, %v4852_v62   ;;  %v4868_v14 = vld [vmem:[%s22746_s3 + $0x80] sm:$0xff] }
0x109a   :  { %14432 = vmatmul.mubr.msk.f32.vlgmr.msra.gmra.mrb[54].mxu0 %vm418_vm9, %v4604_v23  ;;  %14452 = vmatprep.mubr.msk.f32.mxu1 %vm418_vm9, %v4868_v14 }
0x109b   :  { %14438 = vmatprep.mubr.msk.f32.mxu0 %vm418_vm9, %v4686_v43 }
0x109d   :  { %4879 = vperm.xlu0 %16566, %v4871_v7   ;;  %4874 = vperm.xlu1 %16567, %v4870_v2  }
0x1107   :  { %v16735_v45 = vpop.permute.xlu0 %16734  ;;  %v16730_v6 = vpop.permute.xlu1 %16729 }
0x1108   :  { %v16737_v21 = vunpack.i.h.bf16 %v16735_v45  ;;  %v16736_v42 = vunpack.i.l.bf16 %v16735_v45  ;;  %v16732_v11 = vunpack.i.h.bf16 %v16730_v6  ;;  %v16731_v48 = vunpack.i.l.bf16 %v16730_v6 }
0x110a   :  { %v4599_v54 = vsel %vm35_vm1, %v19310_v52, %v16731_v48  ;;  %v4600_v22 = vsel %vm35_vm1, %v19308_v57, %v16732_v11  ;;  %v4593_v19 = vsel %vm34_vm0, %v19310_v52, %v16736_v42  ;;  %v4594_v38 = vsel %vm34_vm0, %v19308_v57, %v16737_v21  ;;  %v4869_v11 = vld [vmem:[%s22746_s3 + $0x88] sm:$0xff]  ;;  %v4983_v48 = vld [vmem:[%s22746_s3 + $0xb0] sm:$0xff] }
0x110b   :  { %v15420_v41 = vpack.c.bf16 %v4600_v22, %v4599_v54  ;;  %v15424_v10 = vpack.c.bf16 %v4594_v38, %v4593_v19 }
0x110d   :  { %15421 = vmatprep.subr.bf16.mxu0 %v15420_v41 }
0x110e   :  { %15423 = vmatpush3.bf16.msra.mxu0 %v15420_v41 }
0x110f   :  { %15425 = vmatprep.subr.bf16.mxu0 %v15424_v10 }
0x1111   :  { %14439 = vmatmul.mubr.msk.f32.vlgmr.msra.gmra.mrb[54].mxu0 %vm418_vm9, %v4687_v44 }
0x1112   :  { %15427 = vmatpush3.bf16.msra.mxu0 %v15424_v10  ;;  %14445 = vmatprep.mubr.msk.f32.mxu0 %vm418_vm9, %v4601_v47 }
0x1118   :  { %v19366_v62 = vpop.permute.xlu0 %4861  ;;  %v19368_v43 = vpop.permute.xlu1 %4856 }
0x1119   :  { %14446 = vmatmul.mubr.msk.f32.vlgmr.msra.gmra.mrb[54].mxu0 %vm418_vm9, %v4602_v63  ;;  %22990 = vst [vmem:[#allocation45_spill] sm:$0xff] %v19366_v62  ;;  %22991 = vst [vmem:[#allocation46_spill] sm:$0xff] %v19368_v43 }
0x111c   :  { %v19380_v54 = vpop.permute.xlu0 %4879  ;;  %v19382_v19 = vpop.permute.xlu1 %4874 }
0x111d   :  { %22992 = vst [vmem:[#allocation47_spill] sm:$0xff] %v19380_v54  ;;  %22993 = vst [vmem:[#allocation48_spill] sm:$0xff] %v19382_v19 }
0x11ec   :  { %v14447_v23 = vpop.f32.mrb[54].mxu0 }
0x11ed   :  { %v4865_v7 = vadd.f32 %v14447_v23, %v19366_v62  ;;  %v4841_v2 = vpop.f32.mrb[55].mxu0 }
0x11ee   :  { %v4864_v45 = vadd.f32 %v19368_v43, %v4841_v2  ;;  %v5287_v2 = vld [vmem:[%s22745_s4 + $0x98] sm:$0xff] }
0x11ef   :  { %v4867_v6 = vmax.f32 %v4865_v7, 0.0 }
0x11f0   :  { %v4866_v21 = vmax.f32 %v4864_v45, 0.0  ;;  %v4985_v45 = vld [vmem:[%s22746_s3 + $0xc0] sm:$0xff] }
0x11f2   :  { %v15428_v42 = vpack.c.bf16 %v4867_v6, %v4866_v21  ;;  %v5289_v6 = vld [vmem:[%s22745_s4 + $0xa8] sm:$0xff]  ;;  %v5288_v21 = vld [vmem:[%s22745_s4 + $0xa0] sm:$0xff] }
0x11f4   :  { %15429 = vmatprep.subr.bf16.mxu1 %v15428_v42 }
0x11f5   :  { %15431 = vmatpush3.bf16.msra.mxu1 %v15428_v42  ;;  %v4986_v42 = vld [vmem:[%s22746_s3 + $0xc8] sm:$0xff] }
0x11f8   :  { %14453 = vmatmul.mubr.msk.f32.vlgmr.msra.gmra.mrb[80].mxu1 %vm418_vm9, %v4869_v11  ;;  %v5084_v11 = vld [vmem:[%s22746_s3 + $0xd0] sm:$0xff] }
0x11f9   :  { %14459 = vmatprep.mubr.msk.f32.mxu1 %vm418_vm9, %v4983_v48  ;;  %v5323_v48 = vld [vmem:[%s22745_s4 + $0xf8] sm:$0xff] }
0x12cb   :  { %v14454_v22 = vpop.f32.mrb[80].mxu1 }
0x12cc   :  { %v4960_v38 = vadd.f32 %v14454_v22, %v19380_v54  ;;  %v4954_v41 = vpop.f32.mrb[81].mxu1  ;;  %v5322_v22 = vld [vmem:[%s22745_s4 + $0xf0] sm:$0xff] }
0x12cd   :  { %v4955_v10 = vadd.f32 %v4954_v41, %v19382_v19  ;;  %v5447_v41 = vld [vmem:[%s22745_s4 + $0x110] sm:$0xff] }
0x12ce   :  { %v4964_v44 = vadd.f32 %v4960_v38, %v19308_v57  ;;  %v5286_v57 = vld [vmem:[%s22745_s4 + $0x90] sm:$0xff]  ;;  %v5448_v38 = vld [vmem:[%s22745_s4 + $0x118] sm:$0xff] }
0x12cf   :  { %v4963_v47 = vadd.f32 %v4955_v10, %v19310_v52  ;;  %v4984_v52 = vld [vmem:[%s22746_s3 + $0xb8] sm:$0xff]  ;;  %v5325_v10 = vld [vmem:[%s22745_s4 + $0x108] sm:$0xff] }
0x12d0   :  { %v4966_v63 = vmax.f32 %v4964_v44, 0.0  ;;  %v5324_v44 = vld [vmem:[%s22745_s4 + $0x100] sm:$0xff] }
0x12d1   :  { %v4965_v14 = vmax.f32 %v4963_v47, 0.0  ;;  %v5450_v47 = vld [vmem:[%s22745_s4 + $0x128] sm:$0xff] }
0x12d3   :  { %v16743_v23 = vpack.i.bf16 %v4966_v63, %v4965_v14  ;;  %v19388_v7 = vpack.c.bf16 %v4966_v63, %v4965_v14 }
0x12d5   :  { %16744 = vrot.lane.b32.xlu0 %v16743_v23, %s17311_s23  ;;  %16739 = vrot.lane.b32.xlu1 %v16743_v23, %s17310_s22  ;;  %v5449_v23 = vld [vmem:[%s22745_s4 + $0x120] sm:$0xff] }
0x12d6   :  { %15433 = vmatprep.subr.bf16.mxu1 %v19388_v7 }
0x12d7   :  { %15435 = vmatpush3.bf16.msra.mxu1 %v19388_v7 }
0x12d9   :  { %5297 = vperm.xlu0 %16566, %v5287_v2   ;;  %5292 = vperm.xlu1 %16567, %v5286_v57  }
0x12da   :  { %14460 = vmatmul.mubr.msk.f32.vlgmr.msra.gmra.mrb[82].mxu1 %vm418_vm9, %v4984_v52 }
0x12db   :  { %14462 = vmatprep.mubr.msk.f32.mxu1 %vm418_vm9, %v4985_v45 }
0x12dd   :  { %5307 = vperm.xlu0 %16566, %v5289_v6   ;;  %5302 = vperm.xlu1 %16567, %v5288_v21  }
0x12de   :  { %14463 = vmatmul.mubr.msk.f32.gmra.mrb[84].mxu1 %vm418_vm9, %v4986_v42 }
0x12df   :  { %14469 = vmatprep.mubr.msk.f32.mxu1 %vm418_vm9, %v5084_v11 }
0x12e1   :  { %5333 = vperm.xlu0 %16566, %v5323_v48   ;;  %5328 = vperm.xlu1 %16567, %v5322_v22  }
0x12e5   :  { %5458 = vperm.xlu0 %16566, %v5448_v38   ;;  %5453 = vperm.xlu1 %16567, %v5447_v41  }
0x12e9   :  { %5343 = vperm.xlu0 %16566, %v5325_v10   ;;  %5338 = vperm.xlu1 %16567, %v5324_v44   ;;  %v5085_v10 = vld [vmem:[%s22746_s3 + $0xd8] sm:$0xff]  ;;  %v5086_v44 = vld [vmem:[%s22746_s3 + $0xe0] sm:$0xff] }
0x12ed   :  { %5468 = vperm.xlu0 %16566, %v5450_v47   ;;  %5463 = vperm.xlu1 %16567, %v5449_v23   ;;  %v4980_v47 = vld [vmem:[%s22746_s3 + $0x98] sm:$0xff]  ;;  %v4981_v23 = vld [vmem:[%s22746_s3 + $0xa0] sm:$0xff] }
0x1347   :  { %v16745_v2 = vpop.permute.xlu0 %16744  ;;  %v16740_v57 = vpop.permute.xlu1 %16739 }
0x1348   :  { %v16747_v52 = vunpack.i.h.bf16 %v16745_v2  ;;  %v16746_v45 = vunpack.i.l.bf16 %v16745_v2  ;;  %v16742_v6 = vunpack.i.h.bf16 %v16740_v57  ;;  %v16741_v21 = vunpack.i.l.bf16 %v16740_v57  ;;  %v4982_v2 = vld [vmem:[%s22746_s3 + $0xa8] sm:$0xff]  ;;  %v5318_v57 = vld [vmem:[%s22746_s3 + $0xf0] sm:$0xff] }
0x1349   :  { %14493 = vmatprep.mubr.msk.f32.mxu0 %vm1446_vm10, %v5318_v57 }
0x134a   :  { %v4977_v42 = vsel %vm35_vm1, %v4965_v14, %v16741_v21  ;;  %v4978_v11 = vsel %vm35_vm1, %v4966_v63, %v16742_v6  ;;  %v4971_v48 = vsel %vm34_vm0, %v4965_v14, %v16746_v45  ;;  %v4972_v22 = vsel %vm34_vm0, %v4966_v63, %v16747_v52  ;;  %v5087_v63 = vld [vmem:[%s22746_s3 + $0xe8] sm:$0xff]  ;;  %v4979_v14 = vld [vmem:[%s22746_s3 + $0x90] sm:$0xff] }
0x134b   :  { %v15436_v38 = vpack.c.bf16 %v4978_v11, %v4977_v42  ;;  %v15440_v41 = vpack.c.bf16 %v4972_v22, %v4971_v48 }
0x134d   :  { %15437 = vmatprep.subr.bf16.mxu1 %v15436_v38 }
0x134e   :  { %15439 = vmatpush3.bf16.msra.mxu1 %v15436_v38 }
0x134f   :  { %15441 = vmatprep.subr.bf16.mxu1 %v15440_v41 }
0x1351   :  { %14470 = vmatmul.mubr.msk.f32.vlgmr.msra.gmra.mrb[82].mxu1 %vm418_vm9, %v5085_v10 }
0x1352   :  { %15443 = vmatpush3.bf16.msra.mxu1 %v15440_v41  ;;  %14472 = vmatprep.mubr.msk.f32.mxu1 %vm418_vm9, %v5086_v44 }
0x1355   :  { %14473 = vmatmul.mubr.msk.f32.gmra.mrb[84].mxu1 %vm418_vm9, %v5087_v63 }
0x1356   :  { %14479 = vmatprep.mubr.msk.f32.mxu1 %vm418_vm9, %v4979_v14 }
0x1358   :  { %v19486_v52 = vpop.permute.xlu0 %5297  ;;  %v19488_v45 = vpop.permute.xlu1 %5292 }
0x1359   :  { %14480 = vmatmul.mubr.msk.f32.vlgmr.msra.gmra.mrb[82].mxu1 %vm418_vm9, %v4980_v47  ;;  %22994 = vst [vmem:[#allocation49_spill] sm:$0xff] %v19486_v52  ;;  %22995 = vst [vmem:[#allocation50_spill] sm:$0xff] %v19488_v45 }
0x135a   :  { %14482 = vmatprep.mubr.msk.f32.mxu1 %vm418_vm9, %v4981_v23 }
0x135c   :  { %v19492_v22 = vpop.permute.xlu0 %5307  ;;  %v19494_v10 = vpop.permute.xlu1 %5302 }
0x135d   :  { %14483 = vmatmul.mubr.msk.f32.gmra.mrb[84].mxu1 %vm418_vm9, %v4982_v2  ;;  %22996 = vst [vmem:[#allocation51_spill] sm:$0xff] %v19492_v22  ;;  %22997 = vst [vmem:[#allocation52_spill] sm:$0xff] %v19494_v10 }
0x142c   :  { %v14481_v6 = vpop.f32.mrb[82].mxu1 }
0x142d   :  { %v5311_v21 = vadd.f32 %v14481_v6, %v19486_v52  ;;  %v5263_v42 = vpop.f32.mrb[83].mxu1  ;;  %v5319_v6 = vld [vmem:[%s22746_s3 + $0xf8] sm:$0xff] }
0x142e   :  { %v5310_v11 = vadd.f32 %v19488_v45, %v5263_v42  ;;  %v5321_v42 = vld [vmem:[%s22746_s3 + $0x108] sm:$0xff] }
0x142f   :  { %v5315_v48 = vmax.f32 %v5311_v21, 0.0  ;;  %v5320_v21 = vld [vmem:[%s22746_s3 + $0x100] sm:$0xff] }
0x1430   :  { %v5314_v38 = vmax.f32 %v5310_v11, 0.0  ;;  %v14484_v41 = vpop.f32.mrb[84].mxu1  ;;  %v5443_v11 = vld [vmem:[%s22746_s3 + $0x110] sm:$0xff] }
0x1431   :  { %v5313_v44 = vadd.f32 %v14484_v41, %v19492_v22  ;;  %v5273_v63 = vpop.f32.mrb[85].mxu1  ;;  %v5608_v41 = vld [vmem:[%s22746_s3 + $0x170] sm:$0xff] }
0x1432   :  { %v15444_v14 = vpack.c.bf16 %v5315_v48, %v5314_v38  ;;  %v5312_v47 = vadd.f32 %v19494_v10, %v5273_v63  ;;  %v5444_v48 = vld [vmem:[%s22746_s3 + $0x118] sm:$0xff]  ;;  %v5446_v38 = vld [vmem:[%s22746_s3 + $0x128] sm:$0xff]  ;;  %14517 = vmatprep.mubr.msk.f32.mxu1 %vm1446_vm10, %v5608_v41  ;;  %v5329_v63 = vpop.permute.xlu1 %5328 }
0x1433   :  { %v5317_v23 = vmax.f32 %v5313_v44, 0.0  ;;  %v5334_v44 = vpop.permute.xlu0 %5333 }
0x1434   :  { %v5316_v2 = vmax.f32 %v5312_v47, 0.0  ;;  %15445 = vmatprep.subr.bf16.mxu0 %v15444_v14 }
0x1435   :  { %15447 = vmatpush3.bf16.msra.mxu0 %v15444_v14 }
0x1436   :  { %v15448_v57 = vpack.c.bf16 %v5317_v23, %v5316_v2  ;;  %v5454_v47 = vpop.permute.xlu1 %5453 }
0x1437   :  { %v5459_v14 = vpop.permute.xlu0 %5458 }
0x1438   :  { %15449 = vmatprep.subr.bf16.mxu0 %v15448_v57 }
0x1439   :  { %15451 = vmatpush3.bf16.msra.mxu0 %v15448_v57  ;;  %v19532_v57 = vadd.f32 %v5459_v14, %v5334_v44 }
0x143a   :  { %15453 = vmatprep.subr.bf16.mxu0 %v19388_v7  ;;  %v5339_v2 = vpop.permute.xlu1 %5338 }
0x143b   :  { %v5344_v23 = vpop.permute.xlu0 %5343  ;;  %22998 = vst [vmem:[#allocation53_spill] sm:$0xff] %v19532_v57 }
0x143c   :  { %14494 = vmatmul.mubr.msk.f32.vlgmr.msra.gmra.mrb[56].mxu0 %vm1446_vm10, %v5319_v6  ;;  %v19534_v6 = vadd.f32 %v5454_v47, %v5329_v63 }
0x143d   :  { %15455 = vmatpush3.bf16.msra.mxu0 %v19388_v7  ;;  %14496 = vmatprep.mubr.msk.f32.mxu0 %vm1446_vm10, %v5320_v21  ;;  %v5445_v7 = vld [vmem:[%s22746_s3 + $0x120] sm:$0xff] }
0x143e   :  { %22999 = vst [vmem:[#allocation54_spill] sm:$0xff] %v19534_v6 }
0x143f   :  { %v5469_v21 = vpop.permute.xlu0 %5468 }
0x1440   :  { %14497 = vmatmul.mubr.msk.f32.gmra.mrb[58].mxu0 %vm1446_vm10, %v5321_v42  ;;  %v19538_v10 = vadd.f32 %v5469_v21, %v5344_v23 }
0x1441   :  { %14503 = vmatprep.mubr.msk.f32.mxu0 %vm418_vm9, %v5443_v11  ;;  %v5464_v11 = vpop.permute.xlu1 %5463 }
0x1442   :  { %23000 = vst [vmem:[#allocation55_spill] sm:$0xff] %v19538_v10  ;;  %v19542_v22 = vadd.f32 %v5464_v11, %v5339_v2 }
0x1444   :  { %14504 = vmatmul.mubr.msk.f32.vlgmr.msra.gmra.mrb[56].mxu0 %vm418_vm9, %v5444_v48  ;;  %23001 = vst [vmem:[#allocation56_spill] sm:$0xff] %v19542_v22 }
0x1445   :  { %14506 = vmatprep.mubr.msk.f32.mxu0 %vm418_vm9, %v5445_v7 }
0x1448   :  { %14507 = vmatmul.mubr.msk.f32.gmra.mrb[58].mxu0 %vm418_vm9, %v5446_v38 }
0x1517   :  { %v14505_v42 = vpop.f32.mrb[56].mxu0 }
0x1518   :  { %v16077_v48 = vadd.f32 %v19532_v57, %v14505_v42  ;;  %v5549_v7 = vpop.f32.mrb[57].mxu0 }
0x1519   :  { %v16079_v38 = vadd.f32 %v19534_v6, %v5549_v7 }
0x151a   :  { %v19540_v41 = vmax.f32 %v16077_v48, 0.0  ;;  %v6019_v48 = vld [vmem:[%s22745_s4 + $0x130] sm:$0xff] }
0x151b   :  { %v19544_v45 = vmax.f32 %v16079_v38, 0.0  ;;  %v14508_v44 = vpop.f32.mrb[58].mxu0  ;;  %v5609_v38 = vld [vmem:[%s22746_s3 + $0x178] sm:$0xff] }
0x151c   :  { %v16081_v63 = vadd.f32 %v19538_v10, %v14508_v44  ;;  %v5559_v14 = vpop.f32.mrb[59].mxu0  ;;  %v5610_v44 = vld [vmem:[%s22746_s3 + $0x180] sm:$0xff] }
0x151d   :  { %v16083_v47 = vadd.f32 %v19542_v22, %v5559_v14  ;;  %v16748_v42 = vpack.i.bf16 %v19540_v41, %v19544_v45  ;;  %v19552_v7 = vpack.c.bf16 %v19540_v41, %v19544_v45  ;;  %v6020_v14 = vld [vmem:[%s22745_s4 + $0x138] sm:$0xff] }
0x151e   :  { %v19554_v23 = vmax.f32 %v16081_v63, 0.0  ;;  %v6021_v63 = vld [vmem:[%s22745_s4 + $0x140] sm:$0xff] }
0x151f   :  { %v19556_v21 = vmax.f32 %v16083_v47, 0.0  ;;  %16749 = vrot.lane.b32.xlu1 %v16748_v42, %s17310_s22  ;;  %15457 = vmatprep.subr.bf16.mxu1 %v19552_v7  ;;  %v5611_v47 = vld [vmem:[%s22746_s3 + $0x188] sm:$0xff] }
0x1520   :  { %15459 = vmatpush3.bf16.msra.mxu1 %v19552_v7 }
0x1521   :  { %v16753_v2 = vpack.i.bf16 %v19554_v23, %v19556_v21  ;;  %v19565_v11 = vpack.c.bf16 %v19554_v23, %v19556_v21 }
0x1523   :  { %16759 = vrot.lane.b32.xlu1 %v16748_v42, %s17311_s23  ;;  %16754 = vrot.lane.b32.xlu0 %v16753_v2, %s17310_s22  ;;  %v5612_v42 = vld [vmem:[%s22746_s3 + $0x190] sm:$0xff] }
0x1524   :  { %15461 = vmatprep.subr.bf16.mxu1 %v19565_v11 }
0x1525   :  { %15463 = vmatpush3.bf16.msra.mxu1 %v19565_v11 }
0x1527   :  { %6029 = vperm.xlu1 %16567, %v6019_v48   ;;  %16764 = vrot.lane.b32.xlu0 %v16753_v2, %s17311_s23  ;;  %v6023_v2 = vld [vmem:[%s22745_s4 + $0x150] sm:$0xff]  ;;  %v6022_v48 = vld [vmem:[%s22745_s4 + $0x148] sm:$0xff] }
0x1528   :  { %14518 = vmatmul.mubr.msk.f32.vlgmr.msra.gmra.mrb[86].mxu1 %vm1446_vm10, %v5609_v38  ;;  %v5613_v38 = vld [vmem:[%s22746_s3 + $0x198] sm:$0xff] }
0x1529   :  { %14520 = vmatprep.mubr.msk.f32.mxu1 %vm1446_vm10, %v5610_v44  ;;  %v5614_v44 = vld [vmem:[%s22746_s3 + $0x1a0] sm:$0xff] }
0x152b   :  { %6039 = vperm.xlu1 %16567, %v6021_v63   ;;  %6034 = vperm.xlu0 %16566, %v6020_v14   ;;  %v6025_v63 = vld [vmem:[%s22745_s4 + $0x160] sm:$0xff]  ;;  %v6024_v14 = vld [vmem:[%s22745_s4 + $0x158] sm:$0xff] }
0x152c   :  { %14521 = vmatmul.mubr.msk.f32.gmra.mrb[88].mxu1 %vm1446_vm10, %v5611_v47  ;;  %v5615_v47 = vld [vmem:[%s22746_s3 + $0x1a8] sm:$0xff] }
0x152d   :  { %14523 = vmatprep.mubr.msk.f32.mxu1 %vm1446_vm10, %v5612_v42  ;;  %v5745_v42 = vld [vmem:[%s22746_s3 + $0x1b0] sm:$0xff] }
0x152f   :  { %6049 = vperm.xlu1 %16567, %v6023_v2   ;;  %6044 = vperm.xlu0 %16566, %v6022_v48   ;;  %v6091_v2 = vld [vmem:[%s22745_s4 + $0x1f0] sm:$0xff]  ;;  %v6026_v48 = vld [vmem:[%s22745_s4 + $0x168] sm:$0xff] }
0x1530   :  { %14524 = vmatmul.mubr.msk.f32.gmra.mrb[90].mxu1 %vm1446_vm10, %v5613_v38  ;;  %v6276_v38 = vld [vmem:[%s22745_s4 + $0x230] sm:$0xff] }
0x1531   :  { %14526 = vmatprep.mubr.msk.f32.mxu1 %vm1446_vm10, %v5614_v44  ;;  %v6092_v44 = vld [vmem:[%s22745_s4 + $0x1f8] sm:$0xff] }
0x1533   :  { %6059 = vperm.xlu1 %16567, %v6025_v63   ;;  %6054 = vperm.xlu0 %16566, %v6024_v14   ;;  %v6093_v63 = vld [vmem:[%s22745_s4 + $0x200] sm:$0xff]  ;;  %v6277_v14 = vld [vmem:[%s22745_s4 + $0x238] sm:$0xff] }
0x1534   :  { %14527 = vmatmul.mubr.msk.f32.gmra.mrb[92].mxu1 %vm1446_vm10, %v5615_v47  ;;  %v6278_v47 = vld [vmem:[%s22745_s4 + $0x240] sm:$0xff] }
0x1535   :  { %14537 = vmatprep.mubr.msk.f32.mxu1 %vm1446_vm10, %v5745_v42  ;;  %v6094_v42 = vld [vmem:[%s22745_s4 + $0x208] sm:$0xff] }
0x1537   :  { %6101 = vperm.xlu1 %16567, %v6091_v2   ;;  %6064 = vperm.xlu0 %16566, %v6026_v48   ;;  %v6095_v2 = vld [vmem:[%s22745_s4 + $0x210] sm:$0xff]  ;;  %v6279_v48 = vld [vmem:[%s22745_s4 + $0x248] sm:$0xff] }
0x153b   :  { %6286 = vperm.xlu1 %16567, %v6276_v38   ;;  %6106 = vperm.xlu0 %16566, %v6092_v44   ;;  %v6280_v38 = vld [vmem:[%s22745_s4 + $0x250] sm:$0xff]  ;;  %v6096_v44 = vld [vmem:[%s22745_s4 + $0x218] sm:$0xff] }
0x153f   :  { %6111 = vperm.xlu1 %16567, %v6093_v63   ;;  %6291 = vperm.xlu0 %16566, %v6277_v14   ;;  %v6097_v63 = vld [vmem:[%s22745_s4 + $0x220] sm:$0xff]  ;;  %v6281_v14 = vld [vmem:[%s22745_s4 + $0x258] sm:$0xff] }
0x1543   :  { %6296 = vperm.xlu1 %16567, %v6278_v47   ;;  %6116 = vperm.xlu0 %16566, %v6094_v42   ;;  %v6282_v47 = vld [vmem:[%s22745_s4 + $0x260] sm:$0xff]  ;;  %v6098_v42 = vld [vmem:[%s22745_s4 + $0x228] sm:$0xff] }
0x1547   :  { %6121 = vperm.xlu1 %16567, %v6095_v2   ;;  %6301 = vperm.xlu0 %16566, %v6279_v48   ;;  %v6283_v2 = vld [vmem:[%s22745_s4 + $0x268] sm:$0xff] }
0x154b   :  { %6306 = vperm.xlu1 %16567, %v6280_v38   ;;  %6126 = vperm.xlu0 %16566, %v6096_v44  }
0x154f   :  { %6131 = vperm.xlu1 %16567, %v6097_v63   ;;  %6311 = vperm.xlu0 %16566, %v6281_v14  }
0x1553   :  { %6316 = vperm.xlu1 %16567, %v6282_v47   ;;  %6136 = vperm.xlu0 %16566, %v6098_v42  }
0x1557   :  { %6321 = vperm.xlu0 %16566, %v6283_v2  }
0x1591   :  { %v16750_v48 = vpop.permute.xlu1 %16749 }
0x1592   :  { %v16752_v38 = vunpack.i.h.bf16 %v16750_v48  ;;  %v16751_v44 = vunpack.i.l.bf16 %v16750_v48 }
0x1594   :  { %v5596_v63 = vsel %vm35_vm1, %v19544_v45, %v16751_v44  ;;  %v5597_v14 = vsel %vm35_vm1, %v19540_v41, %v16752_v38 }
0x1595   :  { %v16760_v22 = vpop.permute.xlu1 %16759  ;;  %v16755_v10 = vpop.permute.xlu0 %16754  ;;  %v15464_v47 = vpack.c.bf16 %v5597_v14, %v5596_v63 }
0x1596   :  { %v16762_v42 = vunpack.i.h.bf16 %v16760_v22  ;;  %v16761_v6 = vunpack.i.l.bf16 %v16760_v22  ;;  %v16757_v57 = vunpack.i.h.bf16 %v16755_v10  ;;  %v16756_v52 = vunpack.i.l.bf16 %v16755_v10 }
0x1597   :  { %15465 = vmatprep.subr.bf16.mxu1 %v15464_v47 }
0x1598   :  { %15467 = vmatpush3.bf16.msra.mxu1 %v15464_v47  ;;  %v5598_v2 = vsel %vm35_vm1, %v19556_v21, %v16756_v52  ;;  %v5599_v48 = vsel %vm35_vm1, %v19554_v23, %v16757_v57  ;;  %v5584_v38 = vsel %vm34_vm0, %v19544_v45, %v16761_v6  ;;  %v5585_v22 = vsel %vm34_vm0, %v19540_v41, %v16762_v42  ;;  %v5746_v52 = vld [vmem:[%s22746_s3 + $0x1b8] sm:$0xff]  ;;  %v5747_v6 = vld [vmem:[%s22746_s3 + $0x1c0] sm:$0xff]  ;;  %v5748_v42 = vld [vmem:[%s22746_s3 + $0x1c8] sm:$0xff] }
0x1599   :  { %v16765_v44 = vpop.permute.xlu0 %16764  ;;  %v15468_v10 = vpack.c.bf16 %v5599_v48, %v5598_v2  ;;  %v15472_v47 = vpack.c.bf16 %v5585_v22, %v5584_v38  ;;  %v5751_v2 = vld [vmem:[%s22746_s3 + $0x1e0] sm:$0xff]  ;;  %v5752_v48 = vld [vmem:[%s22746_s3 + $0x1e8] sm:$0xff]  ;;  %v5600_v38 = vld [vmem:[%s22746_s3 + $0x130] sm:$0xff] }
0x159a   :  { %v16767_v63 = vunpack.i.h.bf16 %v16765_v44  ;;  %v16766_v14 = vunpack.i.l.bf16 %v16765_v44  ;;  %v5601_v22 = vld [vmem:[%s22746_s3 + $0x138] sm:$0xff]  ;;  %v5602_v44 = vld [vmem:[%s22746_s3 + $0x140] sm:$0xff] }
0x159b   :  { %15469 = vmatprep.subr.bf16.mxu1 %v15468_v10 }
0x159c   :  { %15471 = vmatpush3.bf16.msra.mxu1 %v15468_v10  ;;  %v5586_v57 = vsel %vm34_vm0, %v19556_v21, %v16766_v14  ;;  %v5587_v45 = vsel %vm34_vm0, %v19554_v23, %v16767_v63  ;;  %v5749_v23 = vld [vmem:[%s22746_s3 + $0x1d0] sm:$0xff]  ;;  %v5750_v21 = vld [vmem:[%s22746_s3 + $0x1d8] sm:$0xff]  ;;  %v5603_v10 = vld [vmem:[%s22746_s3 + $0x148] sm:$0xff] }
0x159d   :  { %15473 = vmatprep.subr.bf16.mxu1 %v15472_v47  ;;  %v15476_v41 = vpack.c.bf16 %v5587_v45, %v5586_v57  ;;  %v5604_v63 = vld [vmem:[%s22746_s3 + $0x150] sm:$0xff]  ;;  %v5605_v14 = vld [vmem:[%s22746_s3 + $0x158] sm:$0xff] }
0x159e   :  { %v6083_v57 = vld [vmem:[%s22746_s3 + $0x1f0] sm:$0xff] }
0x159f   :  { %14538 = vmatmul.mubr.msk.f32.vlgmr.msra.gmra.mrb[86].mxu1 %vm1446_vm10, %v5746_v52  ;;  %v5607_v52 = vld [vmem:[%s22746_s3 + $0x168] sm:$0xff]  ;;  %14585 = vmatprep.mubr.msk.f32.mxu0 %vm2344_vm11, %v6083_v57 }
0x15a0   :  { %15475 = vmatpush3.bf16.msra.mxu1 %v15472_v47  ;;  %14540 = vmatprep.mubr.msk.f32.mxu1 %vm1446_vm10, %v5747_v6  ;;  %v5606_v47 = vld [vmem:[%s22746_s3 + $0x160] sm:$0xff] }
0x15a1   :  { %15477 = vmatprep.subr.bf16.mxu1 %v15476_v41 }
0x15a3   :  { %14541 = vmatmul.mubr.msk.f32.gmra.mrb[88].mxu1 %vm1446_vm10, %v5748_v42 }
0x15a4   :  { %15479 = vmatpush3.bf16.msra.mxu1 %v15476_v41  ;;  %14543 = vmatprep.mubr.msk.f32.mxu1 %vm1446_vm10, %v5749_v23 }
0x15a6   :  { %v19766_v6 = vpop.permute.xlu1 %6029 }
0x15a7   :  { %14544 = vmatmul.mubr.msk.f32.gmra.mrb[90].mxu1 %vm1446_vm10, %v5750_v21  ;;  %23003 = vst [vmem:[#allocation58_spill] sm:$0xff] %v19766_v6 }
0x15a8   :  { %14546 = vmatprep.mubr.msk.f32.mxu1 %vm1446_vm10, %v5751_v2 }
0x15aa   :  { %v19764_v45 = vpop.permute.xlu0 %6034  ;;  %v19770_v23 = vpop.permute.xlu1 %6039 }
0x15ab   :  { %14547 = vmatmul.mubr.msk.f32.gmra.mrb[92].mxu1 %vm1446_vm10, %v5752_v48  ;;  %23002 = vst [vmem:[#allocation57_spill] sm:$0xff] %v19764_v45  ;;  %23005 = vst [vmem:[#allocation60_spill] sm:$0xff] %v19770_v23 }
0x15ac   :  { %14557 = vmatprep.mubr.msk.f32.mxu1 %vm1446_vm10, %v5600_v38 }
0x15ae   :  { %v19768_v41 = vpop.permute.xlu0 %6044  ;;  %v19778_v57 = vpop.permute.xlu1 %6049 }
0x15af   :  { %14558 = vmatmul.mubr.msk.f32.vlgmr.msra.gmra.mrb[86].mxu1 %vm1446_vm10, %v5601_v22  ;;  %23004 = vst [vmem:[#allocation59_spill] sm:$0xff] %v19768_v41  ;;  %23007 = vst [vmem:[#allocation62_spill] sm:$0xff] %v19778_v57 }
0x15b0   :  { %14560 = vmatprep.mubr.msk.f32.mxu1 %vm1446_vm10, %v5602_v44 }
0x15b3   :  { %14561 = vmatmul.mubr.msk.f32.gmra.mrb[88].mxu1 %vm1446_vm10, %v5603_v10 }
0x15b4   :  { %14563 = vmatprep.mubr.msk.f32.mxu1 %vm1446_vm10, %v5604_v63 }
0x15b7   :  { %14564 = vmatmul.mubr.msk.f32.gmra.mrb[90].mxu1 %vm1446_vm10, %v5605_v14  ;;  %v19775_v14 = vpop.permute.xlu0 %6054 }
0x15b8   :  { %14566 = vmatprep.mubr.msk.f32.mxu1 %vm1446_vm10, %v5606_v47  ;;  %23006 = vst [vmem:[#allocation61_spill] sm:$0xff] %v19775_v14 }
0x15bb   :  { %14567 = vmatmul.mubr.msk.f32.gmra.mrb[92].mxu1 %vm1446_vm10, %v5607_v52 }
0x1682   :  { %v14559_v42 = vpop.f32.mrb[86].mxu1 }
0x1683   :  { %v6068_v21 = vadd.f32 %v14559_v42, %v19764_v45  ;;  %v5972_v2 = vpop.f32.mrb[87].mxu1 }
0x1684   :  { %v6067_v48 = vadd.f32 %v19766_v6, %v5972_v2 }
0x1685   :  { %v6076_v38 = vmax.f32 %v6068_v21, 0.0 }
0x1686   :  { %v6075_v22 = vmax.f32 %v6067_v48, 0.0  ;;  %v14562_v44 = vpop.f32.mrb[88].mxu1 }
0x1687   :  { %v6070_v10 = vadd.f32 %v14562_v44, %v19768_v41  ;;  %v5982_v63 = vpop.f32.mrb[89].mxu1  ;;  %v19782_v41 = vpop.permute.xlu0 %6064 }
0x1688   :  { %v15480_v47 = vpack.c.bf16 %v6076_v38, %v6075_v22  ;;  %v6069_v52 = vadd.f32 %v19770_v23, %v5982_v63  ;;  %23008 = vst [vmem:[#allocation63_spill] sm:$0xff] %v19782_v41  ;;  %v19784_v22 = vpop.permute.xlu1 %6059 }
0x1689   :  { %v6078_v19 = vmax.f32 %v6070_v10, 0.0  ;;  %23009 = vst [vmem:[#allocation64_spill] sm:$0xff] %v19784_v22 }
0x168a   :  { %v6077_v54 = vmax.f32 %v6069_v52, 0.0  ;;  %v14565_v43 = vpop.f32.mrb[90].mxu1  ;;  %15481 = vmatprep.subr.bf16.mxu0 %v15480_v47 }
0x168b   :  { %v6072_v42 = vadd.f32 %v14565_v43, %v19775_v14  ;;  %v5992_v2 = vpop.f32.mrb[91].mxu1  ;;  %15483 = vmatpush3.bf16.msra.mxu0 %v15480_v47 }
0x168c   :  { %v15484_v21 = vpack.c.bf16 %v6078_v19, %v6077_v54  ;;  %v6071_v48 = vadd.f32 %v19778_v57, %v5992_v2  ;;  %v6084_v19 = vld [vmem:[%s22746_s3 + $0x1f8] sm:$0xff]  ;;  %v6089_v2 = vld [vmem:[%s22746_s3 + $0x220] sm:$0xff] }
0x168d   :  { %v6080_v44 = vmax.f32 %v6072_v42, 0.0  ;;  %v6085_v42 = vld [vmem:[%s22746_s3 + $0x200] sm:$0xff] }
0x168e   :  { %v6079_v6 = vmax.f32 %v6071_v48, 0.0  ;;  %v14568_v38 = vpop.f32.mrb[92].mxu1  ;;  %15485 = vmatprep.subr.bf16.mxu0 %v15484_v21  ;;  %v6269_v48 = vld [vmem:[%s22746_s3 + $0x238] sm:$0xff] }
0x168f   :  { %v6074_v10 = vadd.f32 %v14568_v38, %v19782_v41  ;;  %v6002_v63 = vpop.f32.mrb[93].mxu1  ;;  %15487 = vmatpush3.bf16.msra.mxu0 %v15484_v21  ;;  %v6090_v21 = vld [vmem:[%s22746_s3 + $0x228] sm:$0xff] }
0x1690   :  { %v15488_v52 = vpack.c.bf16 %v6080_v44, %v6079_v6  ;;  %v6073_v43 = vadd.f32 %v19784_v22, %v6002_v63  ;;  %v6086_v6 = vld [vmem:[%s22746_s3 + $0x208] sm:$0xff]  ;;  %v6270_v44 = vld [vmem:[%s22746_s3 + $0x240] sm:$0xff]  ;;  %v6273_v63 = vld [vmem:[%s22746_s3 + $0x258] sm:$0xff] }
0x1691   :  { %v6082_v14 = vmax.f32 %v6074_v10, 0.0  ;;  %v6271_v38 = vld [vmem:[%s22746_s3 + $0x248] sm:$0xff]  ;;  %v6272_v10 = vld [vmem:[%s22746_s3 + $0x250] sm:$0xff] }
0x1692   :  { %v6081_v47 = vmax.f32 %v6073_v43, 0.0  ;;  %15489 = vmatprep.subr.bf16.mxu0 %v15488_v52  ;;  %v6275_v43 = vld [vmem:[%s22746_s3 + $0x268] sm:$0xff] }
0x1693   :  { %15491 = vmatpush3.bf16.msra.mxu0 %v15488_v52  ;;  %v6274_v52 = vld [vmem:[%s22746_s3 + $0x260] sm:$0xff] }
0x1694   :  { %v15492_v54 = vpack.c.bf16 %v6082_v14, %v6081_v47  ;;  %v6087_v14 = vld [vmem:[%s22746_s3 + $0x210] sm:$0xff]  ;;  %v6107_v47 = vpop.permute.xlu0 %6106 }
0x1696   :  { %15493 = vmatprep.subr.bf16.mxu0 %v15492_v54 }
0x1697   :  { %15495 = vmatpush3.bf16.msra.mxu0 %v15492_v54  ;;  %v6102_v54 = vpop.permute.xlu1 %6101 }
0x1698   :  { %15497 = vmatprep.subr.bf16.mxu0 %v19552_v7 }
0x169a   :  { %14586 = vmatmul.mubr.msk.f32.vlgmr.msra.gmra.mrb[60].mxu0 %vm2344_vm11, %v6084_v19  ;;  %v6292_v19 = vpop.permute.xlu0 %6291 }
0x169b   :  { %15499 = vmatpush3.bf16.msra.mxu0 %v19552_v7  ;;  %14588 = vmatprep.mubr.msk.f32.mxu0 %vm2344_vm11, %v6085_v42  ;;  %v6088_v7 = vld [vmem:[%s22746_s3 + $0x218] sm:$0xff]  ;;  %v6287_v42 = vpop.permute.xlu1 %6286 }
0x169c   :  { %15501 = vmatprep.subr.bf16.mxu0 %v19565_v11 }
0x169e   :  { %14589 = vmatmul.mubr.msk.f32.gmra.mrb[62].mxu0 %vm2344_vm11, %v6086_v6  ;;  %v6117_v6 = vpop.permute.xlu0 %6116 }
0x169f   :  { %15503 = vmatpush3.bf16.msra.mxu0 %v19565_v11  ;;  %14591 = vmatprep.mubr.msk.f32.mxu0 %vm2344_vm11, %v6087_v14  ;;  %v6268_v11 = vld [vmem:[%s22746_s3 + $0x230] sm:$0xff]  ;;  %v6112_v14 = vpop.permute.xlu1 %6111 }
0x16a2   :  { %14592 = vmatmul.mubr.msk.f32.gmra.mrb[64].mxu0 %vm2344_vm11, %v6088_v7  ;;  %v6302_v7 = vpop.permute.xlu0 %6301 }
0x16a3   :  { %14594 = vmatprep.mubr.msk.f32.mxu0 %vm2344_vm11, %v6089_v2  ;;  %v6297_v2 = vpop.permute.xlu1 %6296  ;;  %v19862_v23 = vadd.f32 %v6302_v7, %v6117_v6 }
0x16a5   :  { %23012 = vst [vmem:[#allocation67_spill] sm:$0xff] %v19862_v23 }
0x16a6   :  { %14595 = vmatmul.mubr.msk.f32.gmra.mrb[66].mxu0 %vm2344_vm11, %v6090_v21  ;;  %v6127_v21 = vpop.permute.xlu0 %6126 }
0x16a7   :  { %14605 = vmatprep.mubr.msk.f32.mxu0 %vm1446_vm10, %v6268_v11  ;;  %v6122_v11 = vpop.permute.xlu1 %6121 }
0x16aa   :  { %14606 = vmatmul.mubr.msk.f32.vlgmr.msra.gmra.mrb[60].mxu0 %vm1446_vm10, %v6269_v48  ;;  %v6312_v48 = vpop.permute.xlu0 %6311 }
0x16ab   :  { %14608 = vmatprep.mubr.msk.f32.mxu0 %vm1446_vm10, %v6270_v44  ;;  %v6307_v44 = vpop.permute.xlu1 %6306  ;;  %v19876_v6 = vadd.f32 %v6312_v48, %v6127_v21 }
0x16ad   :  { %23014 = vst [vmem:[#allocation69_spill] sm:$0xff] %v19876_v6 }
0x16ae   :  { %14609 = vmatmul.mubr.msk.f32.gmra.mrb[62].mxu0 %vm1446_vm10, %v6271_v38  ;;  %v19852_v38 = vadd.f32 %v6292_v19, %v6107_v47  ;;  %v6137_v41 = vpop.permute.xlu0 %6136  ;;  %v19866_v19 = vadd.f32 %v6297_v2, %v6112_v14  ;;  %v19880_v14 = vadd.f32 %v6307_v44, %v6122_v11 }
0x16af   :  { %14611 = vmatprep.mubr.msk.f32.mxu0 %vm1446_vm10, %v6272_v10  ;;  %v6525_v10 = vld [vmem:[%s22746_s3 + $0x2b0] sm:$0xff]  ;;  %v6132_v45 = vpop.permute.xlu1 %6131 }
0x16b0   :  { %23010 = vst [vmem:[#allocation65_spill] sm:$0xff] %v19852_v38  ;;  %23013 = vst [vmem:[#allocation68_spill] sm:$0xff] %v19866_v19 }
0x16b1   :  { %23015 = vst [vmem:[#allocation70_spill] sm:$0xff] %v19880_v14 }
0x16b2   :  { %14612 = vmatmul.mubr.msk.f32.gmra.mrb[64].mxu0 %vm1446_vm10, %v6273_v63  ;;  %v19857_v63 = vadd.f32 %v6287_v42, %v6102_v54 }
0x16b3   :  { %14614 = vmatprep.mubr.msk.f32.mxu0 %vm1446_vm10, %v6274_v52 }
0x16b4   :  { %23011 = vst [vmem:[#allocation66_spill] sm:$0xff] %v19857_v63 }
0x16b6   :  { %14615 = vmatmul.mubr.msk.f32.gmra.mrb[66].mxu0 %vm1446_vm10, %v6275_v43 }
0x16b7   :  { %14633 = vmatprep.mubr.msk.f32.mxu0 %vm2344_vm11, %v6525_v10 }
0x177d   :  { %v14607_v52 = vpop.f32.mrb[60].mxu0 }
0x177e   :  { %v16085_v43 = vadd.f32 %v19852_v38, %v14607_v52  ;;  %v6414_v22 = vpop.f32.mrb[61].mxu0 }
0x177f   :  { %v16087_v57 = vadd.f32 %v19857_v63, %v6414_v22 }
0x1780   :  { %v19864_v47 = vmax.f32 %v16085_v43, 0.0 }
0x1781   :  { %v19868_v62 = vmax.f32 %v16087_v57, 0.0  ;;  %v14610_v54 = vpop.f32.mrb[62].mxu0  ;;  %v6322_v57 = vpop.permute.xlu0 %6321 }
0x1782   :  { %v16089_v42 = vadd.f32 %v19862_v23, %v14610_v54  ;;  %v6424_v17 = vpop.f32.mrb[63].mxu0  ;;  %v19891_v48 = vadd.f32 %v6322_v57, %v6137_v41 }
0x1783   :  { %v16091_v10 = vadd.f32 %v19866_v19, %v6424_v17  ;;  %v16768_v52 = vpack.i.bf16 %v19864_v47, %v19868_v62  ;;  %v15504_v22 = vpack.c.bf16 %v19864_v47, %v19868_v62  ;;  %v6317_v17 = vpop.permute.xlu1 %6316 }
0x1784   :  { %v19878_v7 = vmax.f32 %v16089_v42, 0.0  ;;  %23016 = vst [vmem:[#allocation71_spill] sm:$0xff] %v19891_v48  ;;  %v19895_v42 = vadd.f32 %v6317_v17, %v6132_v45 }
0x1785   :  { %v19882_v2 = vmax.f32 %v16091_v10, 0.0  ;;  %16769 = vrot.lane.b32.xlu1 %v16768_v52, %s17310_s22  ;;  %v14613_v43 = vpop.f32.mrb[64].mxu0  ;;  %15505 = vmatprep.subr.bf16.mxu0 %v15504_v22 }
0x1786   :  { %v16093_v54 = vadd.f32 %v19876_v6, %v14613_v43  ;;  %v6434_v19 = vpop.f32.mrb[65].mxu0  ;;  %15507 = vmatpush3.bf16.msra.mxu0 %v15504_v22  ;;  %23017 = vst [vmem:[#allocation72_spill] sm:$0xff] %v19895_v42 }
0x1787   :  { %v16095_v23 = vadd.f32 %v19880_v14, %v6434_v19  ;;  %v16773_v21 = vpack.i.bf16 %v19878_v7, %v19882_v2  ;;  %v15508_v11 = vpack.c.bf16 %v19878_v7, %v19882_v2 }
0x1788   :  { %v19893_v44 = vmax.f32 %v16093_v54, 0.0 }
0x1789   :  { %v19897_v10 = vmax.f32 %v16095_v23, 0.0  ;;  %16774 = vrot.lane.b32.xlu0 %v16773_v21, %s17310_s22  ;;  %v14616_v43 = vpop.f32.mrb[66].mxu0  ;;  %15509 = vmatprep.subr.bf16.mxu0 %v15508_v11 }
0x178a   :  { %v16097_v19 = vadd.f32 %v19891_v48, %v14616_v43  ;;  %v6444_v22 = vpop.f32.mrb[67].mxu0  ;;  %15511 = vmatpush3.bf16.msra.mxu0 %v15508_v11  ;;  %v6527_v11 = vld [vmem:[%s22746_s3 + $0x2c0] sm:$0xff]  ;;  %v6528_v43 = vld [vmem:[%s22746_s3 + $0x2c8] sm:$0xff] }
0x178b   :  { %v16099_v14 = vadd.f32 %v19895_v42, %v6444_v22  ;;  %v16778_v41 = vpack.i.bf16 %v19893_v44, %v19897_v10  ;;  %v15512_v57 = vpack.c.bf16 %v19893_v44, %v19897_v10  ;;  %v6937_v22 = vld [vmem:[%s22745_s4 + $0x278] sm:$0xff] }
0x178c   :  { %v19906_v45 = vmax.f32 %v16097_v19, 0.0  ;;  %v6529_v19 = vld [vmem:[%s22746_s3 + $0x2d0] sm:$0xff] }
0x178d   :  { %v19908_v23 = vmax.f32 %v16099_v14, 0.0  ;;  %16779 = vrot.lane.b32.xlu1 %v16778_v41, %s17310_s22  ;;  %15513 = vmatprep.subr.bf16.mxu0 %v15512_v57  ;;  %v6526_v14 = vld [vmem:[%s22746_s3 + $0x2b8] sm:$0xff] }
0x178e   :  { %15515 = vmatpush3.bf16.msra.mxu0 %v15512_v57  ;;  %v6531_v57 = vld [vmem:[%s22746_s3 + $0x2e0] sm:$0xff] }
0x178f   :  { %v16783_v17 = vpack.i.bf16 %v19906_v45, %v19908_v23  ;;  %v15516_v54 = vpack.c.bf16 %v19906_v45, %v19908_v23 }
0x1791   :  { %16789 = vrot.lane.b32.xlu1 %v16768_v52, %s17311_s23  ;;  %16784 = vrot.lane.b32.xlu0 %v16783_v17, %s17310_s22  ;;  %v6936_v52 = vld [vmem:[%s22745_s4 + $0x270] sm:$0xff] }
0x1792   :  { %15517 = vmatprep.subr.bf16.mxu0 %v15516_v54 }
0x1793   :  { %15519 = vmatpush3.bf16.msra.mxu0 %v15516_v54  ;;  %v6939_v54 = vld [vmem:[%s22745_s4 + $0x288] sm:$0xff] }
0x1795   :  { %16799 = vrot.lane.b32.xlu1 %v16778_v41, %s17311_s23  ;;  %16794 = vrot.lane.b32.xlu0 %v16773_v21, %s17311_s23  ;;  %v6938_v21 = vld [vmem:[%s22745_s4 + $0x280] sm:$0xff]  ;;  %v6530_v41 = vld [vmem:[%s22746_s3 + $0x2d8] sm:$0xff] }
0x1796   :  { %14634 = vmatmul.mubr.msk.f32.vlgmr.msra.gmra.mrb[68].mxu0 %vm2344_vm11, %v6526_v14  ;;  %v6532_v14 = vld [vmem:[%s22746_s3 + $0x2e8] sm:$0xff] }
0x1797   :  { %14636 = vmatprep.mubr.msk.f32.mxu0 %vm2344_vm11, %v6527_v11  ;;  %v6662_v11 = vld [vmem:[%s22746_s3 + $0x2f0] sm:$0xff] }
0x1799   :  { %6946 = vperm.xlu1 %16567, %v6936_v52   ;;  %16804 = vrot.lane.b32.xlu0 %v16783_v17, %s17311_s23  ;;  %v6940_v17 = vld [vmem:[%s22745_s4 + $0x290] sm:$0xff]  ;;  %v6942_v52 = vld [vmem:[%s22745_s4 + $0x2a0] sm:$0xff] }
0x179a   :  { %14637 = vmatmul.mubr.msk.f32.gmra.mrb[70].mxu0 %vm2344_vm11, %v6528_v43  ;;  %v6941_v43 = vld [vmem:[%s22745_s4 + $0x298] sm:$0xff] }
0x179b   :  { %14639 = vmatprep.mubr.msk.f32.mxu0 %vm2344_vm11, %v6529_v19  ;;  %v7008_v19 = vld [vmem:[%s22745_s4 + $0x330] sm:$0xff] }
0x179d   :  { %6956 = vperm.xlu1 %16567, %v6938_v21   ;;  %6951 = vperm.xlu0 %16566, %v6937_v22   ;;  %v6943_v21 = vld [vmem:[%s22745_s4 + $0x2a8] sm:$0xff]  ;;  %v7010_v22 = vld [vmem:[%s22745_s4 + $0x340] sm:$0xff] }
0x179e   :  { %14640 = vmatmul.mubr.msk.f32.gmra.mrb[72].mxu0 %vm2344_vm11, %v6530_v41  ;;  %v7009_v41 = vld [vmem:[%s22745_s4 + $0x338] sm:$0xff] }
0x179f   :  { %14642 = vmatprep.mubr.msk.f32.mxu0 %vm2344_vm11, %v6531_v57  ;;  %v7012_v57 = vld [vmem:[%s22745_s4 + $0x350] sm:$0xff] }
0x17a1   :  { %6966 = vperm.xlu1 %16567, %v6940_v17   ;;  %6961 = vperm.xlu0 %16566, %v6939_v54   ;;  %v7011_v17 = vld [vmem:[%s22745_s4 + $0x348] sm:$0xff]  ;;  %v7014_v54 = vld [vmem:[%s22745_s4 + $0x360] sm:$0xff] }
0x17a2   :  { %14643 = vmatmul.mubr.msk.f32.gmra.mrb[74].mxu0 %vm2344_vm11, %v6532_v14  ;;  %v7013_v14 = vld [vmem:[%s22745_s4 + $0x358] sm:$0xff] }
0x17a3   :  { %14661 = vmatprep.mubr.msk.f32.mxu0 %vm2344_vm11, %v6662_v11  ;;  %v7209_v11 = vld [vmem:[%s22745_s4 + $0x370] sm:$0xff] }
0x17a5   :  { %6976 = vperm.xlu1 %16567, %v6942_v52   ;;  %6971 = vperm.xlu0 %16566, %v6941_v43   ;;  %v7015_v52 = vld [vmem:[%s22745_s4 + $0x368] sm:$0xff]  ;;  %v7211_v43 = vld [vmem:[%s22745_s4 + $0x380] sm:$0xff] }
0x17a9   :  { %7018 = vperm.xlu1 %16567, %v7008_v19   ;;  %6981 = vperm.xlu0 %16566, %v6943_v21   ;;  %v7210_v19 = vld [vmem:[%s22745_s4 + $0x378] sm:$0xff]  ;;  %v7213_v21 = vld [vmem:[%s22745_s4 + $0x390] sm:$0xff] }
0x17ad   :  { %7028 = vperm.xlu1 %16567, %v7010_v22   ;;  %7023 = vperm.xlu0 %16566, %v7009_v41   ;;  %v7212_v22 = vld [vmem:[%s22745_s4 + $0x388] sm:$0xff]  ;;  %v7215_v41 = vld [vmem:[%s22745_s4 + $0x3a0] sm:$0xff] }
0x17b1   :  { %7038 = vperm.xlu1 %16567, %v7012_v57   ;;  %7033 = vperm.xlu0 %16566, %v7011_v17   ;;  %v7214_v57 = vld [vmem:[%s22745_s4 + $0x398] sm:$0xff]  ;;  %v7402_v17 = vld [vmem:[%s22745_s4 + $0x3b0] sm:$0xff] }
0x17b5   :  { %7048 = vperm.xlu1 %16567, %v7014_v54   ;;  %7043 = vperm.xlu0 %16566, %v7013_v14   ;;  %v7216_v54 = vld [vmem:[%s22745_s4 + $0x3a8] sm:$0xff]  ;;  %v7404_v14 = vld [vmem:[%s22745_s4 + $0x3c0] sm:$0xff] }
0x17b9   :  { %7219 = vperm.xlu1 %16567, %v7209_v11   ;;  %7053 = vperm.xlu0 %16566, %v7015_v52   ;;  %v7403_v11 = vld [vmem:[%s22745_s4 + $0x3b8] sm:$0xff]  ;;  %v7406_v52 = vld [vmem:[%s22745_s4 + $0x3d0] sm:$0xff] }
0x17bd   :  { %7229 = vperm.xlu1 %16567, %v7211_v43   ;;  %7224 = vperm.xlu0 %16566, %v7210_v19   ;;  %v7405_v43 = vld [vmem:[%s22745_s4 + $0x3c8] sm:$0xff]  ;;  %v7408_v19 = vld [vmem:[%s22745_s4 + $0x3e0] sm:$0xff] }
0x17c1   :  { %7239 = vperm.xlu1 %16567, %v7213_v21   ;;  %7234 = vperm.xlu0 %16566, %v7212_v22   ;;  %v7407_v21 = vld [vmem:[%s22745_s4 + $0x3d8] sm:$0xff]  ;;  %v7596_v22 = vld [vmem:[%s22745_s4 + $0x3f0] sm:$0xf] }
0x17c5   :  { %7249 = vperm.xlu1 %16567, %v7215_v41   ;;  %7244 = vperm.xlu0 %16566, %v7214_v57   ;;  %v7409_v41 = vld [vmem:[%s22745_s4 + $0x3e8] sm:$0xff]  ;;  %v4026_v57 = vld [vmem:[%s22744_s2 + $0x3f0] sm:$0xf] }
0x17c9   :  { %7412 = vperm.xlu1 %16567, %v7402_v17   ;;  %7254 = vperm.xlu0 %16566, %v7216_v54  }
0x17cd   :  { %7422 = vperm.xlu1 %16567, %v7404_v14   ;;  %7417 = vperm.xlu0 %16566, %v7403_v11  }
0x17d1   :  { %7432 = vperm.xlu1 %16567, %v7406_v52   ;;  %7427 = vperm.xlu0 %16566, %v7405_v43  }
0x17d5   :  { %7442 = vperm.xlu1 %16567, %v7408_v19   ;;  %7437 = vperm.xlu0 %16566, %v7407_v21  }
0x17d9   :  { %7599 = vperm.xlu1 %16567, %v7596_v22   ;;  %7447 = vperm.xlu0 %16566, %v7409_v41  }
0x17dd   :  { %4029 = vperm.xlu0 %16566, %v4026_v57  }
0x17f7   :  { %v16770_v17 = vpop.permute.xlu1 %16769 }
0x17f8   :  { %v16772_v54 = vunpack.i.h.bf16 %v16770_v17  ;;  %v16771_v14 = vunpack.i.l.bf16 %v16770_v17 }
0x17fa   :  { %v6509_v11 = vsel %vm35_vm1, %v19868_v62, %v16771_v14  ;;  %v6510_v52 = vsel %vm35_vm1, %v19864_v47, %v16772_v54 }
0x17fb   :  { %v16775_v43 = vpop.permute.xlu0 %16774  ;;  %v15520_v19 = vpack.c.bf16 %v6510_v52, %v6509_v11 }
0x17fc   :  { %v16777_v21 = vunpack.i.h.bf16 %v16775_v43  ;;  %v16776_v22 = vunpack.i.l.bf16 %v16775_v43 }
0x17fd   :  { %15521 = vmatprep.subr.bf16.mxu0 %v15520_v19 }
0x17fe   :  { %15523 = vmatpush3.bf16.msra.mxu0 %v15520_v19  ;;  %v6511_v41 = vsel %vm35_vm1, %v19882_v2, %v16776_v22  ;;  %v6512_v57 = vsel %vm35_vm1, %v19878_v7, %v16777_v21 }
0x17ff   :  { %v16780_v17 = vpop.permute.xlu1 %16779  ;;  %v15524_v14 = vpack.c.bf16 %v6512_v57, %v6511_v41 }
0x1800   :  { %v16782_v42 = vunpack.i.h.bf16 %v16780_v17  ;;  %v16781_v48 = vunpack.i.l.bf16 %v16780_v17 }
0x1801   :  { %15525 = vmatprep.subr.bf16.mxu0 %v15524_v14 }
0x1802   :  { %15527 = vmatpush3.bf16.msra.mxu0 %v15524_v14  ;;  %v6513_v54 = vsel %vm35_vm1, %v19897_v10, %v16781_v48  ;;  %v6514_v11 = vsel %vm35_vm1, %v19893_v44, %v16782_v42 }
0x1803   :  { %v16790_v52 = vpop.permute.xlu1 %16789  ;;  %v16785_v43 = vpop.permute.xlu0 %16784  ;;  %v15528_v19 = vpack.c.bf16 %v6514_v11, %v6513_v54 }
0x1804   :  { %v16792_v22 = vunpack.i.h.bf16 %v16790_v52  ;;  %v16791_v6 = vunpack.i.l.bf16 %v16790_v52  ;;  %v16787_v21 = vunpack.i.h.bf16 %v16785_v43  ;;  %v16786_v63 = vunpack.i.l.bf16 %v16785_v43 }
0x1805   :  { %15529 = vmatprep.subr.bf16.mxu0 %v15528_v19 }
0x1806   :  { %15531 = vmatpush3.bf16.msra.mxu0 %v15528_v19  ;;  %v6515_v41 = vsel %vm35_vm1, %v19908_v23, %v16786_v63  ;;  %v6516_v48 = vsel %vm35_vm1, %v19906_v45, %v16787_v21  ;;  %v6485_v42 = vsel %vm34_vm0, %v19868_v62, %v16791_v6  ;;  %v6486_v57 = vsel %vm34_vm0, %v19864_v47, %v16792_v22  ;;  %v6663_v21 = vld [vmem:[%s22746_s3 + $0x2f8] sm:$0xff] }
0x1807   :  { %v16800_v17 = vpop.permute.xlu1 %16799  ;;  %v16795_v14 = vpop.permute.xlu0 %16794  ;;  %v15532_v54 = vpack.c.bf16 %v6516_v48, %v6515_v41  ;;  %v15536_v43 = vpack.c.bf16 %v6486_v57, %v6485_v42  ;;  %v6664_v48 = vld [vmem:[%s22746_s3 + $0x300] sm:$0xff] }
0x1808   :  { %v16797_v11 = vunpack.i.h.bf16 %v16795_v14  ;;  %v16796_v52 = vunpack.i.l.bf16 %v16795_v14  ;;  %v16802_v63 = vunpack.i.h.bf16 %v16800_v17  ;;  %v16801_v19 = vunpack.i.l.bf16 %v16800_v17  ;;  %v6665_v14 = vld [vmem:[%s22746_s3 + $0x308] sm:$0xff] }
0x1809   :  { %15533 = vmatprep.subr.bf16.mxu0 %v15532_v54 }
0x180a   :  { %15535 = vmatpush3.bf16.msra.mxu0 %v15532_v54  ;;  %v6487_v6 = vsel %vm34_vm0, %v19882_v2, %v16796_v52  ;;  %v6488_v22 = vsel %vm34_vm0, %v19878_v7, %v16797_v11  ;;  %v6489_v54 = vsel %vm34_vm0, %v19897_v10, %v16801_v19  ;;  %v6490_v11 = vsel %vm34_vm0, %v19893_v44, %v16802_v63  ;;  %v6666_v52 = vld [vmem:[%s22746_s3 + $0x310] sm:$0xff] }
0x180b   :  { %v16805_v41 = vpop.permute.xlu0 %16804  ;;  %15537 = vmatprep.subr.bf16.mxu0 %v15536_v43  ;;  %v15540_v42 = vpack.c.bf16 %v6488_v22, %v6487_v6  ;;  %v6668_v6 = vld [vmem:[%s22746_s3 + $0x320] sm:$0xff] }
0x180c   :  { %v16807_v57 = vunpack.i.h.bf16 %v16805_v41  ;;  %v16806_v17 = vunpack.i.l.bf16 %v16805_v41  ;;  %v6669_v41 = vld [vmem:[%s22746_s3 + $0x328] sm:$0xff] }
0x180d   :  { %14662 = vmatmul.mubr.msk.f32.vlgmr.msra.gmra.mrb[68].mxu0 %vm2344_vm11, %v6663_v21  ;;  %v6667_v21 = vld [vmem:[%s22746_s3 + $0x318] sm:$0xff] }
0x180e   :  { %15539 = vmatpush3.bf16.msra.mxu0 %v15536_v43  ;;  %14664 = vmatprep.mubr.msk.f32.mxu0 %vm2344_vm11, %v6664_v48  ;;  %v15544_v43 = vpack.c.bf16 %v6490_v11, %v6489_v54  ;;  %v6491_v19 = vsel %vm34_vm0, %v19908_v23, %v16806_v17  ;;  %v6492_v63 = vsel %vm34_vm0, %v19906_v45, %v16807_v57  ;;  %v6517_v48 = vld [vmem:[%s22746_s3 + $0x270] sm:$0xff]  ;;  %v6519_v57 = vld [vmem:[%s22746_s3 + $0x280] sm:$0xff]  ;;  %v6520_v17 = vld [vmem:[%s22746_s3 + $0x288] sm:$0xff] }
0x180f   :  { %15541 = vmatprep.subr.bf16.mxu0 %v15540_v42  ;;  %v15548_v22 = vpack.c.bf16 %v6492_v63, %v6491_v19  ;;  %v6522_v54 = vld [vmem:[%s22746_s3 + $0x298] sm:$0xff]  ;;  %v6523_v11 = vld [vmem:[%s22746_s3 + $0x2a0] sm:$0xff] }
0x1811   :  { %14665 = vmatmul.mubr.msk.f32.gmra.mrb[70].mxu0 %vm2344_vm11, %v6665_v14  ;;  %v6521_v14 = vld [vmem:[%s22746_s3 + $0x290] sm:$0xff] }
0x1812   :  { %15543 = vmatpush3.bf16.msra.mxu0 %v15540_v42  ;;  %14667 = vmatprep.mubr.msk.f32.mxu0 %vm2344_vm11, %v6666_v52  ;;  %v6518_v42 = vld [vmem:[%s22746_s3 + $0x278] sm:$0xff]  ;;  %v6524_v52 = vld [vmem:[%s22746_s3 + $0x2a8] sm:$0xff] }
0x1813   :  { %15545 = vmatprep.subr.bf16.mxu0 %v15544_v43 }
0x1815   :  { %14668 = vmatmul.mubr.msk.f32.gmra.mrb[72].mxu0 %vm2344_vm11, %v6667_v21 }
0x1816   :  { %15547 = vmatpush3.bf16.msra.mxu0 %v15544_v43  ;;  %14670 = vmatprep.mubr.msk.f32.mxu0 %vm2344_vm11, %v6668_v6  ;;  %v7000_v43 = vld [vmem:[%s22746_s3 + $0x330] sm:$0xff] }
0x1817   :  { %15549 = vmatprep.subr.bf16.mxu0 %v15548_v22  ;;  %14717 = vmatprep.mubr.msk.f32.mxu1 %vm2344_vm11, %v7000_v43 }
0x1818   :  { %v20168_v19 = vpop.permute.xlu1 %6946 }
0x1819   :  { %14671 = vmatmul.mubr.msk.f32.gmra.mrb[74].mxu0 %vm2344_vm11, %v6669_v41  ;;  %23019 = vst [vmem:[#allocation74_spill] sm:$0xff] %v20168_v19 }
0x181a   :  { %15551 = vmatpush3.bf16.msra.mxu0 %v15548_v22  ;;  %14689 = vmatprep.mubr.msk.f32.mxu0 %vm2344_vm11, %v6517_v48 }
0x181c   :  { %v20166_v21 = vpop.permute.xlu0 %6951  ;;  %v20172_v22 = vpop.permute.xlu1 %6956 }
0x181d   :  { %14690 = vmatmul.mubr.msk.f32.vlgmr.msra.gmra.mrb[68].mxu0 %vm2344_vm11, %v6518_v42  ;;  %23018 = vst [vmem:[#allocation73_spill] sm:$0xff] %v20166_v21  ;;  %23021 = vst [vmem:[#allocation76_spill] sm:$0xff] %v20172_v22 }
0x181e   :  { %14692 = vmatprep.mubr.msk.f32.mxu0 %vm2344_vm11, %v6519_v57 }
0x1820   :  { %v20170_v63 = vpop.permute.xlu0 %6961  ;;  %v20180_v31 = vpop.permute.xlu1 %6966 }
0x1821   :  { %14693 = vmatmul.mubr.msk.f32.gmra.mrb[70].mxu0 %vm2344_vm11, %v6520_v17  ;;  %23020 = vst [vmem:[#allocation75_spill] sm:$0xff] %v20170_v63  ;;  %23023 = vst [vmem:[#allocation78_spill] sm:$0xff] %v20180_v31 }
0x1822   :  { %14695 = vmatprep.mubr.msk.f32.mxu0 %vm2344_vm11, %v6521_v14 }
0x1825   :  { %14696 = vmatmul.mubr.msk.f32.gmra.mrb[72].mxu0 %vm2344_vm11, %v6522_v54 }
0x1826   :  { %14698 = vmatprep.mubr.msk.f32.mxu0 %vm2344_vm11, %v6523_v11 }
0x1829   :  { %14699 = vmatmul.mubr.msk.f32.gmra.mrb[74].mxu0 %vm2344_vm11, %v6524_v52  ;;  %v20177_v52 = vpop.permute.xlu0 %6971 }
0x182a   :  { %23022 = vst [vmem:[#allocation77_spill] sm:$0xff] %v20177_v52  ;;  %14801 = vmatprep.mubr.msk.f32.mxu0 %vm17314_vm12, %v22944_v58 }
0x18f0   :  { %v14691_v6 = vpop.f32.mrb[68].mxu0 }
0x18f1   :  { %v6985_v41 = vadd.f32 %v14691_v6, %v20166_v21  ;;  %v6889_v48 = vpop.f32.mrb[69].mxu0 }
0x18f2   :  { %v6984_v42 = vadd.f32 %v20168_v19, %v6889_v48 }
0x18f3   :  { %v6993_v57 = vmax.f32 %v6985_v41, 0.0 }
0x18f4   :  { %v6992_v17 = vmax.f32 %v6984_v42, 0.0  ;;  %v14694_v14 = vpop.f32.mrb[70].mxu0 }
0x18f5   :  { %v6987_v54 = vadd.f32 %v14694_v14, %v20170_v63  ;;  %v6899_v11 = vpop.f32.mrb[71].mxu0  ;;  %v20184_v63 = vpop.permute.xlu0 %6981 }
0x18f6   :  { %v15552_v43 = vpack.c.bf16 %v6993_v57, %v6992_v17  ;;  %v6986_v38 = vadd.f32 %v20172_v22, %v6899_v11  ;;  %23024 = vst [vmem:[#allocation79_spill] sm:$0xff] %v20184_v63  ;;  %v20186_v17 = vpop.permute.xlu1 %6976 }
0x18f7   :  { %v6995_v28 = vmax.f32 %v6987_v54, 0.0  ;;  %23025 = vst [vmem:[#allocation80_spill] sm:$0xff] %v20186_v17 }
0x18f8   :  { %v6994_v9 = vmax.f32 %v6986_v38, 0.0  ;;  %v14697_v61 = vpop.f32.mrb[72].mxu0  ;;  %15553 = vmatprep.subr.bf16.mxu1 %v15552_v43 }
0x18f9   :  { %v6989_v6 = vadd.f32 %v14697_v61, %v20177_v52  ;;  %v6909_v48 = vpop.f32.mrb[73].mxu0  ;;  %15555 = vmatpush3.bf16.msra.mxu1 %v15552_v43 }
0x18fa   :  { %v15556_v41 = vpack.c.bf16 %v6995_v28, %v6994_v9  ;;  %v6988_v42 = vadd.f32 %v20180_v31, %v6909_v48  ;;  %v7001_v28 = vld [vmem:[%s22746_s3 + $0x338] sm:$0xff] }
0x18fb   :  { %v6997_v14 = vmax.f32 %v6989_v6, 0.0  ;;  %v7002_v6 = vld [vmem:[%s22746_s3 + $0x340] sm:$0xff]  ;;  %v7005_v48 = vld [vmem:[%s22746_s3 + $0x358] sm:$0xff] }
0x18fc   :  { %v6996_v19 = vmax.f32 %v6988_v42, 0.0  ;;  %v14700_v57 = vpop.f32.mrb[74].mxu0  ;;  %15557 = vmatprep.subr.bf16.mxu1 %v15556_v41  ;;  %v7007_v42 = vld [vmem:[%s22746_s3 + $0x368] sm:$0xff] }
0x18fd   :  { %v6991_v54 = vadd.f32 %v14700_v57, %v20184_v63  ;;  %v6919_v38 = vpop.f32.mrb[75].mxu0  ;;  %15559 = vmatpush3.bf16.msra.mxu1 %v15556_v41  ;;  %v7006_v41 = vld [vmem:[%s22746_s3 + $0x360] sm:$0xff]  ;;  %v20222_v57 = vpop.permute.xlu0 %7023 }
0x18fe   :  { %v15560_v11 = vpack.c.bf16 %v6997_v14, %v6996_v19  ;;  %v6990_v61 = vadd.f32 %v20186_v17, %v6919_v38  ;;  %v7003_v19 = vld [vmem:[%s22746_s3 + $0x348] sm:$0xff]  ;;  %v7201_v14 = vld [vmem:[%s22746_s3 + $0x370] sm:$0xff]  ;;  %23026 = vst [vmem:[#allocation81_spill] sm:$0xff] %v20222_v57 }
0x18ff   :  { %v6999_v52 = vmax.f32 %v6991_v54, 0.0  ;;  %v20224_v54 = vpop.permute.xlu1 %7018 }
0x1900   :  { %v6998_v43 = vmax.f32 %v6990_v61, 0.0  ;;  %15561 = vmatprep.subr.bf16.mxu1 %v15560_v11  ;;  %23027 = vst [vmem:[#allocation82_spill] sm:$0xff] %v20224_v54 }
0x1901   :  { %15563 = vmatpush3.bf16.msra.mxu1 %v15560_v11  ;;  %v20226_v38 = vpop.permute.xlu0 %7033 }
0x1902   :  { %v15564_v9 = vpack.c.bf16 %v6999_v52, %v6998_v43  ;;  %v7004_v52 = vld [vmem:[%s22746_s3 + $0x350] sm:$0xff]  ;;  %23028 = vst [vmem:[#allocation83_spill] sm:$0xff] %v20226_v38 }
0x1903   :  { %v20228_v61 = vpop.permute.xlu1 %7028 }
0x1904   :  { %15565 = vmatprep.subr.bf16.mxu1 %v15564_v9  ;;  %23029 = vst [vmem:[#allocation84_spill] sm:$0xff] %v20228_v61 }
0x1905   :  { %15567 = vmatpush3.bf16.msra.mxu1 %v15564_v9 }
0x1908   :  { %14718 = vmatmul.mubr.msk.f32.vlgmr.msra.gmra.mrb[94].mxu1 %vm2344_vm11, %v7001_v28 }
0x1909   :  { %14720 = vmatprep.mubr.msk.f32.mxu1 %vm2344_vm11, %v7002_v6 }
0x190c   :  { %14721 = vmatmul.mubr.msk.f32.gmra.mrb[96].mxu1 %vm2344_vm11, %v7003_v19 }
0x190d   :  { %14723 = vmatprep.mubr.msk.f32.mxu1 %vm2344_vm11, %v7004_v52 }
0x1910   :  { %14724 = vmatmul.mubr.msk.f32.gmra.mrb[98].mxu1 %vm2344_vm11, %v7005_v48 }
0x1911   :  { %14726 = vmatprep.mubr.msk.f32.mxu1 %vm2344_vm11, %v7006_v41 }
0x1914   :  { %14727 = vmatmul.mubr.msk.f32.gmra.mrb[100].mxu1 %vm2344_vm11, %v7007_v42 }
0x1915   :  { %14745 = vmatprep.mubr.msk.f32.mxu1 %vm2344_vm11, %v7201_v14  ;;  %v20240_v14 = vpop.permute.xlu0 %7043 }
0x1916   :  { %23030 = vst [vmem:[#allocation85_spill] sm:$0xff] %v20240_v14 }
0x19db   :  { %v14719_v11 = vpop.f32.mrb[94].mxu1 }
0x19dc   :  { %v7152_v43 = vadd.f32 %v14719_v11, %v20222_v57  ;;  %v7146_v9 = vpop.f32.mrb[95].mxu1  ;;  %v20244_v57 = vpop.permute.xlu1 %7038 }
0x19dd   :  { %v7147_v28 = vadd.f32 %v7146_v9, %v20224_v54  ;;  %23031 = vst [vmem:[#allocation86_spill] sm:$0xff] %v20244_v57 }
0x19de   :  { %v20233_v6 = vadd.f32 %v7152_v43, %v19864_v47 }
0x19df   :  { %v20236_v19 = vadd.f32 %v7147_v28, %v19868_v62  ;;  %v14722_v52 = vpop.f32.mrb[96].mxu1 }
0x19e0   :  { %v22884_v48 = vmax.f32 %v20233_v6, 0.0  ;;  %v7162_v41 = vadd.f32 %v14722_v52, %v20226_v38  ;;  %v7156_v42 = vpop.f32.mrb[97].mxu1 }
0x19e1   :  { %v22883_v17 = vmax.f32 %v20236_v19, 0.0  ;;  %v7157_v11 = vadd.f32 %v7156_v42, %v20228_v61 }
0x19e2   :  { %v20247_v47 = vadd.f32 %v7162_v41, %v19878_v7 }
0x19e3   :  { %v20250_v62 = vadd.f32 %v7157_v11, %v19882_v2  ;;  %v14725_v43 = vpop.f32.mrb[98].mxu1  ;;  %v15568_v9 = vpack.c.bf16 %v22884_v48, %v22883_v17  ;;  %v20263_v2 = vpop.permute.xlu0 %7053 }
0x19e4   :  { %v22886_v28 = vmax.f32 %v20247_v47, 0.0  ;;  %v7172_v52 = vadd.f32 %v14725_v43, %v20240_v14  ;;  %v7166_v38 = vpop.f32.mrb[99].mxu1  ;;  %23032 = vst [vmem:[#allocation87_spill] sm:$0xff] %v20263_v2  ;;  %v20272_v17 = vpop.permute.xlu1 %7048 }
0x19e5   :  { %v22885_v42 = vmax.f32 %v20250_v62, 0.0  ;;  %v7167_v61 = vadd.f32 %v7166_v38, %v20244_v57  ;;  %15569 = vmatprep.subr.bf16.mxu1 %v15568_v9  ;;  %23033 = vst [vmem:[#allocation88_spill] sm:$0xff] %v20272_v17 }
0x19e6   :  { %v20261_v7 = vadd.f32 %v7172_v52, %v19893_v44  ;;  %15571 = vmatpush3.bf16.msra.mxu1 %v15568_v9 }
0x19e7   :  { %v20266_v41 = vadd.f32 %v7167_v61, %v19897_v10  ;;  %v14728_v11 = vpop.f32.mrb[100].mxu1  ;;  %v15572_v43 = vpack.c.bf16 %v22886_v28, %v22885_v42 }
0x19e8   :  { %v22890_v38 = vmax.f32 %v20261_v7, 0.0  ;;  %v7182_v48 = vadd.f32 %v14728_v11, %v20263_v2  ;;  %v7176_v44 = vpop.f32.mrb[101].mxu1 }
0x19e9   :  { %v22889_v9 = vmax.f32 %v20266_v41, 0.0  ;;  %v7177_v52 = vadd.f32 %v7176_v44, %v20272_v17  ;;  %15573 = vmatprep.subr.bf16.mxu1 %v15572_v43  ;;  %v7206_v44 = vld [vmem:[%s22746_s3 + $0x398] sm:$0xff] }
0x19ea   :  { %v20279_v10 = vadd.f32 %v7182_v48, %v19906_v45  ;;  %15575 = vmatpush3.bf16.msra.mxu1 %v15572_v43  ;;  %v7203_v48 = vld [vmem:[%s22746_s3 + $0x380] sm:$0xff]  ;;  %v7205_v43 = vld [vmem:[%s22746_s3 + $0x390] sm:$0xff] }
0x19eb   :  { %v20282_v61 = vadd.f32 %v7177_v52, %v19908_v23  ;;  %v15576_v42 = vpack.c.bf16 %v22890_v38, %v22889_v9  ;;  %v7202_v23 = vld [vmem:[%s22746_s3 + $0x378] sm:$0xff]  ;;  %v7207_v52 = vld [vmem:[%s22746_s3 + $0x3a0] sm:$0xff] }
0x19ec   :  { %v22888_v11 = vmax.f32 %v20279_v10, 0.0 }
0x19ed   :  { %v22887_v28 = vmax.f32 %v20282_v61, 0.0  ;;  %15577 = vmatprep.subr.bf16.mxu1 %v15576_v42 }
0x19ee   :  { %15579 = vmatpush3.bf16.msra.mxu1 %v15576_v42  ;;  %v7204_v42 = vld [vmem:[%s22746_s3 + $0x388] sm:$0xff] }
0x19ef   :  { %v15580_v45 = vpack.c.bf16 %v22888_v11, %v22887_v28 }
0x19f1   :  { %15581 = vmatprep.subr.bf16.mxu1 %v15580_v45 }
0x19f2   :  { %15583 = vmatpush3.bf16.msra.mxu1 %v15580_v45  ;;  %v7208_v45 = vld [vmem:[%s22746_s3 + $0x3a8] sm:$0xff] }
0x19f5   :  { %14746 = vmatmul.mubr.msk.f32.vlgmr.msra.gmra.mrb[102].mxu1 %vm2344_vm11, %v7202_v23  ;;  %v7394_v23 = vld [vmem:[%s22746_s3 + $0x3b0] sm:$0xff] }
0x19f6   :  { %14748 = vmatprep.mubr.msk.f32.mxu1 %vm2344_vm11, %v7203_v48  ;;  %v20326_v48 = vpop.permute.xlu0 %7224 }
0x19f9   :  { %14749 = vmatmul.mubr.msk.f32.gmra.mrb[104].mxu1 %vm2344_vm11, %v7204_v42  ;;  %v20328_v42 = vpop.permute.xlu1 %7219 }
0x19fa   :  { %14751 = vmatprep.mubr.msk.f32.mxu1 %vm2344_vm11, %v7205_v43  ;;  %23034 = vst [vmem:[#allocation89_spill] sm:$0xff] %v20328_v42  ;;  %v20330_v43 = vpop.permute.xlu0 %7234 }
0x19fb   :  { %23035 = vst [vmem:[#allocation90_spill] sm:$0xff] %v20330_v43 }
0x19fd   :  { %14752 = vmatmul.mubr.msk.f32.gmra.mrb[106].mxu1 %vm2344_vm11, %v7206_v44 }
0x19fe   :  { %14754 = vmatprep.mubr.msk.f32.mxu1 %vm2344_vm11, %v7207_v52  ;;  %v20332_v52 = vpop.permute.xlu1 %7229  ;;  %v20337_v57 = vpop.permute.xlu0 %7244 }
0x19ff   :  { %23036 = vst [vmem:[#allocation91_spill] sm:$0xff] %v20332_v52  ;;  %23037 = vst [vmem:[#allocation92_spill] sm:$0xff] %v20337_v57 }
0x1a01   :  { %14755 = vmatmul.mubr.msk.f32.gmra.mrb[108].mxu1 %vm2344_vm11, %v7208_v45 }
0x1a02   :  { %14773 = vmatprep.mubr.msk.f32.mxu1 %vm2344_vm11, %v7394_v23  ;;  %v20340_v63 = vpop.permute.xlu1 %7239 }
0x1a03   :  { %23038 = vst [vmem:[#allocation93_spill] sm:$0xff] %v20340_v63 }
0x1ac8   :  { %v14747_v44 = vpop.f32.mrb[102].mxu1 }
0x1ac9   :  { %v7353_v28 = vadd.f32 %v14747_v44, %v20326_v48  ;;  %v7347_v11 = vpop.f32.mrb[103].mxu1 }
0x1aca   :  { %v7348_v45 = vadd.f32 %v7347_v11, %v20328_v42 }
0x1acb   :  { %v7387_v9 = vmax.f32 %v7353_v28, 0.0 }
0x1acc   :  { %v7386_v38 = vmax.f32 %v7348_v45, 0.0  ;;  %v14750_v17 = vpop.f32.mrb[104].mxu1 }
0x1acd   :  { %v7363_v2 = vadd.f32 %v14750_v17, %v20330_v43  ;;  %v7357_v23 = vpop.f32.mrb[105].mxu1  ;;  %v20344_v43 = vpop.permute.xlu0 %7254 }
0x1ace   :  { %v15584_v14 = vpack.c.bf16 %v7387_v9, %v7386_v38  ;;  %v7358_v54 = vadd.f32 %v7357_v23, %v20332_v52  ;;  %23039 = vst [vmem:[#allocation94_spill] sm:$0xff] %v20344_v43  ;;  %v20346_v9 = vpop.permute.xlu1 %7249 }
0x1acf   :  { %v7389_v31 = vmax.f32 %v7363_v2, 0.0  ;;  %23040 = vst [vmem:[#allocation95_spill] sm:$0xff] %v20346_v9 }
0x1ad0   :  { %v7388_v22 = vmax.f32 %v7358_v54, 0.0  ;;  %v14753_v21 = vpop.f32.mrb[106].mxu1  ;;  %15585 = vmatprep.subr.bf16.mxu1 %v15584_v14 }
0x1ad1   :  { %v7373_v44 = vadd.f32 %v14753_v21, %v20337_v57  ;;  %v7367_v11 = vpop.f32.mrb[107].mxu1  ;;  %15587 = vmatpush3.bf16.msra.mxu1 %v15584_v14 }
0x1ad2   :  { %v15588_v28 = vpack.c.bf16 %v7389_v31, %v7388_v22  ;;  %v7368_v45 = vadd.f32 %v7367_v11, %v20340_v63  ;;  %v7395_v22 = vld [vmem:[%s22746_s3 + $0x3b8] sm:$0xff] }
0x1ad3   :  { %v7391_v17 = vmax.f32 %v7373_v44, 0.0  ;;  %v7396_v44 = vld [vmem:[%s22746_s3 + $0x3c0] sm:$0xff]  ;;  %v7399_v11 = vld [vmem:[%s22746_s3 + $0x3d8] sm:$0xff] }
0x1ad4   :  { %v7390_v42 = vmax.f32 %v7368_v45, 0.0  ;;  %v14756_v38 = vpop.f32.mrb[108].mxu1  ;;  %15589 = vmatprep.subr.bf16.mxu1 %v15588_v28  ;;  %v7401_v45 = vld [vmem:[%s22746_s3 + $0x3e8] sm:$0xff] }
0x1ad5   :  { %v7383_v2 = vadd.f32 %v14756_v38, %v20344_v43  ;;  %v7377_v54 = vpop.f32.mrb[109].mxu1  ;;  %15591 = vmatpush3.bf16.msra.mxu1 %v15588_v28  ;;  %v7400_v28 = vld [vmem:[%s22746_s3 + $0x3e0] sm:$0xff]  ;;  %v20382_v38 = vpop.permute.xlu0 %7417 }
0x1ad6   :  { %v15592_v23 = vpack.c.bf16 %v7391_v17, %v7390_v42  ;;  %v7378_v21 = vadd.f32 %v7377_v54, %v20346_v9  ;;  %v7397_v42 = vld [vmem:[%s22746_s3 + $0x3c8] sm:$0xff]  ;;  %v22903_v17 = vmov 0.0|0.0  }
0x1ad7   :  { %v7393_v57 = vmax.f32 %v7383_v2, 0.0  ;;  %15600 = vmatprep.subr.bf16.mxu0 %v22903_v17  ;;  %v20384_v2 = vpop.permute.xlu1 %7412 }
0x1ad8   :  { %v7392_v14 = vmax.f32 %v7378_v21, 0.0  ;;  %15593 = vmatprep.subr.bf16.mxu1 %v15592_v23  ;;  %23041 = vst [vmem:[#allocation96_spill] sm:$0xff] %v20384_v2 }
0x1ad9   :  { %15595 = vmatpush3.bf16.msra.mxu1 %v15592_v23  ;;  %v20386_v54 = vpop.permute.xlu0 %7427 }
0x1ada   :  { %v15596_v31 = vpack.c.bf16 %v7393_v57, %v7392_v14  ;;  %v7398_v57 = vld [vmem:[%s22746_s3 + $0x3d0] sm:$0xff]  ;;  %23042 = vst [vmem:[#allocation97_spill] sm:$0xff] %v20386_v54 }
0x1adb   :  { %v20388_v21 = vpop.permute.xlu1 %7422 }
0x1adc   :  { %15597 = vmatprep.subr.bf16.mxu1 %v15596_v31  ;;  %23043 = vst [vmem:[#allocation98_spill] sm:$0xff] %v20388_v21 }
0x1add   :  { %15599 = vmatpush3.bf16.msra.mxu1 %v15596_v31  ;;  %v20397_v43 = vpop.permute.xlu0 %7437 }
0x1ae0   :  { %14774 = vmatmul.mubr.msk.f32.vlgmr.msra.gmra.mrb[110].mxu1 %vm2344_vm11, %v7395_v22 }
0x1ae1   :  { %14776 = vmatprep.mubr.msk.f32.mxu1 %vm2344_vm11, %v7396_v44  ;;  %v23044_v44 = vmax.f32 %v20233_v6, 0.0 }
0x1ae4   :  { %14777 = vmatmul.mubr.msk.f32.gmra.mrb[112].mxu1 %vm2344_vm11, %v7397_v42 }
0x1ae5   :  { %14779 = vmatprep.mubr.msk.f32.mxu1 %vm2344_vm11, %v7398_v57  ;;  %v23045_v57 = vmax.f32 %v20236_v19, 0.0 }
0x1ae8   :  { %14780 = vmatmul.mubr.msk.f32.gmra.mrb[114].mxu1 %vm2344_vm11, %v7399_v11 }
0x1ae9   :  { %14782 = vmatprep.mubr.msk.f32.mxu1 %vm2344_vm11, %v7400_v28 }
0x1aec   :  { %14783 = vmatmul.mubr.msk.f32.gmra.mrb[116].mxu1 %vm2344_vm11, %v7401_v45 }
0x1aed   :  { %8089 = vmatprep.mubr.f32.mxu1 %v22944_v58 }
0x1bb3   :  { %v14775_v23 = vpop.f32.mrb[110].mxu1 }
0x1bb4   :  { %v7546_v14 = vadd.f32 %v14775_v23, %v20382_v38  ;;  %v7540_v31 = vpop.f32.mrb[111].mxu1  ;;  %v20400_v23 = vpop.permute.xlu1 %7432 }
0x1bb5   :  { %v7541_v22 = vadd.f32 %v7540_v31, %v20384_v2  ;;  %v23046_v31 = vmax.f32 %v20247_v47, 0.0  ;;  %v20411_v47 = vpop.permute.xlu0 %7447 }
0x1bb6   :  { %v7580_v42 = vadd.f32 %v7546_v14, %v23044_v44  ;;  %v23047_v14 = vmax.f32 %v20250_v62, 0.0  ;;  %v23050_v62 = vmax.f32 %v20266_v41, 0.0  ;;  %v23052_v41 = vmax.f32 %v20282_v61, 0.0 }
0x1bb7   :  { %v7579_v11 = vadd.f32 %v7541_v22, %v23045_v57  ;;  %v14778_v28 = vpop.f32.mrb[112].mxu1 }
0x1bb8   :  { %v7588_v45 = vmax.f32 %v7580_v42, 0.0  ;;  %v7556_v17 = vadd.f32 %v14778_v28, %v20386_v54  ;;  %v7550_v9 = vpop.f32.mrb[113].mxu1 }
0x1bb9   :  { %v7587_v63 = vmax.f32 %v7579_v11, 0.0  ;;  %v7551_v52 = vadd.f32 %v7550_v9, %v20388_v21  ;;  %v23048_v9 = vmax.f32 %v20261_v7, 0.0  ;;  %v23049_v21 = vmov 0.0|0.0  }
0x1bba   :  { %v7582_v2 = vadd.f32 %v7556_v17, %v23046_v31  ;;  %v23051_v7 = vmax.f32 %v20279_v10, 0.0  ;;  %v20430_v10 = vpop.permute.xlu0 %4029 }
0x1bbb   :  { %v15601_v6 = vpack.c.bf16 %v7588_v45, %v7587_v63  ;;  %v7581_v19 = vadd.f32 %v7551_v52, %v23047_v14  ;;  %v14781_v22 = vpop.f32.mrb[114].mxu1  ;;  %23053 = vst [vmem:[#allocation99_spill] sm:$0xff] %v20430_v10  ;;  %v4102_v61 = vadd.f32 %v19272_v53, %v20430_v10 }
0x1bbc   :  { %v7590_v44 = vmax.f32 %v7582_v2, 0.0  ;;  %v7566_v42 = vadd.f32 %v14781_v22, %v20397_v43  ;;  %v7560_v57 = vpop.f32.mrb[115].mxu1  ;;  %v20415_v2 = vpop.permute.xlu1 %7442 }
0x1bbd   :  { %v7589_v28 = vmax.f32 %v7581_v19, 0.0  ;;  %v7561_v54 = vadd.f32 %v7560_v57, %v20400_v23  ;;  %15602 = vmatpush3.bf16.msra.mxu0 %v15601_v6 }
0x1bbe   :  { %v7584_v11 = vadd.f32 %v7566_v42, %v23048_v9  ;;  %15603 = vmatprep.subr.bf16.mxu0 %v23049_v21  ;;  %v7595_v9 = vld [vmem:[%s22746_s3 + $0x3f0] sm:$0xf] }
0x1bbf   :  { %v15604_v63 = vpack.c.bf16 %v7590_v44, %v7589_v28  ;;  %v7583_v52 = vadd.f32 %v7561_v54, %v23050_v62  ;;  %v14784_v17 = vpop.f32.mrb[116].mxu1  ;;  %v7697_v62 = vand.u32 2147483647, %v4102_v61 }
0x1bc0   :  { %v7592_v45 = vmax.f32 %v7584_v11, 0.0  ;;  %v7576_v31 = vadd.f32 %v14784_v17, %v20411_v47  ;;  %v7570_v14 = vpop.f32.mrb[117].mxu1  ;;  %v4104_v11 = vadd.f32 %v19274_v46, %v20430_v10 }
0x1bc1   :  { %v7591_v19 = vmax.f32 %v7583_v52, 0.0  ;;  %v7571_v6 = vadd.f32 %v7570_v14, %v20415_v2  ;;  %15605 = vmatpush3.bf16.msra.mxu0 %v15604_v63  ;;  %v20436_v52 = vpop.permute.xlu1 %7599 }
0x1bc2   :  { %v7586_v22 = vadd.f32 %v7576_v31, %v23051_v7  ;;  %15606 = vmatprep.subr.bf16.mxu0 %v23049_v21  ;;  %v7685_v63 = vand.u32 2147483647, %v4104_v11  ;;  %23054 = vst [vmem:[#allocation100_spill] sm:$0xff] %v20436_v52  ;;  %v7698_v31 = vadd.f32 %v7697_v62, %v4102_v61 }
0x1bc3   :  { %v15607_v44 = vpack.c.bf16 %v7592_v45, %v7591_v19  ;;  %v7585_v54 = vadd.f32 %v7571_v6, %v23052_v41 }
0x1bc4   :  { %v7594_v42 = vmax.f32 %v7586_v22, 0.0  ;;  %v7686_v45 = vsub.f32 %v4104_v11, %v7685_v63 }
0x1bc5   :  { %v7593_v57 = vmax.f32 %v7585_v54, 0.0  ;;  %15608 = vmatpush3.bf16.msra.mxu0 %v15607_v44 }
0x1bc6   :  { %15609 = vmatprep.subr.bf16.mxu0 %v23049_v21 }
0x1bc7   :  { %v15610_v28 = vpack.c.bf16 %v7594_v42, %v7593_v57 }
0x1bc9   :  { %15611 = vmatpush3.bf16.msra.mxu0 %v15610_v28 }
0x1bcc   :  { %14802 = vmatmul.mubr.msk.f32.vlgmr.msra.gmra.mrb[76].mxu0 %vm2344_vm11, %v7595_v9 }
0x1bcd   :  { %7834 = vmatprep.mubr.f32.mxu0 %v22944_v58 }
0x1c9f   :  { %v7671_v17 = vpop.f32.mrb[76].mxu0 }
0x1ca0   :  { %v7672_v14 = vadd.f32 %v7671_v17, %v20436_v52  ;;  %v14803_v19 = vpop.f32.mrb[77].mxu0 }
0x1ca2   :  { %v7675_v6 = vmul.f32 %v7672_v14, %v7672_v14  ;;  %v7687_v7 = vmul.f32 %v7686_v45, %v7672_v14  ;;  %v7699_v22 = vmul.f32 %v7698_v31, %v7672_v14 }
0x1ca4   :  { %v7677_v44 = vsel %vm7676_vm13, %v7675_v6, 0.0  ;;  %v7688_v53 = vmul.f32 %v7687_v7, %v7672_v14  ;;  %v7700_v41 = vmul.f32 %v7699_v22, %v7672_v14 }
0x1ca5   :  { %v7678_v54 = vrot.slane %v7677_v44, 4 }
0x1ca6   :  { %v7689_v46 = vsel %vm7676_vm13, %v7688_v53, 0.0  ;;  %v7701_v42 = vsel %vm7676_vm13, %v7700_v41, 0.0 }
0x1ca7   :  { %v7679_v57 = vadd.f32 %v7678_v54, %v7677_v44  ;;  %v7690_v28 = vrot.slane %v7689_v46, 4  ;;  %v7702_v9 = vrot.slane %v7701_v42, 4  ;;  %v17052_v44 = vld [vmem:[%s22742_s0] sm:$0x1] }
0x1ca8   :  { %v7709_v41 = vsub.f32 %v17372_v12, %v17052_v44  ;;  %v7711_v54 = vsub.f32 %v17052_v44, %v17376_v13 }
0x1ca9   :  { %v7680_v61 = vrot.slane %v7679_v57, 2  ;;  %v7691_v11 = vadd.f32 %v7690_v28, %v7689_v46  ;;  %v7703_v63 = vadd.f32 %v7702_v9, %v7701_v42 }
0x1cab   :  { %v7681_v62 = vadd.f32 %v7680_v61, %v7679_v57  ;;  %v7692_v19 = vrot.slane %v7691_v11, 2  ;;  %v7704_v45 = vrot.slane %v7703_v63, 2 }
0x1cad   :  { %v7682_v17 = vrot.slane %v7681_v62, 1  ;;  %v7693_v6 = vadd.f32 %v7692_v19, %v7691_v11  ;;  %v7705_v7 = vadd.f32 %v7704_v45, %v7703_v63 }
0x1caf   :  { %v7683_v31 = vadd.f32 %v7682_v17, %v7681_v62  ;;  %v7694_v14 = vrot.slane %v7693_v6, 1  ;;  %v7706_v22 = vrot.slane %v7705_v7, 1 }
0x1cb1   :  { %17048 = vrcp.f32 %v7683_v31  ;;  %v7695_v52 = vadd.f32 %v7694_v14, %v7693_v6  ;;  %v7707_v53 = vadd.f32 %v7706_v22, %v7705_v7 }
0x1cbb   :  { %v17049_v10 = vpop.eup %17048 }
0x1cbc   :  { %v7696_v46 = vmul.f32 %v17049_v10, %v7695_v52  ;;  %v7708_v42 = vmul.f32 %v17049_v10, %v7707_v53 }
0x1cbe   :  { %v7710_v57 = vmul.f32 %v7709_v41, %v7696_v46  ;;  %v7712_v28 = vmul.f32 %v7711_v54, %v7708_v42 }
0x1cc0   :  { %v7713_v9 = vadd.f32 %v7712_v28, %v7710_v57 }
0x1cc2   :  { %v7714_v61 = vmul.f32 1.1, %v7713_v9 }
0x1cc4   :  { %v7715_v11 = vsub.f32 %v17052_v44, %v7714_v61  ;;  %v17053_v44 = vld [vmem:[%s22743_s1 + $0x10] sm:$0xff] }
0x1cc6   :  { %7716 = vrot.lane.b32.xlu0 %v7715_v11, %s17315_s19  ;;  %7718 = vrot.lane.b32.xlu1 %v7715_v11, %s17316_s24 }
0x1d38   :  { %v7717_v12 = vpop.permute.xlu0 %7716  ;;  %v7719_v63 = vpop.permute.xlu1 %7718 }
0x1d39   :  { %v7722_v13 = vsel %vm7721_vm14, %v7719_v63, %v7715_v11 }
0x1d3a   :  { %v20455_v10 = vsel %vm7720_vm15, %v7717_v12, %v7722_v13  ;;  %v17055_v12 = vld [vmem:[%s22743_s1 + $0x20] sm:$0xff] }
0x1d3b   :  { %7726 = vrot.lane.b32.xlu0 %v20455_v10, %s17311_s23  ;;  %7724 = vrot.lane.b32.xlu1 %v20455_v10, %s17308_s21  ;;  %v7741_v45 = vrot.slane %v20455_v10, %v17364_v8 }
0x1d3f   :  { %7731 = vrot.lane.b32.xlu0 %v20455_v10, %s17310_s22  ;;  %7729 = vrot.lane.b32.xlu1 %v20455_v10, %s17307_s20 }
0x1dad   :  { %v7727_v52 = vpop.permute.xlu0 %7726  ;;  %v7725_v62 = vpop.permute.xlu1 %7724 }
0x1dae   :  { %v20467_v17 = vsel %vm34_vm0, %v7725_v62, %v7727_v52  ;;  %v17056_v52 = vld [vmem:[%s22743_s1 + $0x28] sm:$0xff]  ;;  %v17057_v62 = vld [vmem:[%s22743_s1] sm:$0xff] }
0x1daf   :  { %v7737_v19 = vrot.slane %v20467_v17, %v17364_v8 }
0x1db1   :  { %v20475_v31 = vsel %vm64_vm2, %v7737_v19, %v7741_v45  ;;  %v7732_v6 = vpop.permute.xlu0 %7731  ;;  %v7730_v7 = vpop.permute.xlu1 %7729  ;;  %v17058_v19 = vld [vmem:[%s22743_s1 + $0x8] sm:$0xff] }
0x1db2   :  { %v20479_v14 = vsel %vm35_vm1, %v7730_v7, %v7732_v6  ;;  %7756 = vrot.lane.b32.xlu1 %v20475_v31, %s17310_s22 }
0x1db3   :  { %v7745_v22 = vrot.slane %v20479_v14, %v17364_v8 }
0x1db5   :  { %v7747_v53 = vsel %vm64_vm2, %v7741_v45, %v7745_v22 }
0x1db6   :  { %7758 = vrot.lane.b32.xlu0 %v7747_v53, %s17310_s22  ;;  %13668 = vmatprep.subr.msk.mxu0 %vm116_vm3, %v7747_v53 }
0x1db7   :  { %7748 = vrot.lane.b32.xlu1 %v20475_v31, %s17311_s23  ;;  %13669 = vmatpush1.msk.msra.mxu0 %vm116_vm3, %v20475_v31 }
0x1db8   :  { %13670 = vmatmul.mubr.msk.f32.vlgmr.msra.gmra.mrb[78].mxu0 %vm109_vm4, %v17053_v44 }
0x1db9   :  { %7840 = vmatprep.mubr.f32.mxu0 %v22944_v58 }
0x1dba   :  { %7750 = vrot.lane.b32.xlu0 %v7747_v53, %s17311_s23 }
0x1dbc   :  { %13671 = vmatmul.mubr.msk.f32.gmra.mrb[80].mxu0 %vm109_vm4, %v17054_v4 }
0x1dbd   :  { %7917 = vmatprep.mubr.f32.mxu0 %v22944_v58 }
0x1e24   :  { %v20504_v8 = vpop.permute.xlu1 %7756 }
0x1e28   :  { %v7759_v41 = vpop.permute.xlu0 %7758 }
0x1e29   :  { %v7760_v54 = vsel %vm96_vm5, %v20504_v8, %v7759_v41  ;;  %v7761_v46 = vsel %vm96_vm5, %v7759_v41, %v20504_v8  ;;  %v20518_v28 = vpop.permute.xlu1 %7748 }
0x1e2a   :  { %v7762_v42 = vsel %vm35_vm1, %v20475_v31, %v7760_v54  ;;  %v7763_v57 = vsel %vm17432_vm6, %v7747_v53, %v7761_v46 }
0x1e2b   :  { %13672 = vmatprep.subr.msk.mxu0 %vm116_vm3, %v7763_v57 }
0x1e2c   :  { %v7751_v9 = vpop.permute.xlu0 %7750  ;;  %13673 = vmatpush1.msk.msra.mxu0 %vm116_vm3, %v7762_v42 }
0x1e2d   :  { %v7752_v61 = vsel %vm83_vm7, %v20518_v28, %v7751_v9  ;;  %v7753_v11 = vsel %vm83_vm7, %v7751_v9, %v20518_v28  ;;  %13674 = vmatmul.mubr.msk.f32.vlgmr.msra.gmra.mrb[78].mxu0 %vm109_vm4, %v17055_v12  ;;  %v17062_v12 = vld [vmem:[%s22743_s1 + $0x48] sm:$0xff] }
0x1e2e   :  { %v7754_v63 = vsel %vm34_vm0, %v20475_v31, %v7753_v11  ;;  %v7755_v13 = vsel %vm17450_vm8, %v7747_v53, %v7752_v61  ;;  %7923 = vmatprep.mubr.f32.mxu0 %v22944_v58 }
0x1e2f   :  { %13676 = vmatprep.subr.msk.mxu0 %vm116_vm3, %v7755_v13 }
0x1e30   :  { %13677 = vmatpush1.msk.msra.mxu0 %vm116_vm3, %v7754_v63 }
0x1e31   :  { %13675 = vmatmul.mubr.msk.f32.gmra.mrb[80].mxu0 %vm109_vm4, %v17056_v52 }
0x1e32   :  { %8000 = vmatprep.mubr.f32.mxu0 %v22944_v58 }
0x1e35   :  { %13678 = vmatmul.mubr.msk.f32.vlgmr.msra.gmra.mrb[78].mxu0 %vm109_vm4, %v17057_v62 }
0x1e36   :  { %8006 = vmatprep.mubr.f32.mxu0 %v22944_v58 }
0x1e39   :  { %13679 = vmatmul.mubr.msk.f32.gmra.mrb[80].mxu0 %vm109_vm4, %v17058_v19 }
0x1e3a   :  { %8526 = vmatprep.mubr.f32.mxu0 %v22944_v58 }
0x1f08   :  { %v8002_v45 = vpop.f32.mrb[78].mxu0 }
0x1f09   :  { %v8004_v6 = vpop.f32.mrb[79].mxu0  ;;  %v8017_v7 = vadd.f32 %v8002_v45, %v17485_v49 }
0x1f0a   :  { %v8018_v22 = vadd.f32 %v8004_v6, %v17485_v49  ;;  %v17059_v49 = vld [vmem:[%s22743_s1 + $0x30] sm:$0xff] }
0x1f0b   :  { %v8021_v46 = vmax.f32 %v8017_v7, 0.0 }
0x1f0c   :  { %v8008_v44 = vpop.f32.mrb[80].mxu0  ;;  %v8022_v57 = vmax.f32 %v8018_v22, 0.0 }
0x1f0d   :  { %v8019_v4 = vadd.f32 %v8008_v44, %v17488_v51  ;;  %v8010_v41 = vpop.f32.mrb[81].mxu0 }
0x1f0e   :  { %v8020_v54 = vadd.f32 %v8010_v41, %v17488_v51  ;;  %v17060_v51 = vld [vmem:[%s22743_s1 + $0x38] sm:$0xff] }
0x1f0f   :  { %v8023_v42 = vmax.f32 %v8019_v4, 0.0 }
0x1f10   :  { %v8024_v9 = vmax.f32 %v8020_v54, 0.0 }
0x1f11   :  { %v15614_v61 = vpack.c.bf16 %v8023_v42, %v8021_v46  ;;  %v17063_v42 = vld [vmem:[%s22743_s1 + $0x60] sm:$0xff] }
0x1f12   :  { %v15612_v11 = vpack.c.bf16 %v8024_v9, %v8022_v57  ;;  %v17064_v57 = vld [vmem:[%s22743_s1 + $0x68] sm:$0xff] }
0x1f14   :  { %15613 = vmatprep.subr.bf16.mxu1 %v15612_v11 }
0x1f15   :  { %15615 = vmatpush1.bf16.msra.mxu1 %v15614_v61 }
0x1f16   :  { %13682 = vmatprep.subr.msk.mxu1 %vm116_vm3, %v7747_v53  ;;  %v17061_v53 = vld [vmem:[%s22743_s1 + $0x40] sm:$0xff] }
0x1f18   :  { %13680 = vmatmul.mubr.msk.f32.vlgmr.msra.gmra.mrb[118].mxu1 %vm418_vm9, %v17059_v49 }
0x1f19   :  { %13683 = vmatpush1.msk.msra.mxu1 %vm116_vm3, %v20475_v31  ;;  %8095 = vmatprep.mubr.f32.mxu1 %v22944_v58 }
0x1f1c   :  { %13681 = vmatmul.mubr.msk.f32.gmra.mrb[120].mxu1 %vm418_vm9, %v17060_v51 }
0x1f1d   :  { %8166 = vmatprep.mubr.f32.mxu1 %v22944_v58 }
0x1f20   :  { %13684 = vmatmul.mubr.msk.f32.vlgmr.msra.gmra.mrb[118].mxu1 %vm109_vm4, %v17061_v53 }
0x1f21   :  { %8172 = vmatprep.mubr.f32.mxu1 %v22944_v58 }
0x1f24   :  { %13685 = vmatmul.mubr.msk.f32.gmra.mrb[120].mxu1 %vm109_vm4, %v17062_v12 }
0x1f25   :  { %8283 = vmatprep.mubr.f32.mxu1 %v22944_v58 }
0x1ff3   :  { %v8168_v63 = vpop.f32.mrb[118].mxu1 }
0x1ff4   :  { %v8170_v13 = vpop.f32.mrb[119].mxu1  ;;  %v16101_v52 = vadd.f32 %v17517_v15, %v8168_v63 }
0x1ff5   :  { %v16103_v62 = vadd.f32 %v17517_v15, %v8170_v13 }
0x1ff6   :  { %v20585_v22 = vmax.f32 %v16101_v52, 0.0 }
0x1ff7   :  { %v8174_v19 = vpop.f32.mrb[120].mxu1  ;;  %v20589_v4 = vmax.f32 %v16103_v62, 0.0 }
0x1ff8   :  { %v16105_v45 = vadd.f32 %v17519_v18, %v8174_v19  ;;  %v8176_v6 = vpop.f32.mrb[121].mxu1 }
0x1ff9   :  { %v16107_v7 = vadd.f32 %v17519_v18, %v8176_v6 }
0x1ffa   :  { %v20587_v44 = vmax.f32 %v16105_v45, 0.0 }
0x1ffb   :  { %v20591_v41 = vmax.f32 %v16107_v7, 0.0 }
0x1ffc   :  { %v16808_v54 = vpack.i.bf16 %v20587_v44, %v20585_v22  ;;  %v15618_v18 = vpack.c.bf16 %v20587_v44, %v20585_v22 }
0x1ffd   :  { %v16813_v15 = vpack.i.bf16 %v20591_v41, %v20589_v4  ;;  %v15616_v46 = vpack.c.bf16 %v20591_v41, %v20589_v4 }
0x1ffe   :  { %16809 = vrot.lane.b32.xlu1 %v16808_v54, %s17310_s22 }
0x1fff   :  { %16814 = vrot.lane.b32.xlu0 %v16813_v15, %s17310_s22  ;;  %15617 = vmatprep.subr.bf16.mxu1 %v15616_v46 }
0x2000   :  { %15619 = vmatpush1.bf16.msra.mxu1 %v15618_v18 }
0x2002   :  { %16819 = vrot.lane.b32.xlu1 %v16808_v54, %s17311_s23 }
0x2003   :  { %16824 = vrot.lane.b32.xlu0 %v16813_v15, %s17311_s23  ;;  %13686 = vmatmul.mubr.msk.f32.vlgmr.msra.gmra.mrb[122].mxu1 %vm418_vm9, %v17063_v42 }
0x2004   :  { %8289 = vmatprep.mubr.f32.mxu1 %v22944_v58 }
0x2007   :  { %13687 = vmatmul.mubr.msk.f32.gmra.mrb[124].mxu1 %vm418_vm9, %v17064_v57 }
0x2008   :  { %8360 = vmatprep.mubr.f32.mxu1 %v22944_v58 }
0x2070   :  { %v16810_v9 = vpop.permute.xlu1 %16809 }
0x2071   :  { %v16812_v61 = vunpack.i.h.bf16 %v16810_v9  ;;  %v16811_v11 = vunpack.i.l.bf16 %v16810_v9  ;;  %v16815_v49 = vpop.permute.xlu0 %16814 }
0x2072   :  { %v16817_v51 = vunpack.i.h.bf16 %v16815_v49  ;;  %v16816_v53 = vunpack.i.l.bf16 %v16815_v49 }
0x2074   :  { %v8212_v12 = vsel %vm96_vm5, %v16812_v61, %v16817_v51  ;;  %v8214_v63 = vsel %vm96_vm5, %v16817_v51, %v16812_v61  ;;  %v8211_v13 = vsel %vm96_vm5, %v16811_v11, %v16816_v53  ;;  %v8213_v52 = vsel %vm96_vm5, %v16816_v53, %v16811_v11  ;;  %v16820_v62 = vpop.permute.xlu1 %16819 }
0x2075   :  { %v16822_v19 = vunpack.i.h.bf16 %v16820_v62  ;;  %v16821_v45 = vunpack.i.l.bf16 %v16820_v62  ;;  %v16825_v6 = vpop.permute.xlu0 %16824  ;;  %v8216_v7 = vsel %vm17432_vm6, %v20589_v4, %v8213_v52  ;;  %v8218_v54 = vsel %vm17432_vm6, %v20591_v41, %v8214_v63 }
0x2076   :  { %v16827_v15 = vunpack.i.h.bf16 %v16825_v6  ;;  %v16826_v46 = vunpack.i.l.bf16 %v16825_v6  ;;  %v15620_v18 = vpack.c.bf16 %v8218_v54, %v8216_v7  ;;  %v8215_v42 = vsel %vm35_vm1, %v20585_v22, %v8211_v13  ;;  %v17067_v6 = vld [vmem:[%s22743_s1 + $0x50] sm:$0xff]  ;;  %v17068_v7 = vld [vmem:[%s22743_s1 + $0x58] sm:$0xff] }
0x2077   :  { %v8217_v57 = vsel %vm35_vm1, %v20587_v44, %v8212_v12 }
0x2078   :  { %v8196_v9 = vsel %vm83_vm7, %v16822_v19, %v16827_v15  ;;  %v8198_v61 = vsel %vm83_vm7, %v16827_v15, %v16822_v19  ;;  %v8195_v11 = vsel %vm83_vm7, %v16821_v45, %v16826_v46  ;;  %v8197_v49 = vsel %vm83_vm7, %v16826_v46, %v16821_v45  ;;  %15621 = vmatprep.subr.bf16.mxu1 %v15620_v18  ;;  %v17065_v19 = vld [vmem:[%s22743_s1 + $0x70] sm:$0xff]  ;;  %v17066_v45 = vld [vmem:[%s22743_s1 + $0x78] sm:$0xff] }
0x2079   :  { %v15622_v51 = vpack.c.bf16 %v8217_v57, %v8215_v42  ;;  %v8200_v53 = vsel %vm17450_vm8, %v20589_v4, %v8195_v11  ;;  %v8202_v12 = vsel %vm17450_vm8, %v20591_v41, %v8196_v9  ;;  %v8199_v63 = vsel %vm34_vm0, %v20585_v22, %v8197_v49 }
0x207a   :  { %v15624_v13 = vpack.c.bf16 %v8202_v12, %v8200_v53  ;;  %v8201_v52 = vsel %vm34_vm0, %v20587_v44, %v8198_v61 }
0x207b   :  { %15623 = vmatpush1.bf16.msra.mxu1 %v15622_v51  ;;  %v15626_v62 = vpack.c.bf16 %v8201_v52, %v8199_v63 }
0x207c   :  { %15625 = vmatprep.subr.bf16.mxu1 %v15624_v13  ;;  %v17069_v13 = vld [vmem:[%s22743_s1 + $0x80] sm:$0xff] }
0x207e   :  { %13688 = vmatmul.mubr.msk.f32.vlgmr.msra.gmra.mrb[122].mxu1 %vm418_vm9, %v17065_v19 }
0x207f   :  { %15627 = vmatpush1.bf16.msra.mxu1 %v15626_v62  ;;  %8366 = vmatprep.mubr.f32.mxu1 %v22944_v58 }
0x2082   :  { %13689 = vmatmul.mubr.msk.f32.gmra.mrb[124].mxu1 %vm418_vm9, %v17066_v45 }
0x2083   :  { %8437 = vmatprep.mubr.f32.mxu1 %v22944_v58 }
0x2086   :  { %13690 = vmatmul.mubr.msk.f32.vlgmr.msra.gmra.mrb[122].mxu1 %vm418_vm9, %v17067_v6 }
0x2087   :  { %8443 = vmatprep.mubr.f32.mxu1 %v22944_v58 }
0x208a   :  { %13691 = vmatmul.mubr.msk.f32.gmra.mrb[124].mxu1 %vm418_vm9, %v17068_v7 }
0x208b   :  { %8934 = vmatprep.mubr.f32.mxu1 %v22944_v58 }
0x2159   :  { %v8439_v54 = vpop.f32.mrb[122].mxu1 }
0x215a   :  { %v8441_v15 = vpop.f32.mrb[123].mxu1  ;;  %v8454_v46 = vadd.f32 %v8439_v54, %v17627_v32 }
0x215b   :  { %v8455_v18 = vadd.f32 %v8441_v15, %v17627_v32  ;;  %v17070_v32 = vld [vmem:[%s22743_s1 + $0x88] sm:$0xff] }
0x215c   :  { %v8458_v11 = vmax.f32 %v8454_v46, 0.0 }
0x215d   :  { %v8445_v42 = vpop.f32.mrb[124].mxu1  ;;  %v8459_v51 = vmax.f32 %v8455_v18, 0.0 }
0x215e   :  { %v8456_v57 = vadd.f32 %v8445_v42, %v17630_v34  ;;  %v8447_v9 = vpop.f32.mrb[125].mxu1 }
0x215f   :  { %v8457_v61 = vadd.f32 %v8447_v9, %v17630_v34 }
0x2160   :  { %v8460_v49 = vmax.f32 %v8456_v57, 0.0 }
0x2161   :  { %v8461_v53 = vmax.f32 %v8457_v61, 0.0 }
0x2162   :  { %v15630_v12 = vpack.c.bf16 %v8460_v49, %v8458_v11 }
0x2163   :  { %v15628_v63 = vpack.c.bf16 %v8461_v53, %v8459_v51 }
0x2165   :  { %15629 = vmatprep.subr.bf16.mxu0 %v15628_v63 }
0x2166   :  { %15631 = vmatpush1.bf16.msra.mxu0 %v15630_v12 }
0x2169   :  { %13692 = vmatmul.mubr.msk.f32.vlgmr.msra.gmra.mrb[82].mxu0 %vm418_vm9, %v17069_v13 }
0x216a   :  { %8532 = vmatprep.mubr.f32.mxu0 %v22944_v58 }
0x216d   :  { %13693 = vmatmul.mubr.msk.f32.gmra.mrb[84].mxu0 %vm418_vm9, %v17070_v32 }
0x216e   :  { %8643 = vmatprep.mubr.f32.mxu0 %v22944_v58 }
0x223c   :  { %v8528_v34 = vpop.f32.mrb[82].mxu0 }
0x223d   :  { %v8529_v52 = vadd.f32 %v8528_v34, %v17645_v50  ;;  %v8530_v62 = vpop.f32.mrb[83].mxu0 }
0x223e   :  { %v8531_v19 = vadd.f32 %v8530_v62, %v17645_v50 }
0x223f   :  { %v8539_v6 = vadd.f32 %v8529_v52, %v20585_v22 }
0x2240   :  { %v8534_v45 = vpop.f32.mrb[84].mxu0  ;;  %v8540_v15 = vadd.f32 %v8531_v19, %v20589_v4  ;;  %v17073_v4 = vld [vmem:[%s22743_s1 + $0xc0] sm:$0xff] }
0x2241   :  { %v8535_v7 = vadd.f32 %v8534_v45, %v17649_v56  ;;  %v8536_v54 = vpop.f32.mrb[85].mxu0  ;;  %v8543_v57 = vmax.f32 %v8539_v6, 0.0 }
0x2242   :  { %v8537_v46 = vadd.f32 %v8536_v54, %v17649_v56  ;;  %v8544_v61 = vmax.f32 %v8540_v15, 0.0  ;;  %v17071_v56 = vld [vmem:[%s22743_s1 + $0xb0] sm:$0xff] }
0x2243   :  { %v8541_v18 = vadd.f32 %v8535_v7, %v20587_v44  ;;  %v17072_v44 = vld [vmem:[%s22743_s1 + $0xb8] sm:$0xff] }
0x2244   :  { %v8542_v42 = vadd.f32 %v8537_v46, %v20591_v41  ;;  %v17074_v41 = vld [vmem:[%s22743_s1 + $0xc8] sm:$0xff] }
0x2245   :  { %v8545_v9 = vmax.f32 %v8541_v18, 0.0 }
0x2246   :  { %v8546_v11 = vmax.f32 %v8542_v42, 0.0 }
0x2247   :  { %v16828_v49 = vpack.i.bf16 %v8545_v9, %v8543_v57  ;;  %v20700_v22 = vpack.c.bf16 %v8545_v9, %v8543_v57 }
0x2248   :  { %v16833_v50 = vpack.i.bf16 %v8546_v11, %v8544_v61  ;;  %v20697_v51 = vpack.c.bf16 %v8546_v11, %v8544_v61 }
0x2249   :  { %16829 = vrot.lane.b32.xlu1 %v16828_v49, %s17310_s22 }
0x224a   :  { %16834 = vrot.lane.b32.xlu0 %v16833_v50, %s17310_s22  ;;  %15633 = vmatprep.subr.bf16.mxu0 %v20697_v51 }
0x224b   :  { %15635 = vmatpush1.bf16.msra.mxu0 %v20700_v22 }
0x224d   :  { %16839 = vrot.lane.b32.xlu1 %v16828_v49, %s17311_s23 }
0x224e   :  { %16844 = vrot.lane.b32.xlu0 %v16833_v50, %s17311_s23  ;;  %13694 = vmatmul.mubr.msk.f32.vlgmr.msra.gmra.mrb[86].mxu0 %vm418_vm9, %v17071_v56 }
0x224f   :  { %8649 = vmatprep.mubr.f32.mxu0 %v22944_v58 }
0x2252   :  { %13695 = vmatmul.mubr.msk.f32.gmra.mrb[88].mxu0 %vm418_vm9, %v17072_v44 }
0x2253   :  { %8655 = vmatprep.mubr.f32.mxu0 %v22944_v58 }
0x2256   :  { %13696 = vmatmul.mubr.msk.f32.gmra.mrb[90].mxu0 %vm418_vm9, %v17073_v4 }
0x2257   :  { %8661 = vmatprep.mubr.f32.mxu0 %v22944_v58 }
0x225a   :  { %13697 = vmatmul.mubr.msk.f32.gmra.mrb[92].mxu0 %vm418_vm9, %v17074_v41 }
0x225b   :  { %8732 = vmatprep.mubr.f32.mxu0 %v22944_v58 }
0x22bb   :  { %v16830_v53 = vpop.permute.xlu1 %16829 }
0x22bc   :  { %v16832_v12 = vunpack.i.h.bf16 %v16830_v53  ;;  %v16831_v63 = vunpack.i.l.bf16 %v16830_v53  ;;  %v16835_v13 = vpop.permute.xlu0 %16834 }
0x22bd   :  { %v16837_v32 = vunpack.i.h.bf16 %v16835_v13  ;;  %v16836_v34 = vunpack.i.l.bf16 %v16835_v13 }
0x22bf   :  { %v8571_v52 = vsel %vm96_vm5, %v16831_v63, %v16836_v34  ;;  %v8572_v62 = vsel %vm96_vm5, %v16832_v12, %v16837_v32  ;;  %v8573_v19 = vsel %vm96_vm5, %v16836_v34, %v16831_v63  ;;  %v8574_v45 = vsel %vm96_vm5, %v16837_v32, %v16832_v12  ;;  %v16840_v6 = vpop.permute.xlu1 %16839 }
0x22c0   :  { %v16842_v7 = vunpack.i.h.bf16 %v16840_v6  ;;  %v16841_v54 = vunpack.i.l.bf16 %v16840_v6  ;;  %v16845_v15 = vpop.permute.xlu0 %16844  ;;  %v8576_v46 = vsel %vm17432_vm6, %v8544_v61, %v8573_v19  ;;  %v8578_v18 = vsel %vm17432_vm6, %v8546_v11, %v8574_v45  ;;  %v17075_v45 = vld [vmem:[%s22743_s1 + $0xd0] sm:$0xff]  ;;  %v17080_v6 = vld [vmem:[%s22743_s1 + $0x98] sm:$0xff] }
0x22c1   :  { %v16847_v42 = vunpack.i.h.bf16 %v16845_v15  ;;  %v16846_v49 = vunpack.i.l.bf16 %v16845_v15  ;;  %v15636_v50 = vpack.c.bf16 %v8578_v18, %v8576_v46  ;;  %v8575_v56 = vsel %vm35_vm1, %v8543_v57, %v8571_v52 }
0x22c2   :  { %v8577_v44 = vsel %vm35_vm1, %v8545_v9, %v8572_v62 }
0x22c3   :  { %v8555_v4 = vsel %vm83_vm7, %v16841_v54, %v16846_v49  ;;  %v8556_v41 = vsel %vm83_vm7, %v16842_v7, %v16847_v42  ;;  %v8557_v53 = vsel %vm83_vm7, %v16846_v49, %v16841_v54  ;;  %v8558_v12 = vsel %vm83_vm7, %v16847_v42, %v16842_v7  ;;  %15637 = vmatprep.subr.bf16.mxu0 %v15636_v50  ;;  %v17081_v7 = vld [vmem:[%s22743_s1 + $0xa0] sm:$0xff]  ;;  %v17082_v54 = vld [vmem:[%s22743_s1 + $0xa8] sm:$0xff] }
0x22c4   :  { %v15638_v63 = vpack.c.bf16 %v8577_v44, %v8575_v56  ;;  %v8560_v13 = vsel %vm17450_vm8, %v8544_v61, %v8555_v4  ;;  %v8562_v32 = vsel %vm17450_vm8, %v8546_v11, %v8556_v41  ;;  %v8559_v34 = vsel %vm34_vm0, %v8543_v57, %v8557_v53  ;;  %v17076_v57 = vld [vmem:[%s22743_s1 + $0xd8] sm:$0xff]  ;;  %v17078_v61 = vld [vmem:[%s22743_s1 + $0xe8] sm:$0xff]  ;;  %v17079_v11 = vld [vmem:[%s22743_s1 + $0x90] sm:$0xff] }
0x22c5   :  { %v15640_v52 = vpack.c.bf16 %v8562_v32, %v8560_v13  ;;  %v8561_v62 = vsel %vm34_vm0, %v8545_v9, %v8558_v12  ;;  %v17077_v9 = vld [vmem:[%s22743_s1 + $0xe0] sm:$0xff] }
0x22c6   :  { %15639 = vmatpush1.bf16.msra.mxu0 %v15638_v63  ;;  %v15642_v19 = vpack.c.bf16 %v8561_v62, %v8559_v34 }
0x22c7   :  { %15641 = vmatprep.subr.bf16.mxu0 %v15640_v52 }
0x22c9   :  { %13698 = vmatmul.mubr.msk.f32.vlgmr.msra.gmra.mrb[86].mxu0 %vm418_vm9, %v17075_v45 }
0x22ca   :  { %15643 = vmatpush1.bf16.msra.mxu0 %v15642_v19  ;;  %8738 = vmatprep.mubr.f32.mxu0 %v22944_v58 }
0x22cd   :  { %13699 = vmatmul.mubr.msk.f32.gmra.mrb[88].mxu0 %vm418_vm9, %v17076_v57 }
0x22ce   :  { %8744 = vmatprep.mubr.f32.mxu0 %v22944_v58 }
0x22d1   :  { %13700 = vmatmul.mubr.msk.f32.gmra.mrb[90].mxu0 %vm418_vm9, %v17077_v9 }
0x22d2   :  { %8750 = vmatprep.mubr.f32.mxu0 %v22944_v58 }
0x22d5   :  { %13701 = vmatmul.mubr.msk.f32.gmra.mrb[92].mxu0 %vm418_vm9, %v17078_v61 }
0x22d6   :  { %8821 = vmatprep.mubr.f32.mxu0 %v22944_v58 }
0x22d9   :  { %13702 = vmatmul.mubr.msk.f32.vlgmr.msra.gmra.mrb[86].mxu0 %vm418_vm9, %v17079_v11 }
0x22da   :  { %8827 = vmatprep.mubr.f32.mxu0 %v22944_v58 }
0x22dd   :  { %13703 = vmatmul.mubr.msk.f32.gmra.mrb[88].mxu0 %vm418_vm9, %v17080_v6 }
0x22de   :  { %8833 = vmatprep.mubr.f32.mxu0 %v22944_v58 }
0x22e1   :  { %13704 = vmatmul.mubr.msk.f32.gmra.mrb[90].mxu0 %vm418_vm9, %v17081_v7 }
0x22e2   :  { %8839 = vmatprep.mubr.f32.mxu0 %v22944_v58 }
0x22e5   :  { %13705 = vmatmul.mubr.msk.f32.gmra.mrb[92].mxu0 %vm418_vm9, %v17082_v54  ;;  %v17087_v54 = vld [vmem:[%s22743_s1 + $0x110] sm:$0xff] }
0x22e6   :  { %9579 = vmatprep.mubr.f32.mxu0 %v22944_v58 }
0x23ac   :  { %v8823_v15 = vpop.f32.mrb[86].mxu0 }
0x23ad   :  { %v8825_v46 = vpop.f32.mrb[87].mxu0  ;;  %v8854_v18 = vadd.f32 %v8823_v15, %v17819_v36  ;;  %v17088_v15 = vld [vmem:[%s22743_s1 + $0x118] sm:$0xff] }
0x23ae   :  { %v8855_v42 = vadd.f32 %v8825_v46, %v17819_v36  ;;  %v17089_v46 = vld [vmem:[%s22743_s1 + $0x120] sm:$0xff] }
0x23af   :  { %v8862_v4 = vmax.f32 %v8854_v18, 0.0  ;;  %v17090_v18 = vld [vmem:[%s22743_s1 + $0x128] sm:$0xff] }
0x23b0   :  { %v8829_v49 = vpop.f32.mrb[88].mxu0  ;;  %v8863_v53 = vmax.f32 %v8855_v42, 0.0 }
0x23b1   :  { %v8856_v50 = vadd.f32 %v8829_v49, %v17822_v39  ;;  %v8831_v56 = vpop.f32.mrb[89].mxu0 }
0x23b2   :  { %v8857_v44 = vadd.f32 %v8831_v56, %v17822_v39 }
0x23b3   :  { %v8864_v41 = vmax.f32 %v8856_v50, 0.0 }
0x23b4   :  { %v8865_v12 = vmax.f32 %v8857_v44, 0.0  ;;  %v8835_v63 = vpop.f32.mrb[90].mxu0 }
0x23b5   :  { %v15646_v13 = vpack.c.bf16 %v8864_v41, %v8862_v4  ;;  %v8837_v32 = vpop.f32.mrb[91].mxu0  ;;  %v8858_v52 = vadd.f32 %v8835_v63, %v17827_v55 }
0x23b6   :  { %v15644_v34 = vpack.c.bf16 %v8865_v12, %v8863_v53  ;;  %v8859_v62 = vadd.f32 %v8837_v32, %v17827_v55  ;;  %v17083_v55 = vld [vmem:[%s22743_s1 + $0xf0] sm:$0xff] }
0x23b7   :  { %v8866_v57 = vmax.f32 %v8858_v52, 0.0 }
0x23b8   :  { %v8841_v19 = vpop.f32.mrb[92].mxu0  ;;  %15645 = vmatprep.subr.bf16.mxu1 %v15644_v34  ;;  %v8867_v61 = vmax.f32 %v8859_v62, 0.0 }
0x23b9   :  { %v8860_v36 = vadd.f32 %v8841_v19, %v17830_v59  ;;  %v8843_v45 = vpop.f32.mrb[93].mxu0  ;;  %15647 = vmatpush1.bf16.msra.mxu1 %v15646_v13 }
0x23ba   :  { %v8861_v39 = vadd.f32 %v8843_v45, %v17830_v59  ;;  %v17084_v59 = vld [vmem:[%s22743_s1 + $0xf8] sm:$0xff] }
0x23bb   :  { %v8868_v9 = vmax.f32 %v8860_v36, 0.0 }
0x23bc   :  { %v8869_v11 = vmax.f32 %v8861_v39, 0.0 }
0x23bd   :  { %v15650_v6 = vpack.c.bf16 %v8868_v9, %v8866_v57 }
0x23be   :  { %v15648_v7 = vpack.c.bf16 %v8869_v11, %v8867_v61 }
0x23c0   :  { %15649 = vmatprep.subr.bf16.mxu1 %v15648_v7 }
0x23c1   :  { %15651 = vmatpush1.bf16.msra.mxu1 %v15650_v6 }
0x23c2   :  { %15653 = vmatprep.subr.bf16.mxu1 %v20697_v51  ;;  %v17085_v51 = vld [vmem:[%s22743_s1 + $0x100] sm:$0xff] }
0x23c4   :  { %13706 = vmatmul.mubr.msk.f32.vlgmr.msra.gmra.mrb[126].mxu1 %vm1446_vm10, %v17083_v55 }
0x23c5   :  { %15655 = vmatpush1.bf16.msra.mxu1 %v20700_v22  ;;  %8940 = vmatprep.mubr.f32.mxu1 %v22944_v58  ;;  %v17086_v22 = vld [vmem:[%s22743_s1 + $0x108] sm:$0xff] }
0x23c8   :  { %13707 = vmatmul.mubr.msk.f32.gmra.mrb[128].mxu1 %vm1446_vm10, %v17084_v59 }
0x23c9   :  { %8946 = vmatprep.mubr.f32.mxu1 %v22944_v58 }
0x23cc   :  { %13708 = vmatmul.mubr.msk.f32.gmra.mrb[130].mxu1 %vm1446_vm10, %v17085_v51 }
0x23cd   :  { %8952 = vmatprep.mubr.f32.mxu1 %v22944_v58 }
0x23d0   :  { %13709 = vmatmul.mubr.msk.f32.gmra.mrb[132].mxu1 %vm1446_vm10, %v17086_v22  ;;  %v17091_v22 = vld [vmem:[%s22743_s1 + $0x170] sm:$0xff] }
0x23d1   :  { %9023 = vmatprep.mubr.f32.mxu1 %v22944_v58 }
0x23d4   :  { %13710 = vmatmul.mubr.msk.f32.vlgmr.msra.gmra.mrb[126].mxu1 %vm418_vm9, %v17087_v54  ;;  %v17092_v54 = vld [vmem:[%s22743_s1 + $0x178] sm:$0xff] }
0x23d5   :  { %9029 = vmatprep.mubr.f32.mxu1 %v22944_v58 }
0x23d8   :  { %13711 = vmatmul.mubr.msk.f32.gmra.mrb[128].mxu1 %vm418_vm9, %v17088_v15  ;;  %v17093_v15 = vld [vmem:[%s22743_s1 + $0x180] sm:$0xff] }
0x23d9   :  { %9035 = vmatprep.mubr.f32.mxu1 %v22944_v58 }
0x23dc   :  { %13712 = vmatmul.mubr.msk.f32.gmra.mrb[130].mxu1 %vm418_vm9, %v17089_v46  ;;  %v17094_v46 = vld [vmem:[%s22743_s1 + $0x188] sm:$0xff] }
0x23dd   :  { %9041 = vmatprep.mubr.f32.mxu1 %v22944_v58 }
0x23e0   :  { %13713 = vmatmul.mubr.msk.f32.gmra.mrb[132].mxu1 %vm418_vm9, %v17090_v18  ;;  %v17095_v18 = vld [vmem:[%s22743_s1 + $0x190] sm:$0xff] }
0x23e1   :  { %9192 = vmatprep.mubr.f32.mxu1 %v22944_v58 }
0x24a7   :  { %v9025_v42 = vpop.f32.mrb[126].mxu1 }
0x24a8   :  { %v9027_v49 = vpop.f32.mrb[127].mxu1  ;;  %v16109_v50 = vadd.f32 %v17877_v33, %v9025_v42  ;;  %v17096_v42 = vld [vmem:[%s22743_s1 + $0x198] sm:$0xff] }
0x24a9   :  { %v16111_v56 = vadd.f32 %v17877_v33, %v9027_v49  ;;  %v17097_v49 = vld [vmem:[%s22743_s1 + $0x1a0] sm:$0xff] }
0x24aa   :  { %v20853_v12 = vmax.f32 %v16109_v50, 0.0  ;;  %v17098_v50 = vld [vmem:[%s22743_s1 + $0x1a8] sm:$0xff] }
0x24ab   :  { %v9031_v44 = vpop.f32.mrb[128].mxu1  ;;  %v20857_v13 = vmax.f32 %v16111_v56, 0.0 }
0x24ac   :  { %v16113_v4 = vadd.f32 %v17879_v40, %v9031_v44  ;;  %v9033_v41 = vpop.f32.mrb[129].mxu1 }
0x24ad   :  { %v16115_v53 = vadd.f32 %v17879_v40, %v9033_v41 }
0x24ae   :  { %v20855_v63 = vmax.f32 %v16113_v4, 0.0 }
0x24af   :  { %v20859_v32 = vmax.f32 %v16115_v53, 0.0  ;;  %v9037_v34 = vpop.f32.mrb[130].mxu1 }
0x24b0   :  { %v9039_v52 = vpop.f32.mrb[131].mxu1  ;;  %v16848_v62 = vpack.i.bf16 %v20855_v63, %v20853_v12  ;;  %v16117_v40 = vadd.f32 %v17893_v60, %v9037_v34  ;;  %v20873_v36 = vpack.c.bf16 %v20855_v63, %v20853_v12 }
0x24b1   :  { %v16853_v33 = vpack.i.bf16 %v20859_v32, %v20857_v13  ;;  %v20867_v19 = vpack.c.bf16 %v20859_v32, %v20857_v13  ;;  %v16119_v45 = vadd.f32 %v17893_v60, %v9039_v52 }
0x24b2   :  { %16849 = vrot.lane.b32.xlu1 %v16848_v62, %s17310_s22  ;;  %v20881_v11 = vmax.f32 %v16117_v40, 0.0 }
0x24b3   :  { %16854 = vrot.lane.b32.xlu0 %v16853_v33, %s17310_s22  ;;  %v9043_v39 = vpop.f32.mrb[132].mxu1  ;;  %15657 = vmatprep.subr.bf16.mxu1 %v20867_v19  ;;  %v20885_v7 = vmax.f32 %v16119_v45, 0.0 }
0x24b4   :  { %v16121_v57 = vadd.f32 %v17903_v25, %v9043_v39  ;;  %v9045_v9 = vpop.f32.mrb[133].mxu1  ;;  %15659 = vmatpush1.bf16.msra.mxu1 %v20873_v36 }
0x24b5   :  { %v16123_v61 = vadd.f32 %v17903_v25, %v9045_v9 }
0x24b6   :  { %v20883_v6 = vmax.f32 %v16121_v57, 0.0 }
0x24b7   :  { %v20887_v55 = vmax.f32 %v16123_v61, 0.0 }
0x24b8   :  { %v16858_v60 = vpack.i.bf16 %v20883_v6, %v20881_v11  ;;  %v20900_v25 = vpack.c.bf16 %v20883_v6, %v20881_v11 }
0x24b9   :  { %v16863_v59 = vpack.i.bf16 %v20887_v55, %v20885_v7  ;;  %v20895_v51 = vpack.c.bf16 %v20887_v55, %v20885_v7 }
0x24ba   :  { %16859 = vrot.lane.b32.xlu1 %v16858_v60, %s17310_s22 }
0x24bb   :  { %16864 = vrot.lane.b32.xlu0 %v16863_v59, %s17310_s22  ;;  %15661 = vmatprep.subr.bf16.mxu1 %v20895_v51 }
0x24bc   :  { %15663 = vmatpush1.bf16.msra.mxu1 %v20900_v25 }
0x24be   :  { %16869 = vrot.lane.b32.xlu1 %v16848_v62, %s17311_s23 }
0x24bf   :  { %16874 = vrot.lane.b32.xlu0 %v16853_v33, %s17311_s23  ;;  %13714 = vmatmul.mubr.msk.f32.vlgmr.msra.gmra.mrb[134].mxu1 %vm1446_vm10, %v17091_v22 }
0x24c0   :  { %9198 = vmatprep.mubr.f32.mxu1 %v22944_v58 }
0x24c2   :  { %16879 = vrot.lane.b32.xlu1 %v16858_v60, %s17311_s23 }
0x24c3   :  { %16884 = vrot.lane.b32.xlu0 %v16863_v59, %s17311_s23  ;;  %13715 = vmatmul.mubr.msk.f32.gmra.mrb[136].mxu1 %vm1446_vm10, %v17092_v54 }
0x24c4   :  { %9204 = vmatprep.mubr.f32.mxu1 %v22944_v58 }
0x24c7   :  { %13716 = vmatmul.mubr.msk.f32.gmra.mrb[138].mxu1 %vm1446_vm10, %v17093_v15 }
0x24c8   :  { %9210 = vmatprep.mubr.f32.mxu1 %v22944_v58 }
0x24cb   :  { %13717 = vmatmul.mubr.msk.f32.gmra.mrb[140].mxu1 %vm1446_vm10, %v17094_v46 }
0x24cc   :  { %9216 = vmatprep.mubr.f32.mxu1 %v22944_v58 }
0x24cf   :  { %13718 = vmatmul.mubr.msk.f32.gmra.mrb[142].mxu1 %vm1446_vm10, %v17095_v18 }
0x24d0   :  { %9222 = vmatprep.mubr.f32.mxu1 %v22944_v58 }
0x24d3   :  { %13719 = vmatmul.mubr.msk.f32.gmra.mrb[144].mxu1 %vm1446_vm10, %v17096_v42 }
0x24d4   :  { %9228 = vmatprep.mubr.f32.mxu1 %v22944_v58 }
0x24d7   :  { %13720 = vmatmul.mubr.msk.f32.gmra.mrb[146].mxu1 %vm1446_vm10, %v17097_v49 }
0x24d8   :  { %9234 = vmatprep.mubr.f32.mxu1 %v22944_v58 }
0x24db   :  { %13721 = vmatmul.mubr.msk.f32.gmra.mrb[148].mxu1 %vm1446_vm10, %v17098_v50 }
0x24dc   :  { %9305 = vmatprep.mubr.f32.mxu1 %v22944_v58 }
0x2524   :  { %v16850_v56 = vpop.permute.xlu1 %16849 }
0x2525   :  { %v16852_v44 = vunpack.i.h.bf16 %v16850_v56  ;;  %v16851_v4 = vunpack.i.l.bf16 %v16850_v56  ;;  %v16855_v41 = vpop.permute.xlu0 %16854 }
0x2526   :  { %v16857_v53 = vunpack.i.h.bf16 %v16855_v41  ;;  %v16856_v34 = vunpack.i.l.bf16 %v16855_v41 }
0x2528   :  { %v9113_v52 = vsel %vm96_vm5, %v16852_v44, %v16857_v53  ;;  %v9117_v62 = vsel %vm96_vm5, %v16857_v53, %v16852_v44  ;;  %v9112_v33 = vsel %vm96_vm5, %v16851_v4, %v16856_v34  ;;  %v9116_v40 = vsel %vm96_vm5, %v16856_v34, %v16851_v4 }
0x2529   :  { %v9121_v45 = vsel %vm17432_vm6, %v20857_v13, %v9116_v40  ;;  %v9123_v39 = vsel %vm17432_vm6, %v20859_v32, %v9117_v62  ;;  %v9120_v57 = vsel %vm35_vm1, %v20853_v12, %v9112_v33  ;;  %v9122_v9 = vsel %vm35_vm1, %v20855_v63, %v9113_v52 }
0x252a   :  { %v15664_v61 = vpack.c.bf16 %v9123_v39, %v9121_v45  ;;  %v15666_v60 = vpack.c.bf16 %v9122_v9, %v9120_v57 }
0x252c   :  { %v16860_v59 = vpop.permute.xlu1 %16859  ;;  %15665 = vmatprep.subr.bf16.mxu1 %v15664_v61 }
0x252d   :  { %v16862_v22 = vunpack.i.h.bf16 %v16860_v59  ;;  %v16861_v54 = vunpack.i.l.bf16 %v16860_v59  ;;  %v16865_v15 = vpop.permute.xlu0 %16864  ;;  %15667 = vmatpush1.bf16.msra.mxu1 %v15666_v60 }
0x252e   :  { %v16867_v46 = vunpack.i.h.bf16 %v16865_v15  ;;  %v16866_v18 = vunpack.i.l.bf16 %v16865_v15 }
0x2530   :  { %v9115_v42 = vsel %vm96_vm5, %v16862_v22, %v16867_v46  ;;  %v9119_v49 = vsel %vm96_vm5, %v16867_v46, %v16862_v22  ;;  %v9114_v50 = vsel %vm96_vm5, %v16861_v54, %v16866_v18  ;;  %v9118_v56 = vsel %vm96_vm5, %v16866_v18, %v16861_v54  ;;  %v16870_v44 = vpop.permute.xlu1 %16869 }
0x2531   :  { %v16872_v4 = vunpack.i.h.bf16 %v16870_v44  ;;  %v16871_v41 = vunpack.i.l.bf16 %v16870_v44  ;;  %v16875_v53 = vpop.permute.xlu0 %16874  ;;  %v9125_v34 = vsel %vm17432_vm6, %v20885_v7, %v9118_v56  ;;  %v9127_v52 = vsel %vm17432_vm6, %v20887_v55, %v9119_v49 }
0x2532   :  { %v16877_v62 = vunpack.i.h.bf16 %v16875_v53  ;;  %v16876_v33 = vunpack.i.l.bf16 %v16875_v53  ;;  %v15668_v40 = vpack.c.bf16 %v9127_v52, %v9125_v34  ;;  %v9124_v45 = vsel %vm35_vm1, %v20881_v11, %v9114_v50 }
0x2533   :  { %v9126_v39 = vsel %vm35_vm1, %v20883_v6, %v9115_v42 }
0x2534   :  { %v9081_v57 = vsel %vm83_vm7, %v16872_v4, %v16877_v62  ;;  %v9085_v9 = vsel %vm83_vm7, %v16877_v62, %v16872_v4  ;;  %v9080_v61 = vsel %vm83_vm7, %v16871_v41, %v16876_v33  ;;  %v9084_v60 = vsel %vm83_vm7, %v16876_v33, %v16871_v41  ;;  %v16880_v59 = vpop.permute.xlu1 %16879  ;;  %15669 = vmatprep.subr.bf16.mxu1 %v15668_v40  ;;  %v17099_v62 = vld [vmem:[%s22743_s1 + $0x1b0] sm:$0xff] }
0x2535   :  { %v16882_v22 = vunpack.i.h.bf16 %v16880_v59  ;;  %v16881_v54 = vunpack.i.l.bf16 %v16880_v59  ;;  %v16885_v15 = vpop.permute.xlu0 %16884  ;;  %v15670_v46 = vpack.c.bf16 %v9126_v39, %v9124_v45  ;;  %v9089_v18 = vsel %vm17450_vm8, %v20857_v13, %v9080_v61  ;;  %v17103_v45 = vld [vmem:[%s22743_s1 + $0x1d0] sm:$0xff]  ;;  %v17104_v39 = vld [vmem:[%s22743_s1 + $0x1d8] sm:$0xff]  ;;  %v17109_v59 = vld [vmem:[%s22743_s1 + $0x140] sm:$0xff] }
0x2536   :  { %v16887_v42 = vunpack.i.h.bf16 %v16885_v15  ;;  %v16886_v49 = vunpack.i.l.bf16 %v16885_v15  ;;  %v9091_v50 = vsel %vm17450_vm8, %v20859_v32, %v9081_v57  ;;  %v9088_v56 = vsel %vm34_vm0, %v20853_v12, %v9084_v60  ;;  %v17105_v57 = vld [vmem:[%s22743_s1 + $0x1e0] sm:$0xff]  ;;  %v17107_v61 = vld [vmem:[%s22743_s1 + $0x130] sm:$0xff]  ;;  %v17108_v60 = vld [vmem:[%s22743_s1 + $0x138] sm:$0xff] }
0x2537   :  { %15671 = vmatpush1.bf16.msra.mxu1 %v15670_v46  ;;  %v15672_v44 = vpack.c.bf16 %v9091_v50, %v9089_v18  ;;  %v9090_v4 = vsel %vm34_vm0, %v20855_v63, %v9085_v9  ;;  %v17106_v9 = vld [vmem:[%s22743_s1 + $0x1e8] sm:$0xff]  ;;  %v17112_v15 = vld [vmem:[%s22743_s1 + $0x158] sm:$0xff]  ;;  %v17113_v46 = vld [vmem:[%s22743_s1 + $0x160] sm:$0xff] }
0x2538   :  { %v9083_v41 = vsel %vm83_vm7, %v16882_v22, %v16887_v42  ;;  %v9087_v13 = vsel %vm83_vm7, %v16887_v42, %v16882_v22  ;;  %v9082_v53 = vsel %vm83_vm7, %v16881_v54, %v16886_v49  ;;  %v9086_v32 = vsel %vm83_vm7, %v16886_v49, %v16881_v54  ;;  %v17110_v22 = vld [vmem:[%s22743_s1 + $0x148] sm:$0xff]  ;;  %v17111_v54 = vld [vmem:[%s22743_s1 + $0x150] sm:$0xff] }
0x2539   :  { %15673 = vmatprep.subr.bf16.mxu1 %v15672_v44  ;;  %v15674_v12 = vpack.c.bf16 %v9090_v4, %v9088_v56  ;;  %v9093_v34 = vsel %vm17450_vm8, %v20885_v7, %v9082_v53  ;;  %v9095_v63 = vsel %vm17450_vm8, %v20887_v55, %v9083_v41  ;;  %v9092_v52 = vsel %vm34_vm0, %v20881_v11, %v9086_v32  ;;  %v17100_v11 = vld [vmem:[%s22743_s1 + $0x1b8] sm:$0xff]  ;;  %v17101_v55 = vld [vmem:[%s22743_s1 + $0x1c0] sm:$0xff]  ;;  %v17114_v18 = vld [vmem:[%s22743_s1 + $0x168] sm:$0xff] }
0x253a   :  { %13722 = vmatmul.mubr.msk.f32.vlgmr.msra.gmra.mrb[134].mxu1 %vm1446_vm10, %v17099_v62  ;;  %v15676_v33 = vpack.c.bf16 %v9095_v63, %v9093_v34  ;;  %v9094_v40 = vsel %vm34_vm0, %v20883_v6, %v9087_v13  ;;  %v17102_v6 = vld [vmem:[%s22743_s1 + $0x1c8] sm:$0xff] }
0x253b   :  { %15675 = vmatpush1.bf16.msra.mxu1 %v15674_v12  ;;  %9311 = vmatprep.mubr.f32.mxu1 %v22944_v58  ;;  %v15678_v7 = vpack.c.bf16 %v9094_v40, %v9092_v52  ;;  %v23055_v40 = vld [vmem:[#allocation2_spill] sm:$0xff] }
0x253c   :  { %15677 = vmatprep.subr.bf16.mxu1 %v15676_v33 }
0x253e   :  { %13723 = vmatmul.mubr.msk.f32.gmra.mrb[136].mxu1 %vm1446_vm10, %v17100_v11 }
0x253f   :  { %15679 = vmatpush1.bf16.msra.mxu1 %v15678_v7  ;;  %9317 = vmatprep.mubr.f32.mxu1 %v22944_v58 }
0x2542   :  { %13724 = vmatmul.mubr.msk.f32.gmra.mrb[138].mxu1 %vm1446_vm10, %v17101_v55 }
0x2543   :  { %9323 = vmatprep.mubr.f32.mxu1 %v22944_v58 }
0x2546   :  { %13725 = vmatmul.mubr.msk.f32.gmra.mrb[140].mxu1 %vm1446_vm10, %v17102_v6 }
0x2547   :  { %9329 = vmatprep.mubr.f32.mxu1 %v22944_v58 }
0x254a   :  { %13726 = vmatmul.mubr.msk.f32.gmra.mrb[142].mxu1 %vm1446_vm10, %v17103_v45 }
0x254b   :  { %9335 = vmatprep.mubr.f32.mxu1 %v22944_v58 }
0x254e   :  { %13727 = vmatmul.mubr.msk.f32.gmra.mrb[144].mxu1 %vm1446_vm10, %v17104_v39 }
0x254f   :  { %9341 = vmatprep.mubr.f32.mxu1 %v22944_v58 }
0x2552   :  { %13728 = vmatmul.mubr.msk.f32.gmra.mrb[146].mxu1 %vm1446_vm10, %v17105_v57 }
0x2553   :  { %9347 = vmatprep.mubr.f32.mxu1 %v22944_v58 }
0x2556   :  { %13729 = vmatmul.mubr.msk.f32.gmra.mrb[148].mxu1 %vm1446_vm10, %v17106_v9 }
0x2557   :  { %9418 = vmatprep.mubr.f32.mxu1 %v22944_v58 }
0x255a   :  { %13730 = vmatmul.mubr.msk.f32.vlgmr.msra.gmra.mrb[134].mxu1 %vm1446_vm10, %v17107_v61 }
0x255b   :  { %9424 = vmatprep.mubr.f32.mxu1 %v22944_v58 }
0x255e   :  { %13731 = vmatmul.mubr.msk.f32.gmra.mrb[136].mxu1 %vm1446_vm10, %v17108_v60 }
0x255f   :  { %9430 = vmatprep.mubr.f32.mxu1 %v22944_v58 }
0x2562   :  { %13732 = vmatmul.mubr.msk.f32.gmra.mrb[138].mxu1 %vm1446_vm10, %v17109_v59 }
0x2563   :  { %9436 = vmatprep.mubr.f32.mxu1 %v22944_v58 }
0x2566   :  { %13733 = vmatmul.mubr.msk.f32.gmra.mrb[140].mxu1 %vm1446_vm10, %v17110_v22 }
0x2567   :  { %9442 = vmatprep.mubr.f32.mxu1 %v22944_v58 }
0x256a   :  { %13734 = vmatmul.mubr.msk.f32.gmra.mrb[142].mxu1 %vm1446_vm10, %v17111_v54 }
0x256b   :  { %9448 = vmatprep.mubr.f32.mxu1 %v22944_v58 }
0x256e   :  { %13735 = vmatmul.mubr.msk.f32.gmra.mrb[144].mxu1 %vm1446_vm10, %v17112_v15  ;;  %v23057_v15 = vld [vmem:[#allocation4_spill] sm:$0xff] }
0x256f   :  { %9454 = vmatprep.mubr.f32.mxu1 %v22944_v58 }
0x2572   :  { %13736 = vmatmul.mubr.msk.f32.gmra.mrb[146].mxu1 %vm1446_vm10, %v17113_v46 }
0x2573   :  { %9460 = vmatprep.mubr.f32.mxu1 %v22944_v58 }
0x2576   :  { %13737 = vmatmul.mubr.msk.f32.gmra.mrb[148].mxu1 %vm1446_vm10, %v17114_v18 }
0x2577   :  { %10352 = vmatprep.mubr.f32.mxu1 %v22944_v58 }
0x262d   :  { %v9420_v42 = vpop.f32.mrb[134].mxu1 }
0x262e   :  { %v9422_v49 = vpop.f32.mrb[135].mxu1  ;;  %v9483_v50 = vadd.f32 %v9420_v42, %v18217_v30 }
0x262f   :  { %v9484_v56 = vadd.f32 %v9422_v49, %v18217_v30  ;;  %v23056_v30 = vld [vmem:[#allocation3_spill] sm:$0xff]  ;;  %v23058_v49 = vld [vmem:[#allocation5_spill] sm:$0xff] }
0x2630   :  { %v9499_v53 = vmax.f32 %v9483_v50, 0.0 }
0x2631   :  { %v9426_v44 = vpop.f32.mrb[136].mxu1  ;;  %v9500_v12 = vmax.f32 %v9484_v56, 0.0 }
0x2632   :  { %v9485_v4 = vadd.f32 %v9426_v44, %v18220_v35  ;;  %v9428_v41 = vpop.f32.mrb[137].mxu1 }
0x2633   :  { %v9486_v13 = vadd.f32 %v9428_v41, %v18220_v35 }
0x2634   :  { %v9501_v32 = vmax.f32 %v9485_v4, 0.0 }
0x2635   :  { %v9502_v34 = vmax.f32 %v9486_v13, 0.0  ;;  %v9432_v63 = vpop.f32.mrb[138].mxu1 }
0x2636   :  { %v15682_v52 = vpack.c.bf16 %v9501_v32, %v9499_v53  ;;  %v9434_v62 = vpop.f32.mrb[139].mxu1  ;;  %v9487_v7 = vadd.f32 %v9432_v63, %v23055_v40 }
0x2637   :  { %v15680_v33 = vpack.c.bf16 %v9502_v34, %v9500_v12  ;;  %v9488_v11 = vadd.f32 %v9434_v62, %v23055_v40 }
0x2638   :  { %v9503_v39 = vmax.f32 %v9487_v7, 0.0  ;;  %v23060_v7 = vld [vmem:[#allocation7_spill] sm:$0xff] }
0x2639   :  { %v9438_v55 = vpop.f32.mrb[140].mxu1  ;;  %15681 = vmatprep.subr.bf16.mxu0 %v15680_v33  ;;  %v9504_v9 = vmax.f32 %v9488_v11, 0.0 }
0x263a   :  { %v9489_v6 = vadd.f32 %v9438_v55, %v23056_v30  ;;  %v9440_v45 = vpop.f32.mrb[141].mxu1  ;;  %15683 = vmatpush1.bf16.msra.mxu0 %v15682_v52  ;;  %v23059_v52 = vld [vmem:[#allocation6_spill] sm:$0xff] }
0x263b   :  { %v9490_v35 = vadd.f32 %v9440_v45, %v23056_v30 }
0x263c   :  { %v9505_v57 = vmax.f32 %v9489_v6, 0.0 }
0x263d   :  { %v9506_v61 = vmax.f32 %v9490_v35, 0.0  ;;  %v9444_v60 = vpop.f32.mrb[142].mxu1 }
0x263e   :  { %v15686_v59 = vpack.c.bf16 %v9505_v57, %v9503_v39  ;;  %v9446_v22 = vpop.f32.mrb[143].mxu1  ;;  %v9491_v46 = vadd.f32 %v9444_v60, %v23057_v15  ;;  %v17116_v60 = vld [vmem:[%s22743_s1 + $0x1f8] sm:$0xff] }
0x263f   :  { %v15684_v54 = vpack.c.bf16 %v9506_v61, %v9504_v9  ;;  %v9492_v18 = vadd.f32 %v9446_v22, %v23057_v15  ;;  %v17115_v61 = vld [vmem:[%s22743_s1 + $0x1f0] sm:$0xff]  ;;  %v17122_v22 = vld [vmem:[%s22743_s1 + $0x228] sm:$0xff]  ;;  %v17124_v15 = vld [vmem:[%s22743_s1 + $0x238] sm:$0xff] }
0x2640   :  { %v9507_v4 = vmax.f32 %v9491_v46, 0.0  ;;  %v17125_v46 = vld [vmem:[%s22743_s1 + $0x240] sm:$0xff] }
0x2641   :  { %v9450_v42 = vpop.f32.mrb[144].mxu1  ;;  %15685 = vmatprep.subr.bf16.mxu0 %v15684_v54  ;;  %v9508_v13 = vmax.f32 %v9492_v18, 0.0  ;;  %v17123_v54 = vld [vmem:[%s22743_s1 + $0x230] sm:$0xff]  ;;  %v17126_v18 = vld [vmem:[%s22743_s1 + $0x248] sm:$0xff] }
0x2642   :  { %v9493_v50 = vadd.f32 %v9450_v42, %v23058_v49  ;;  %v9452_v56 = vpop.f32.mrb[145].mxu1  ;;  %15687 = vmatpush1.bf16.msra.mxu0 %v15686_v59  ;;  %v17121_v59 = vld [vmem:[%s22743_s1 + $0x220] sm:$0xff]  ;;  %v17127_v42 = vld [vmem:[%s22743_s1 + $0x250] sm:$0xff] }
0x2643   :  { %v9494_v44 = vadd.f32 %v9452_v56, %v23058_v49  ;;  %v17128_v49 = vld [vmem:[%s22743_s1 + $0x258] sm:$0xff]  ;;  %v17130_v56 = vld [vmem:[%s22743_s1 + $0x268] sm:$0xff] }
0x2644   :  { %v9509_v41 = vmax.f32 %v9493_v50, 0.0  ;;  %v17129_v50 = vld [vmem:[%s22743_s1 + $0x260] sm:$0xff] }
0x2645   :  { %v9510_v53 = vmax.f32 %v9494_v44, 0.0  ;;  %v9456_v32 = vpop.f32.mrb[146].mxu1 }
0x2646   :  { %v15690_v12 = vpack.c.bf16 %v9509_v41, %v9507_v4  ;;  %v9458_v34 = vpop.f32.mrb[147].mxu1  ;;  %v9495_v62 = vadd.f32 %v9456_v32, %v23059_v52  ;;  %v23061_v41 = vld [vmem:[#allocation8_spill] sm:$0xff] }
0x2647   :  { %v15688_v63 = vpack.c.bf16 %v9510_v53, %v9508_v13  ;;  %v9496_v33 = vadd.f32 %v9458_v34, %v23059_v52 }
0x2648   :  { %v9511_v6 = vmax.f32 %v9495_v62, 0.0 }
0x2649   :  { %v9462_v40 = vpop.f32.mrb[148].mxu1  ;;  %15689 = vmatprep.subr.bf16.mxu0 %v15688_v63  ;;  %v9512_v35 = vmax.f32 %v9496_v33, 0.0 }
0x264a   :  { %v9497_v11 = vadd.f32 %v9462_v40, %v23060_v7  ;;  %v9464_v55 = vpop.f32.mrb[149].mxu1  ;;  %15691 = vmatpush1.bf16.msra.mxu0 %v15690_v12  ;;  %v23062_v12 = vld [vmem:[#allocation9_spill] sm:$0xff] }
0x264b   :  { %v9498_v30 = vadd.f32 %v9464_v55, %v23060_v7 }
0x264c   :  { %v9513_v45 = vmax.f32 %v9497_v11, 0.0 }
0x264d   :  { %v9514_v39 = vmax.f32 %v9498_v30, 0.0 }
0x264e   :  { %v15694_v57 = vpack.c.bf16 %v9513_v45, %v9511_v6 }
0x264f   :  { %v15692_v9 = vpack.c.bf16 %v9514_v39, %v9512_v35  ;;  %v23063_v35 = vld [vmem:[#allocation10_spill] sm:$0xff] }
0x2651   :  { %15693 = vmatprep.subr.bf16.mxu0 %v15692_v9 }
0x2652   :  { %15695 = vmatpush1.bf16.msra.mxu0 %v15694_v57 }
0x2653   :  { %15697 = vmatprep.subr.bf16.mxu0 %v20867_v19  ;;  %v17117_v19 = vld [vmem:[%s22743_s1 + $0x200] sm:$0xff] }
0x2655   :  { %13738 = vmatmul.mubr.msk.f32.vlgmr.msra.gmra.mrb[94].mxu0 %vm2344_vm11, %v17115_v61 }
0x2656   :  { %15699 = vmatpush1.bf16.msra.mxu0 %v20873_v36  ;;  %9585 = vmatprep.mubr.f32.mxu0 %v22944_v58  ;;  %v17118_v36 = vld [vmem:[%s22743_s1 + $0x208] sm:$0xff] }
0x2657   :  { %15701 = vmatprep.subr.bf16.mxu0 %v20895_v51  ;;  %v17119_v51 = vld [vmem:[%s22743_s1 + $0x210] sm:$0xff] }
0x2659   :  { %13739 = vmatmul.mubr.msk.f32.gmra.mrb[96].mxu0 %vm2344_vm11, %v17116_v60  ;;  %v23064_v60 = vld [vmem:[#allocation11_spill] sm:$0xff] }
0x265a   :  { %15703 = vmatpush1.bf16.msra.mxu0 %v20900_v25  ;;  %9591 = vmatprep.mubr.f32.mxu0 %v22944_v58  ;;  %v17120_v25 = vld [vmem:[%s22743_s1 + $0x218] sm:$0xff] }
0x265d   :  { %13740 = vmatmul.mubr.msk.f32.gmra.mrb[98].mxu0 %vm2344_vm11, %v17117_v19 }
0x265e   :  { %9597 = vmatprep.mubr.f32.mxu0 %v22944_v58 }
0x2661   :  { %13741 = vmatmul.mubr.msk.f32.gmra.mrb[100].mxu0 %vm2344_vm11, %v17118_v36 }
0x2662   :  { %9603 = vmatprep.mubr.f32.mxu0 %v22944_v58 }
0x2665   :  { %13742 = vmatmul.mubr.msk.f32.gmra.mrb[102].mxu0 %vm2344_vm11, %v17119_v51 }
0x2666   :  { %9609 = vmatprep.mubr.f32.mxu0 %v22944_v58 }
0x2669   :  { %13743 = vmatmul.mubr.msk.f32.gmra.mrb[104].mxu0 %vm2344_vm11, %v17120_v25 }
0x266a   :  { %9615 = vmatprep.mubr.f32.mxu0 %v22944_v58 }
0x266d   :  { %13744 = vmatmul.mubr.msk.f32.gmra.mrb[106].mxu0 %vm2344_vm11, %v17121_v59 }
0x266e   :  { %9621 = vmatprep.mubr.f32.mxu0 %v22944_v58 }
0x2671   :  { %13745 = vmatmul.mubr.msk.f32.gmra.mrb[108].mxu0 %vm2344_vm11, %v17122_v22 }
0x2672   :  { %9692 = vmatprep.mubr.f32.mxu0 %v22944_v58 }
0x2675   :  { %13746 = vmatmul.mubr.msk.f32.vlgmr.msra.gmra.mrb[94].mxu0 %vm1446_vm10, %v17123_v54 }
0x2676   :  { %9698 = vmatprep.mubr.f32.mxu0 %v22944_v58 }
0x2679   :  { %13747 = vmatmul.mubr.msk.f32.gmra.mrb[96].mxu0 %vm1446_vm10, %v17124_v15 }
0x267a   :  { %9704 = vmatprep.mubr.f32.mxu0 %v22944_v58 }
0x267d   :  { %13748 = vmatmul.mubr.msk.f32.gmra.mrb[98].mxu0 %vm1446_vm10, %v17125_v46 }
0x267e   :  { %9710 = vmatprep.mubr.f32.mxu0 %v22944_v58 }
0x2681   :  { %13749 = vmatmul.mubr.msk.f32.gmra.mrb[100].mxu0 %vm1446_vm10, %v17126_v18 }
0x2682   :  { %9716 = vmatprep.mubr.f32.mxu0 %v22944_v58 }
0x2685   :  { %13750 = vmatmul.mubr.msk.f32.gmra.mrb[102].mxu0 %vm1446_vm10, %v17127_v42 }
0x2686   :  { %9722 = vmatprep.mubr.f32.mxu0 %v22944_v58 }
0x2689   :  { %13751 = vmatmul.mubr.msk.f32.gmra.mrb[104].mxu0 %vm1446_vm10, %v17128_v49 }
0x268a   :  { %9728 = vmatprep.mubr.f32.mxu0 %v22944_v58 }
0x268d   :  { %13752 = vmatmul.mubr.msk.f32.gmra.mrb[106].mxu0 %vm1446_vm10, %v17129_v50  ;;  %v23065_v50 = vld [vmem:[#allocation12_spill] sm:$0xff] }
0x268e   :  { %9734 = vmatprep.mubr.f32.mxu0 %v22944_v58 }
0x2691   :  { %13753 = vmatmul.mubr.msk.f32.gmra.mrb[108].mxu0 %vm1446_vm10, %v17130_v56 }
0x2692   :  { %9965 = vmatprep.mubr.f32.mxu0 %v22944_v58 }
0x2748   :  { %v9694_v44 = vpop.f32.mrb[94].mxu0 }
0x2749   :  { %v9696_v4 = vpop.f32.mrb[95].mxu0  ;;  %v16125_v13 = vadd.f32 %v23061_v41, %v9694_v44 }
0x274a   :  { %v16127_v53 = vadd.f32 %v23061_v41, %v9696_v4 }
0x274b   :  { %v21213_v62 = vmax.f32 %v16125_v13, 0.0  ;;  %v23066_v13 = vld [vmem:[#allocation13_spill] sm:$0xff] }
0x274c   :  { %v9700_v32 = vpop.f32.mrb[96].mxu0  ;;  %v21217_v40 = vmax.f32 %v16127_v53, 0.0 }
0x274d   :  { %v16129_v34 = vadd.f32 %v23062_v12, %v9700_v32  ;;  %v9702_v63 = vpop.f32.mrb[97].mxu0 }
0x274e   :  { %v16131_v52 = vadd.f32 %v23062_v12, %v9702_v63 }
0x274f   :  { %v21215_v33 = vmax.f32 %v16129_v34, 0.0 }
0x2750   :  { %v21219_v7 = vmax.f32 %v16131_v52, 0.0  ;;  %v9706_v11 = vpop.f32.mrb[98].mxu0 }
0x2751   :  { %v9708_v55 = vpop.f32.mrb[99].mxu0  ;;  %v21223_v30 = vpack.i.bf16 %v21215_v33, %v21213_v62  ;;  %v16133_v39 = vadd.f32 %v23063_v35, %v9706_v11  ;;  %v15706_v57 = vpack.c.bf16 %v21215_v33, %v21213_v62 }
0x2752   :  { %v21227_v6 = vpack.i.bf16 %v21219_v7, %v21217_v40  ;;  %v15704_v45 = vpack.c.bf16 %v21219_v7, %v21217_v40  ;;  %v16135_v9 = vadd.f32 %v23063_v35, %v9708_v55 }
0x2753   :  { %16889 = vrot.lane.b32.xlu1 %v21223_v30, %s17310_s22  ;;  %v21241_v25 = vmax.f32 %v16133_v39, 0.0 }
0x2754   :  { %16894 = vrot.lane.b32.xlu0 %v21227_v6, %s17310_s22  ;;  %v9712_v61 = vpop.f32.mrb[100].mxu0  ;;  %15705 = vmatprep.subr.bf16.mxu0 %v15704_v45  ;;  %v21245_v22 = vmax.f32 %v16135_v9, 0.0  ;;  %v23067_v9 = vld [vmem:[#allocation14_spill] sm:$0xff] }
0x2755   :  { %v16137_v19 = vadd.f32 %v23064_v60, %v9712_v61  ;;  %v9714_v36 = vpop.f32.mrb[101].mxu0  ;;  %15707 = vmatpush1.bf16.msra.mxu0 %v15706_v57 }
0x2756   :  { %v16139_v51 = vadd.f32 %v23064_v60, %v9714_v36 }
0x2757   :  { %v21243_v59 = vmax.f32 %v16137_v19, 0.0 }
0x2758   :  { %v21247_v54 = vmax.f32 %v16139_v51, 0.0  ;;  %v9718_v15 = vpop.f32.mrb[102].mxu0  ;;  %v23068_v51 = vld [vmem:[#allocation15_spill] sm:$0xff] }
0x2759   :  { %v9720_v46 = vpop.f32.mrb[103].mxu0  ;;  %v16898_v18 = vpack.i.bf16 %v21243_v59, %v21241_v25  ;;  %v16141_v56 = vadd.f32 %v23065_v50, %v9718_v15  ;;  %v15710_v44 = vpack.c.bf16 %v21243_v59, %v21241_v25 }
0x275a   :  { %v16903_v42 = vpack.i.bf16 %v21247_v54, %v21245_v22  ;;  %v15708_v49 = vpack.c.bf16 %v21247_v54, %v21245_v22  ;;  %v16143_v4 = vadd.f32 %v23065_v50, %v9720_v46 }
0x275b   :  { %16899 = vrot.lane.b32.xlu1 %v16898_v18, %s17310_s22  ;;  %v21263_v34 = vmax.f32 %v16141_v56, 0.0 }
0x275c   :  { %16904 = vrot.lane.b32.xlu0 %v16903_v42, %s17310_s22  ;;  %v9724_v41 = vpop.f32.mrb[104].mxu0  ;;  %15709 = vmatprep.subr.bf16.mxu0 %v15708_v49  ;;  %v21267_v52 = vmax.f32 %v16143_v4, 0.0 }
0x275d   :  { %v16145_v53 = vadd.f32 %v23066_v13, %v9724_v41  ;;  %v9726_v32 = vpop.f32.mrb[105].mxu0  ;;  %15711 = vmatpush1.bf16.msra.mxu0 %v15710_v44 }
0x275e   :  { %v16147_v12 = vadd.f32 %v23066_v13, %v9726_v32 }
0x275f   :  { %v21265_v63 = vmax.f32 %v16145_v53, 0.0 }
0x2760   :  { %v21269_v11 = vmax.f32 %v16147_v12, 0.0  ;;  %v9730_v55 = vpop.f32.mrb[106].mxu0  ;;  %v17131_v12 = vld [vmem:[%s22743_s1 + $0x2b0] sm:$0xff] }
0x2761   :  { %v9732_v45 = vpop.f32.mrb[107].mxu0  ;;  %v16908_v35 = vpack.i.bf16 %v21265_v63, %v21263_v34  ;;  %v16149_v61 = vadd.f32 %v23067_v9, %v9730_v55  ;;  %v15714_v60 = vpack.c.bf16 %v21265_v63, %v21263_v34  ;;  %v17132_v55 = vld [vmem:[%s22743_s1 + $0x2b8] sm:$0xff] }
0x2762   :  { %v16913_v39 = vpack.i.bf16 %v21269_v11, %v21267_v52  ;;  %v15712_v57 = vpack.c.bf16 %v21269_v11, %v21267_v52  ;;  %v16151_v19 = vadd.f32 %v23067_v9, %v9732_v45  ;;  %v17137_v45 = vld [vmem:[%s22743_s1 + $0x2e0] sm:$0xff] }
0x2763   :  { %16909 = vrot.lane.b32.xlu1 %v16908_v35, %s17310_s22  ;;  %v21285_v50 = vmax.f32 %v16149_v61, 0.0 }
0x2764   :  { %16914 = vrot.lane.b32.xlu0 %v16913_v39, %s17310_s22  ;;  %v9736_v36 = vpop.f32.mrb[108].mxu0  ;;  %15713 = vmatprep.subr.bf16.mxu0 %v15712_v57  ;;  %v21289_v44 = vmax.f32 %v16151_v19, 0.0 }
0x2765   :  { %v16153_v15 = vadd.f32 %v23068_v51, %v9736_v36  ;;  %v9738_v46 = vpop.f32.mrb[109].mxu0  ;;  %15715 = vmatpush1.bf16.msra.mxu0 %v15714_v60 }
0x2766   :  { %v16155_v49 = vadd.f32 %v23068_v51, %v9738_v46 }
0x2767   :  { %v21287_v56 = vmax.f32 %v16153_v15, 0.0 }
0x2768   :  { %v21291_v4 = vmax.f32 %v16155_v49, 0.0 }
0x2769   :  { %v16918_v41 = vpack.i.bf16 %v21287_v56, %v21285_v50  ;;  %v15718_v32 = vpack.c.bf16 %v21287_v56, %v21285_v50 }
0x276a   :  { %v16923_v13 = vpack.i.bf16 %v21291_v4, %v21289_v44  ;;  %v15716_v53 = vpack.c.bf16 %v21291_v4, %v21289_v44 }
0x276b   :  { %16919 = vrot.lane.b32.xlu1 %v16918_v41, %s17310_s22 }
0x276c   :  { %16924 = vrot.lane.b32.xlu0 %v16923_v13, %s17310_s22  ;;  %15717 = vmatprep.subr.bf16.mxu0 %v15716_v53 }
0x276d   :  { %15719 = vmatpush1.bf16.msra.mxu0 %v15718_v32 }
0x276f   :  { %16929 = vrot.lane.b32.xlu1 %v21223_v30, %s17311_s23  ;;  %v17133_v30 = vld [vmem:[%s22743_s1 + $0x2c0] sm:$0xff] }
0x2770   :  { %16934 = vrot.lane.b32.xlu0 %v21227_v6, %s17311_s23  ;;  %13754 = vmatmul.mubr.msk.f32.vlgmr.msra.gmra.mrb[110].mxu0 %vm2344_vm11, %v17131_v12  ;;  %v17134_v6 = vld [vmem:[%s22743_s1 + $0x2c8] sm:$0xff] }
0x2771   :  { %9971 = vmatprep.mubr.f32.mxu0 %v22944_v58 }
0x2773   :  { %16939 = vrot.lane.b32.xlu1 %v16898_v18, %s17311_s23  ;;  %v17135_v18 = vld [vmem:[%s22743_s1 + $0x2d0] sm:$0xff] }
0x2774   :  { %16944 = vrot.lane.b32.xlu0 %v16903_v42, %s17311_s23  ;;  %13755 = vmatmul.mubr.msk.f32.gmra.mrb[112].mxu0 %vm2344_vm11, %v17132_v55  ;;  %v17136_v42 = vld [vmem:[%s22743_s1 + $0x2d8] sm:$0xff] }
0x2775   :  { %9977 = vmatprep.mubr.f32.mxu0 %v22944_v58 }
0x2777   :  { %16949 = vrot.lane.b32.xlu1 %v16908_v35, %s17311_s23  ;;  %v17138_v35 = vld [vmem:[%s22743_s1 + $0x2e8] sm:$0xff] }
0x2778   :  { %16954 = vrot.lane.b32.xlu0 %v16913_v39, %s17311_s23  ;;  %13756 = vmatmul.mubr.msk.f32.gmra.mrb[114].mxu0 %vm2344_vm11, %v17133_v30 }
0x2779   :  { %9983 = vmatprep.mubr.f32.mxu0 %v22944_v58 }
0x277b   :  { %16959 = vrot.lane.b32.xlu1 %v16918_v41, %s17311_s23 }
0x277c   :  { %16964 = vrot.lane.b32.xlu0 %v16923_v13, %s17311_s23  ;;  %13757 = vmatmul.mubr.msk.f32.gmra.mrb[116].mxu0 %vm2344_vm11, %v17134_v6 }
0x277d   :  { %9989 = vmatprep.mubr.f32.mxu0 %v22944_v58 }
0x2780   :  { %13758 = vmatmul.mubr.msk.f32.gmra.mrb[118].mxu0 %vm2344_vm11, %v17135_v18 }
0x2781   :  { %9995 = vmatprep.mubr.f32.mxu0 %v22944_v58 }
0x2784   :  { %13759 = vmatmul.mubr.msk.f32.gmra.mrb[120].mxu0 %vm2344_vm11, %v17136_v42 }
0x2785   :  { %10001 = vmatprep.mubr.f32.mxu0 %v22944_v58 }
0x2788   :  { %13760 = vmatmul.mubr.msk.f32.gmra.mrb[122].mxu0 %vm2344_vm11, %v17137_v45 }
0x2789   :  { %10007 = vmatprep.mubr.f32.mxu0 %v22944_v58 }
0x278c   :  { %13761 = vmatmul.mubr.msk.f32.gmra.mrb[124].mxu0 %vm2344_vm11, %v17138_v35 }
0x278d   :  { %10078 = vmatprep.mubr.f32.mxu0 %v22944_v58 }
0x27c5   :  { %v16890_v39 = vpop.permute.xlu1 %16889 }
0x27c6   :  { %v16892_v57 = vunpack.i.h.bf16 %v16890_v39  ;;  %v16891_v9 = vunpack.i.l.bf16 %v16890_v39  ;;  %v16895_v61 = vpop.permute.xlu0 %16894 }
0x27c7   :  { %v16897_v60 = vunpack.i.h.bf16 %v16895_v61  ;;  %v16896_v19 = vunpack.i.l.bf16 %v16895_v61 }
0x27c9   :  { %v9870_v36 = vsel %vm96_vm5, %v16892_v57, %v16897_v60  ;;  %v9878_v51 = vsel %vm96_vm5, %v16897_v60, %v16892_v57  ;;  %v9869_v15 = vsel %vm96_vm5, %v16891_v9, %v16896_v19  ;;  %v9877_v46 = vsel %vm96_vm5, %v16896_v19, %v16891_v9 }
0x27ca   :  { %v9886_v49 = vsel %vm17432_vm6, %v21217_v40, %v9877_v46  ;;  %v9888_v41 = vsel %vm17432_vm6, %v21219_v7, %v9878_v51  ;;  %v9885_v13 = vsel %vm35_vm1, %v21213_v62, %v9869_v15  ;;  %v9887_v53 = vsel %vm35_vm1, %v21215_v33, %v9870_v36 }
0x27cb   :  { %v15720_v32 = vpack.c.bf16 %v9888_v41, %v9886_v49  ;;  %v15722_v12 = vpack.c.bf16 %v9887_v53, %v9885_v13 }
0x27cd   :  { %v16900_v55 = vpop.permute.xlu1 %16899  ;;  %15721 = vmatprep.subr.bf16.mxu0 %v15720_v32 }
0x27ce   :  { %v16902_v30 = vunpack.i.h.bf16 %v16900_v55  ;;  %v16901_v6 = vunpack.i.l.bf16 %v16900_v55  ;;  %v16905_v18 = vpop.permute.xlu0 %16904  ;;  %15723 = vmatpush1.bf16.msra.mxu0 %v15722_v12 }
0x27cf   :  { %v16907_v42 = vunpack.i.h.bf16 %v16905_v18  ;;  %v16906_v45 = vunpack.i.l.bf16 %v16905_v18 }
0x27d1   :  { %v9872_v35 = vsel %vm96_vm5, %v16902_v30, %v16907_v42  ;;  %v9880_v39 = vsel %vm96_vm5, %v16907_v42, %v16902_v30  ;;  %v9871_v57 = vsel %vm96_vm5, %v16901_v6, %v16906_v45  ;;  %v9879_v9 = vsel %vm96_vm5, %v16906_v45, %v16901_v6 }
0x27d2   :  { %v9890_v61 = vsel %vm17432_vm6, %v21245_v22, %v9879_v9  ;;  %v9892_v60 = vsel %vm17432_vm6, %v21247_v54, %v9880_v39  ;;  %v9889_v19 = vsel %vm35_vm1, %v21241_v25, %v9871_v57  ;;  %v9891_v36 = vsel %vm35_vm1, %v21243_v59, %v9872_v35 }
0x27d3   :  { %v15724_v51 = vpack.c.bf16 %v9892_v60, %v9890_v61  ;;  %v15726_v15 = vpack.c.bf16 %v9891_v36, %v9889_v19 }
0x27d5   :  { %v16910_v46 = vpop.permute.xlu1 %16909  ;;  %15725 = vmatprep.subr.bf16.mxu0 %v15724_v51 }
0x27d6   :  { %v16912_v49 = vunpack.i.h.bf16 %v16910_v46  ;;  %v16911_v41 = vunpack.i.l.bf16 %v16910_v46  ;;  %v16915_v13 = vpop.permute.xlu0 %16914  ;;  %15727 = vmatpush1.bf16.msra.mxu0 %v15726_v15 }
0x27d7   :  { %v16917_v53 = vunpack.i.h.bf16 %v16915_v13  ;;  %v16916_v32 = vunpack.i.l.bf16 %v16915_v13 }
0x27d9   :  { %v9874_v12 = vsel %vm96_vm5, %v16912_v49, %v16917_v53  ;;  %v9882_v55 = vsel %vm96_vm5, %v16917_v53, %v16912_v49  ;;  %v9873_v30 = vsel %vm96_vm5, %v16911_v41, %v16916_v32  ;;  %v9881_v6 = vsel %vm96_vm5, %v16916_v32, %v16911_v41 }
0x27da   :  { %v9894_v18 = vsel %vm17432_vm6, %v21267_v52, %v9881_v6  ;;  %v9896_v42 = vsel %vm17432_vm6, %v21269_v11, %v9882_v55  ;;  %v9893_v45 = vsel %vm35_vm1, %v21263_v34, %v9873_v30  ;;  %v9895_v35 = vsel %vm35_vm1, %v21265_v63, %v9874_v12 }
0x27db   :  { %v15728_v39 = vpack.c.bf16 %v9896_v42, %v9894_v18  ;;  %v15730_v57 = vpack.c.bf16 %v9895_v35, %v9893_v45 }
0x27dd   :  { %v16920_v9 = vpop.permute.xlu1 %16919  ;;  %15729 = vmatprep.subr.bf16.mxu0 %v15728_v39 }
0x27de   :  { %v16922_v61 = vunpack.i.h.bf16 %v16920_v9  ;;  %v16921_v60 = vunpack.i.l.bf16 %v16920_v9  ;;  %v16925_v19 = vpop.permute.xlu0 %16924  ;;  %15731 = vmatpush1.bf16.msra.mxu0 %v15730_v57 }
0x27df   :  { %v16927_v36 = vunpack.i.h.bf16 %v16925_v19  ;;  %v16926_v51 = vunpack.i.l.bf16 %v16925_v19 }
0x27e1   :  { %v9876_v15 = vsel %vm96_vm5, %v16922_v61, %v16927_v36  ;;  %v9884_v46 = vsel %vm96_vm5, %v16927_v36, %v16922_v61  ;;  %v9875_v49 = vsel %vm96_vm5, %v16921_v60, %v16926_v51  ;;  %v9883_v41 = vsel %vm96_vm5, %v16926_v51, %v16921_v60  ;;  %v16930_v13 = vpop.permute.xlu1 %16929 }
0x27e2   :  { %v16932_v53 = vunpack.i.h.bf16 %v16930_v13  ;;  %v16931_v32 = vunpack.i.l.bf16 %v16930_v13  ;;  %v16935_v12 = vpop.permute.xlu0 %16934  ;;  %v9898_v55 = vsel %vm17432_vm6, %v21289_v44, %v9883_v41  ;;  %v9900_v30 = vsel %vm17432_vm6, %v21291_v4, %v9884_v46 }
0x27e3   :  { %v16937_v6 = vunpack.i.h.bf16 %v16935_v12  ;;  %v16936_v18 = vunpack.i.l.bf16 %v16935_v12  ;;  %v15732_v42 = vpack.c.bf16 %v9900_v30, %v9898_v55  ;;  %v9897_v45 = vsel %vm35_vm1, %v21285_v50, %v9875_v49 }
0x27e4   :  { %v9899_v35 = vsel %vm35_vm1, %v21287_v56, %v9876_v15 }
0x27e5   :  { %v9806_v39 = vsel %vm83_vm7, %v16932_v53, %v16937_v6  ;;  %v9814_v57 = vsel %vm83_vm7, %v16937_v6, %v16932_v53  ;;  %v9805_v29 = vsel %vm83_vm7, %v16931_v32, %v16936_v18  ;;  %v9813_v9 = vsel %vm83_vm7, %v16936_v18, %v16931_v32  ;;  %v16940_v61 = vpop.permute.xlu1 %16939  ;;  %15733 = vmatprep.subr.bf16.mxu0 %v15732_v42 }
0x27e6   :  { %v16942_v60 = vunpack.i.h.bf16 %v16940_v61  ;;  %v16941_v19 = vunpack.i.l.bf16 %v16940_v61  ;;  %v16945_v36 = vpop.permute.xlu0 %16944  ;;  %v15734_v51 = vpack.c.bf16 %v9899_v35, %v9897_v45  ;;  %v9822_v15 = vsel %vm17450_vm8, %v21217_v40, %v9805_v29  ;;  %v17139_v29 = vld [vmem:[%s22743_s1 + $0x2f0] sm:$0xff] }
0x27e7   :  { %v16947_v46 = vunpack.i.h.bf16 %v16945_v36  ;;  %v16946_v49 = vunpack.i.l.bf16 %v16945_v36  ;;  %v9824_v41 = vsel %vm17450_vm8, %v21219_v7, %v9806_v39  ;;  %v9821_v13 = vsel %vm34_vm0, %v21213_v62, %v9813_v9 }
0x27e8   :  { %15735 = vmatpush1.bf16.msra.mxu0 %v15734_v51  ;;  %v15736_v53 = vpack.c.bf16 %v9824_v41, %v9822_v15  ;;  %v9823_v32 = vsel %vm34_vm0, %v21215_v33, %v9814_v57 }
0x27e9   :  { %v9808_v12 = vsel %vm83_vm7, %v16942_v60, %v16947_v46  ;;  %v9816_v55 = vsel %vm83_vm7, %v16947_v46, %v16942_v60  ;;  %v9807_v30 = vsel %vm83_vm7, %v16941_v19, %v16946_v49  ;;  %v9815_v6 = vsel %vm83_vm7, %v16946_v49, %v16941_v19  ;;  %v16950_v18 = vpop.permute.xlu1 %16949 }
0x27ea   :  { %v16952_v42 = vunpack.i.h.bf16 %v16950_v18  ;;  %v16951_v45 = vunpack.i.l.bf16 %v16950_v18  ;;  %15737 = vmatprep.subr.bf16.mxu0 %v15736_v53  ;;  %v16955_v35 = vpop.permute.xlu0 %16954  ;;  %v15738_v39 = vpack.c.bf16 %v9823_v32, %v9821_v13  ;;  %v9826_v57 = vsel %vm17450_vm8, %v21245_v22, %v9807_v30 }
0x27eb   :  { %13762 = vmatmul.mubr.msk.f32.vlgmr.msra.gmra.mrb[110].mxu0 %vm2344_vm11, %v17139_v29  ;;  %v16957_v9 = vunpack.i.h.bf16 %v16955_v35  ;;  %v16956_v61 = vunpack.i.l.bf16 %v16955_v35  ;;  %v9828_v60 = vsel %vm17450_vm8, %v21247_v54, %v9808_v12  ;;  %v9825_v19 = vsel %vm34_vm0, %v21241_v25, %v9815_v6  ;;  %v17140_v6 = vld [vmem:[%s22743_s1 + $0x2f8] sm:$0xff] }
0x27ec   :  { %15739 = vmatpush1.bf16.msra.mxu0 %v15738_v39  ;;  %10084 = vmatprep.mubr.f32.mxu0 %v22944_v58  ;;  %v15740_v36 = vpack.c.bf16 %v9828_v60, %v9826_v57  ;;  %v9827_v51 = vsel %vm34_vm0, %v21243_v59, %v9816_v55 }
0x27ed   :  { %v9810_v15 = vsel %vm83_vm7, %v16952_v42, %v16957_v9  ;;  %v9818_v46 = vsel %vm83_vm7, %v16957_v9, %v16952_v42  ;;  %v9809_v49 = vsel %vm83_vm7, %v16951_v45, %v16956_v61  ;;  %v9817_v41 = vsel %vm83_vm7, %v16956_v61, %v16951_v45  ;;  %v16960_v13 = vpop.permute.xlu1 %16959 }
0x27ee   :  { %v16962_v53 = vunpack.i.h.bf16 %v16960_v13  ;;  %v16961_v32 = vunpack.i.l.bf16 %v16960_v13  ;;  %15741 = vmatprep.subr.bf16.mxu0 %v15740_v36  ;;  %v16965_v12 = vpop.permute.xlu0 %16964  ;;  %v15742_v30 = vpack.c.bf16 %v9827_v51, %v9825_v19  ;;  %v9830_v55 = vsel %vm17450_vm8, %v21267_v52, %v9809_v49  ;;  %v17143_v13 = vld [vmem:[%s22743_s1 + $0x310] sm:$0xff] }
0x27ef   :  { %13763 = vmatmul.mubr.msk.f32.gmra.mrb[112].mxu0 %vm2344_vm11, %v17140_v6  ;;  %v16967_v18 = vunpack.i.h.bf16 %v16965_v12  ;;  %v16966_v42 = vunpack.i.l.bf16 %v16965_v12  ;;  %v9832_v45 = vsel %vm17450_vm8, %v21269_v11, %v9810_v15  ;;  %v9829_v35 = vsel %vm34_vm0, %v21263_v34, %v9817_v41  ;;  %v17142_v41 = vld [vmem:[%s22743_s1 + $0x308] sm:$0xff]  ;;  %v17149_v6 = vld [vmem:[%s22743_s1 + $0x280] sm:$0xff] }
0x27f0   :  { %15743 = vmatpush1.bf16.msra.mxu0 %v15742_v30  ;;  %10090 = vmatprep.mubr.f32.mxu0 %v22944_v58  ;;  %v15744_v39 = vpack.c.bf16 %v9832_v45, %v9830_v55  ;;  %v9831_v57 = vsel %vm34_vm0, %v21265_v63, %v9818_v46  ;;  %v17141_v46 = vld [vmem:[%s22743_s1 + $0x300] sm:$0xff]  ;;  %v17146_v12 = vld [vmem:[%s22743_s1 + $0x328] sm:$0xff]  ;;  %v17147_v30 = vld [vmem:[%s22743_s1 + $0x270] sm:$0xff] }
0x27f1   :  { %v9812_v29 = vsel %vm83_vm7, %v16962_v53, %v16967_v18  ;;  %v9820_v9 = vsel %vm83_vm7, %v16967_v18, %v16962_v53  ;;  %v9811_v61 = vsel %vm83_vm7, %v16961_v32, %v16966_v42  ;;  %v9819_v60 = vsel %vm83_vm7, %v16966_v42, %v16961_v32  ;;  %v17144_v53 = vld [vmem:[%s22743_s1 + $0x318] sm:$0xff]  ;;  %v17145_v32 = vld [vmem:[%s22743_s1 + $0x320] sm:$0xff]  ;;  %v17150_v18 = vld [vmem:[%s22743_s1 + $0x288] sm:$0xff] }
0x27f2   :  { %15745 = vmatprep.subr.bf16.mxu0 %v15744_v39  ;;  %v15746_v19 = vpack.c.bf16 %v9831_v57, %v9829_v35  ;;  %v9834_v36 = vsel %vm17450_vm8, %v21289_v44, %v9811_v61  ;;  %v9836_v51 = vsel %vm17450_vm8, %v21291_v4, %v9812_v29  ;;  %v9833_v15 = vsel %vm34_vm0, %v21285_v50, %v9819_v60  ;;  %v17148_v55 = vld [vmem:[%s22743_s1 + $0x278] sm:$0xff]  ;;  %v17151_v42 = vld [vmem:[%s22743_s1 + $0x290] sm:$0xff]  ;;  %v17153_v35 = vld [vmem:[%s22743_s1 + $0x2a0] sm:$0xff] }
0x27f3   :  { %13764 = vmatmul.mubr.msk.f32.gmra.mrb[114].mxu0 %vm2344_vm11, %v17141_v46  ;;  %v15748_v3 = vpack.c.bf16 %v9836_v51, %v9834_v36  ;;  %v9835_v49 = vsel %vm34_vm0, %v21287_v56, %v9820_v9  ;;  %v17152_v45 = vld [vmem:[%s22743_s1 + $0x298] sm:$0xff]  ;;  %v17154_v39 = vld [vmem:[%s22743_s1 + $0x2a8] sm:$0xff]  ;;  %v23069_v9 = vld [vmem:[#allocation16_spill] sm:$0xff] }
0x27f4   :  { %15747 = vmatpush1.bf16.msra.mxu0 %v15746_v19  ;;  %10096 = vmatprep.mubr.f32.mxu0 %v22944_v58  ;;  %v15750_v37 = vpack.c.bf16 %v9835_v49, %v9833_v15  ;;  %v23070_v36 = vld [vmem:[#allocation17_spill] sm:$0xff] }
0x27f5   :  { %15749 = vmatprep.subr.bf16.mxu0 %v15748_v3 }
0x27f7   :  { %13765 = vmatmul.mubr.msk.f32.gmra.mrb[116].mxu0 %vm2344_vm11, %v17142_v41 }
0x27f8   :  { %15751 = vmatpush1.bf16.msra.mxu0 %v15750_v37  ;;  %10102 = vmatprep.mubr.f32.mxu0 %v22944_v58 }
0x27fb   :  { %13766 = vmatmul.mubr.msk.f32.gmra.mrb[118].mxu0 %vm2344_vm11, %v17143_v13 }
0x27fc   :  { %10108 = vmatprep.mubr.f32.mxu0 %v22944_v58 }
0x27ff   :  { %13767 = vmatmul.mubr.msk.f32.gmra.mrb[120].mxu0 %vm2344_vm11, %v17144_v53 }
0x2800   :  { %10114 = vmatprep.mubr.f32.mxu0 %v22944_v58 }
0x2803   :  { %13768 = vmatmul.mubr.msk.f32.gmra.mrb[122].mxu0 %vm2344_vm11, %v17145_v32 }
0x2804   :  { %10120 = vmatprep.mubr.f32.mxu0 %v22944_v58 }
0x2807   :  { %13769 = vmatmul.mubr.msk.f32.gmra.mrb[124].mxu0 %vm2344_vm11, %v17146_v12 }
0x2808   :  { %10191 = vmatprep.mubr.f32.mxu0 %v22944_v58 }
0x280b   :  { %13770 = vmatmul.mubr.msk.f32.vlgmr.msra.gmra.mrb[110].mxu0 %vm2344_vm11, %v17147_v30  ;;  %v23071_v30 = vld [vmem:[#allocation18_spill] sm:$0xff] }
0x280c   :  { %10197 = vmatprep.mubr.f32.mxu0 %v22944_v58 }
0x280f   :  { %13771 = vmatmul.mubr.msk.f32.gmra.mrb[112].mxu0 %vm2344_vm11, %v17148_v55 }
0x2810   :  { %10203 = vmatprep.mubr.f32.mxu0 %v22944_v58 }
0x2813   :  { %13772 = vmatmul.mubr.msk.f32.gmra.mrb[114].mxu0 %vm2344_vm11, %v17149_v6 }
0x2814   :  { %10209 = vmatprep.mubr.f32.mxu0 %v22944_v58 }
0x2817   :  { %13773 = vmatmul.mubr.msk.f32.gmra.mrb[116].mxu0 %vm2344_vm11, %v17150_v18 }
0x2818   :  { %10215 = vmatprep.mubr.f32.mxu0 %v22944_v58 }
0x281b   :  { %13774 = vmatmul.mubr.msk.f32.gmra.mrb[118].mxu0 %vm2344_vm11, %v17151_v42  ;;  %v23072_v42 = vld [vmem:[#allocation19_spill] sm:$0xff] }
0x281c   :  { %10221 = vmatprep.mubr.f32.mxu0 %v22944_v58 }
0x281f   :  { %13775 = vmatmul.mubr.msk.f32.gmra.mrb[120].mxu0 %vm2344_vm11, %v17152_v45 }
0x2820   :  { %10227 = vmatprep.mubr.f32.mxu0 %v22944_v58 }
0x2823   :  { %13776 = vmatmul.mubr.msk.f32.gmra.mrb[122].mxu0 %vm2344_vm11, %v17153_v35 }
0x2824   :  { %10233 = vmatprep.mubr.f32.mxu0 %v22944_v58 }
0x2827   :  { %13777 = vmatmul.mubr.msk.f32.gmra.mrb[124].mxu0 %vm2344_vm11, %v17154_v39 }
0x2828   :  { %10771 = vmatprep.mubr.f32.mxu0 %v22944_v58 }
0x28de   :  { %v10193_v57 = vpop.f32.mrb[110].mxu0 }
0x28df   :  { %v10195_v29 = vpop.f32.mrb[111].mxu0  ;;  %v10256_v61 = vadd.f32 %v10193_v57, %v23069_v9 }
0x28e0   :  { %v10257_v60 = vadd.f32 %v10195_v29, %v23069_v9 }
0x28e1   :  { %v10272_v3 = vmax.f32 %v10256_v61, 0.0 }
0x28e2   :  { %v10199_v19 = vpop.f32.mrb[112].mxu0  ;;  %v10273_v37 = vmax.f32 %v10257_v60, 0.0 }
0x28e3   :  { %v10258_v51 = vadd.f32 %v10199_v19, %v23070_v36  ;;  %v10201_v15 = vpop.f32.mrb[113].mxu0 }
0x28e4   :  { %v10259_v46 = vadd.f32 %v10201_v15, %v23070_v36  ;;  %v23073_v15 = vld [vmem:[#allocation20_spill] sm:$0xff] }
0x28e5   :  { %v10274_v49 = vmax.f32 %v10258_v51, 0.0 }
0x28e6   :  { %v10275_v41 = vmax.f32 %v10259_v46, 0.0  ;;  %v10205_v13 = vpop.f32.mrb[114].mxu0 }
0x28e7   :  { %v15754_v53 = vpack.c.bf16 %v10274_v49, %v10272_v3  ;;  %v10207_v32 = vpop.f32.mrb[115].mxu0  ;;  %v10260_v55 = vadd.f32 %v10205_v13, %v23071_v30 }
0x28e8   :  { %v15752_v12 = vpack.c.bf16 %v10275_v41, %v10273_v37  ;;  %v10261_v6 = vadd.f32 %v10207_v32, %v23071_v30  ;;  %v23074_v37 = vld [vmem:[#allocation21_spill] sm:$0xff] }
0x28e9   :  { %v10276_v57 = vmax.f32 %v10260_v55, 0.0 }
0x28ea   :  { %v10211_v18 = vpop.f32.mrb[116].mxu0  ;;  %15753 = vmatprep.subr.bf16.mxu1 %v15752_v12  ;;  %v10277_v9 = vmax.f32 %v10261_v6, 0.0 }
0x28eb   :  { %v10262_v45 = vadd.f32 %v10211_v18, %v23072_v42  ;;  %v10213_v35 = vpop.f32.mrb[117].mxu0  ;;  %15755 = vmatpush1.bf16.msra.mxu1 %v15754_v53 }
0x28ec   :  { %v10263_v39 = vadd.f32 %v10213_v35, %v23072_v42  ;;  %v23075_v35 = vld [vmem:[#allocation22_spill] sm:$0xff] }
0x28ed   :  { %v10278_v29 = vmax.f32 %v10262_v45, 0.0 }
0x28ee   :  { %v10279_v61 = vmax.f32 %v10263_v39, 0.0  ;;  %v10217_v60 = vpop.f32.mrb[118].mxu0 }
0x28ef   :  { %v15758_v19 = vpack.c.bf16 %v10278_v29, %v10276_v57  ;;  %v10219_v36 = vpop.f32.mrb[119].mxu0  ;;  %v10264_v46 = vadd.f32 %v10217_v60, %v23073_v15 }
0x28f0   :  { %v15756_v51 = vpack.c.bf16 %v10279_v61, %v10277_v9  ;;  %v10265_v3 = vadd.f32 %v10219_v36, %v23073_v15  ;;  %v23076_v9 = vld [vmem:[#allocation23_spill] sm:$0xff] }
0x28f1   :  { %v10280_v32 = vmax.f32 %v10264_v46, 0.0 }
0x28f2   :  { %v10223_v49 = vpop.f32.mrb[120].mxu0  ;;  %15757 = vmatprep.subr.bf16.mxu1 %v15756_v51  ;;  %v10281_v30 = vmax.f32 %v10265_v3, 0.0 }
0x28f3   :  { %v10266_v41 = vadd.f32 %v10223_v49, %v23074_v37  ;;  %v10225_v13 = vpop.f32.mrb[121].mxu0  ;;  %15759 = vmatpush1.bf16.msra.mxu1 %v15758_v19 }
0x28f4   :  { %v10267_v53 = vadd.f32 %v10225_v13, %v23074_v37  ;;  %v17155_v37 = vld [vmem:[%s22743_s1 + $0x330] sm:$0xff]  ;;  %v17157_v13 = vld [vmem:[%s22743_s1 + $0x340] sm:$0xff] }
0x28f5   :  { %v10282_v12 = vmax.f32 %v10266_v41, 0.0  ;;  %v17156_v41 = vld [vmem:[%s22743_s1 + $0x338] sm:$0xff] }
0x28f6   :  { %v10283_v55 = vmax.f32 %v10267_v53, 0.0  ;;  %v10229_v6 = vpop.f32.mrb[122].mxu0  ;;  %v17158_v53 = vld [vmem:[%s22743_s1 + $0x348] sm:$0xff] }
0x28f7   :  { %v15762_v18 = vpack.c.bf16 %v10282_v12, %v10280_v32  ;;  %v10231_v42 = vpop.f32.mrb[123].mxu0  ;;  %v10268_v39 = vadd.f32 %v10229_v6, %v23075_v35  ;;  %v17159_v32 = vld [vmem:[%s22743_s1 + $0x350] sm:$0xff]  ;;  %v17160_v12 = vld [vmem:[%s22743_s1 + $0x358] sm:$0xff] }
0x28f8   :  { %v15760_v45 = vpack.c.bf16 %v10283_v55, %v10281_v30  ;;  %v10269_v57 = vadd.f32 %v10231_v42, %v23075_v35  ;;  %v17161_v30 = vld [vmem:[%s22743_s1 + $0x360] sm:$0xff]  ;;  %v17162_v55 = vld [vmem:[%s22743_s1 + $0x368] sm:$0xff]  ;;  %v23077_v42 = vld [vmem:[#allocation24_spill] sm:$0xff] }
0x28f9   :  { %v10284_v36 = vmax.f32 %v10268_v39, 0.0 }
0x28fa   :  { %v10235_v29 = vpop.f32.mrb[124].mxu0  ;;  %15761 = vmatprep.subr.bf16.mxu1 %v15760_v45  ;;  %v10285_v15 = vmax.f32 %v10269_v57, 0.0  ;;  %v23078_v57 = vld [vmem:[#allocation25_spill] sm:$0xff] }
0x28fb   :  { %v10270_v61 = vadd.f32 %v10235_v29, %v23076_v9  ;;  %v10237_v60 = vpop.f32.mrb[125].mxu0  ;;  %15763 = vmatpush1.bf16.msra.mxu1 %v15762_v18 }
0x28fc   :  { %v10271_v19 = vadd.f32 %v10237_v60, %v23076_v9 }
0x28fd   :  { %v10286_v51 = vmax.f32 %v10270_v61, 0.0 }
0x28fe   :  { %v10287_v46 = vmax.f32 %v10271_v19, 0.0 }
0x28ff   :  { %v15766_v3 = vpack.c.bf16 %v10286_v51, %v10284_v36 }
0x2900   :  { %v15764_v49 = vpack.c.bf16 %v10287_v46, %v10285_v15 }
0x2902   :  { %15765 = vmatprep.subr.bf16.mxu1 %v15764_v49 }
0x2903   :  { %15767 = vmatpush1.bf16.msra.mxu1 %v15766_v3 }
0x2906   :  { %13778 = vmatmul.mubr.msk.f32.vlgmr.msra.gmra.mrb[150].mxu1 %vm2344_vm11, %v17155_v37  ;;  %v23079_v37 = vld [vmem:[#allocation26_spill] sm:$0xff] }
0x2907   :  { %10358 = vmatprep.mubr.f32.mxu1 %v22944_v58 }
0x290a   :  { %13779 = vmatmul.mubr.msk.f32.gmra.mrb[152].mxu1 %vm2344_vm11, %v17156_v41 }
0x290b   :  { %10364 = vmatprep.mubr.f32.mxu1 %v22944_v58 }
0x290e   :  { %13780 = vmatmul.mubr.msk.f32.gmra.mrb[154].mxu1 %vm2344_vm11, %v17157_v13 }
0x290f   :  { %10370 = vmatprep.mubr.f32.mxu1 %v22944_v58 }
0x2912   :  { %13781 = vmatmul.mubr.msk.f32.gmra.mrb[156].mxu1 %vm2344_vm11, %v17158_v53 }
0x2913   :  { %10376 = vmatprep.mubr.f32.mxu1 %v22944_v58 }
0x2916   :  { %13782 = vmatmul.mubr.msk.f32.gmra.mrb[158].mxu1 %vm2344_vm11, %v17159_v32  ;;  %v23080_v32 = vld [vmem:[#allocation27_spill] sm:$0xff] }
0x2917   :  { %10382 = vmatprep.mubr.f32.mxu1 %v22944_v58 }
0x291a   :  { %13783 = vmatmul.mubr.msk.f32.gmra.mrb[160].mxu1 %vm2344_vm11, %v17160_v12 }
0x291b   :  { %10388 = vmatprep.mubr.f32.mxu1 %v22944_v58 }
0x291e   :  { %13784 = vmatmul.mubr.msk.f32.gmra.mrb[162].mxu1 %vm2344_vm11, %v17161_v30 }
0x291f   :  { %10394 = vmatprep.mubr.f32.mxu1 %v22944_v58 }
0x2922   :  { %13785 = vmatmul.mubr.msk.f32.gmra.mrb[164].mxu1 %vm2344_vm11, %v17162_v55 }
0x2923   :  { %10497 = vmatprep.mubr.f32.mxu1 %v22944_v58 }
0x29d9   :  { %v10354_v6 = vpop.f32.mrb[150].mxu1 }
0x29da   :  { %v10356_v18 = vpop.f32.mrb[151].mxu1  ;;  %v10355_v35 = vadd.f32 %v10354_v6, %v23077_v42 }
0x29db   :  { %v10357_v45 = vadd.f32 %v10356_v18, %v23077_v42 }
0x29dc   :  { %v21657_v19 = vadd.f32 %v10355_v35, %v21213_v62 }
0x29dd   :  { %v10360_v39 = vpop.f32.mrb[152].mxu1  ;;  %v21653_v61 = vadd.f32 %v10357_v45, %v21217_v40 }
0x29de   :  { %v10361_v29 = vadd.f32 %v10360_v39, %v23078_v57  ;;  %v10362_v9 = vpop.f32.mrb[153].mxu1  ;;  %v10417_v13 = vmax.f32 %v21657_v19, 0.0 }
0x29df   :  { %v10363_v60 = vadd.f32 %v10362_v9, %v23078_v57  ;;  %v10418_v49 = vmax.f32 %v21653_v61, 0.0  ;;  %v23081_v9 = vld [vmem:[#allocation28_spill] sm:$0xff] }
0x29e0   :  { %v21660_v36 = vadd.f32 %v10361_v29, %v21215_v33 }
0x29e1   :  { %v21663_v51 = vadd.f32 %v10363_v60, %v21219_v7  ;;  %v10366_v15 = vpop.f32.mrb[154].mxu1 }
0x29e2   :  { %v10419_v46 = vmax.f32 %v21660_v36, 0.0  ;;  %v10368_v3 = vpop.f32.mrb[155].mxu1  ;;  %v10367_v62 = vadd.f32 %v10366_v15, %v23079_v37 }
0x29e3   :  { %v10420_v40 = vmax.f32 %v21663_v51, 0.0  ;;  %v10369_v41 = vadd.f32 %v10368_v3, %v23079_v37  ;;  %v23082_v37 = vld [vmem:[#allocation29_spill] sm:$0xff] }
0x29e4   :  { %v15770_v7 = vpack.c.bf16 %v10419_v46, %v10417_v13  ;;  %v21685_v18 = vadd.f32 %v10367_v62, %v21241_v25 }
0x29e5   :  { %v10372_v53 = vpop.f32.mrb[156].mxu1  ;;  %v15768_v33 = vpack.c.bf16 %v10420_v40, %v10418_v49  ;;  %v21681_v55 = vadd.f32 %v10369_v41, %v21245_v22 }
0x29e6   :  { %v10373_v12 = vadd.f32 %v10372_v53, %v23080_v32  ;;  %v10374_v30 = vpop.f32.mrb[157].mxu1  ;;  %v10421_v25 = vmax.f32 %v21685_v18, 0.0 }
0x29e7   :  { %v10375_v6 = vadd.f32 %v10374_v30, %v23080_v32  ;;  %15769 = vmatprep.subr.bf16.mxu1 %v15768_v33  ;;  %v22925_v22 = vmax.f32 %v21681_v55, 0.0 }
0x29e8   :  { %v21688_v42 = vadd.f32 %v10373_v12, %v21243_v59  ;;  %15771 = vmatpush1.bf16.msra.mxu1 %v15770_v7 }
0x29e9   :  { %v21691_v45 = vadd.f32 %v10375_v6, %v21247_v54  ;;  %v10378_v35 = vpop.f32.mrb[158].mxu1 }
0x29ea   :  { %v22924_v39 = vmax.f32 %v21688_v42, 0.0  ;;  %v10380_v57 = vpop.f32.mrb[159].mxu1  ;;  %v10379_v15 = vadd.f32 %v10378_v35, %v23081_v9 }
0x29eb   :  { %v22923_v29 = vmax.f32 %v21691_v45, 0.0  ;;  %v10381_v60 = vadd.f32 %v10380_v57, %v23081_v9  ;;  %v23083_v9 = vld [vmem:[#allocation30_spill] sm:$0xff] }
0x29ec   :  { %v15774_v3 = vpack.c.bf16 %v22924_v39, %v10421_v25  ;;  %v21713_v7 = vadd.f32 %v10379_v15, %v21263_v34 }
0x29ed   :  { %v10384_v59 = vpop.f32.mrb[160].mxu1  ;;  %v15772_v54 = vpack.c.bf16 %v22923_v29, %v22925_v22  ;;  %v21709_v53 = vadd.f32 %v10381_v60, %v21267_v52  ;;  %v23087_v29 = vld [vmem:[#allocation34_spill] sm:$0xff] }
0x29ee   :  { %v10385_v41 = vadd.f32 %v10384_v59, %v23082_v37  ;;  %v10386_v62 = vpop.f32.mrb[161].mxu1  ;;  %v22922_v34 = vmax.f32 %v21713_v7, 0.0 }
0x29ef   :  { %v10387_v33 = vadd.f32 %v10386_v62, %v23082_v37  ;;  %15773 = vmatprep.subr.bf16.mxu1 %v15772_v54  ;;  %v22921_v52 = vmax.f32 %v21709_v53, 0.0  ;;  %v23084_v54 = vld [vmem:[#allocation31_spill] sm:$0xff] }
0x29f0   :  { %v21716_v32 = vadd.f32 %v10385_v41, %v21265_v63  ;;  %15775 = vmatpush1.bf16.msra.mxu1 %v15774_v3 }
0x29f1   :  { %v21719_v12 = vadd.f32 %v10387_v33, %v21269_v11  ;;  %v10390_v30 = vpop.f32.mrb[162].mxu1 }
0x29f2   :  { %v22920_v6 = vmax.f32 %v21716_v32, 0.0  ;;  %v10392_v35 = vpop.f32.mrb[163].mxu1  ;;  %v10391_v15 = vadd.f32 %v10390_v30, %v23083_v9 }
0x29f3   :  { %v22919_v57 = vmax.f32 %v21719_v12, 0.0  ;;  %v10393_v60 = vadd.f32 %v10392_v35, %v23083_v9 }
0x29f4   :  { %v15778_v59 = vpack.c.bf16 %v22920_v6, %v22922_v34  ;;  %v21741_v33 = vadd.f32 %v10391_v15, %v21285_v50  ;;  %v17164_v15 = vld [vmem:[%s22743_s1 + $0x378] sm:$0xff] }
0x29f5   :  { %v10396_v63 = vpop.f32.mrb[164].mxu1  ;;  %v15776_v11 = vpack.c.bf16 %v22919_v57, %v22921_v52  ;;  %v21737_v41 = vadd.f32 %v10393_v60, %v21289_v44 }
0x29f6   :  { %v10397_v3 = vadd.f32 %v10396_v63, %v23084_v54  ;;  %v10398_v37 = vpop.f32.mrb[165].mxu1  ;;  %v22918_v60 = vmax.f32 %v21741_v33, 0.0 }
0x29f7   :  { %v10399_v62 = vadd.f32 %v10398_v37, %v23084_v54  ;;  %15777 = vmatprep.subr.bf16.mxu1 %v15776_v11  ;;  %v22917_v63 = vmax.f32 %v21737_v41, 0.0  ;;  %v17165_v11 = vld [vmem:[%s22743_s1 + $0x380] sm:$0xff]  ;;  %v17167_v54 = vld [vmem:[%s22743_s1 + $0x390] sm:$0xff] }
0x29f8   :  { %v21744_v30 = vadd.f32 %v10397_v3, %v21287_v56  ;;  %15779 = vmatpush1.bf16.msra.mxu1 %v15778_v59  ;;  %v17166_v59 = vld [vmem:[%s22743_s1 + $0x388] sm:$0xff]  ;;  %v17168_v3 = vld [vmem:[%s22743_s1 + $0x398] sm:$0xff]  ;;  %v17169_v37 = vld [vmem:[%s22743_s1 + $0x3a0] sm:$0xff] }
0x29f9   :  { %v21747_v35 = vadd.f32 %v10399_v62, %v21291_v4  ;;  %v17163_v4 = vld [vmem:[%s22743_s1 + $0x370] sm:$0xff]  ;;  %v17170_v62 = vld [vmem:[%s22743_s1 + $0x3a8] sm:$0xff] }
0x29fa   :  { %v22916_v9 = vmax.f32 %v21744_v30, 0.0 }
0x29fb   :  { %v22915_v44 = vmax.f32 %v21747_v35, 0.0 }
0x29fc   :  { %v15782_v56 = vpack.c.bf16 %v22916_v9, %v22918_v60 }
0x29fd   :  { %v15780_v50 = vpack.c.bf16 %v22915_v44, %v22917_v63 }
0x29ff   :  { %15781 = vmatprep.subr.bf16.mxu1 %v15780_v50 }
0x2a00   :  { %15783 = vmatpush1.bf16.msra.mxu1 %v15782_v56 }
0x2a03   :  { %13786 = vmatmul.mubr.msk.f32.vlgmr.msra.gmra.mrb[166].mxu1 %vm2344_vm11, %v17163_v4  ;;  %v23085_v4 = vld [vmem:[#allocation32_spill] sm:$0xff] }
0x2a04   :  { %10503 = vmatprep.mubr.f32.mxu1 %v22944_v58 }
0x2a07   :  { %13787 = vmatmul.mubr.msk.f32.gmra.mrb[168].mxu1 %vm2344_vm11, %v17164_v15 }
0x2a08   :  { %10509 = vmatprep.mubr.f32.mxu1 %v22944_v58 }
0x2a0b   :  { %13788 = vmatmul.mubr.msk.f32.gmra.mrb[170].mxu1 %vm2344_vm11, %v17165_v11 }
0x2a0c   :  { %10515 = vmatprep.mubr.f32.mxu1 %v22944_v58 }
0x2a0f   :  { %13789 = vmatmul.mubr.msk.f32.gmra.mrb[172].mxu1 %vm2344_vm11, %v17166_v59 }
0x2a10   :  { %10521 = vmatprep.mubr.f32.mxu1 %v22944_v58 }
0x2a13   :  { %13790 = vmatmul.mubr.msk.f32.gmra.mrb[174].mxu1 %vm2344_vm11, %v17167_v54  ;;  %v23086_v54 = vld [vmem:[#allocation33_spill] sm:$0xff] }
0x2a14   :  { %10527 = vmatprep.mubr.f32.mxu1 %v22944_v58 }
0x2a17   :  { %13791 = vmatmul.mubr.msk.f32.gmra.mrb[176].mxu1 %vm2344_vm11, %v17168_v3 }
0x2a18   :  { %10533 = vmatprep.mubr.f32.mxu1 %v22944_v58 }
0x2a1b   :  { %13792 = vmatmul.mubr.msk.f32.gmra.mrb[178].mxu1 %vm2344_vm11, %v17169_v37 }
0x2a1c   :  { %10539 = vmatprep.mubr.f32.mxu1 %v22944_v58 }
0x2a1f   :  { %13793 = vmatmul.mubr.msk.f32.gmra.mrb[180].mxu1 %vm2344_vm11, %v17170_v62 }
0x2a20   :  { %10626 = vmatprep.mubr.f32.mxu1 %v22944_v58 }
0x2ad6   :  { %v10499_v50 = vpop.f32.mrb[166].mxu1 }
0x2ad7   :  { %v10501_v56 = vpop.f32.mrb[167].mxu1  ;;  %v10500_v15 = vadd.f32 %v10499_v50, %v23085_v4 }
0x2ad8   :  { %v10502_v11 = vadd.f32 %v10501_v56, %v23085_v4  ;;  %v23088_v56 = vld [vmem:[#allocation35_spill] sm:$0xff] }
0x2ad9   :  { %v10546_v9 = vmax.f32 %v10500_v15, 0.0 }
0x2ada   :  { %v10505_v59 = vpop.f32.mrb[168].mxu1  ;;  %v10547_v60 = vmax.f32 %v10502_v11, 0.0 }
0x2adb   :  { %v10506_v3 = vadd.f32 %v10505_v59, %v23086_v54  ;;  %v10507_v37 = vpop.f32.mrb[169].mxu1 }
0x2adc   :  { %v10508_v44 = vadd.f32 %v10507_v37, %v23086_v54 }
0x2add   :  { %v10548_v63 = vmax.f32 %v10506_v3, 0.0 }
0x2ade   :  { %v10549_v57 = vmax.f32 %v10508_v44, 0.0  ;;  %v10511_v6 = vpop.f32.mrb[170].mxu1 }
0x2adf   :  { %v15786_v62 = vpack.c.bf16 %v10548_v63, %v10546_v9  ;;  %v10513_v52 = vpop.f32.mrb[171].mxu1  ;;  %v10512_v39 = vadd.f32 %v10511_v6, %v23087_v29 }
0x2ae0   :  { %v15784_v34 = vpack.c.bf16 %v10549_v57, %v10547_v60  ;;  %v10514_v50 = vadd.f32 %v10513_v52, %v23087_v29  ;;  %v23089_v60 = vld [vmem:[#allocation36_spill] sm:$0xff] }
0x2ae1   :  { %v10550_v15 = vmax.f32 %v10512_v39, 0.0 }
0x2ae2   :  { %v10517_v22 = vpop.f32.mrb[172].mxu1  ;;  %15785 = vmatprep.subr.bf16.mxu1 %v15784_v34  ;;  %v10551_v11 = vmax.f32 %v10514_v50, 0.0 }
0x2ae3   :  { %v10518_v4 = vadd.f32 %v10517_v22, %v23088_v56  ;;  %v10519_v59 = vpop.f32.mrb[173].mxu1  ;;  %15787 = vmatpush1.bf16.msra.mxu1 %v15786_v62 }
0x2ae4   :  { %v10520_v54 = vadd.f32 %v10519_v59, %v23088_v56 }
0x2ae5   :  { %v10552_v3 = vmax.f32 %v10518_v4, 0.0 }
0x2ae6   :  { %v10553_v44 = vmax.f32 %v10520_v54, 0.0  ;;  %v10523_v37 = vpop.f32.mrb[174].mxu1 }
0x2ae7   :  { %v15790_v9 = vpack.c.bf16 %v10552_v3, %v10550_v15  ;;  %v10525_v63 = vpop.f32.mrb[175].mxu1  ;;  %v10524_v6 = vadd.f32 %v10523_v37, %v23089_v60 }
0x2ae8   :  { %v15788_v57 = vpack.c.bf16 %v10553_v44, %v10551_v11  ;;  %v10526_v29 = vadd.f32 %v10525_v63, %v23089_v60  ;;  %v23090_v11 = vld [vmem:[#allocation37_spill] sm:$0xff] }
0x2ae9   :  { %v10554_v39 = vmax.f32 %v10524_v6, 0.0 }
0x2aea   :  { %v10529_v52 = vpop.f32.mrb[176].mxu1  ;;  %15789 = vmatprep.subr.bf16.mxu1 %v15788_v57  ;;  %v10555_v50 = vmax.f32 %v10526_v29, 0.0  ;;  %v23091_v57 = vld [vmem:[#allocation38_spill] sm:$0xff] }
0x2aeb   :  { %v10530_v22 = vadd.f32 %v10529_v52, %v19110_v1  ;;  %v10531_v34 = vpop.f32.mrb[177].mxu1  ;;  %15791 = vmatpush1.bf16.msra.mxu1 %v15790_v9 }
0x2aec   :  { %v10532_v62 = vadd.f32 %v10531_v34, %v19110_v1 }
0x2aed   :  { %v10556_v56 = vmax.f32 %v10530_v22, 0.0 }
0x2aee   :  { %v10557_v4 = vmax.f32 %v10532_v62, 0.0  ;;  %v10535_v59 = vpop.f32.mrb[178].mxu1 }
0x2aef   :  { %v15794_v54 = vpack.c.bf16 %v10556_v56, %v10554_v39  ;;  %v10537_v15 = vpop.f32.mrb[179].mxu1  ;;  %v10536_v44 = vadd.f32 %v10535_v59, %v23090_v11  ;;  %v17171_v39 = vld [vmem:[%s22743_s1 + $0x3b0] sm:$0xff]  ;;  %v17172_v56 = vld [vmem:[%s22743_s1 + $0x3b8] sm:$0xff] }
0x2af0   :  { %v15792_v3 = vpack.c.bf16 %v10557_v4, %v10555_v50  ;;  %v10538_v37 = vadd.f32 %v10537_v15, %v23090_v11  ;;  %v17173_v50 = vld [vmem:[%s22743_s1 + $0x3c0] sm:$0xff]  ;;  %v17174_v4 = vld [vmem:[%s22743_s1 + $0x3c8] sm:$0xff]  ;;  %v17175_v59 = vld [vmem:[%s22743_s1 + $0x3d0] sm:$0xff] }
0x2af1   :  { %v10558_v9 = vmax.f32 %v10536_v44, 0.0  ;;  %v17177_v15 = vld [vmem:[%s22743_s1 + $0x3e0] sm:$0xff] }
0x2af2   :  { %v10541_v63 = vpop.f32.mrb[180].mxu1  ;;  %15793 = vmatprep.subr.bf16.mxu1 %v15792_v3  ;;  %v10559_v29 = vmax.f32 %v10538_v37, 0.0  ;;  %v17178_v3 = vld [vmem:[%s22743_s1 + $0x3e8] sm:$0xff]  ;;  %v17179_v11 = vld [vmem:[%s22746_s3 + $0x80] sm:$0xff] }
0x2af3   :  { %v10542_v60 = vadd.f32 %v10541_v63, %v23091_v57  ;;  %v10543_v52 = vpop.f32.mrb[181].mxu1  ;;  %15795 = vmatpush1.bf16.msra.mxu1 %v15794_v54  ;;  %v17176_v54 = vld [vmem:[%s22743_s1 + $0x3d8] sm:$0xff]  ;;  %v23092_v37 = vld [vmem:[#allocation39_spill] sm:$0xff] }
0x2af4   :  { %v10544_v1 = vadd.f32 %v10543_v52, %v23091_v57 }
0x2af5   :  { %v10560_v6 = vmax.f32 %v10542_v60, 0.0 }
0x2af6   :  { %v10561_v22 = vmax.f32 %v10544_v1, 0.0 }
0x2af7   :  { %v15798_v34 = vpack.c.bf16 %v10560_v6, %v10558_v9 }
0x2af8   :  { %v15796_v62 = vpack.c.bf16 %v10561_v22, %v10559_v29 }
0x2afa   :  { %15797 = vmatprep.subr.bf16.mxu1 %v15796_v62 }
0x2afb   :  { %15799 = vmatpush1.bf16.msra.mxu1 %v15798_v34 }
0x2afe   :  { %13794 = vmatmul.mubr.msk.f32.vlgmr.msra.gmra.mrb[182].mxu1 %vm2344_vm11, %v17171_v39 }
0x2aff   :  { %10632 = vmatprep.mubr.f32.mxu1 %v22944_v58 }
0x2b02   :  { %13795 = vmatmul.mubr.msk.f32.gmra.mrb[184].mxu1 %vm2344_vm11, %v17172_v56 }
0x2b03   :  { %10638 = vmatprep.mubr.f32.mxu1 %v22944_v58 }
0x2b06   :  { %13796 = vmatmul.mubr.msk.f32.gmra.mrb[186].mxu1 %vm2344_vm11, %v17173_v50 }
0x2b07   :  { %10644 = vmatprep.mubr.f32.mxu1 %v22944_v58 }
0x2b0a   :  { %13797 = vmatmul.mubr.msk.f32.gmra.mrb[188].mxu1 %vm2344_vm11, %v17174_v4 }
0x2b0b   :  { %10650 = vmatprep.mubr.f32.mxu1 %v22944_v58 }
0x2b0e   :  { %13798 = vmatmul.mubr.msk.f32.gmra.mrb[190].mxu1 %vm2344_vm11, %v17175_v59 }
0x2b0f   :  { %10656 = vmatprep.mubr.f32.mxu1 %v22944_v58 }
0x2b12   :  { %13799 = vmatmul.mubr.msk.f32.gmra.mrb[192].mxu1 %vm2344_vm11, %v17176_v54 }
0x2b13   :  { %10662 = vmatprep.mubr.f32.mxu1 %v22944_v58 }
0x2b16   :  { %13800 = vmatmul.mubr.msk.f32.gmra.mrb[194].mxu1 %vm2344_vm11, %v17177_v15 }
0x2b17   :  { %10668 = vmatprep.mubr.f32.mxu1 %v22944_v58 }
0x2b1a   :  { %13801 = vmatmul.mubr.msk.f32.gmra.mrb[196].mxu1 %vm2344_vm11, %v17178_v3 }
0x2b1b   :  { %14856 = vmatprep.mubr.msk.f32.mxu1 %vm418_vm9, %v17179_v11  ;;  %v23094_v11 = vmax.f32 %v21688_v42, 0.0  ;;  %v23096_v42 = vmax.f32 %v21713_v7, 0.0 }
0x2bd1   :  { %v10628_v44 = vpop.f32.mrb[182].mxu1 }
0x2bd2   :  { %v10629_v63 = vadd.f32 %v10628_v44, %v23092_v37  ;;  %v10630_v57 = vpop.f32.mrb[183].mxu1 }
0x2bd3   :  { %v10631_v60 = vadd.f32 %v10630_v57, %v23092_v37 }
0x2bd4   :  { %v10675_v1 = vadd.f32 %v10629_v63, %v10417_v13 }
0x2bd5   :  { %v10634_v52 = vpop.f32.mrb[184].mxu1  ;;  %v10676_v29 = vadd.f32 %v10631_v60, %v10418_v49 }
0x2bd6   :  { %v10635_v9 = vadd.f32 %v10634_v52, %v19166_v26  ;;  %v10636_v6 = vpop.f32.mrb[185].mxu1  ;;  %v10691_v56 = vmax.f32 %v10675_v1, 0.0 }
0x2bd7   :  { %v10637_v22 = vadd.f32 %v10636_v6, %v19166_v26  ;;  %v10692_v4 = vmax.f32 %v10676_v29, 0.0 }
0x2bd8   :  { %v10677_v34 = vadd.f32 %v10635_v9, %v10419_v46  ;;  %v23093_v46 = vmax.f32 %v21681_v55, 0.0 }
0x2bd9   :  { %v10678_v62 = vadd.f32 %v10637_v22, %v10420_v40  ;;  %v10640_v39 = vpop.f32.mrb[186].mxu1 }
0x2bda   :  { %v10693_v50 = vmax.f32 %v10677_v34, 0.0  ;;  %v10641_v19 = vadd.f32 %v10640_v39, %v19176_v20  ;;  %v10642_v13 = vpop.f32.mrb[187].mxu1  ;;  %v23097_v34 = vmax.f32 %v21709_v53, 0.0 }
0x2bdb   :  { %v10694_v59 = vmax.f32 %v10678_v62, 0.0  ;;  %v10643_v54 = vadd.f32 %v10642_v13, %v19176_v20  ;;  %v23095_v20 = vmax.f32 %v21691_v45, 0.0 }
0x2bdc   :  { %v15802_v61 = vpack.c.bf16 %v10693_v50, %v10691_v56  ;;  %v10679_v26 = vadd.f32 %v10641_v19, %v10421_v25  ;;  %v23098_v56 = vmax.f32 %v21716_v32, 0.0  ;;  %v23100_v32 = vmax.f32 %v21741_v33, 0.0 }
0x2bdd   :  { %v10646_v49 = vpop.f32.mrb[188].mxu1  ;;  %v15800_v15 = vpack.c.bf16 %v10694_v59, %v10692_v4  ;;  %v10680_v40 = vadd.f32 %v10643_v54, %v23093_v46 }
0x2bde   :  { %v10647_v36 = vadd.f32 %v10646_v49, %v19182_v27  ;;  %v10648_v51 = vpop.f32.mrb[189].mxu1  ;;  %v10695_v57 = vmax.f32 %v10679_v26, 0.0 }
0x2bdf   :  { %v10649_v3 = vadd.f32 %v10648_v51, %v19182_v27  ;;  %15801 = vmatprep.subr.bf16.mxu0 %v15800_v15  ;;  %v10696_v52 = vmax.f32 %v10680_v40, 0.0  ;;  %v23101_v51 = vld [vmem:[#allocation40_spill] sm:$0xff]  ;;  %v23102_v40 = vmax.f32 %v21737_v41, 0.0 }
0x2be0   :  { %v10681_v44 = vadd.f32 %v10647_v36, %v23094_v11  ;;  %15803 = vmatpush1.bf16.msra.mxu0 %v15802_v61  ;;  %v17180_v41 = vld [vmem:[%s22743_s1 + $0x3f0] sm:$0xf] }
0x2be1   :  { %v10682_v37 = vadd.f32 %v10649_v3, %v23095_v20  ;;  %v10652_v63 = vpop.f32.mrb[190].mxu1 }
0x2be2   :  { %v10697_v18 = vmax.f32 %v10681_v44, 0.0  ;;  %v10653_v25 = vadd.f32 %v10652_v63, %v19192_v24  ;;  %v10654_v60 = vpop.f32.mrb[191].mxu1  ;;  %v23103_v44 = vmax.f32 %v21744_v30, 0.0  ;;  %v10779_v30 = vsel %vm35_vm1, %v20475_v31, %v20504_v8 }
0x2be3   :  { %v10698_v1 = vmax.f32 %v10682_v37, 0.0  ;;  %v10655_v55 = vadd.f32 %v10654_v60, %v19192_v24  ;;  %v23099_v24 = vmax.f32 %v21719_v12, 0.0  ;;  %v10778_v8 = vsel %vm34_vm0, %v20475_v31, %v20518_v28  ;;  %v17185_v28 = vld [vmem:[%s22746_s3] sm:$0xff] }
0x2be4   :  { %v15806_v9 = vpack.c.bf16 %v10697_v18, %v10695_v57  ;;  %v10683_v29 = vadd.f32 %v10653_v25, %v23096_v42 }
0x2be5   :  { %v10658_v27 = vpop.f32.mrb[192].mxu1  ;;  %v15804_v6 = vpack.c.bf16 %v10698_v1, %v10696_v52  ;;  %v10684_v62 = vadd.f32 %v10655_v55, %v23097_v34  ;;  %v17182_v52 = vld [vmem:[%s22746_s3 + $0x18] sm:$0xff]  ;;  %v17183_v1 = vld [vmem:[%s22746_s3 + $0x20] sm:$0xff]  ;;  %v17184_v55 = vld [vmem:[%s22746_s3 + $0x28] sm:$0xff] }
0x2be6   :  { %v10659_v22 = vadd.f32 %v10658_v27, %v19198_v16  ;;  %v10660_v45 = vpop.f32.mrb[193].mxu1  ;;  %v10699_v4 = vmax.f32 %v10683_v29, 0.0  ;;  %v17187_v27 = vld [vmem:[%s22746_s3 + $0x30] sm:$0xff] }
0x2be7   :  { %v10661_v39 = vadd.f32 %v10660_v45, %v19198_v16  ;;  %15805 = vmatprep.subr.bf16.mxu0 %v15804_v6  ;;  %v10700_v61 = vmax.f32 %v10684_v62, 0.0  ;;  %v23106_v62 = vld [vmem:[#allocation42_spill] sm:$0xff] }
0x2be8   :  { %v10685_v50 = vadd.f32 %v10659_v22, %v23098_v56  ;;  %15807 = vmatpush1.bf16.msra.mxu0 %v15806_v9  ;;  %v17186_v9 = vld [vmem:[%s22746_s3 + $0x8] sm:$0xff]  ;;  %v23105_v22 = vld [vmem:[#allocation41_spill] sm:$0xff] }
0x2be9   :  { %v10686_v19 = vadd.f32 %v10661_v39, %v23099_v24  ;;  %v10664_v13 = vpop.f32.mrb[194].mxu1 }
0x2bea   :  { %v10701_v7 = vmax.f32 %v10685_v50, 0.0  ;;  %v10665_v59 = vadd.f32 %v10664_v13, %v19208_v0  ;;  %v10666_v54 = vpop.f32.mrb[195].mxu1  ;;  %v17189_v13 = vld [vmem:[%s22746_s3 + $0x40] sm:$0xff] }
0x2beb   :  { %v10702_v49 = vmax.f32 %v10686_v19, 0.0  ;;  %v10667_v53 = vadd.f32 %v10666_v54, %v19208_v0  ;;  %v23104_v0 = vmax.f32 %v21747_v35, 0.0  ;;  %v17181_v35 = vld [vmem:[%s22746_s3 + $0x10] sm:$0xff]  ;;  %v17188_v19 = vld [vmem:[%s22746_s3 + $0x38] sm:$0xff] }
0x2bec   :  { %v15810_v15 = vpack.c.bf16 %v10701_v7, %v10699_v4  ;;  %v10687_v36 = vadd.f32 %v10665_v59, %v23100_v32  ;;  %v17190_v4 = vld [vmem:[%s22746_s3 + $0x48] sm:$0xff]  ;;  %v17191_v7 = vld [vmem:[%s22746_s3 + $0x60] sm:$0xff] }
0x2bed   :  { %v10670_v16 = vpop.f32.mrb[196].mxu1  ;;  %v15808_v26 = vpack.c.bf16 %v10702_v49, %v10700_v61  ;;  %v10688_v3 = vadd.f32 %v10667_v53, %v23102_v40  ;;  %v23108_v49 = vld [vmem:[#allocation44_spill] sm:$0xff] }
0x2bee   :  { %v10671_v46 = vadd.f32 %v10670_v16, %v23101_v51  ;;  %v10672_v12 = vpop.f32.mrb[197].mxu1  ;;  %v10703_v63 = vmax.f32 %v10687_v36, 0.0  ;;  %v17192_v36 = vld [vmem:[%s22746_s3 + $0x68] sm:$0xff] }
0x2bef   :  { %v10673_v11 = vadd.f32 %v10672_v12, %v23101_v51  ;;  %15809 = vmatprep.subr.bf16.mxu0 %v15808_v26  ;;  %v10704_v33 = vmax.f32 %v10688_v3, 0.0  ;;  %v17193_v51 = vld [vmem:[%s22746_s3 + $0x70] sm:$0xff] }
0x2bf0   :  { %v10689_v20 = vadd.f32 %v10671_v46, %v23103_v44  ;;  %15811 = vmatpush1.bf16.msra.mxu0 %v15810_v15 }
0x2bf1   :  { %v10690_v37 = vadd.f32 %v10673_v11, %v23104_v0 }
0x2bf2   :  { %v10705_v57 = vmax.f32 %v10689_v20, 0.0 }
0x2bf3   :  { %v10706_v18 = vmax.f32 %v10690_v37, 0.0 }
0x2bf4   :  { %v15814_v25 = vpack.c.bf16 %v10705_v57, %v10703_v63 }
0x2bf5   :  { %v15812_v60 = vpack.c.bf16 %v10706_v18, %v10704_v33  ;;  %v17194_v18 = vld [vmem:[%s22746_s3 + $0x78] sm:$0xff] }
0x2bf7   :  { %15813 = vmatprep.subr.bf16.mxu0 %v15812_v60  ;;  %v17196_v60 = vld [vmem:[%s22746_s3 + $0x58] sm:$0xff] }
0x2bf8   :  { %15815 = vmatpush1.bf16.msra.mxu0 %v15814_v25  ;;  %v17195_v25 = vld [vmem:[%s22746_s3 + $0x50] sm:$0xff] }
0x2bf9   :  { %14804 = vmatprep.subr.msk.mxu0 %vm116_vm3, %v20475_v31 }
0x2bfb   :  { %13802 = vmatmul.mubr.msk.f32.vlgmr.msra.gmra.mrb[126].mxu0 %vm2344_vm11, %v17180_v41  ;;  %v17197_v41 = vld [vmem:[%s22746_s3 + $0xf0] sm:$0xff] }
0x2bfc   :  { %14805 = vmatpush3.msk.msra.mxu0 %vm116_vm3, %v20475_v31  ;;  %14806 = vmatprep.mubr.msk.f32.mxu0 %vm109_vm4, %v17181_v35  ;;  %v23109_v35 = vld [vmem:[#allocation45_spill] sm:$0xff] }
0x2bfd   :  { %14809 = vmatprep.subr.msk.mxu0 %vm116_vm3, %v10779_v30 }
0x2bff   :  { %14807 = vmatmul.mubr.msk.f32.vlgmr.msra.gmra.mrb[128].mxu0 %vm109_vm4, %v17182_v52 }
0x2c00   :  { %14810 = vmatpush3.msk.msra.mxu0 %vm116_vm3, %v10779_v30  ;;  %14811 = vmatprep.mubr.msk.f32.mxu0 %vm109_vm4, %v17183_v1  ;;  %v23110_v1 = vld [vmem:[#allocation46_spill] sm:$0xff] }
0x2c01   :  { %14814 = vmatprep.subr.msk.mxu0 %vm116_vm3, %v10778_v8 }
0x2c07   :  { %14812 = vmatmul.mubr.msk.f32.vlgmr.msra.gmra.mrb[128].mxu0 %vm109_vm4, %v17184_v55 }
0x2c08   :  { %14815 = vmatpush3.msk.msra.mxu0 %vm116_vm3, %v10778_v8  ;;  %14816 = vmatprep.mubr.msk.f32.mxu0 %vm109_vm4, %v17185_v28 }
0x2c0f   :  { %14817 = vmatmul.mubr.msk.f32.vlgmr.msra.gmra.mrb[128].mxu0 %vm109_vm4, %v17186_v9 }
0x2c10   :  { %14823 = vmatprep.mubr.msk.f32.mxu0 %vm418_vm9, %v17187_v27 }
0x2cce   :  { %v21956_v6 = vpop.f32.mrb[126].mxu0 }
0x2ccf   :  { %v21958_v42 = vpop.f32.mrb[127].mxu0 }
0x2ce2   :  { %v14818_v29 = vpop.f32.mrb[128].mxu0 }
0x2ce3   :  { %v11014_v45 = vadd.f32 %v14818_v29, %v23105_v22  ;;  %v11002_v34 = vpop.f32.mrb[129].mxu0  ;;  %v17198_v29 = vld [vmem:[%s22746_s3 + $0x88] sm:$0xff]  ;;  %v17199_v22 = vld [vmem:[%s22746_s3 + $0xb0] sm:$0xff] }
0x2ce4   :  { %v11013_v39 = vadd.f32 %v11002_v34, %v23106_v62  ;;  %v23111_v34 = vld [vmem:[#allocation47_spill] sm:$0xff] }
0x2ce5   :  { %v11016_v56 = vmax.f32 %v11014_v45, 0.0 }
0x2ce6   :  { %v11015_v50 = vmax.f32 %v11013_v39, 0.0 }
0x2ce8   :  { %v15816_v24 = vpack.c.bf16 %v11016_v56, %v11015_v50  ;;  %v23112_v56 = vld [vmem:[#allocation48_spill] sm:$0xff] }
0x2cea   :  { %15817 = vmatprep.subr.bf16.mxu0 %v15816_v24 }
0x2ceb   :  { %15819 = vmatpush3.bf16.msra.mxu0 %v15816_v24 }
0x2cec   :  { %14826 = vmatprep.subr.msk.mxu0 %vm116_vm3, %v20475_v31 }
0x2cee   :  { %14824 = vmatmul.mubr.msk.f32.vlgmr.msra.gmra.mrb[130].mxu0 %vm418_vm9, %v17188_v19 }
0x2cef   :  { %14827 = vmatpush3.msk.msra.mxu0 %vm116_vm3, %v20475_v31  ;;  %14828 = vmatprep.mubr.msk.f32.mxu0 %vm109_vm4, %v17189_v13  ;;  %v23107_v31 = vld [vmem:[#allocation43_spill] sm:$0xff] }
0x2cf6   :  { %14829 = vmatmul.mubr.msk.f32.vlgmr.msra.gmra.mrb[130].mxu0 %vm109_vm4, %v17190_v4 }
0x2cf7   :  { %14835 = vmatprep.mubr.msk.f32.mxu0 %vm418_vm9, %v17191_v7 }
0x2dc9   :  { %v14830_v59 = vpop.f32.mrb[130].mxu0 }
0x2dca   :  { %v16157_v54 = vadd.f32 %v23107_v31, %v14830_v59  ;;  %v11158_v61 = vpop.f32.mrb[131].mxu0  ;;  %v17200_v31 = vld [vmem:[%s22746_s3 + $0xb8] sm:$0xff] }
0x2dcb   :  { %v16159_v53 = vadd.f32 %v23108_v49, %v11158_v61  ;;  %v17202_v61 = vld [vmem:[%s22746_s3 + $0xc8] sm:$0xff]  ;;  %v17203_v49 = vld [vmem:[%s22746_s3 + $0xd0] sm:$0xff] }
0x2dcc   :  { %v11170_v15 = vmax.f32 %v16157_v54, 0.0  ;;  %v17201_v54 = vld [vmem:[%s22746_s3 + $0xc0] sm:$0xff] }
0x2dcd   :  { %v11169_v16 = vmax.f32 %v16159_v53, 0.0 }
0x2dcf   :  { %v16973_v26 = vpack.i.bf16 %v11170_v15, %v11169_v16  ;;  %v15820_v32 = vpack.c.bf16 %v11170_v15, %v11169_v16 }
0x2dd1   :  { %16974 = vrot.lane.b32.xlu0 %v16973_v26, %s17311_s23  ;;  %16969 = vrot.lane.b32.xlu1 %v16973_v26, %s17310_s22 }
0x2dd2   :  { %15821 = vmatprep.subr.bf16.mxu0 %v15820_v32 }
0x2dd3   :  { %15823 = vmatpush3.bf16.msra.mxu0 %v15820_v32 }
0x2dd6   :  { %14836 = vmatmul.mubr.msk.f32.vlgmr.msra.gmra.mrb[132].mxu0 %vm418_vm9, %v17192_v36 }
0x2dd7   :  { %14842 = vmatprep.mubr.msk.f32.mxu0 %vm418_vm9, %v17193_v51 }
0x2e43   :  { %v16975_v46 = vpop.permute.xlu0 %16974  ;;  %v16970_v12 = vpop.permute.xlu1 %16969 }
0x2e44   :  { %v16977_v40 = vunpack.i.h.bf16 %v16975_v46  ;;  %v16976_v3 = vunpack.i.l.bf16 %v16975_v46  ;;  %v16972_v11 = vunpack.i.h.bf16 %v16970_v12  ;;  %v16971_v44 = vunpack.i.l.bf16 %v16970_v12 }
0x2e46   :  { %v11181_v20 = vsel %vm35_vm1, %v11169_v16, %v16971_v44  ;;  %v11182_v0 = vsel %vm35_vm1, %v11170_v15, %v16972_v11  ;;  %v11175_v37 = vsel %vm34_vm0, %v11169_v16, %v16976_v3  ;;  %v11176_v63 = vsel %vm34_vm0, %v11170_v15, %v16977_v40  ;;  %v17204_v44 = vld [vmem:[%s22746_s3 + $0xd8] sm:$0xff] }
0x2e47   :  { %v15824_v57 = vpack.c.bf16 %v11182_v0, %v11181_v20  ;;  %v15828_v33 = vpack.c.bf16 %v11176_v63, %v11175_v37  ;;  %v17205_v20 = vld [vmem:[%s22746_s3 + $0xe0] sm:$0xff]  ;;  %v17206_v0 = vld [vmem:[%s22746_s3 + $0xe8] sm:$0xff]  ;;  %v17207_v37 = vld [vmem:[%s22746_s3 + $0x90] sm:$0xff] }
0x2e48   :  { %v17208_v63 = vld [vmem:[%s22746_s3 + $0x98] sm:$0xff] }
0x2e49   :  { %15825 = vmatprep.subr.bf16.mxu0 %v15824_v57 }
0x2e4a   :  { %15827 = vmatpush3.bf16.msra.mxu0 %v15824_v57  ;;  %v17209_v57 = vld [vmem:[%s22746_s3 + $0xa0] sm:$0xff] }
0x2e4b   :  { %15829 = vmatprep.subr.bf16.mxu0 %v15828_v33 }
0x2e4d   :  { %14843 = vmatmul.mubr.msk.f32.vlgmr.msra.gmra.mrb[132].mxu0 %vm418_vm9, %v17194_v18  ;;  %v17211_v18 = vld [vmem:[%s22746_s3 + $0x170] sm:$0xff] }
0x2e4e   :  { %15831 = vmatpush3.bf16.msra.mxu0 %v15828_v33  ;;  %14849 = vmatprep.mubr.msk.f32.mxu0 %vm418_vm9, %v17195_v25  ;;  %v17210_v33 = vld [vmem:[%s22746_s3 + $0xa8] sm:$0xff] }
0x2e55   :  { %14850 = vmatmul.mubr.msk.f32.vlgmr.msra.gmra.mrb[132].mxu0 %vm418_vm9, %v17196_v60  ;;  %v23113_v60 = vld [vmem:[#allocation49_spill] sm:$0xff] }
0x2e56   :  { %14897 = vmatprep.mubr.msk.f32.mxu0 %vm1446_vm10, %v17197_v41 }
0x2f28   :  { %v14851_v30 = vpop.f32.mrb[132].mxu0 }
0x2f29   :  { %v11411_v52 = vadd.f32 %v14851_v30, %v23109_v35  ;;  %v11399_v8 = vpop.f32.mrb[133].mxu0  ;;  %v23114_v35 = vld [vmem:[#allocation50_spill] sm:$0xff] }
0x2f2a   :  { %v11410_v55 = vadd.f32 %v11399_v8, %v23110_v1 }
0x2f2b   :  { %v11413_v28 = vmax.f32 %v11411_v52, 0.0 }
0x2f2c   :  { %v11412_v9 = vmax.f32 %v11410_v55, 0.0 }
0x2f2e   :  { %v15832_v27 = vpack.c.bf16 %v11413_v28, %v11412_v9  ;;  %v23115_v28 = vld [vmem:[#allocation51_spill] sm:$0xff] }
0x2f30   :  { %15833 = vmatprep.subr.bf16.mxu1 %v15832_v27 }
0x2f31   :  { %15835 = vmatpush3.bf16.msra.mxu1 %v15832_v27 }
0x2f34   :  { %14857 = vmatmul.mubr.msk.f32.vlgmr.msra.gmra.mrb[198].mxu1 %vm418_vm9, %v17198_v29 }
0x2f35   :  { %14863 = vmatprep.mubr.msk.f32.mxu1 %vm418_vm9, %v17199_v22  ;;  %v23116_v22 = vld [vmem:[#allocation52_spill] sm:$0xff] }
0x3007   :  { %v14858_v45 = vpop.f32.mrb[198].mxu1 }
0x3008   :  { %v11486_v62 = vadd.f32 %v14858_v45, %v23111_v34  ;;  %v11480_v39 = vpop.f32.mrb[199].mxu1 }
0x3009   :  { %v11481_v50 = vadd.f32 %v11480_v39, %v23112_v56  ;;  %v17212_v56 = vld [vmem:[%s22746_s3 + $0xf8] sm:$0xff] }
0x300a   :  { %v11490_v24 = vadd.f32 %v11486_v62, %v11170_v15 }
0x300b   :  { %v11489_v19 = vadd.f32 %v11481_v50, %v11169_v16  ;;  %v17213_v50 = vld [vmem:[%s22746_s3 + $0x100] sm:$0xff] }
0x300c   :  { %v11492_v13 = vmax.f32 %v11490_v24, 0.0  ;;  %v17214_v24 = vld [vmem:[%s22746_s3 + $0x108] sm:$0xff] }
0x300d   :  { %v11491_v4 = vmax.f32 %v11489_v19, 0.0  ;;  %v17215_v19 = vld [vmem:[%s22746_s3 + $0x110] sm:$0xff] }
0x300f   :  { %v16983_v7 = vpack.i.bf16 %v11492_v13, %v11491_v4  ;;  %v22030_v59 = vpack.c.bf16 %v11492_v13, %v11491_v4 }
0x3011   :  { %16984 = vrot.lane.b32.xlu0 %v16983_v7, %s17311_s23  ;;  %16979 = vrot.lane.b32.xlu1 %v16983_v7, %s17310_s22  ;;  %v17218_v7 = vld [vmem:[%s22746_s3 + $0x128] sm:$0xff] }
0x3012   :  { %15837 = vmatprep.subr.bf16.mxu1 %v22030_v59 }
0x3013   :  { %15839 = vmatpush3.bf16.msra.mxu1 %v22030_v59 }
0x3016   :  { %14864 = vmatmul.mubr.msk.f32.vlgmr.msra.gmra.mrb[200].mxu1 %vm418_vm9, %v17200_v31 }
0x3017   :  { %14866 = vmatprep.mubr.msk.f32.mxu1 %vm418_vm9, %v17201_v54  ;;  %v23117_v54 = vld [vmem:[#allocation53_spill] sm:$0xff] }
0x301a   :  { %14867 = vmatmul.mubr.msk.f32.gmra.mrb[202].mxu1 %vm418_vm9, %v17202_v61 }
0x301b   :  { %14873 = vmatprep.mubr.msk.f32.mxu1 %vm418_vm9, %v17203_v49 }
0x3083   :  { %v16985_v53 = vpop.permute.xlu0 %16984  ;;  %v16980_v15 = vpop.permute.xlu1 %16979 }
0x3084   :  { %v16987_v16 = vunpack.i.h.bf16 %v16985_v53  ;;  %v16986_v26 = vunpack.i.l.bf16 %v16985_v53  ;;  %v16982_v32 = vunpack.i.h.bf16 %v16980_v15  ;;  %v16981_v36 = vunpack.i.l.bf16 %v16980_v15  ;;  %v23118_v53 = vld [vmem:[#allocation54_spill] sm:$0xff] }
0x3086   :  { %v11503_v51 = vsel %vm35_vm1, %v11491_v4, %v16981_v36  ;;  %v11504_v46 = vsel %vm35_vm1, %v11492_v13, %v16982_v32  ;;  %v11497_v12 = vsel %vm34_vm0, %v11491_v4, %v16986_v26  ;;  %v11498_v40 = vsel %vm34_vm0, %v11492_v13, %v16987_v16  ;;  %v17216_v13 = vld [vmem:[%s22746_s3 + $0x118] sm:$0xff]  ;;  %v17217_v4 = vld [vmem:[%s22746_s3 + $0x120] sm:$0xff]  ;;  %v23119_v36 = vld [vmem:[#allocation55_spill] sm:$0xff] }
0x3087   :  { %v15840_v3 = vpack.c.bf16 %v11504_v46, %v11503_v51  ;;  %v15844_v11 = vpack.c.bf16 %v11498_v40, %v11497_v12  ;;  %v23120_v12 = vld [vmem:[#allocation56_spill] sm:$0xff] }
0x3089   :  { %15841 = vmatprep.subr.bf16.mxu1 %v15840_v3 }
0x308a   :  { %15843 = vmatpush3.bf16.msra.mxu1 %v15840_v3 }
0x308b   :  { %15845 = vmatprep.subr.bf16.mxu1 %v15844_v11 }
0x308d   :  { %14874 = vmatmul.mubr.msk.f32.vlgmr.msra.gmra.mrb[200].mxu1 %vm418_vm9, %v17204_v44 }
0x308e   :  { %15847 = vmatpush3.bf16.msra.mxu1 %v15844_v11  ;;  %14876 = vmatprep.mubr.msk.f32.mxu1 %vm418_vm9, %v17205_v20 }
0x3091   :  { %14877 = vmatmul.mubr.msk.f32.gmra.mrb[202].mxu1 %vm418_vm9, %v17206_v0 }
0x3092   :  { %14883 = vmatprep.mubr.msk.f32.mxu1 %vm418_vm9, %v17207_v37 }
0x3095   :  { %14884 = vmatmul.mubr.msk.f32.vlgmr.msra.gmra.mrb[200].mxu1 %vm418_vm9, %v17208_v63  ;;  %v17220_v63 = vld [vmem:[%s22746_s3 + $0x178] sm:$0xff] }
0x3096   :  { %14886 = vmatprep.mubr.msk.f32.mxu1 %vm418_vm9, %v17209_v57  ;;  %v17221_v57 = vld [vmem:[%s22746_s3 + $0x180] sm:$0xff] }
0x3099   :  { %14887 = vmatmul.mubr.msk.f32.gmra.mrb[202].mxu1 %vm418_vm9, %v17210_v33  ;;  %v17222_v33 = vld [vmem:[%s22746_s3 + $0x188] sm:$0xff] }
0x309a   :  { %14921 = vmatprep.mubr.msk.f32.mxu1 %vm1446_vm10, %v17211_v18  ;;  %v17223_v18 = vld [vmem:[%s22746_s3 + $0x190] sm:$0xff] }
0x3168   :  { %v14885_v25 = vpop.f32.mrb[200].mxu1 }
0x3169   :  { %v11765_v41 = vadd.f32 %v14885_v25, %v23113_v60  ;;  %v11741_v30 = vpop.f32.mrb[201].mxu1  ;;  %v17224_v25 = vld [vmem:[%s22746_s3 + $0x198] sm:$0xff]  ;;  %v17225_v60 = vld [vmem:[%s22746_s3 + $0x1a0] sm:$0xff] }
0x316a   :  { %v11764_v52 = vadd.f32 %v11741_v30, %v23114_v35  ;;  %v17227_v30 = vld [vmem:[%s22746_s3 + $0x1b0] sm:$0xff] }
0x316b   :  { %v11769_v8 = vmax.f32 %v11765_v41, 0.0  ;;  %v17226_v41 = vld [vmem:[%s22746_s3 + $0x1a8] sm:$0xff] }
0x316c   :  { %v11768_v1 = vmax.f32 %v11764_v52, 0.0  ;;  %v14888_v55 = vpop.f32.mrb[202].mxu1 }
0x316d   :  { %v11767_v9 = vadd.f32 %v14888_v55, %v23115_v28  ;;  %v11751_v27 = vpop.f32.mrb[203].mxu1 }
0x316e   :  { %v15848_v29 = vpack.c.bf16 %v11769_v8, %v11768_v1  ;;  %v11766_v45 = vadd.f32 %v11751_v27, %v23116_v22 }
0x316f   :  { %v11771_v34 = vmax.f32 %v11767_v9, 0.0 }
0x3170   :  { %v11770_v62 = vmax.f32 %v11766_v45, 0.0  ;;  %15849 = vmatprep.subr.bf16.mxu0 %v15848_v29 }
0x3171   :  { %15851 = vmatpush3.bf16.msra.mxu0 %v15848_v29 }
0x3172   :  { %v15852_v39 = vpack.c.bf16 %v11771_v34, %v11770_v62 }
0x3174   :  { %15853 = vmatprep.subr.bf16.mxu0 %v15852_v39 }
0x3175   :  { %15855 = vmatpush3.bf16.msra.mxu0 %v15852_v39 }
0x3176   :  { %15857 = vmatprep.subr.bf16.mxu0 %v22030_v59 }
0x3178   :  { %14898 = vmatmul.mubr.msk.f32.vlgmr.msra.gmra.mrb[134].mxu0 %vm1446_vm10, %v17212_v56 }
0x3179   :  { %15859 = vmatpush3.bf16.msra.mxu0 %v22030_v59  ;;  %14900 = vmatprep.mubr.msk.f32.mxu0 %vm1446_vm10, %v17213_v50  ;;  %v17219_v59 = vld [vmem:[%s22746_s3 + $0x1f0] sm:$0xff] }
0x317c   :  { %14901 = vmatmul.mubr.msk.f32.gmra.mrb[136].mxu0 %vm1446_vm10, %v17214_v24 }
0x317d   :  { %14907 = vmatprep.mubr.msk.f32.mxu0 %vm418_vm9, %v17215_v19 }
0x3180   :  { %14908 = vmatmul.mubr.msk.f32.vlgmr.msra.gmra.mrb[134].mxu0 %vm418_vm9, %v17216_v13 }
0x3181   :  { %14910 = vmatprep.mubr.msk.f32.mxu0 %vm418_vm9, %v17217_v4 }
0x3184   :  { %14911 = vmatmul.mubr.msk.f32.gmra.mrb[136].mxu0 %vm418_vm9, %v17218_v7 }
0x3185   :  { %14989 = vmatprep.mubr.msk.f32.mxu0 %vm2344_vm11, %v17219_v59 }
0x3253   :  { %v14909_v31 = vpop.f32.mrb[134].mxu0 }
0x3254   :  { %v16161_v61 = vadd.f32 %v23117_v54, %v14909_v31  ;;  %v11923_v49 = vpop.f32.mrb[135].mxu0  ;;  %v17228_v54 = vld [vmem:[%s22746_s3 + $0x1b8] sm:$0xff] }
0x3255   :  { %v16163_v15 = vadd.f32 %v23118_v53, %v11923_v49  ;;  %v17229_v49 = vld [vmem:[%s22746_s3 + $0x1c0] sm:$0xff]  ;;  %v17230_v53 = vld [vmem:[%s22746_s3 + $0x1c8] sm:$0xff] }
0x3256   :  { %v11947_v16 = vmax.f32 %v16161_v61, 0.0 }
0x3257   :  { %v11946_v26 = vmax.f32 %v16163_v15, 0.0  ;;  %v14912_v32 = vpop.f32.mrb[136].mxu0  ;;  %v17231_v15 = vld [vmem:[%s22746_s3 + $0x1d0] sm:$0xff] }
0x3258   :  { %v16165_v51 = vadd.f32 %v23119_v36, %v14912_v32  ;;  %v11933_v46 = vpop.f32.mrb[137].mxu0  ;;  %v17234_v32 = vld [vmem:[%s22746_s3 + $0x1e8] sm:$0xff]  ;;  %v17235_v36 = vld [vmem:[%s22746_s3 + $0x130] sm:$0xff] }
0x3259   :  { %v16167_v40 = vadd.f32 %v23120_v12, %v11933_v46  ;;  %v16988_v3 = vpack.i.bf16 %v11947_v16, %v11946_v26  ;;  %v22134_v11 = vpack.c.bf16 %v11947_v16, %v11946_v26  ;;  %v17237_v46 = vld [vmem:[%s22746_s3 + $0x140] sm:$0xff]  ;;  %v17238_v12 = vld [vmem:[%s22746_s3 + $0x148] sm:$0xff] }
0x325a   :  { %v11949_v44 = vmax.f32 %v16165_v51, 0.0  ;;  %v17236_v51 = vld [vmem:[%s22746_s3 + $0x138] sm:$0xff] }
0x325b   :  { %v11948_v20 = vmax.f32 %v16167_v40, 0.0  ;;  %16989 = vrot.lane.b32.xlu1 %v16988_v3, %s17310_s22  ;;  %15861 = vmatprep.subr.bf16.mxu1 %v22134_v11  ;;  %v17239_v40 = vld [vmem:[%s22746_s3 + $0x150] sm:$0xff] }
0x325c   :  { %15863 = vmatpush3.bf16.msra.mxu1 %v22134_v11 }
0x325d   :  { %v16993_v0 = vpack.i.bf16 %v11949_v44, %v11948_v20  ;;  %v22139_v37 = vpack.c.bf16 %v11949_v44, %v11948_v20 }
0x325f   :  { %16999 = vrot.lane.b32.xlu1 %v16988_v3, %s17311_s23  ;;  %16994 = vrot.lane.b32.xlu0 %v16993_v0, %s17310_s22  ;;  %v17240_v3 = vld [vmem:[%s22746_s3 + $0x158] sm:$0xff] }
0x3260   :  { %15865 = vmatprep.subr.bf16.mxu1 %v22139_v37 }
0x3261   :  { %15867 = vmatpush3.bf16.msra.mxu1 %v22139_v37 }
0x3263   :  { %17004 = vrot.lane.b32.xlu0 %v16993_v0, %s17311_s23  ;;  %v17243_v0 = vld [vmem:[%s22746_s3 + $0x330] sm:$0xff] }
0x3264   :  { %14922 = vmatmul.mubr.msk.f32.vlgmr.msra.gmra.mrb[204].mxu1 %vm1446_vm10, %v17220_v63 }
0x3265   :  { %14924 = vmatprep.mubr.msk.f32.mxu1 %vm1446_vm10, %v17221_v57  ;;  %v23121_v57 = vld [vmem:[#allocation57_spill] sm:$0xff] }
0x3268   :  { %14925 = vmatmul.mubr.msk.f32.gmra.mrb[206].mxu1 %vm1446_vm10, %v17222_v33 }
0x3269   :  { %14927 = vmatprep.mubr.msk.f32.mxu1 %vm1446_vm10, %v17223_v18 }
0x326c   :  { %14928 = vmatmul.mubr.msk.f32.gmra.mrb[208].mxu1 %vm1446_vm10, %v17224_v25  ;;  %v23122_v25 = vld [vmem:[#allocation58_spill] sm:$0xff] }
0x326d   :  { %14930 = vmatprep.mubr.msk.f32.mxu1 %vm1446_vm10, %v17225_v60 }
0x3270   :  { %14931 = vmatmul.mubr.msk.f32.gmra.mrb[210].mxu1 %vm1446_vm10, %v17226_v41 }
0x3271   :  { %14941 = vmatprep.mubr.msk.f32.mxu1 %vm1446_vm10, %v17227_v30 }
0x32cd   :  { %v16990_v35 = vpop.permute.xlu1 %16989 }
0x32ce   :  { %v16992_v52 = vunpack.i.h.bf16 %v16990_v35  ;;  %v16991_v8 = vunpack.i.l.bf16 %v16990_v35 }
0x32d0   :  { %v11970_v1 = vsel %vm35_vm1, %v11946_v26, %v16991_v8  ;;  %v11971_v55 = vsel %vm35_vm1, %v11947_v16, %v16992_v52  ;;  %v23123_v52 = vld [vmem:[#allocation59_spill] sm:$0xff] }
0x32d1   :  { %v17000_v28 = vpop.permute.xlu1 %16999  ;;  %v16995_v9 = vpop.permute.xlu0 %16994  ;;  %v15868_v27 = vpack.c.bf16 %v11971_v55, %v11970_v1 }
0x32d2   :  { %v17002_v29 = vunpack.i.h.bf16 %v17000_v28  ;;  %v17001_v22 = vunpack.i.l.bf16 %v17000_v28  ;;  %v16997_v45 = vunpack.i.h.bf16 %v16995_v9  ;;  %v16996_v34 = vunpack.i.l.bf16 %v16995_v9  ;;  %v23124_v28 = vld [vmem:[#allocation60_spill] sm:$0xff] }
0x32d3   :  { %15869 = vmatprep.subr.bf16.mxu1 %v15868_v27 }
0x32d4   :  { %15871 = vmatpush3.bf16.msra.mxu1 %v15868_v27  ;;  %v11972_v62 = vsel %vm35_vm1, %v11948_v20, %v16996_v34  ;;  %v11973_v39 = vsel %vm35_vm1, %v11949_v44, %v16997_v45  ;;  %v11958_v56 = vsel %vm34_vm0, %v11946_v26, %v17001_v22  ;;  %v11959_v50 = vsel %vm34_vm0, %v11947_v16, %v17002_v29  ;;  %v17232_v16 = vld [vmem:[%s22746_s3 + $0x1d8] sm:$0xff]  ;;  %v17233_v26 = vld [vmem:[%s22746_s3 + $0x1e0] sm:$0xff] }
0x32d5   :  { %v17005_v24 = vpop.permute.xlu0 %17004  ;;  %v15872_v19 = vpack.c.bf16 %v11973_v39, %v11972_v62  ;;  %v15876_v7 = vpack.c.bf16 %v11959_v50, %v11958_v56  ;;  %v23125_v45 = vld [vmem:[#allocation61_spill] sm:$0xff]  ;;  %v23126_v56 = vld [vmem:[#allocation62_spill] sm:$0xff] }
0x32d6   :  { %v17007_v13 = vunpack.i.h.bf16 %v17005_v24  ;;  %v17006_v4 = vunpack.i.l.bf16 %v17005_v24 }
0x32d7   :  { %15873 = vmatprep.subr.bf16.mxu1 %v15872_v19 }
0x32d8   :  { %15875 = vmatpush3.bf16.msra.mxu1 %v15872_v19  ;;  %v11960_v59 = vsel %vm34_vm0, %v11948_v20, %v17006_v4  ;;  %v11961_v31 = vsel %vm34_vm0, %v11949_v44, %v17007_v13  ;;  %v17241_v44 = vld [vmem:[%s22746_s3 + $0x160] sm:$0xff]  ;;  %v17242_v20 = vld [vmem:[%s22746_s3 + $0x168] sm:$0xff] }
0x32d9   :  { %15877 = vmatprep.subr.bf16.mxu1 %v15876_v7  ;;  %v15880_v61 = vpack.c.bf16 %v11961_v31, %v11960_v59  ;;  %v23127_v4 = vld [vmem:[#allocation63_spill] sm:$0xff] }
0x32db   :  { %14942 = vmatmul.mubr.msk.f32.vlgmr.msra.gmra.mrb[204].mxu1 %vm1446_vm10, %v17228_v54  ;;  %v23128_v54 = vld [vmem:[#allocation64_spill] sm:$0xff] }
0x32dc   :  { %15879 = vmatpush3.bf16.msra.mxu1 %v15876_v7  ;;  %14944 = vmatprep.mubr.msk.f32.mxu1 %vm1446_vm10, %v17229_v49 }
0x32dd   :  { %15881 = vmatprep.subr.bf16.mxu1 %v15880_v61 }
0x32df   :  { %14945 = vmatmul.mubr.msk.f32.gmra.mrb[206].mxu1 %vm1446_vm10, %v17230_v53 }
0x32e0   :  { %15883 = vmatpush3.bf16.msra.mxu1 %v15880_v61  ;;  %14947 = vmatprep.mubr.msk.f32.mxu1 %vm1446_vm10, %v17231_v15 }
0x32e3   :  { %14948 = vmatmul.mubr.msk.f32.gmra.mrb[208].mxu1 %vm1446_vm10, %v17232_v16  ;;  %v17244_v16 = vld [vmem:[%s22746_s3 + $0x1f8] sm:$0xff] }
0x32e4   :  { %14950 = vmatprep.mubr.msk.f32.mxu1 %vm1446_vm10, %v17233_v26  ;;  %v17245_v26 = vld [vmem:[%s22746_s3 + $0x200] sm:$0xff] }
0x32e7   :  { %14951 = vmatmul.mubr.msk.f32.gmra.mrb[210].mxu1 %vm1446_vm10, %v17234_v32  ;;  %v17246_v32 = vld [vmem:[%s22746_s3 + $0x208] sm:$0xff] }
0x32e8   :  { %14961 = vmatprep.mubr.msk.f32.mxu1 %vm1446_vm10, %v17235_v36  ;;  %v17248_v36 = vld [vmem:[%s22746_s3 + $0x218] sm:$0xff] }
0x32eb   :  { %14962 = vmatmul.mubr.msk.f32.vlgmr.msra.gmra.mrb[204].mxu1 %vm1446_vm10, %v17236_v51  ;;  %v17249_v51 = vld [vmem:[%s22746_s3 + $0x220] sm:$0xff] }
0x32ec   :  { %14964 = vmatprep.mubr.msk.f32.mxu1 %vm1446_vm10, %v17237_v46  ;;  %v17251_v46 = vld [vmem:[%s22746_s3 + $0x230] sm:$0xff] }
0x32ef   :  { %14965 = vmatmul.mubr.msk.f32.gmra.mrb[206].mxu1 %vm1446_vm10, %v17238_v12  ;;  %v17252_v12 = vld [vmem:[%s22746_s3 + $0x238] sm:$0xff] }
0x32f0   :  { %14967 = vmatprep.mubr.msk.f32.mxu1 %vm1446_vm10, %v17239_v40  ;;  %v17253_v40 = vld [vmem:[%s22746_s3 + $0x240] sm:$0xff] }
0x32f3   :  { %14968 = vmatmul.mubr.msk.f32.gmra.mrb[208].mxu1 %vm1446_vm10, %v17240_v3  ;;  %v17254_v3 = vld [vmem:[%s22746_s3 + $0x248] sm:$0xff] }
0x32f4   :  { %14970 = vmatprep.mubr.msk.f32.mxu1 %vm1446_vm10, %v17241_v44  ;;  %v17255_v44 = vld [vmem:[%s22746_s3 + $0x250] sm:$0xff] }
0x32f7   :  { %14971 = vmatmul.mubr.msk.f32.gmra.mrb[210].mxu1 %vm1446_vm10, %v17242_v20  ;;  %v17256_v20 = vld [vmem:[%s22746_s3 + $0x258] sm:$0xff] }
0x32f8   :  { %15121 = vmatprep.mubr.msk.f32.mxu1 %vm2344_vm11, %v17243_v0  ;;  %v17257_v0 = vld [vmem:[%s22746_s3 + $0x260] sm:$0xff] }
0x33be   :  { %v14963_v63 = vpop.f32.mrb[204].mxu1 }
0x33bf   :  { %v12298_v33 = vadd.f32 %v14963_v63, %v23121_v57  ;;  %v12250_v18 = vpop.f32.mrb[205].mxu1  ;;  %v17258_v63 = vld [vmem:[%s22746_s3 + $0x268] sm:$0xff]  ;;  %v17259_v57 = vld [vmem:[%s22746_s3 + $0x2b0] sm:$0xff] }
0x33c0   :  { %v12297_v60 = vadd.f32 %v12250_v18, %v23122_v25  ;;  %v23129_v18 = vld [vmem:[#allocation65_spill] sm:$0xff] }
0x33c1   :  { %v12306_v41 = vmax.f32 %v12298_v33, 0.0 }
0x33c2   :  { %v12305_v30 = vmax.f32 %v12297_v60, 0.0  ;;  %v14966_v35 = vpop.f32.mrb[206].mxu1 }
0x33c3   :  { %v12300_v8 = vadd.f32 %v14966_v35, %v23123_v52  ;;  %v12260_v1 = vpop.f32.mrb[207].mxu1 }
0x33c4   :  { %v15884_v55 = vpack.c.bf16 %v12306_v41, %v12305_v30  ;;  %v12299_v9 = vadd.f32 %v12260_v1, %v23124_v28  ;;  %v23130_v41 = vld [vmem:[#allocation66_spill] sm:$0xff]  ;;  %v23131_v1 = vld [vmem:[#allocation67_spill] sm:$0xff] }
0x33c5   :  { %v12308_v27 = vmax.f32 %v12300_v8, 0.0 }
0x33c6   :  { %v12307_v29 = vmax.f32 %v12299_v9, 0.0  ;;  %v14969_v22 = vpop.f32.mrb[208].mxu1  ;;  %15885 = vmatprep.subr.bf16.mxu0 %v15884_v55  ;;  %v23132_v9 = vld [vmem:[#allocation68_spill] sm:$0xff] }
0x33c7   :  { %v12302_v34 = vadd.f32 %v14969_v22, %v23125_v45  ;;  %v12270_v62 = vpop.f32.mrb[209].mxu1  ;;  %15887 = vmatpush3.bf16.msra.mxu0 %v15884_v55 }
0x33c8   :  { %v15888_v39 = vpack.c.bf16 %v12308_v27, %v12307_v29  ;;  %v12301_v50 = vadd.f32 %v12270_v62, %v23126_v56 }
0x33c9   :  { %v12310_v24 = vmax.f32 %v12302_v34, 0.0 }
0x33ca   :  { %v12309_v19 = vmax.f32 %v12301_v50, 0.0  ;;  %v14972_v13 = vpop.f32.mrb[210].mxu1  ;;  %15889 = vmatprep.subr.bf16.mxu0 %v15888_v39 }
0x33cb   :  { %v12304_v7 = vadd.f32 %v14972_v13, %v23127_v4  ;;  %v12280_v59 = vpop.f32.mrb[211].mxu1  ;;  %15891 = vmatpush3.bf16.msra.mxu0 %v15888_v39  ;;  %v23133_v39 = vld [vmem:[#allocation69_spill] sm:$0xff] }
0x33cc   :  { %v15892_v31 = vpack.c.bf16 %v12310_v24, %v12309_v19  ;;  %v12303_v61 = vadd.f32 %v12280_v59, %v23128_v54  ;;  %v23134_v24 = vld [vmem:[#allocation70_spill] sm:$0xff]  ;;  %v23135_v54 = vld [vmem:[#allocation71_spill] sm:$0xff] }
0x33cd   :  { %v12312_v49 = vmax.f32 %v12304_v7, 0.0 }
0x33ce   :  { %v12311_v53 = vmax.f32 %v12303_v61, 0.0  ;;  %15893 = vmatprep.subr.bf16.mxu0 %v15892_v31 }
0x33cf   :  { %15895 = vmatpush3.bf16.msra.mxu0 %v15892_v31 }
0x33d0   :  { %v15896_v15 = vpack.c.bf16 %v12312_v49, %v12311_v53  ;;  %v23136_v53 = vld [vmem:[#allocation72_spill] sm:$0xff] }
0x33d2   :  { %15897 = vmatprep.subr.bf16.mxu0 %v15896_v15 }
0x33d3   :  { %15899 = vmatpush3.bf16.msra.mxu0 %v15896_v15 }
0x33d4   :  { %15901 = vmatprep.subr.bf16.mxu0 %v22134_v11 }
0x33d6   :  { %14990 = vmatmul.mubr.msk.f32.vlgmr.msra.gmra.mrb[138].mxu0 %vm2344_vm11, %v17244_v16 }
0x33d7   :  { %15903 = vmatpush3.bf16.msra.mxu0 %v22134_v11  ;;  %14992 = vmatprep.mubr.msk.f32.mxu0 %vm2344_vm11, %v17245_v26  ;;  %v17247_v11 = vld [vmem:[%s22746_s3 + $0x210] sm:$0xff] }
0x33d8   :  { %15905 = vmatprep.subr.bf16.mxu0 %v22139_v37 }
0x33da   :  { %14993 = vmatmul.mubr.msk.f32.gmra.mrb[140].mxu0 %vm2344_vm11, %v17246_v32 }
0x33db   :  { %15907 = vmatpush3.bf16.msra.mxu0 %v22139_v37  ;;  %14995 = vmatprep.mubr.msk.f32.mxu0 %vm2344_vm11, %v17247_v11  ;;  %v17250_v37 = vld [vmem:[%s22746_s3 + $0x228] sm:$0xff] }
0x33de   :  { %14996 = vmatmul.mubr.msk.f32.gmra.mrb[142].mxu0 %vm2344_vm11, %v17248_v36 }
0x33df   :  { %14998 = vmatprep.mubr.msk.f32.mxu0 %vm2344_vm11, %v17249_v51 }
0x33e2   :  { %14999 = vmatmul.mubr.msk.f32.gmra.mrb[144].mxu0 %vm2344_vm11, %v17250_v37  ;;  %v17260_v37 = vld [vmem:[%s22746_s3 + $0x2b8] sm:$0xff] }
0x33e3   :  { %15009 = vmatprep.mubr.msk.f32.mxu0 %vm1446_vm10, %v17251_v46  ;;  %v17261_v46 = vld [vmem:[%s22746_s3 + $0x2c0] sm:$0xff] }
0x33e6   :  { %15010 = vmatmul.mubr.msk.f32.vlgmr.msra.gmra.mrb[138].mxu0 %vm1446_vm10, %v17252_v12  ;;  %v17262_v12 = vld [vmem:[%s22746_s3 + $0x2c8] sm:$0xff] }
0x33e7   :  { %15012 = vmatprep.mubr.msk.f32.mxu0 %vm1446_vm10, %v17253_v40  ;;  %v17263_v40 = vld [vmem:[%s22746_s3 + $0x2d0] sm:$0xff] }
0x33ea   :  { %15013 = vmatmul.mubr.msk.f32.gmra.mrb[140].mxu0 %vm1446_vm10, %v17254_v3  ;;  %v17264_v3 = vld [vmem:[%s22746_s3 + $0x2d8] sm:$0xff] }
0x33eb   :  { %15015 = vmatprep.mubr.msk.f32.mxu0 %vm1446_vm10, %v17255_v44  ;;  %v17265_v44 = vld [vmem:[%s22746_s3 + $0x2e0] sm:$0xff] }
0x33ee   :  { %15016 = vmatmul.mubr.msk.f32.gmra.mrb[142].mxu0 %vm1446_vm10, %v17256_v20  ;;  %v17266_v20 = vld [vmem:[%s22746_s3 + $0x2e8] sm:$0xff] }
0x33ef   :  { %15018 = vmatprep.mubr.msk.f32.mxu0 %vm1446_vm10, %v17257_v0  ;;  %v17267_v0 = vld [vmem:[%s22746_s3 + $0x2f0] sm:$0xff] }
0x33f2   :  { %15019 = vmatmul.mubr.msk.f32.gmra.mrb[144].mxu0 %vm1446_vm10, %v17258_v63 }
0x33f3   :  { %15037 = vmatprep.mubr.msk.f32.mxu0 %vm2344_vm11, %v17259_v57 }
0x34b9   :  { %v15011_v33 = vpop.f32.mrb[138].mxu0 }
0x34ba   :  { %v16169_v25 = vadd.f32 %v23129_v18, %v15011_v33  ;;  %v12484_v60 = vpop.f32.mrb[139].mxu0 }
0x34bb   :  { %v16171_v30 = vadd.f32 %v23130_v41, %v12484_v60 }
0x34bc   :  { %v22336_v35 = vmax.f32 %v16169_v25, 0.0 }
0x34bd   :  { %v22338_v52 = vmax.f32 %v16171_v30, 0.0  ;;  %v15014_v8 = vpop.f32.mrb[140].mxu0 }
0x34be   :  { %v16173_v55 = vadd.f32 %v23131_v1, %v15014_v8  ;;  %v12494_v28 = vpop.f32.mrb[141].mxu0 }
0x34bf   :  { %v16175_v27 = vadd.f32 %v23132_v9, %v12494_v28  ;;  %v17008_v29 = vpack.i.bf16 %v22336_v35, %v22338_v52  ;;  %v15908_v22 = vpack.c.bf16 %v22336_v35, %v22338_v52 }
0x34c0   :  { %v22346_v45 = vmax.f32 %v16173_v55, 0.0 }
0x34c1   :  { %v22348_v34 = vmax.f32 %v16175_v27, 0.0  ;;  %17009 = vrot.lane.b32.xlu1 %v17008_v29, %s17310_s22  ;;  %v15017_v62 = vpop.f32.mrb[142].mxu0  ;;  %15909 = vmatprep.subr.bf16.mxu0 %v15908_v22 }
0x34c2   :  { %v16177_v56 = vadd.f32 %v23133_v39, %v15017_v62  ;;  %v12504_v50 = vpop.f32.mrb[143].mxu0  ;;  %15911 = vmatpush3.bf16.msra.mxu0 %v15908_v22 }
0x34c3   :  { %v16179_v19 = vadd.f32 %v23134_v24, %v12504_v50  ;;  %v17013_v13 = vpack.i.bf16 %v22346_v45, %v22348_v34  ;;  %v15912_v4 = vpack.c.bf16 %v22346_v45, %v22348_v34 }
0x34c4   :  { %v22357_v7 = vmax.f32 %v16177_v56, 0.0 }
0x34c5   :  { %v22359_v59 = vmax.f32 %v16179_v19, 0.0  ;;  %17014 = vrot.lane.b32.xlu0 %v17013_v13, %s17310_s22  ;;  %v15020_v31 = vpop.f32.mrb[144].mxu0  ;;  %15913 = vmatprep.subr.bf16.mxu0 %v15912_v4 }
0x34c6   :  { %v16181_v61 = vadd.f32 %v23135_v54, %v15020_v31  ;;  %v12514_v49 = vpop.f32.mrb[145].mxu0  ;;  %15915 = vmatpush3.bf16.msra.mxu0 %v15912_v4 }
0x34c7   :  { %v16183_v15 = vadd.f32 %v23136_v53, %v12514_v49  ;;  %v17018_v16 = vpack.i.bf16 %v22357_v7, %v22359_v59  ;;  %v15916_v26 = vpack.c.bf16 %v22357_v7, %v22359_v59 }
0x34c8   :  { %v22368_v32 = vmax.f32 %v16181_v61, 0.0 }
0x34c9   :  { %v22370_v11 = vmax.f32 %v16183_v15, 0.0  ;;  %17019 = vrot.lane.b32.xlu1 %v17018_v16, %s17310_s22  ;;  %15917 = vmatprep.subr.bf16.mxu0 %v15916_v26 }
0x34ca   :  { %15919 = vmatpush3.bf16.msra.mxu0 %v15916_v26 }
0x34cb   :  { %v17023_v36 = vpack.i.bf16 %v22368_v32, %v22370_v11  ;;  %v15920_v51 = vpack.c.bf16 %v22368_v32, %v22370_v11 }
0x34cd   :  { %17029 = vrot.lane.b32.xlu1 %v17008_v29, %s17311_s23  ;;  %17024 = vrot.lane.b32.xlu0 %v17023_v36, %s17310_s22 }
0x34ce   :  { %15921 = vmatprep.subr.bf16.mxu0 %v15920_v51 }
0x34cf   :  { %15923 = vmatpush3.bf16.msra.mxu0 %v15920_v51 }
0x34d1   :  { %17039 = vrot.lane.b32.xlu1 %v17018_v16, %s17311_s23  ;;  %17034 = vrot.lane.b32.xlu0 %v17013_v13, %s17311_s23 }
0x34d2   :  { %15038 = vmatmul.mubr.msk.f32.vlgmr.msra.gmra.mrb[146].mxu0 %vm2344_vm11, %v17260_v37 }
0x34d3   :  { %15040 = vmatprep.mubr.msk.f32.mxu0 %vm2344_vm11, %v17261_v46 }
0x34d5   :  { %17044 = vrot.lane.b32.xlu0 %v17023_v36, %s17311_s23 }
0x34d6   :  { %15041 = vmatmul.mubr.msk.f32.gmra.mrb[148].mxu0 %vm2344_vm11, %v17262_v12 }
0x34d7   :  { %15043 = vmatprep.mubr.msk.f32.mxu0 %vm2344_vm11, %v17263_v40 }
0x34da   :  { %15044 = vmatmul.mubr.msk.f32.gmra.mrb[150].mxu0 %vm2344_vm11, %v17264_v3 }
0x34db   :  { %15046 = vmatprep.mubr.msk.f32.mxu0 %vm2344_vm11, %v17265_v44  ;;  %v17268_v44 = vld [vmem:[%s22746_s3 + $0x2f8] sm:$0xff] }
0x34de   :  { %15047 = vmatmul.mubr.msk.f32.gmra.mrb[152].mxu0 %vm2344_vm11, %v17266_v20 }
0x34df   :  { %15065 = vmatprep.mubr.msk.f32.mxu0 %vm2344_vm11, %v17267_v0 }
0x3533   :  { %v17010_v63 = vpop.permute.xlu1 %17009 }
0x3534   :  { %v17012_v57 = vunpack.i.h.bf16 %v17010_v63  ;;  %v17011_v33 = vunpack.i.l.bf16 %v17010_v63 }
0x3536   :  { %v12579_v18 = vsel %vm35_vm1, %v22338_v52, %v17011_v33  ;;  %v12580_v25 = vsel %vm35_vm1, %v22336_v35, %v17012_v57  ;;  %v17269_v57 = vld [vmem:[%s22746_s3 + $0x300] sm:$0xff] }
0x3537   :  { %v17015_v60 = vpop.permute.xlu0 %17014  ;;  %v15924_v41 = vpack.c.bf16 %v12580_v25, %v12579_v18  ;;  %v17270_v25 = vld [vmem:[%s22746_s3 + $0x308] sm:$0xff] }
0x3538   :  { %v17017_v30 = vunpack.i.h.bf16 %v17015_v60  ;;  %v17016_v8 = vunpack.i.l.bf16 %v17015_v60 }
0x3539   :  { %15925 = vmatprep.subr.bf16.mxu0 %v15924_v41 }
0x353a   :  { %15927 = vmatpush3.bf16.msra.mxu0 %v15924_v41  ;;  %v12581_v1 = vsel %vm35_vm1, %v22348_v34, %v17016_v8  ;;  %v12582_v55 = vsel %vm35_vm1, %v22346_v45, %v17017_v30  ;;  %v17271_v41 = vld [vmem:[%s22746_s3 + $0x310] sm:$0xff] }
0x353b   :  { %v17020_v28 = vpop.permute.xlu1 %17019  ;;  %v15928_v9 = vpack.c.bf16 %v12582_v55, %v12581_v1  ;;  %v17272_v1 = vld [vmem:[%s22746_s3 + $0x318] sm:$0xff] }
0x353c   :  { %v17022_v27 = vunpack.i.h.bf16 %v17020_v28  ;;  %v17021_v29 = vunpack.i.l.bf16 %v17020_v28  ;;  %v17273_v28 = vld [vmem:[%s22746_s3 + $0x320] sm:$0xff] }
0x353d   :  { %15929 = vmatprep.subr.bf16.mxu0 %v15928_v9 }
0x353e   :  { %15931 = vmatpush3.bf16.msra.mxu0 %v15928_v9  ;;  %v12583_v22 = vsel %vm35_vm1, %v22359_v59, %v17021_v29  ;;  %v12584_v62 = vsel %vm35_vm1, %v22357_v7, %v17022_v27  ;;  %v17274_v9 = vld [vmem:[%s22746_s3 + $0x328] sm:$0xff]  ;;  %v17275_v27 = vld [vmem:[%s22746_s3 + $0x270] sm:$0xff]  ;;  %v17276_v29 = vld [vmem:[%s22746_s3 + $0x278] sm:$0xff] }
0x353f   :  { %v17030_v39 = vpop.permute.xlu1 %17029  ;;  %v17025_v56 = vpop.permute.xlu0 %17024  ;;  %v15932_v50 = vpack.c.bf16 %v12584_v62, %v12583_v22  ;;  %v17277_v22 = vld [vmem:[%s22746_s3 + $0x280] sm:$0xff]  ;;  %v17278_v62 = vld [vmem:[%s22746_s3 + $0x288] sm:$0xff] }
0x3540   :  { %v17032_v24 = vunpack.i.h.bf16 %v17030_v39  ;;  %v17031_v19 = vunpack.i.l.bf16 %v17030_v39  ;;  %v17027_v13 = vunpack.i.h.bf16 %v17025_v56  ;;  %v17026_v4 = vunpack.i.l.bf16 %v17025_v56  ;;  %v17279_v39 = vld [vmem:[%s22746_s3 + $0x290] sm:$0xff]  ;;  %v17280_v56 = vld [vmem:[%s22746_s3 + $0x298] sm:$0xff] }
0x3541   :  { %15933 = vmatprep.subr.bf16.mxu0 %v15932_v50 }
0x3542   :  { %15935 = vmatpush3.bf16.msra.mxu0 %v15932_v50  ;;  %v12585_v31 = vsel %vm35_vm1, %v22370_v11, %v17026_v4  ;;  %v12586_v54 = vsel %vm35_vm1, %v22368_v32, %v17027_v13  ;;  %v12555_v61 = vsel %vm34_vm0, %v22338_v52, %v17031_v19  ;;  %v12556_v49 = vsel %vm34_vm0, %v22336_v35, %v17032_v24  ;;  %v17281_v50 = vld [vmem:[%s22746_s3 + $0x2a0] sm:$0xff]  ;;  %v17282_v24 = vld [vmem:[%s22746_s3 + $0x2a8] sm:$0xff]  ;;  %v23137_v13 = vld [vmem:[#allocation73_spill] sm:$0xff] }
0x3543   :  { %v17040_v53 = vpop.permute.xlu1 %17039  ;;  %v17035_v15 = vpop.permute.xlu0 %17034  ;;  %v15936_v16 = vpack.c.bf16 %v12586_v54, %v12585_v31  ;;  %v15940_v51 = vpack.c.bf16 %v12556_v49, %v12555_v61  ;;  %v23138_v54 = vld [vmem:[#allocation74_spill] sm:$0xff] }
0x3544   :  { %v17037_v26 = vunpack.i.h.bf16 %v17035_v15  ;;  %v17036_v36 = vunpack.i.l.bf16 %v17035_v15  ;;  %v17042_v37 = vunpack.i.h.bf16 %v17040_v53  ;;  %v17041_v46 = vunpack.i.l.bf16 %v17040_v53 }
0x3545   :  { %15937 = vmatprep.subr.bf16.mxu0 %v15936_v16 }
0x3546   :  { %15939 = vmatpush3.bf16.msra.mxu0 %v15936_v16  ;;  %v12557_v12 = vsel %vm34_vm0, %v22348_v34, %v17036_v36  ;;  %v12558_v40 = vsel %vm34_vm0, %v22346_v45, %v17037_v26  ;;  %v12559_v33 = vsel %vm34_vm0, %v22359_v59, %v17041_v46  ;;  %v12560_v18 = vsel %vm34_vm0, %v22357_v7, %v17042_v37  ;;  %v23139_v16 = vld [vmem:[#allocation75_spill] sm:$0xff]  ;;  %v23140_v37 = vld [vmem:[#allocation76_spill] sm:$0xff] }
0x3547   :  { %v17045_v3 = vpop.permute.xlu0 %17044  ;;  %15941 = vmatprep.subr.bf16.mxu0 %v15940_v51  ;;  %v15944_v20 = vpack.c.bf16 %v12558_v40, %v12557_v12  ;;  %v15948_v60 = vpack.c.bf16 %v12560_v18, %v12559_v33 }
0x3548   :  { %v17047_v0 = vunpack.i.h.bf16 %v17045_v3  ;;  %v17046_v63 = vunpack.i.l.bf16 %v17045_v3 }
0x3549   :  { %15066 = vmatmul.mubr.msk.f32.vlgmr.msra.gmra.mrb[146].mxu0 %vm2344_vm11, %v17268_v44 }
0x354a   :  { %15943 = vmatpush3.bf16.msra.mxu0 %v15940_v51  ;;  %15068 = vmatprep.mubr.msk.f32.mxu0 %vm2344_vm11, %v17269_v57  ;;  %v12561_v30 = vsel %vm34_vm0, %v22370_v11, %v17046_v63  ;;  %v12562_v8 = vsel %vm34_vm0, %v22368_v32, %v17047_v0  ;;  %v23142_v63 = vld [vmem:[#allocation78_spill] sm:$0xff] }
0x354b   :  { %15945 = vmatprep.subr.bf16.mxu0 %v15944_v20  ;;  %v15952_v55 = vpack.c.bf16 %v12562_v8, %v12561_v30 }
0x354d   :  { %15069 = vmatmul.mubr.msk.f32.gmra.mrb[148].mxu0 %vm2344_vm11, %v17270_v25 }
0x354e   :  { %15947 = vmatpush3.bf16.msra.mxu0 %v15944_v20  ;;  %15071 = vmatprep.mubr.msk.f32.mxu0 %vm2344_vm11, %v17271_v41 }
0x354f   :  { %15949 = vmatprep.subr.bf16.mxu0 %v15948_v60 }
0x3551   :  { %15072 = vmatmul.mubr.msk.f32.gmra.mrb[150].mxu0 %vm2344_vm11, %v17272_v1  ;;  %v23144_v1 = vld [vmem:[#allocation80_spill] sm:$0xff] }
0x3552   :  { %15951 = vmatpush3.bf16.msra.mxu0 %v15948_v60  ;;  %15074 = vmatprep.mubr.msk.f32.mxu0 %vm2344_vm11, %v17273_v28  ;;  %v23143_v60 = vld [vmem:[#allocation79_spill] sm:$0xff] }
0x3553   :  { %15953 = vmatprep.subr.bf16.mxu0 %v15952_v55 }
0x3555   :  { %15075 = vmatmul.mubr.msk.f32.gmra.mrb[152].mxu0 %vm2344_vm11, %v17274_v9 }
0x3556   :  { %15955 = vmatpush3.bf16.msra.mxu0 %v15952_v55  ;;  %15093 = vmatprep.mubr.msk.f32.mxu0 %vm2344_vm11, %v17275_v27 }
0x3557   :  { %16004 = vmatprep.subr.bf16.mxu0 %v23049_v21 }
0x3559   :  { %15094 = vmatmul.mubr.msk.f32.vlgmr.msra.gmra.mrb[146].mxu0 %vm2344_vm11, %v17276_v29  ;;  %v17283_v29 = vld [vmem:[%s22746_s3 + $0x338] sm:$0xff] }
0x355a   :  { %15096 = vmatprep.mubr.msk.f32.mxu0 %vm2344_vm11, %v17277_v22  ;;  %v17284_v22 = vld [vmem:[%s22746_s3 + $0x340] sm:$0xff] }
0x355d   :  { %15097 = vmatmul.mubr.msk.f32.gmra.mrb[148].mxu0 %vm2344_vm11, %v17278_v62  ;;  %v17285_v62 = vld [vmem:[%s22746_s3 + $0x348] sm:$0xff] }
0x355e   :  { %15099 = vmatprep.mubr.msk.f32.mxu0 %vm2344_vm11, %v17279_v39  ;;  %v17286_v39 = vld [vmem:[%s22746_s3 + $0x350] sm:$0xff] }
0x3561   :  { %15100 = vmatmul.mubr.msk.f32.gmra.mrb[150].mxu0 %vm2344_vm11, %v17280_v56  ;;  %v17287_v56 = vld [vmem:[%s22746_s3 + $0x358] sm:$0xff] }
0x3562   :  { %15102 = vmatprep.mubr.msk.f32.mxu0 %vm2344_vm11, %v17281_v50  ;;  %v17288_v50 = vld [vmem:[%s22746_s3 + $0x360] sm:$0xff] }
0x3565   :  { %15103 = vmatmul.mubr.msk.f32.gmra.mrb[152].mxu0 %vm2344_vm11, %v17282_v24  ;;  %v17289_v24 = vld [vmem:[%s22746_s3 + $0x368] sm:$0xff] }
0x3566   :  { %15205 = vmatprep.mubr.msk.f32.mxu0 %vm17314_vm12, %v22944_v58  ;;  %v23141_v58 = vld [vmem:[#allocation77_spill] sm:$0xff] }
0x362c   :  { %v15095_v19 = vpop.f32.mrb[146].mxu0 }
0x362d   :  { %v12911_v4 = vadd.f32 %v15095_v19, %v23137_v13  ;;  %v12863_v31 = vpop.f32.mrb[147].mxu0  ;;  %v17290_v19 = vld [vmem:[%s22746_s3 + $0x370] sm:$0xff] }
0x362e   :  { %v12910_v61 = vadd.f32 %v12863_v31, %v23138_v54 }
0x362f   :  { %v12919_v49 = vmax.f32 %v12911_v4, 0.0  ;;  %v23145_v4 = vld [vmem:[#allocation81_spill] sm:$0xff] }
0x3630   :  { %v12918_v53 = vmax.f32 %v12910_v61, 0.0  ;;  %v15098_v15 = vpop.f32.mrb[148].mxu0  ;;  %v23146_v61 = vld [vmem:[#allocation82_spill] sm:$0xff] }
0x3631   :  { %v12913_v26 = vadd.f32 %v15098_v15, %v23139_v16  ;;  %v12873_v36 = vpop.f32.mrb[149].mxu0 }
0x3632   :  { %v15956_v51 = vpack.c.bf16 %v12919_v49, %v12918_v53  ;;  %v12912_v46 = vadd.f32 %v12873_v36, %v23140_v37  ;;  %v23147_v36 = vld [vmem:[#allocation83_spill] sm:$0xff] }
0x3633   :  { %v12921_v12 = vmax.f32 %v12913_v26, 0.0 }
0x3634   :  { %v12920_v40 = vmax.f32 %v12912_v46, 0.0  ;;  %v15101_v3 = vpop.f32.mrb[150].mxu0  ;;  %15957 = vmatprep.subr.bf16.mxu1 %v15956_v51 }
0x3635   :  { %v12915_v44 = vadd.f32 %v15101_v3, %v23141_v58  ;;  %v12883_v20 = vpop.f32.mrb[151].mxu0  ;;  %15959 = vmatpush3.bf16.msra.mxu1 %v15956_v51 }
0x3636   :  { %v15960_v0 = vpack.c.bf16 %v12921_v12, %v12920_v40  ;;  %v12914_v57 = vadd.f32 %v12883_v20, %v23142_v63  ;;  %v23148_v12 = vld [vmem:[#allocation84_spill] sm:$0xff]  ;;  %v23149_v20 = vld [vmem:[#allocation85_spill] sm:$0xff] }
0x3637   :  { %v12923_v33 = vmax.f32 %v12915_v44, 0.0 }
0x3638   :  { %v12922_v18 = vmax.f32 %v12914_v57, 0.0  ;;  %v15104_v25 = vpop.f32.mrb[152].mxu0  ;;  %15961 = vmatprep.subr.bf16.mxu1 %v15960_v0 }
0x3639   :  { %v12917_v41 = vadd.f32 %v15104_v25, %v23143_v60  ;;  %v12893_v30 = vpop.f32.mrb[153].mxu0  ;;  %15963 = vmatpush3.bf16.msra.mxu1 %v15960_v0 }
0x363a   :  { %v15964_v8 = vpack.c.bf16 %v12923_v33, %v12922_v18  ;;  %v12916_v55 = vadd.f32 %v12893_v30, %v23144_v1  ;;  %v23150_v33 = vld [vmem:[#allocation86_spill] sm:$0xff]  ;;  %v23151_v30 = vld [vmem:[#allocation87_spill] sm:$0xff] }
0x363b   :  { %v12925_v28 = vmax.f32 %v12917_v41, 0.0 }
0x363c   :  { %v12924_v9 = vmax.f32 %v12916_v55, 0.0  ;;  %15965 = vmatprep.subr.bf16.mxu1 %v15964_v8 }
0x363d   :  { %15967 = vmatpush3.bf16.msra.mxu1 %v15964_v8 }
0x363e   :  { %v15968_v27 = vpack.c.bf16 %v12925_v28, %v12924_v9  ;;  %v23152_v28 = vld [vmem:[#allocation88_spill] sm:$0xff] }
0x3640   :  { %15969 = vmatprep.subr.bf16.mxu1 %v15968_v27 }
0x3641   :  { %15971 = vmatpush3.bf16.msra.mxu1 %v15968_v27 }
0x3644   :  { %15122 = vmatmul.mubr.msk.f32.vlgmr.msra.gmra.mrb[212].mxu1 %vm2344_vm11, %v17283_v29 }
0x3645   :  { %15124 = vmatprep.mubr.msk.f32.mxu1 %vm2344_vm11, %v17284_v22 }
0x3648   :  { %15125 = vmatmul.mubr.msk.f32.gmra.mrb[214].mxu1 %vm2344_vm11, %v17285_v62  ;;  %v17292_v62 = vld [vmem:[%s22746_s3 + $0x380] sm:$0xff] }
0x3649   :  { %15127 = vmatprep.mubr.msk.f32.mxu1 %vm2344_vm11, %v17286_v39  ;;  %v17293_v39 = vld [vmem:[%s22746_s3 + $0x388] sm:$0xff] }
0x364c   :  { %15128 = vmatmul.mubr.msk.f32.gmra.mrb[216].mxu1 %vm2344_vm11, %v17287_v56  ;;  %v17294_v56 = vld [vmem:[%s22746_s3 + $0x390] sm:$0xff] }
0x364d   :  { %15130 = vmatprep.mubr.msk.f32.mxu1 %vm2344_vm11, %v17288_v50  ;;  %v17295_v50 = vld [vmem:[%s22746_s3 + $0x398] sm:$0xff] }
0x3650   :  { %15131 = vmatmul.mubr.msk.f32.gmra.mrb[218].mxu1 %vm2344_vm11, %v17289_v24  ;;  %v17296_v24 = vld [vmem:[%s22746_s3 + $0x3a0] sm:$0xff] }
0x3651   :  { %15149 = vmatprep.mubr.msk.f32.mxu1 %vm2344_vm11, %v17290_v19  ;;  %v17297_v19 = vld [vmem:[%s22746_s3 + $0x3a8] sm:$0xff] }
0x3717   :  { %v15123_v13 = vpop.f32.mrb[212].mxu1 }
0x3718   :  { %v12998_v31 = vadd.f32 %v15123_v13, %v23145_v4  ;;  %v12992_v54 = vpop.f32.mrb[213].mxu1  ;;  %v17298_v13 = vld [vmem:[%s22746_s3 + $0x3b0] sm:$0xff] }
0x3719   :  { %v12993_v49 = vadd.f32 %v12992_v54, %v23146_v61  ;;  %v23153_v61 = vld [vmem:[#allocation89_spill] sm:$0xff] }
0x371a   :  { %v22568_v53 = vadd.f32 %v12998_v31, %v22336_v35 }
0x371b   :  { %v22571_v15 = vadd.f32 %v12993_v49, %v22338_v52  ;;  %v15126_v16 = vpop.f32.mrb[214].mxu1 }
0x371c   :  { %v13040_v26 = vmax.f32 %v22568_v53, 0.0  ;;  %v13008_v51 = vadd.f32 %v15126_v16, %v23147_v36  ;;  %v13002_v37 = vpop.f32.mrb[215].mxu1 }
0x371d   :  { %v13039_v46 = vmax.f32 %v22571_v15, 0.0  ;;  %v13003_v40 = vadd.f32 %v13002_v37, %v23148_v12  ;;  %v23154_v37 = vld [vmem:[#allocation90_spill] sm:$0xff] }
0x371e   :  { %v22578_v3 = vadd.f32 %v13008_v51, %v22346_v45 }
0x371f   :  { %v22581_v58 = vadd.f32 %v13003_v40, %v22348_v34  ;;  %v15129_v35 = vpop.f32.mrb[216].mxu1  ;;  %v15972_v52 = vpack.c.bf16 %v13040_v26, %v13039_v46 }
0x3720   :  { %v13042_v44 = vmax.f32 %v22578_v3, 0.0  ;;  %v13018_v0 = vadd.f32 %v15129_v35, %v23149_v20  ;;  %v13012_v63 = vpop.f32.mrb[217].mxu1 }
0x3721   :  { %v13041_v57 = vmax.f32 %v22581_v58, 0.0  ;;  %v13013_v18 = vadd.f32 %v13012_v63, %v23150_v33  ;;  %15973 = vmatprep.subr.bf16.mxu1 %v15972_v52 }
0x3722   :  { %v22592_v45 = vadd.f32 %v13018_v0, %v22357_v7  ;;  %15975 = vmatpush3.bf16.msra.mxu1 %v15972_v52  ;;  %v23155_v52 = vld [vmem:[#allocation91_spill] sm:$0xff] }
0x3723   :  { %v22595_v34 = vadd.f32 %v13013_v18, %v22359_v59  ;;  %v15132_v25 = vpop.f32.mrb[218].mxu1  ;;  %v15976_v60 = vpack.c.bf16 %v13042_v44, %v13041_v57  ;;  %v23156_v18 = vld [vmem:[#allocation92_spill] sm:$0xff] }
0x3724   :  { %v13044_v41 = vmax.f32 %v22592_v45, 0.0  ;;  %v13028_v8 = vadd.f32 %v15132_v25, %v23151_v30  ;;  %v13022_v1 = vpop.f32.mrb[219].mxu1  ;;  %v23157_v30 = vld [vmem:[#allocation93_spill] sm:$0xff] }
0x3725   :  { %v13043_v55 = vmax.f32 %v22595_v34, 0.0  ;;  %v13023_v7 = vadd.f32 %v13022_v1, %v23152_v28  ;;  %15977 = vmatprep.subr.bf16.mxu1 %v15976_v60 }
0x3726   :  { %v22606_v9 = vadd.f32 %v13028_v8, %v22368_v32  ;;  %15979 = vmatpush3.bf16.msra.mxu1 %v15976_v60 }
0x3727   :  { %v22609_v59 = vadd.f32 %v13023_v7, %v22370_v11  ;;  %v15980_v27 = vpack.c.bf16 %v13044_v41, %v13043_v55  ;;  %v17291_v11 = vld [vmem:[%s22746_s3 + $0x378] sm:$0xff] }
0x3728   :  { %v13046_v29 = vmax.f32 %v22606_v9, 0.0  ;;  %v23163_v9 = vld [vmem:[#allocation99_spill] sm:$0xff] }
0x3729   :  { %v13045_v22 = vmax.f32 %v22609_v59, 0.0  ;;  %15981 = vmatprep.subr.bf16.mxu1 %v15980_v27  ;;  %v10776_v59 = vadd.f32 %v21958_v42, %v23163_v9 }
0x372a   :  { %15983 = vmatpush3.bf16.msra.mxu1 %v15980_v27  ;;  %v23158_v27 = vld [vmem:[#allocation94_spill] sm:$0xff] }
0x372b   :  { %v15984_v32 = vpack.c.bf16 %v13046_v29, %v13045_v22 }
0x372d   :  { %15985 = vmatprep.subr.bf16.mxu1 %v15984_v32 }
0x372e   :  { %15987 = vmatpush3.bf16.msra.mxu1 %v15984_v32 }
0x3731   :  { %15150 = vmatmul.mubr.msk.f32.vlgmr.msra.gmra.mrb[220].mxu1 %vm2344_vm11, %v17291_v11 }
0x3732   :  { %15152 = vmatprep.mubr.msk.f32.mxu1 %vm2344_vm11, %v17292_v62 }
0x3735   :  { %15153 = vmatmul.mubr.msk.f32.gmra.mrb[222].mxu1 %vm2344_vm11, %v17293_v39  ;;  %v23159_v39 = vld [vmem:[#allocation95_spill] sm:$0xff] }
0x3736   :  { %15155 = vmatprep.mubr.msk.f32.mxu1 %vm2344_vm11, %v17294_v56 }
0x3739   :  { %15156 = vmatmul.mubr.msk.f32.gmra.mrb[224].mxu1 %vm2344_vm11, %v17295_v50 }
0x373a   :  { %15158 = vmatprep.mubr.msk.f32.mxu1 %vm2344_vm11, %v17296_v24 }
0x373d   :  { %15159 = vmatmul.mubr.msk.f32.gmra.mrb[226].mxu1 %vm2344_vm11, %v17297_v19 }
0x373e   :  { %15177 = vmatprep.mubr.msk.f32.mxu1 %vm2344_vm11, %v17298_v13  ;;  %v17299_v13 = vld [vmem:[%s22746_s3 + $0x3b8] sm:$0xff] }
0x3804   :  { %v15151_v4 = vpop.f32.mrb[220].mxu1 }
0x3805   :  { %v13119_v31 = vadd.f32 %v15151_v4, %v20326_v48  ;;  %v13113_v54 = vpop.f32.mrb[221].mxu1  ;;  %v17300_v4 = vld [vmem:[%s22746_s3 + $0x3c0] sm:$0xff] }
0x3806   :  { %v13114_v49 = vadd.f32 %v13113_v54, %v23153_v61  ;;  %v17302_v54 = vld [vmem:[%s22746_s3 + $0x3d0] sm:$0xff]  ;;  %v17303_v61 = vld [vmem:[%s22746_s3 + $0x3d8] sm:$0xff] }
0x3807   :  { %v13153_v16 = vmax.f32 %v13119_v31, 0.0  ;;  %v17301_v31 = vld [vmem:[%s22746_s3 + $0x3c8] sm:$0xff] }
0x3808   :  { %v13152_v36 = vmax.f32 %v13114_v49, 0.0  ;;  %v15154_v51 = vpop.f32.mrb[222].mxu1  ;;  %v17304_v49 = vld [vmem:[%s22746_s3 + $0x3e0] sm:$0xff] }
0x3809   :  { %v13129_v12 = vadd.f32 %v15154_v51, %v23154_v37  ;;  %v13123_v40 = vpop.f32.mrb[223].mxu1 }
0x380a   :  { %v15988_v35 = vpack.c.bf16 %v13153_v16, %v13152_v36  ;;  %v13124_v20 = vadd.f32 %v13123_v40, %v23155_v52  ;;  %v17305_v16 = vld [vmem:[%s22746_s3 + $0x3e8] sm:$0xff] }
0x380b   :  { %v13155_v0 = vmax.f32 %v13129_v12, 0.0  ;;  %v23160_v12 = vld [vmem:[#allocation96_spill] sm:$0xff] }
0x380c   :  { %v13154_v63 = vmax.f32 %v13124_v20, 0.0  ;;  %v15157_v33 = vpop.f32.mrb[224].mxu1  ;;  %15989 = vmatprep.subr.bf16.mxu1 %v15988_v35 }
0x380d   :  { %v13139_v25 = vadd.f32 %v15157_v33, %v23156_v18  ;;  %v13133_v60 = vpop.f32.mrb[225].mxu1  ;;  %15991 = vmatpush3.bf16.msra.mxu1 %v15988_v35 }
0x380e   :  { %v15992_v48 = vpack.c.bf16 %v13155_v0, %v13154_v63  ;;  %v13134_v8 = vadd.f32 %v13133_v60, %v23157_v30  ;;  %v23161_v63 = vld [vmem:[#allocation97_spill] sm:$0xff]  ;;  %v23162_v60 = vld [vmem:[#allocation98_spill] sm:$0xff] }
0x380f   :  { %v13157_v1 = vmax.f32 %v13139_v25, 0.0 }
0x3810   :  { %v13156_v28 = vmax.f32 %v13134_v8, 0.0  ;;  %v15160_v7 = vpop.f32.mrb[226].mxu1  ;;  %15993 = vmatprep.subr.bf16.mxu1 %v15992_v48 }
0x3811   :  { %v13149_v32 = vadd.f32 %v15160_v7, %v23158_v27  ;;  %v13143_v11 = vpop.f32.mrb[227].mxu1  ;;  %15995 = vmatpush3.bf16.msra.mxu1 %v15992_v48 }
0x3812   :  { %v15996_v62 = vpack.c.bf16 %v13157_v1, %v13156_v28  ;;  %v13144_v56 = vadd.f32 %v13143_v11, %v23159_v39 }
0x3813   :  { %v13159_v50 = vmax.f32 %v13149_v32, 0.0 }
0x3814   :  { %v13158_v24 = vmax.f32 %v13144_v56, 0.0  ;;  %15997 = vmatprep.subr.bf16.mxu1 %v15996_v62 }
0x3815   :  { %15999 = vmatpush3.bf16.msra.mxu1 %v15996_v62  ;;  %v13360_v62 = vand.u32 2147483647, %v10776_v59 }
0x3816   :  { %v16000_v19 = vpack.c.bf16 %v13159_v50, %v13158_v24 }
0x3817   :  { %v13361_v50 = vsub.f32 %v10776_v59, %v13360_v62 }
0x3818   :  { %16001 = vmatprep.subr.bf16.mxu1 %v16000_v19 }
0x3819   :  { %16003 = vmatpush3.bf16.msra.mxu1 %v16000_v19 }
0x381c   :  { %15178 = vmatmul.mubr.msk.f32.vlgmr.msra.gmra.mrb[228].mxu1 %vm2344_vm11, %v17299_v13 }
0x381d   :  { %15180 = vmatprep.mubr.msk.f32.mxu1 %vm2344_vm11, %v17300_v4 }
0x3820   :  { %15181 = vmatmul.mubr.msk.f32.gmra.mrb[230].mxu1 %vm2344_vm11, %v17301_v31 }
0x3821   :  { %15183 = vmatprep.mubr.msk.f32.mxu1 %vm2344_vm11, %v17302_v54 }
0x3824   :  { %15184 = vmatmul.mubr.msk.f32.gmra.mrb[232].mxu1 %vm2344_vm11, %v17303_v61 }
0x3825   :  { %15186 = vmatprep.mubr.msk.f32.mxu1 %vm2344_vm11, %v17304_v49 }
0x3828   :  { %15187 = vmatmul.mubr.msk.f32.gmra.mrb[234].mxu1 %vm2344_vm11, %v17305_v16 }
0x38ef   :  { %v15179_v36 = vpop.f32.mrb[228].mxu1 }
0x38f0   :  { %v13232_v51 = vadd.f32 %v15179_v36, %v20382_v38  ;;  %v13226_v37 = vpop.f32.mrb[229].mxu1 }
0x38f1   :  { %v13227_v40 = vadd.f32 %v13226_v37, %v23160_v12 }
0x38f2   :  { %v13266_v35 = vadd.f32 %v13232_v51, %v13040_v26 }
0x38f3   :  { %v13265_v52 = vadd.f32 %v13227_v40, %v13039_v46  ;;  %v15182_v20 = vpop.f32.mrb[230].mxu1 }
0x38f4   :  { %v13274_v0 = vmax.f32 %v13266_v35, 0.0  ;;  %v13242_v33 = vadd.f32 %v15182_v20, %v23161_v63  ;;  %v13236_v18 = vpop.f32.mrb[231].mxu1 }
0x38f5   :  { %v13273_v25 = vmax.f32 %v13265_v52, 0.0  ;;  %v13237_v48 = vadd.f32 %v13236_v18, %v23162_v60 }
0x38f6   :  { %v13268_v38 = vadd.f32 %v13242_v33, %v13042_v44 }
0x38f7   :  { %v16005_v30 = vpack.c.bf16 %v13274_v0, %v13273_v25  ;;  %v13267_v8 = vadd.f32 %v13237_v48, %v13041_v57  ;;  %v15185_v53 = vpop.f32.mrb[232].mxu1 }
0x38f8   :  { %v13276_v26 = vmax.f32 %v13268_v38, 0.0  ;;  %v13252_v15 = vadd.f32 %v15185_v53, %v20397_v43  ;;  %v13246_v46 = vpop.f32.mrb[233].mxu1  ;;  %v13386_v53 = vsub.f32 %v20455_v10, %v20467_v17 }
0x38f9   :  { %v13275_v1 = vmax.f32 %v13267_v8, 0.0  ;;  %v13247_v28 = vadd.f32 %v13246_v46, %v20400_v23  ;;  %16006 = vmatpush3.bf16.msra.mxu0 %v16005_v30 }
0x38fa   :  { %v13270_v7 = vadd.f32 %v13252_v15, %v13044_v41  ;;  %16007 = vmatprep.subr.bf16.mxu0 %v23049_v21 }
0x38fb   :  { %v16008_v3 = vpack.c.bf16 %v13276_v26, %v13275_v1  ;;  %v13269_v44 = vadd.f32 %v13247_v28, %v13043_v55  ;;  %v15188_v58 = vpop.f32.mrb[234].mxu1  ;;  %v13384_v26 = vsub.f32 %v20479_v14, %v20455_v10 }
0x38fc   :  { %v13278_v57 = vmax.f32 %v13270_v7, 0.0  ;;  %v13262_v27 = vadd.f32 %v15188_v58, %v20411_v47  ;;  %v13256_v32 = vpop.f32.mrb[235].mxu1 }
0x38fd   :  { %v13277_v43 = vmax.f32 %v13269_v44, 0.0  ;;  %v13257_v11 = vadd.f32 %v13256_v32, %v20415_v2  ;;  %16009 = vmatpush3.bf16.msra.mxu0 %v16008_v3  ;;  %v17306_v2 = vld [vmem:[%s22746_s3 + $0x3f0] sm:$0xf] }
0x38fe   :  { %v13272_v23 = vadd.f32 %v13262_v27, %v13046_v29  ;;  %16010 = vmatprep.subr.bf16.mxu0 %v23049_v21  ;;  %v10774_v29 = vadd.f32 %v21956_v6, %v23163_v9 }
0x38ff   :  { %v16011_v45 = vpack.c.bf16 %v13278_v57, %v13277_v43  ;;  %v13271_v41 = vadd.f32 %v13257_v11, %v13045_v22 }
0x3900   :  { %v13280_v34 = vmax.f32 %v13272_v23, 0.0  ;;  %v13372_v22 = vand.u32 2147483647, %v10774_v29 }
0x3901   :  { %v13279_v55 = vmax.f32 %v13271_v41, 0.0  ;;  %16012 = vmatpush3.bf16.msra.mxu0 %v16011_v45 }
0x3902   :  { %16013 = vmatprep.subr.bf16.mxu0 %v23049_v21  ;;  %v13373_v56 = vadd.f32 %v13372_v22, %v10774_v29  ;;  %v23164_v21 = vld [vmem:[#allocation100_spill] sm:$0xff] }
0x3903   :  { %v16014_v47 = vpack.c.bf16 %v13280_v34, %v13279_v55 }
0x3905   :  { %16015 = vmatpush3.bf16.msra.mxu0 %v16014_v47 }
0x3908   :  { %15206 = vmatmul.mubr.msk.f32.vlgmr.msra.gmra.mrb[154].mxu0 %vm2344_vm11, %v17306_v2 }
0x39db   :  { %v13347_v39 = vpop.f32.mrb[154].mxu0 }
0x39dc   :  { %v13348_v24 = vadd.f32 %v13347_v39, %v23164_v21  ;;  %v15207_v19 = vpop.f32.mrb[155].mxu0 }
0x39de   :  { %v13351_v13 = vmul.f32 %v13348_v24, %v13348_v24  ;;  %v13362_v4 = vmul.f32 %v13361_v50, %v13348_v24  ;;  %v13374_v31 = vmul.f32 %v13373_v56, %v13348_v24 }
0x39e0   :  { %v13352_v54 = vsel %vm7676_vm13, %v13351_v13, 0.0  ;;  %v13363_v61 = vmul.f32 %v13362_v4, %v13348_v24  ;;  %v13375_v49 = vmul.f32 %v13374_v31, %v13348_v24 }
0x39e1   :  { %v13353_v16 = vrot.slane %v13352_v54, 4 }
0x39e2   :  { %v13364_v6 = vsel %vm7676_vm13, %v13363_v61, 0.0  ;;  %v13376_v42 = vsel %vm7676_vm13, %v13375_v49, 0.0 }
0x39e3   :  { %v13354_v36 = vadd.f32 %v13353_v16, %v13352_v54  ;;  %v13365_v51 = vrot.slane %v13364_v6, 4  ;;  %v13377_v37 = vrot.slane %v13376_v42, 4 }
0x39e5   :  { %v13355_v12 = vrot.slane %v13354_v36, 2  ;;  %v13366_v40 = vadd.f32 %v13365_v51, %v13364_v6  ;;  %v13378_v35 = vadd.f32 %v13377_v37, %v13376_v42 }
0x39e7   :  { %v13356_v52 = vadd.f32 %v13355_v12, %v13354_v36  ;;  %v13367_v0 = vrot.slane %v13366_v40, 2  ;;  %v13379_v63 = vrot.slane %v13378_v35, 2 }
0x39e9   :  { %v13357_v20 = vrot.slane %v13356_v52, 1  ;;  %v13368_v18 = vadd.f32 %v13367_v0, %v13366_v40  ;;  %v13380_v25 = vadd.f32 %v13379_v63, %v13378_v35 }
0x39eb   :  { %v13358_v33 = vadd.f32 %v13357_v20, %v13356_v52  ;;  %v13369_v60 = vrot.slane %v13368_v18, 1  ;;  %v13381_v48 = vrot.slane %v13380_v25, 1 }
0x39ed   :  { %17050 = vrcp.f32 %v13358_v33  ;;  %v13370_v38 = vadd.f32 %v13369_v60, %v13368_v18  ;;  %v13382_v30 = vadd.f32 %v13381_v48, %v13380_v25 }
0x39f7   :  { %v17051_v8 = vpop.eup %17050 }
0x39f8   :  { %v13371_v15 = vmul.f32 %v17051_v8, %v13370_v38  ;;  %v13383_v46 = vmul.f32 %v17051_v8, %v13382_v30 }
0x39fa   :  { %v13385_v1 = vmul.f32 %v13384_v26, %v13371_v15  ;;  %v13387_v28 = vmul.f32 %v13386_v53, %v13383_v46 }
0x39fc   :  { %v13388_v7 = vadd.f32 %v13387_v28, %v13385_v1 }
0x39fe   :  { %v13389_v3 = vmul.f32 1.1, %v13388_v7 }
0x3a00   :  { %v13390_v44 = vsub.f32 %v20455_v10, %v13389_v3 }
0x3a02   :  { %13391 = vrot.lane.b32.xlu0 %v13390_v44, %s17315_s19  ;;  %13393 = vrot.lane.b32.xlu1 %v13390_v44, %s17316_s24 }
0x3a74   :  { %v13392_v58 = vpop.permute.xlu0 %13391  ;;  %v13394_v57 = vpop.permute.xlu1 %13393 }
0x3a75   :  { %v13395_v17 = vsel %vm7721_vm14, %v13394_v57, %v13390_v44 }
0x3a76   :  { %v13396_v14 = vsel %vm7720_vm15, %v13392_v58, %v13395_v17 }
0x3a77   :  { %13397 = vst [vmem:[%s22747_s5] sm:$0x1] %v13396_v14 }

</bundles_post_ra>
